<compile_context>
chip_gen: v7x
topology: tpu7x:2x2x1
jax: 0.10.0
libtpu: 0.0.40
codegen_flags: <defaults>
</compile_context>

<pallas_src>
import math

import jax
import jax.numpy as jnp
from jax.experimental import pallas as pl
from jax.experimental.pallas import tpu as pltpu

_BN_EPS = 1e-3
_LANE = 128


def _ru(v, m):
    return (v + m - 1) // m * m


# ----------------------------------------------------------------------------
# Kernel 1: fused [BN+ReLU prologue] -> matmul (K-reduction grid, f32 acc) ->
#           [bias] [residual add on first res_cols lanes] [BN+ReLU epilogue]
# ----------------------------------------------------------------------------
def _make_mm_kernel(has_pro, has_res, has_bias, has_epi, res_cols):
    def kernel(*refs):
        i = 0
        x_ref = refs[i]; i += 1
        if has_pro:
            ps_ref, pt_ref = refs[i], refs[i + 1]; i += 2
        w_ref = refs[i]; i += 1
        if has_res:
            r_ref = refs[i]; i += 1
        if has_bias:
            b_ref = refs[i]; i += 1
        if has_epi:
            es_ref, et_ref = refs[i], refs[i + 1]; i += 2
        o_ref = refs[i]
        acc_ref = refs[i + 1]

        ki = pl.program_id(1)

        @pl.when(ki == 0)
        def _init():
            acc_ref[...] = jnp.zeros_like(acc_ref)

        xv = x_ref[...]
        if has_pro:
            xv = jnp.maximum(xv.astype(jnp.float32) * ps_ref[...] + pt_ref[...], 0.0)
            xv = xv.astype(jnp.bfloat16)
        acc_ref[...] += jnp.dot(xv, w_ref[...], preferred_element_type=jnp.float32)

        @pl.when(ki == pl.num_programs(1) - 1)
        def _finalize():
            out = acc_ref[...]
            if has_bias:
                out = out + b_ref[...]
            if has_res:
                res = r_ref[...].astype(jnp.float32)
                if res_cols == out.shape[1]:
                    out = out + res
                else:
                    out = jnp.concatenate(
                        [out[:, :res_cols] + res, out[:, res_cols:]], axis=1)
            if has_epi:
                out = jnp.maximum(out * es_ref[...] + et_ref[...], 0.0)
            o_ref[...] = out.astype(o_ref.dtype)

    return kernel


def _fused_matmul(x, w, *, prologue=None, epilogue=None, bias=None, residual=None,
                  out_dtype=jnp.bfloat16):
    m, k = x.shape
    kw, n = w.shape
    assert k == kw
    m8 = _ru(m, 8)
    tm = min(256, m8)
    mp = _ru(m, tm)
    if mp != m:
        x = jnp.pad(x, ((0, mp - m), (0, 0)))
        if residual is not None:
            residual = jnp.pad(residual, ((0, mp - m), (0, 0)))
    tk = 256 if (k % 256 == 0) else 128
    assert k % tk == 0
    nk = k // tk

    args = [x]
    in_specs = [pl.BlockSpec((tm, tk), lambda mi, ki: (mi, ki))]
    if prologue is not None:
        ps, pt = prologue
        args += [ps, pt]
        in_specs += [pl.BlockSpec((1, tk), lambda mi, ki: (0, ki)),
                     pl.BlockSpec((1, tk), lambda mi, ki: (0, ki))]
    args.append(w)
    in_specs.append(pl.BlockSpec((tk, n), lambda mi, ki: (ki, 0)))
    res_cols = 0
    if residual is not None:
        res_cols = residual.shape[1]
        args.append(residual)
        in_specs.append(pl.BlockSpec((tm, res_cols), lambda mi, ki: (mi, 0)))
    if bias is not None:
        args.append(bias)
        in_specs.append(pl.BlockSpec((1, n), lambda mi, ki: (0, 0)))
    if epilogue is not None:
        es, et = epilogue
        args += [es, et]
        in_specs += [pl.BlockSpec((1, n), lambda mi, ki: (0, 0)),
                     pl.BlockSpec((1, n), lambda mi, ki: (0, 0))]

    kernel = _make_mm_kernel(prologue is not None, residual is not None,
                             bias is not None, epilogue is not None, res_cols)
    out = pl.pallas_call(
        kernel,
        grid=(mp // tm, nk),
        out_shape=jax.ShapeDtypeStruct((mp, n), out_dtype),
        in_specs=in_specs,
        out_specs=pl.BlockSpec((tm, n), lambda mi, ki: (mi, 0)),
        scratch_shapes=[pltpu.VMEM((tm, n), jnp.float32)],
        compiler_params=pltpu.CompilerParams(
            dimension_semantics=("parallel", "arbitrary")),
    )(*args)
    return out if mp == m else out[:m]


def _conv1x1(x4, w, *, prologue=None, epilogue=None, bias=None, residual4=None,
             out_dtype=jnp.bfloat16):
    n, h, wd, cp = x4.shape
    x2 = x4.reshape(n * h * wd, cp)
    res2 = None
    if residual4 is not None:
        res2 = residual4.reshape(n * h * wd, residual4.shape[-1])
    out2 = _fused_matmul(x2, w, prologue=prologue, epilogue=epilogue, bias=bias,
                         residual=res2, out_dtype=out_dtype)
    return out2.reshape(n, h, wd, w.shape[1])


# ----------------------------------------------------------------------------
# Kernel 2: kxk conv as k*k shifted-row matmuls over the flattened padded image,
#           fused BN+ReLU epilogue.  Grid tiles the output rows ("parallel").
# ----------------------------------------------------------------------------
def _make_conv_taps_kernel(k, wpad, tm, halo):
    offs = tuple(ti * wpad + tj for ti in range(k) for tj in range(k))

    def kernel(x_ref, w_ref, es_ref, et_ref, o_ref, acc_ref):
        m0 = pl.multiple_of(pl.program_id(0) * tm, 8)
        xs = x_ref[pl.ds(m0, tm + halo), :]          # rows for this tile + halo
        acc_ref[...] = jnp.zeros_like(acc_ref)
        for t, off in enumerate(offs):
            acc_ref[...] += jnp.dot(xs[off:off + tm, :], w_ref[t],
                                    preferred_element_type=jnp.float32)
        out = jnp.maximum(acc_ref[...] * es_ref[...] + et_ref[...], 0.0)
        o_ref[...] = out.astype(o_ref.dtype)

    return kernel


def _conv_taps_bn_act(x, w_taps, es, et, *, k, pad):
    """Stride-1 kxk conv (zero pad) + BN + ReLU.  x: (N,H,W,Cp) bf16 channel-padded."""
    n, h, wd, cp = x.shape
    hp, wp = h + 2 * pad, wd + 2 * pad
    ho, wo = hp - k + 1, wp - k + 1
    ntaps, cin_p, cout_p = w_taps.shape
    assert ntaps == k * k and cin_p == cp
    xp = jnp.pad(x, ((0, 0), (pad, pad), (pad, pad), (0, 0)))
    r_out = n * hp * wp
    tm = min(256, _ru(r_out, 8))
    r_out_pad = _ru(r_out, tm)
    halo = _ru((k - 1) * wp + (k - 1), 8)
    r_x = r_out_pad + halo
    xf = jnp.pad(xp.reshape(r_out, cp), ((0, r_x - r_out), (0, 0)))

    kernel = _make_conv_taps_kernel(k, wp, tm, halo)
    out = pl.pallas_call(
        kernel,
        grid=(r_out_pad // tm,),
        out_shape=jax.ShapeDtypeStruct((r_out_pad, cout_p), jnp.bfloat16),
        in_specs=[
            pl.BlockSpec((r_x, cp), lambda i: (0, 0)),
            pl.BlockSpec((ntaps, cin_p, cout_p), lambda i: (0, 0, 0)),
            pl.BlockSpec((1, cout_p), lambda i: (0, 0)),
            pl.BlockSpec((1, cout_p), lambda i: (0, 0)),
        ],
        out_specs=pl.BlockSpec((tm, cout_p), lambda i: (i, 0)),
        scratch_shapes=[pltpu.VMEM((tm, cout_p), jnp.float32)],
        compiler_params=pltpu.CompilerParams(dimension_semantics=("parallel",)),
    )(xf, w_taps, es, et)
    return out[:r_out].reshape(n, hp, wp, cout_p)[:, :ho, :wo, :]


# ----------------------------------------------------------------------------
# small JAX glue
# ----------------------------------------------------------------------------
def _maxpool_3x3_s2_p1(x):
    return jax.lax.reduce_window(
        x, jnp.array(-jnp.inf, dtype=x.dtype), jax.lax.max,
        (1, 3, 3, 1), (1, 2, 2, 1), ((0, 0), (1, 1), (1, 1), (0, 0)))


# ----------------------------------------------------------------------------
# logical (PyTorch-equivalent) parameter construction
# ----------------------------------------------------------------------------
def build_dpn_params(key, small=True, num_init_features=16, k_r=8, groups=4,
                     b=False, k_sec=(1, 1, 1, 1), inc_sec=(4, 4, 4, 4),
                     num_classes=16):
    # TODO(synk): the b=True DPN variant (CatBnAct + split c1x1_c1/c1x1_c2) is not implemented.
    assert not b
    counter = [0]

    def nk_():
        counter[0] += 1
        return jax.random.fold_in(key, counter[0])

    def conv_w(kh, kw, cin, cout):
        fan = kh * kw * cin
        w = jax.random.normal(nk_(), (kh, kw, cin, cout), jnp.float32)
        return w / math.sqrt(float(fan))

    def bn_p(c):
        k1, k2, k3, k4 = jax.random.split(nk_(), 4)
        return dict(
            gamma=1.0 + 0.1 * jax.random.normal(k1, (c,), jnp.float32),
            beta=0.1 * jax.random.normal(k2, (c,), jnp.float32),
            mean=0.1 * jax.random.normal(k3, (c,), jnp.float32),
            var=1.0 + 0.1 * jax.random.uniform(k4, (c,), jnp.float32),
        )

    def make_block(in_chs, r, bw, inc, block_type):
        bp = dict(bw=bw, inc=inc, r=r, groups=groups)
        if block_type == 'proj':
            bp.update(key_stride=1, has_proj=True)
        elif block_type == 'down':
            bp.update(key_stride=2, has_proj=True)
        else:
            bp.update(key_stride=1, has_proj=False)
        if bp['has_proj']:
            bp['c1x1_w'] = dict(bn=bn_p(in_chs),
                                w=conv_w(1, 1, in_chs, bw + 2 * inc)[0, 0])
        bp['c1x1_a'] = dict(bn=bn_p(in_chs), w=conv_w(1, 1, in_chs, r)[0, 0])
        bp['c3x3_b'] = dict(bn=bn_p(r), w=conv_w(3, 3, r // groups, r))
        bp['c1x1_c'] = dict(bn=bn_p(r), w=conv_w(1, 1, r, bw + inc)[0, 0])
        return bp

    bw_factor = 1 if small else 4
    ks, padd = (3, 1) if small else (7, 3)
    params = dict(stem=dict(w=conv_w(ks, ks, 3, num_init_features),
                            bn=bn_p(num_init_features), k=ks, pad=padd))
    blocks = []
    in_chs = num_init_features
    for stage, mult in enumerate((64, 128, 256, 512)):
        bw = mult * bw_factor
        inc = inc_sec[stage]
        r = (k_r * bw) // (64 * bw_factor)
        blocks.append(make_block(in_chs, r, bw, inc, 'proj' if stage == 0 else 'down'))
        in_chs = bw + 3 * inc
        for _ in range(2, k_sec[stage] + 1):
            blocks.append(make_block(in_chs, r, bw, inc, 'normal'))
            in_chs += inc
    params['blocks'] = blocks
    params['final_bn'] = bn_p(in_chs)
    params['cls_w'] = conv_w(1, 1, in_chs, num_classes)[0, 0]
    params['cls_b'] = 0.01 * jax.random.normal(nk_(), (num_classes,), jnp.float32)
    params['num_classes'] = num_classes
    return params


# ----------------------------------------------------------------------------
# one-time packing into padded bf16 kernel layouts (channels padded to 128)
# ----------------------------------------------------------------------------
def _bn_scale_shift(bn):
    s = bn['gamma'] / jnp.sqrt(bn['var'] + _BN_EPS)
    t = bn['beta'] - bn['mean'] * s
    return s.astype(jnp.float32), t.astype(jnp.float32)


def _scatter_vec(v, segs):
    assert sum(r for _, r in segs) == v.shape[0]
    parts, o = [], 0
    for padw, realw in segs:
        parts.append(jnp.zeros((padw,), jnp.float32).at[:realw].set(v[o:o + realw]))
        o += realw
    return jnp.concatenate(parts).reshape(1, -1)


def _scatter_mat(w, in_segs, out_segs):
    assert sum(r for _, r in in_segs) == w.shape[0]
    assert sum(r for _, r in out_segs) == w.shape[1]
    rows, o = [], 0
    for padw, realw in in_segs:
        rows.append(jnp.zeros((padw, w.shape[1]), jnp.float32).at[:realw].set(w[o:o + realw]))
        o += realw
    wr = jnp.concatenate(rows, axis=0)
    cols, o = [], 0
    for padw, realw in out_segs:
        cols.append(jnp.zeros((wr.shape[0], padw), jnp.float32)
                    .at[:, :realw].set(wr[:, o:o + realw]))
        o += realw
    return jnp.concatenate(cols, axis=1).astype(jnp.bfloat16)


def _expand_grouped_hwio(w, groups):
    kh, kw, cin_g, cout = w.shape
    cout_g = cout // groups
    full = jnp.zeros((kh, kw, cin_g * groups, cout), jnp.float32)
    for g in range(groups):
        full = full.at[:, :, g * cin_g:(g + 1) * cin_g,
                       g * cout_g:(g + 1) * cout_g].set(
            w[:, :, :, g * cout_g:(g + 1) * cout_g])
    return full


def _pack_conv_taps(w_hwio):
    kh, kw, ci, co = w_hwio.shape
    cip, cop = _ru(ci, _LANE), _ru(co, _LANE)
    wp = jnp.pad(w_hwio, ((0, 0), (0, 0), (0, cip - ci), (0, cop - co)))
    return wp.reshape(kh * kw, cip, cop).astype(jnp.bfloat16)


def _cpr(c):
    return [(_ru(c, _LANE), c)]


def pack_dpn_params(lp):
    pk = {}
    stem = lp['stem']
    f = stem['w'].shape[-1]
    ss, st = _bn_scale_shift(stem['bn'])
    pk['stem'] = dict(w=_pack_conv_taps(stem['w']),
                      es=_scatter_vec(ss, _cpr(f)), et=_scatter_vec(st, _cpr(f)),
                      k=stem['k'], pad=stem['pad'])
    in_segs = _cpr(f)
    prev_d = 0
    blocks = []
    for bp in lp['blocks']:
        bw, inc, r, g = bp['bw'], bp['inc'], bp['r'], bp['groups']
        has_proj, ks = bp['has_proj'], bp['key_stride']
        bwp, incp = _ru(bw, _LANE), _ru(inc, _LANE)
        s2 = 2 * inc
        e = dict(has_proj=has_proj, key_stride=ks, bw=bw, bwp=bwp, inc=inc)
        if has_proj:
            s, t = _bn_scale_shift(bp['c1x1_w']['bn'])
            e['proj_s'] = _scatter_vec(s, in_segs)
            e['proj_t'] = _scatter_vec(t, in_segs)
            e['w_proj'] = _scatter_mat(bp['c1x1_w']['w'], in_segs,
                                       [(bwp, bw), (_ru(s2, _LANE), s2)])
            s2_real = s2
        else:
            s2_real = prev_d
        sa, ta = _bn_scale_shift(bp['c1x1_a']['bn'])
        sb, tb = _bn_scale_shift(bp['c3x3_b']['bn'])
        sc, tc = _bn_scale_shift(bp['c1x1_c']['bn'])
        e['a_s'], e['a_t'] = _scatter_vec(sa, in_segs), _scatter_vec(ta, in_segs)
        e['a_es'], e['a_et'] = _scatter_vec(sb, _cpr(r)), _scatter_vec(tb, _cpr(r))
        e['w_a'] = _scatter_mat(bp['c1x1_a']['w'], in_segs, _cpr(r))
        e['w_3x3'] = _pack_conv_taps(_expand_grouped_hwio(bp['c3x3_b']['w'], g))
        e['c3_es'], e['c3_et'] = _scatter_vec(sc, _cpr(r)), _scatter_vec(tc, _cpr(r))
        e['w_c'] = _scatter_mat(bp['c1x1_c']['w'], _cpr(r), [(bwp, bw), (incp, inc)])
        d = s2_real + inc
        e['s2_real'], e['d_real'] = s2_real, d
        blocks.append(e)
        in_segs = [(bwp, bw), (_ru(d, _LANE), d)]
        prev_d = d
    pk['blocks'] = blocks
    fs, ft = _bn_scale_shift(lp['final_bn'])
    pk['final_s'], pk['final_t'] = _scatter_vec(fs, in_segs), _scatter_vec(ft, in_segs)
    nc = lp['num_classes']
    pk['cls_w'] = _scatter_mat(lp['cls_w'], in_segs, _cpr(nc))
    pk['cls_b'] = _scatter_vec(lp['cls_b'], _cpr(nc))
    pk['num_classes'] = nc
    return pk


# ----------------------------------------------------------------------------
# Pallas forward pass
# ----------------------------------------------------------------------------
def dpn_forward(pk, x_nchw):
    x = jnp.transpose(x_nchw, (0, 2, 3, 1))
    cin = x.shape[-1]
    x = jnp.pad(x, ((0, 0), (0, 0), (0, 0), (0, _ru(cin, _LANE) - cin)))
    x = x.astype(jnp.bfloat16)

    st = pk['stem']
    y = _conv_taps_bn_act(x, st['w'], st['es'], st['et'], k=st['k'], pad=st['pad'])
    y = y[:, ::2, ::2, :]                      # stem conv stride 2 (pointwise BN/ReLU commute)
    y = _maxpool_3x3_s2_p1(y)

    feat = y
    for e in pk['blocks']:
        x_in = jnp.concatenate(feat, axis=-1) if isinstance(feat, tuple) else feat
        if e['has_proj']:
            xw = x_in if e['key_stride'] == 1 else x_in[:, ::2, ::2, :]
            xs = _conv1x1(xw, e['w_proj'], prologue=(e['proj_s'], e['proj_t']))
            x_s1 = xs[..., :e['bwp']]
            x_s2 = xs[..., e['bwp']:]
        else:
            x_s1, x_s2 = feat
        # c1x1_a with its BN prologue and the c3x3_b BN fused as epilogue
        h = _conv1x1(x_in, e['w_a'], prologue=(e['a_s'], e['a_t']),
                     epilogue=(e['a_es'], e['a_et']))
        # 3x3 grouped conv (block-diagonal weights), c1x1_c BN fused as epilogue
        h = _conv_taps_bn_act(h, e['w_3x3'], e['c3_es'], e['c3_et'], k=3, pad=1)
        if e['key_stride'] == 2:
            h = h[:, ::2, ::2, :]
        # c1x1_c with residual (x_s1 + out1) fused into the epilogue
        out = _conv1x1(h, e['w_c'], residual4=x_s1)
        resid = out[..., :e['bwp']]
        out2 = out[..., e['bwp']:]
        dense = jnp.concatenate([x_s2[..., :e['s2_real']], out2[..., :e['inc']]],
                                axis=-1)
        dp = _ru(e['d_real'], _LANE)
        if dense.shape[-1] < dp:
            dense = jnp.pad(dense, ((0, 0), (0, 0), (0, 0),
                                    (0, dp - dense.shape[-1])))
        feat = (resid, dense)

    x_in = jnp.concatenate(feat, axis=-1)
    # conv5_bn_ac fused as prologue of the classifier; global avg-pool commutes with 1x1 conv
    logits_px = _conv1x1(x_in, pk['cls_w'], prologue=(pk['final_s'], pk['final_t']),
                         bias=pk['cls_b'], out_dtype=jnp.float32)
    logits = jnp.mean(logits_px, axis=(1, 2))[:, :pk['num_classes']]
    return logits


# ----------------------------------------------------------------------------
# pure-JAX f32 reference (mirrors the PyTorch module) for a sanity check
# ----------------------------------------------------------------------------
def _bn_ref(x, p):
    return (x - p['mean']) / jnp.sqrt(p['var'] + _BN_EPS) * p['gamma'] + p['beta']


def _relu(x):
    return jnp.maximum(x, 0.0)


def _conv_ref(x, w_hwio, stride, padding, groups=1):
    return jax.lax.conv_general_dilated(
        x, w_hwio, (stride, stride), ((padding, padding), (padding, padding)),
        dimension_numbers=('NHWC', 'HWIO', 'NHWC'), feature_group_count=groups)


def _conv1x1_ref(x, w2, stride=1):
    if stride > 1:
        x = x[:, ::stride, ::stride, :]
    return jnp.einsum('nhwc,cd->nhwd', x, w2)


def dpn_reference(lp, x_nchw):
    x = jnp.transpose(x_nchw, (0, 2, 3, 1)).astype(jnp.float32)
    st = lp['stem']
    x = _conv_ref(x, st['w'], 2, st['pad'])
    x = _relu(_bn_ref(x, st['bn']))
    x = _maxpool_3x3_s2_p1(x)
    feat = x
    for bp in lp['blocks']:
        x_in = jnp.concatenate(feat, axis=-1) if isinstance(feat, tuple) else feat
        if bp['has_proj']:
            xs = _conv1x1_ref(_relu(_bn_ref(x_in, bp['c1x1_w']['bn'])),
                              bp['c1x1_w']['w'], stride=bp['key_stride'])
            x_s1, x_s2 = xs[..., :bp['bw']], xs[..., bp['bw']:]
        else:
            x_s1, x_s2 = feat
        h = _conv1x1_ref(_relu(_bn_ref(x_in, bp['c1x1_a']['bn'])), bp['c1x1_a']['w'])
        h = _conv_ref(_relu(_bn_ref(h, bp['c3x3_b']['bn'])), bp['c3x3_b']['w'],
                      bp['key_stride'], 1, groups=bp['groups'])
        h = _conv1x1_ref(_relu(_bn_ref(h, bp['c1x1_c']['bn'])), bp['c1x1_c']['w'])
        out1, out2 = h[..., :bp['bw']], h[..., bp['bw']:]
        feat = (x_s1 + out1, jnp.concatenate([x_s2, out2], axis=-1))
    x = jnp.concatenate(feat, axis=-1)
    x = _relu(_bn_ref(x, lp['final_bn']))
    x = jnp.mean(x, axis=(1, 2))
    return x @ lp['cls_w'] + lp['cls_b']


# ----------------------------------------------------------------------------
if __name__ == "__main__":
    key = jax.random.PRNGKey(0)
    pkey, xkey = jax.random.split(key)

    logical = build_dpn_params(pkey, small=True, num_init_features=16, k_r=8,
                               groups=4, b=False, k_sec=(1, 1, 1, 1),
                               inc_sec=(4, 4, 4, 4), num_classes=16)
    packed = pack_dpn_params(logical)

    x_nchw = jax.random.normal(xkey, (2, 3, 32, 32), jnp.float32)

    fwd = jax.jit(lambda x: dpn_forward(packed, x))
    out = jax.block_until_ready(fwd(x_nchw))
    assert out.shape == (2, 16), out.shape
    assert bool(jnp.all(jnp.isfinite(out)))

    ref = jax.block_until_ready(jax.jit(lambda x: dpn_reference(logical, x))(x_nchw))
    err = float(jnp.max(jnp.abs(out - ref)))
    scale = float(jnp.max(jnp.abs(ref)))
    assert err <= 0.1 * scale + 0.1, (err, scale)   # loose bound for bf16 MXU matmuls

    print("KERNEL_OK")
</pallas_src>

<mosaic_0001>
module attributes {stable_mosaic.version = 11 : i64} {
  func.func @kernel(%arg0: i32, %arg1: memref<2632x128xbf16, #tpu.memory_space<vmem>>, %arg2: memref<9x128x128xbf16, #tpu.memory_space<vmem>>, %arg3: memref<1x128xf32, #tpu.memory_space<vmem>>, %arg4: memref<1x128xf32, #tpu.memory_space<vmem>>, %arg5: memref<256x128xbf16, #tpu.memory_space<vmem>>, %arg6: memref<256x128xf32, #tpu.memory_space<vmem>>) attributes {dimension_semantics = [#tpu.dimension_semantics<parallel>], iteration_bounds = array<i64: 10>, scalar_prefetch = 0 : i64, scratch_operands = 1 : i64, tpu.core_type = #tpu.core_type<tc>, window_params = [{pipeline_mode = #tpu.pipeline_mode<synchronous>, transform_indices = @transform_0, window_bounds = array<i64: 2632, 128>}, {pipeline_mode = #tpu.pipeline_mode<synchronous>, transform_indices = @transform_1, window_bounds = array<i64: 9, 128, 128>}, {pipeline_mode = #tpu.pipeline_mode<synchronous>, transform_indices = @transform_2, window_bounds = array<i64: 1, 128>}, {pipeline_mode = #tpu.pipeline_mode<synchronous>, transform_indices = @transform_3, window_bounds = array<i64: 1, 128>}, {transform_indices = @transform_4, window_bounds = array<i64: 256, 128>}]} {
    %c256_i32 = arith.constant 256 : i32
    %0 = arith.muli %arg0, %c256_i32 : i32
    %1 = tpu.assume_multiple %0, 8 : i32
    %2 = arith.index_cast %1 : i32 to index
    %c0 = arith.constant 0 : index
    %3 = vector.load %arg1[%2, %c0] : memref<2632x128xbf16, #tpu.memory_space<vmem>>, vector<328x128xbf16>
    %cst = arith.constant 0.000000e+00 : f32
    %4 = vector.broadcast %cst : f32 to vector<256x128xf32>
    %c0_0 = arith.constant 0 : index
    %c0_1 = arith.constant 0 : index
    %5 = vector.load %arg6[%c0_0, %c0_1] : memref<256x128xf32, #tpu.memory_space<vmem>>, vector<256x128xf32>
    tpu.vector_store %arg6[%c0_0, %c0_1], %4 {strides = array<i32>} : memref<256x128xf32, #tpu.memory_space<vmem>>, vector<256x128xf32>,
    %c0_2 = arith.constant 0 : index
    %c0_3 = arith.constant 0 : index
    %6 = vector.load %arg6[%c0_2, %c0_3] : memref<256x128xf32, #tpu.memory_space<vmem>>, vector<256x128xf32>
    %7 = vector.extract_strided_slice %3 {offsets = [0, 0], sizes = [256, 128], strides = [1, 1]} : vector<328x128xbf16> to vector<256x128xbf16>
    %c0_4 = arith.constant 0 : index
    %c0_5 = arith.constant 0 : index
    %c0_6 = arith.constant 0 : index
    %8 = vector.load %arg2[%c0_4, %c0_5, %c0_6] : memref<9x128x128xbf16, #tpu.memory_space<vmem>>, vector<1x128x128xbf16>
    %9 = vector.shape_cast %8 : vector<1x128x128xbf16> to vector<128x128xbf16>
    %cst_7 = arith.constant dense<0.000000e+00> : vector<256x128xf32>
    %10 = tpu.matmul %7, %9, %cst_7 {dimension_numbers = #tpu.dot_dimension_numbers<[1], [0], [0], [1], [0, 0, 1, 1], [], []>} : vector<256x128xbf16>, vector<128x128xbf16>, vector<256x128xf32> -> vector<256x128xf32>
    %11 = arith.addf %6, %10 : vector<256x128xf32>
    %c0_8 = arith.constant 0 : index
    %c0_9 = arith.constant 0 : index
    %12 = vector.load %arg6[%c0_8, %c0_9] : memref<256x128xf32, #tpu.memory_space<vmem>>, vector<256x128xf32>
    tpu.vector_store %arg6[%c0_8, %c0_9], %11 {strides = array<i32>} : memref<256x128xf32, #tpu.memory_space<vmem>>, vector<256x128xf32>,
    %c0_10 = arith.constant 0 : index
    %c0_11 = arith.constant 0 : index
    %13 = vector.load %arg6[%c0_10, %c0_11] : memref<256x128xf32, #tpu.memory_space<vmem>>, vector<256x128xf32>
    %14 = vector.extract_strided_slice %3 {offsets = [1, 0], sizes = [256, 128], strides = [1, 1]} : vector<328x128xbf16> to vector<256x128xbf16>
    %c1 = arith.constant 1 : index
    %c0_12 = arith.constant 0 : index
    %c0_13 = arith.constant 0 : index
    %15 = vector.load %arg2[%c1, %c0_12, %c0_13] : memref<9x128x128xbf16, #tpu.memory_space<vmem>>, vector<1x128x128xbf16>
    %16 = vector.shape_cast %15 : vector<1x128x128xbf16> to vector<128x128xbf16>
    %cst_14 = arith.constant dense<0.000000e+00> : vector<256x128xf32>
    %17 = tpu.matmul %14, %16, %cst_14 {dimension_numbers = #tpu.dot_dimension_numbers<[1], [0], [0], [1], [0, 0, 1, 1], [], []>} : vector<256x128xbf16>, vector<128x128xbf16>, vector<256x128xf32> -> vector<256x128xf32>
    %18 = arith.addf %13, %17 : vector<256x128xf32>
    %c0_15 = arith.constant 0 : index
    %c0_16 = arith.constant 0 : index
    %19 = vector.load %arg6[%c0_15, %c0_16] : memref<256x128xf32, #tpu.memory_space<vmem>>, vector<256x128xf32>
    tpu.vector_store %arg6[%c0_15, %c0_16], %18 {strides = array<i32>} : memref<256x128xf32, #tpu.memory_space<vmem>>, vector<256x128xf32>,
    %c0_17 = arith.constant 0 : index
    %c0_18 = arith.constant 0 : index
    %20 = vector.load %arg6[%c0_17, %c0_18] : memref<256x128xf32, #tpu.memory_space<vmem>>, vector<256x128xf32>
    %21 = vector.extract_strided_slice %3 {offsets = [2, 0], sizes = [256, 128], strides = [1, 1]} : vector<328x128xbf16> to vector<256x128xbf16>
    %c2 = arith.constant 2 : index
    %c0_19 = arith.constant 0 : index
    %c0_20 = arith.constant 0 : index
    %22 = vector.load %arg2[%c2, %c0_19, %c0_20] : memref<9x128x128xbf16, #tpu.memory_space<vmem>>, vector<1x128x128xbf16>
    %23 = vector.shape_cast %22 : vector<1x128x128xbf16> to vector<128x128xbf16>
    %cst_21 = arith.constant dense<0.000000e+00> : vector<256x128xf32>
    %24 = tpu.matmul %21, %23, %cst_21 {dimension_numbers = #tpu.dot_dimension_numbers<[1], [0], [0], [1], [0, 0, 1, 1], [], []>} : vector<256x128xbf16>, vector<128x128xbf16>, vector<256x128xf32> -> vector<256x128xf32>
    %25 = arith.addf %20, %24 : vector<256x128xf32>
    %c0_22 = arith.constant 0 : index
    %c0_23 = arith.constant 0 : index
    %26 = vector.load %arg6[%c0_22, %c0_23] : memref<256x128xf32, #tpu.memory_space<vmem>>, vector<256x128xf32>
    tpu.vector_store %arg6[%c0_22, %c0_23], %25 {strides = array<i32>} : memref<256x128xf32, #tpu.memory_space<vmem>>, vector<256x128xf32>,
    %c0_24 = arith.constant 0 : index
    %c0_25 = arith.constant 0 : index
    %27 = vector.load %arg6[%c0_24, %c0_25] : memref<256x128xf32, #tpu.memory_space<vmem>>, vector<256x128xf32>
    %28 = vector.extract_strided_slice %3 {offsets = [34, 0], sizes = [256, 128], strides = [1, 1]} : vector<328x128xbf16> to vector<256x128xbf16>
    %c3 = arith.constant 3 : index
    %c0_26 = arith.constant 0 : index
    %c0_27 = arith.constant 0 : index
    %29 = vector.load %arg2[%c3, %c0_26, %c0_27] : memref<9x128x128xbf16, #tpu.memory_space<vmem>>, vector<1x128x128xbf16>
    %30 = vector.shape_cast %29 : vector<1x128x128xbf16> to vector<128x128xbf16>
    %cst_28 = arith.constant dense<0.000000e+00> : vector<256x128xf32>
    %31 = tpu.matmul %28, %30, %cst_28 {dimension_numbers = #tpu.dot_dimension_numbers<[1], [0], [0], [1], [0, 0, 1, 1], [], []>} : vector<256x128xbf16>, vector<128x128xbf16>, vector<256x128xf32> -> vector<256x128xf32>
    %32 = arith.addf %27, %31 : vector<256x128xf32>
    %c0_29 = arith.constant 0 : index
    %c0_30 = arith.constant 0 : index
    %33 = vector.load %arg6[%c0_29, %c0_30] : memref<256x128xf32, #tpu.memory_space<vmem>>, vector<256x128xf32>
    tpu.vector_store %arg6[%c0_29, %c0_30], %32 {strides = array<i32>} : memref<256x128xf32, #tpu.memory_space<vmem>>, vector<256x128xf32>,
    %c0_31 = arith.constant 0 : index
    %c0_32 = arith.constant 0 : index
    %34 = vector.load %arg6[%c0_31, %c0_32] : memref<256x128xf32, #tpu.memory_space<vmem>>, vector<256x128xf32>
    %35 = vector.extract_strided_slice %3 {offsets = [35, 0], sizes = [256, 128], strides = [1, 1]} : vector<328x128xbf16> to vector<256x128xbf16>
    %c4 = arith.constant 4 : index
    %c0_33 = arith.constant 0 : index
    %c0_34 = arith.constant 0 : index
    %36 = vector.load %arg2[%c4, %c0_33, %c0_34] : memref<9x128x128xbf16, #tpu.memory_space<vmem>>, vector<1x128x128xbf16>
    %37 = vector.shape_cast %36 : vector<1x128x128xbf16> to vector<128x128xbf16>
    %cst_35 = arith.constant dense<0.000000e+00> : vector<256x128xf32>
    %38 = tpu.matmul %35, %37, %cst_35 {dimension_numbers = #tpu.dot_dimension_numbers<[1], [0], [0], [1], [0, 0, 1, 1], [], []>} : vector<256x128xbf16>, vector<128x128xbf16>, vector<256x128xf32> -> vector<256x128xf32>
    %39 = arith.addf %34, %38 : vector<256x128xf32>
    %c0_36 = arith.constant 0 : index
    %c0_37 = arith.constant 0 : index
    %40 = vector.load %arg6[%c0_36, %c0_37] : memref<256x128xf32, #tpu.memory_space<vmem>>, vector<256x128xf32>
    tpu.vector_store %arg6[%c0_36, %c0_37], %39 {strides = array<i32>} : memref<256x128xf32, #tpu.memory_space<vmem>>, vector<256x128xf32>,
    %c0_38 = arith.constant 0 : index
    %c0_39 = arith.constant 0 : index
    %41 = vector.load %arg6[%c0_38, %c0_39] : memref<256x128xf32, #tpu.memory_space<vmem>>, vector<256x128xf32>
    %42 = vector.extract_strided_slice %3 {offsets = [36, 0], sizes = [256, 128], strides = [1, 1]} : vector<328x128xbf16> to vector<256x128xbf16>
    %c5 = arith.constant 5 : index
    %c0_40 = arith.constant 0 : index
    %c0_41 = arith.constant 0 : index
    %43 = vector.load %arg2[%c5, %c0_40, %c0_41] : memref<9x128x128xbf16, #tpu.memory_space<vmem>>, vector<1x128x128xbf16>
    %44 = vector.shape_cast %43 : vector<1x128x128xbf16> to vector<128x128xbf16>
    %cst_42 = arith.constant dense<0.000000e+00> : vector<256x128xf32>
    %45 = tpu.matmul %42, %44, %cst_42 {dimension_numbers = #tpu.dot_dimension_numbers<[1], [0], [0], [1], [0, 0, 1, 1], [], []>} : vector<256x128xbf16>, vector<128x128xbf16>, vector<256x128xf32> -> vector<256x128xf32>
    %46 = arith.addf %41, %45 : vector<256x128xf32>
    %c0_43 = arith.constant 0 : index
    %c0_44 = arith.constant 0 : index
    %47 = vector.load %arg6[%c0_43, %c0_44] : memref<256x128xf32, #tpu.memory_space<vmem>>, vector<256x128xf32>
    tpu.vector_store %arg6[%c0_43, %c0_44], %46 {strides = array<i32>} : memref<256x128xf32, #tpu.memory_space<vmem>>, vector<256x128xf32>,
    %c0_45 = arith.constant 0 : index
    %c0_46 = arith.constant 0 : index
    %48 = vector.load %arg6[%c0_45, %c0_46] : memref<256x128xf32, #tpu.memory_space<vmem>>, vector<256x128xf32>
    %49 = vector.extract_strided_slice %3 {offsets = [68, 0], sizes = [256, 128], strides = [1, 1]} : vector<328x128xbf16> to vector<256x128xbf16>
    %c6 = arith.constant 6 : index
    %c0_47 = arith.constant 0 : index
    %c0_48 = arith.constant 0 : index
    %50 = vector.load %arg2[%c6, %c0_47, %c0_48] : memref<9x128x128xbf16, #tpu.memory_space<vmem>>, vector<1x128x128xbf16>
    %51 = vector.shape_cast %50 : vector<1x128x128xbf16> to vector<128x128xbf16>
    %cst_49 = arith.constant dense<0.000000e+00> : vector<256x128xf32>
    %52 = tpu.matmul %49, %51, %cst_49 {dimension_numbers = #tpu.dot_dimension_numbers<[1], [0], [0], [1], [0, 0, 1, 1], [], []>} : vector<256x128xbf16>, vector<128x128xbf16>, vector<256x128xf32> -> vector<256x128xf32>
    %53 = arith.addf %48, %52 : vector<256x128xf32>
    %c0_50 = arith.constant 0 : index
    %c0_51 = arith.constant 0 : index
    %54 = vector.load %arg6[%c0_50, %c0_51] : memref<256x128xf32, #tpu.memory_space<vmem>>, vector<256x128xf32>
    tpu.vector_store %arg6[%c0_50, %c0_51], %53 {strides = array<i32>} : memref<256x128xf32, #tpu.memory_space<vmem>>, vector<256x128xf32>,
    %c0_52 = arith.constant 0 : index
    %c0_53 = arith.constant 0 : index
    %55 = vector.load %arg6[%c0_52, %c0_53] : memref<256x128xf32, #tpu.memory_space<vmem>>, vector<256x128xf32>
    %56 = vector.extract_strided_slice %3 {offsets = [69, 0], sizes = [256, 128], strides = [1, 1]} : vector<328x128xbf16> to vector<256x128xbf16>
    %c7 = arith.constant 7 : index
    %c0_54 = arith.constant 0 : index
    %c0_55 = arith.constant 0 : index
    %57 = vector.load %arg2[%c7, %c0_54, %c0_55] : memref<9x128x128xbf16, #tpu.memory_space<vmem>>, vector<1x128x128xbf16>
    %58 = vector.shape_cast %57 : vector<1x128x128xbf16> to vector<128x128xbf16>
    %cst_56 = arith.constant dense<0.000000e+00> : vector<256x128xf32>
    %59 = tpu.matmul %56, %58, %cst_56 {dimension_numbers = #tpu.dot_dimension_numbers<[1], [0], [0], [1], [0, 0, 1, 1], [], []>} : vector<256x128xbf16>, vector<128x128xbf16>, vector<256x128xf32> -> vector<256x128xf32>
    %60 = arith.addf %55, %59 : vector<256x128xf32>
    %c0_57 = arith.constant 0 : index
    %c0_58 = arith.constant 0 : index
    %61 = vector.load %arg6[%c0_57, %c0_58] : memref<256x128xf32, #tpu.memory_space<vmem>>, vector<256x128xf32>
    tpu.vector_store %arg6[%c0_57, %c0_58], %60 {strides = array<i32>} : memref<256x128xf32, #tpu.memory_space<vmem>>, vector<256x128xf32>,
    %c0_59 = arith.constant 0 : index
    %c0_60 = arith.constant 0 : index
    %62 = vector.load %arg6[%c0_59, %c0_60] : memref<256x128xf32, #tpu.memory_space<vmem>>, vector<256x128xf32>
    %63 = vector.extract_strided_slice %3 {offsets = [70, 0], sizes = [256, 128], strides = [1, 1]} : vector<328x128xbf16> to vector<256x128xbf16>
    %c8 = arith.constant 8 : index
    %c0_61 = arith.constant 0 : index
    %c0_62 = arith.constant 0 : index
    %64 = vector.load %arg2[%c8, %c0_61, %c0_62] : memref<9x128x128xbf16, #tpu.memory_space<vmem>>, vector<1x128x128xbf16>
    %65 = vector.shape_cast %64 : vector<1x128x128xbf16> to vector<128x128xbf16>
    %cst_63 = arith.constant dense<0.000000e+00> : vector<256x128xf32>
    %66 = tpu.matmul %63, %65, %cst_63 {dimension_numbers = #tpu.dot_dimension_numbers<[1], [0], [0], [1], [0, 0, 1, 1], [], []>} : vector<256x128xbf16>, vector<128x128xbf16>, vector<256x128xf32> -> vector<256x128xf32>
    %67 = arith.addf %62, %66 : vector<256x128xf32>
    %c0_64 = arith.constant 0 : index
    %c0_65 = arith.constant 0 : index
    %68 = vector.load %arg6[%c0_64, %c0_65] : memref<256x128xf32, #tpu.memory_space<vmem>>, vector<256x128xf32>
    tpu.vector_store %arg6[%c0_64, %c0_65], %67 {strides = array<i32>} : memref<256x128xf32, #tpu.memory_space<vmem>>, vector<256x128xf32>,
    %c0_66 = arith.constant 0 : index
    %c0_67 = arith.constant 0 : index
    %69 = vector.load %arg6[%c0_66, %c0_67] : memref<256x128xf32, #tpu.memory_space<vmem>>, vector<256x128xf32>
    %c0_68 = arith.constant 0 : index
    %c0_69 = arith.constant 0 : index
    %70 = vector.load %arg3[%c0_68, %c0_69] : memref<1x128xf32, #tpu.memory_space<vmem>>, vector<1x128xf32>
    %71 = vector.broadcast %70 : vector<1x128xf32> to vector<256x128xf32>
    %72 = arith.mulf %69, %71 : vector<256x128xf32>
    %c0_70 = arith.constant 0 : index
    %c0_71 = arith.constant 0 : index
    %73 = vector.load %arg4[%c0_70, %c0_71] : memref<1x128xf32, #tpu.memory_space<vmem>>, vector<1x128xf32>
    %74 = vector.broadcast %73 : vector<1x128xf32> to vector<256x128xf32>
    %75 = arith.addf %72, %74 : vector<256x128xf32>
    %cst_72 = arith.constant 0.000000e+00 : f32
    %76 = vector.broadcast %cst_72 : f32 to vector<256x128xf32>
    %77 = arith.maximumf %75, %76 : vector<256x128xf32>
    %78 = arith.truncf %77 : vector<256x128xf32> to vector<256x128xbf16>
    %c0_73 = arith.constant 0 : index
    %c0_74 = arith.constant 0 : index
    %79 = vector.load %arg5[%c0_73, %c0_74] : memref<256x128xbf16, #tpu.memory_space<vmem>>, vector<256x128xbf16>
    tpu.vector_store %arg5[%c0_73, %c0_74], %78 {strides = array<i32>} : memref<256x128xbf16, #tpu.memory_space<vmem>>, vector<256x128xbf16>,
    return
  }
  func.func @transform_0(%arg0: i32) -> (i32, i32) {
    %c0_i32 = arith.constant 0 : i32
    %c0_i32_0 = arith.constant 0 : i32
    %c0_i32_1 = arith.constant 0 : i32
    return %c0_i32, %c0_i32_0 : i32, i32
  }
  func.func @transform_1(%arg0: i32) -> (i32, i32, i32) {
    %c0_i32 = arith.constant 0 : i32
    %c0_i32_0 = arith.constant 0 : i32
    %c0_i32_1 = arith.constant 0 : i32
    %c0_i32_2 = arith.constant 0 : i32
    return %c0_i32, %c0_i32_0, %c0_i32_1 : i32, i32, i32
  }
  func.func @transform_2(%arg0: i32) -> (i32, i32) {
    %c0_i32 = arith.constant 0 : i32
    %c0_i32_0 = arith.constant 0 : i32
    %c0_i32_1 = arith.constant 0 : i32
    return %c0_i32, %c0_i32_0 : i32, i32
  }
  func.func @transform_3(%arg0: i32) -> (i32, i32) {
    %c0_i32 = arith.constant 0 : i32
    %c0_i32_0 = arith.constant 0 : i32
    %c0_i32_1 = arith.constant 0 : i32
    return %c0_i32, %c0_i32_0 : i32, i32
  }
  func.func @transform_4(%arg0: i32) -> (i32, i32) {
    %c0_i32 = arith.constant 0 : i32
    %c0_i32_0 = arith.constant 0 : i32
    return %arg0, %c0_i32 : i32, i32
  }
}

module attributes {stable_mosaic.version = 11 : i64} {
  func.func @kernel(%arg0: i32, %arg1: i32, %arg2: memref<128x128xbf16, #tpu.memory_space<vmem>>, %arg3: memref<1x128xf32, #tpu.memory_space<vmem>>, %arg4: memref<1x128xf32, #tpu.memory_space<vmem>>, %arg5: memref<128x256xbf16, #tpu.memory_space<vmem>>, %arg6: memref<128x256xbf16, #tpu.memory_space<vmem>>, %arg7: memref<128x256xf32, #tpu.memory_space<vmem>>) attributes {dimension_semantics = [#tpu.dimension_semantics<parallel>, #tpu.dimension_semantics<arbitrary>], iteration_bounds = array<i64: 1, 1>, scalar_prefetch = 0 : i64, scratch_operands = 1 : i64, tpu.core_type = #tpu.core_type<tc>, window_params = [{transform_indices = @transform_0, window_bounds = array<i64: 128, 128>}, {transform_indices = @transform_1, window_bounds = array<i64: 1, 128>}, {transform_indices = @transform_2, window_bounds = array<i64: 1, 128>}, {transform_indices = @transform_3, window_bounds = array<i64: 128, 256>}, {transform_indices = @transform_4, window_bounds = array<i64: 128, 256>}]} {
    %c0_i32 = arith.constant 0 : i32
    %0 = arith.cmpi eq, %arg1, %c0_i32 : i32
    %1 = arith.extui %0 : i1 to i32
    %c0_i32_0 = arith.constant 0 : i32
    %2 = arith.cmpi ne, %1, %c0_i32_0 : i32
    scf.if %2 {
      %cst_15 = arith.constant 0.000000e+00 : f32
      %22 = vector.broadcast %cst_15 : f32 to vector<128x256xf32>
      %c0_16 = arith.constant 0 : index
      %c0_17 = arith.constant 0 : index
      %23 = vector.load %arg7[%c0_16, %c0_17] : memref<128x256xf32, #tpu.memory_space<vmem>>, vector<128x256xf32>
      tpu.vector_store %arg7[%c0_16, %c0_17], %22 {strides = array<i32>} : memref<128x256xf32, #tpu.memory_space<vmem>>, vector<128x256xf32>,
    } else {
    }
    %c0 = arith.constant 0 : index
    %c0_1 = arith.constant 0 : index
    %3 = vector.load %arg2[%c0, %c0_1] : memref<128x128xbf16, #tpu.memory_space<vmem>>, vector<128x128xbf16>
    %4 = arith.extf %3 : vector<128x128xbf16> to vector<128x128xf32>
    %c0_2 = arith.constant 0 : index
    %c0_3 = arith.constant 0 : index
    %5 = vector.load %arg3[%c0_2, %c0_3] : memref<1x128xf32, #tpu.memory_space<vmem>>, vector<1x128xf32>
    %6 = vector.broadcast %5 : vector<1x128xf32> to vector<128x128xf32>
    %7 = arith.mulf %4, %6 : vector<128x128xf32>
    %c0_4 = arith.constant 0 : index
    %c0_5 = arith.constant 0 : index
    %8 = vector.load %arg4[%c0_4, %c0_5] : memref<1x128xf32, #tpu.memory_space<vmem>>, vector<1x128xf32>
    %9 = vector.broadcast %8 : vector<1x128xf32> to vector<128x128xf32>
    %10 = arith.addf %7, %9 : vector<128x128xf32>
    %cst = arith.constant 0.000000e+00 : f32
    %11 = vector.broadcast %cst : f32 to vector<128x128xf32>
    %12 = arith.maximumf %10, %11 : vector<128x128xf32>
    %13 = arith.truncf %12 : vector<128x128xf32> to vector<128x128xbf16>
    %c0_6 = arith.constant 0 : index
    %c0_7 = arith.constant 0 : index
    %14 = vector.load %arg7[%c0_6, %c0_7] : memref<128x256xf32, #tpu.memory_space<vmem>>, vector<128x256xf32>
    %c0_8 = arith.constant 0 : index
    %c0_9 = arith.constant 0 : index
    %15 = vector.load %arg5[%c0_8, %c0_9] : memref<128x256xbf16, #tpu.memory_space<vmem>>, vector<128x256xbf16>
    %cst_10 = arith.constant dense<0.000000e+00> : vector<128x256xf32>
    %16 = tpu.matmul %13, %15, %cst_10 {dimension_numbers = #tpu.dot_dimension_numbers<[1], [0], [0], [1], [0, 0, 1, 1], [], []>} : vector<128x128xbf16>, vector<128x256xbf16>, vector<128x256xf32> -> vector<128x256xf32>
    %17 = arith.addf %14, %16 : vector<128x256xf32>
    %c0_11 = arith.constant 0 : index
    %c0_12 = arith.constant 0 : index
    %18 = vector.load %arg7[%c0_11, %c0_12] : memref<128x256xf32, #tpu.memory_space<vmem>>, vector<128x256xf32>
    tpu.vector_store %arg7[%c0_11, %c0_12], %17 {strides = array<i32>} : memref<128x256xf32, #tpu.memory_space<vmem>>, vector<128x256xf32>,
    %c0_i32_13 = arith.constant 0 : i32
    %19 = arith.cmpi eq, %arg1, %c0_i32_13 : i32
    %20 = arith.extui %19 : i1 to i32
    %c0_i32_14 = arith.constant 0 : i32
    %21 = arith.cmpi ne, %20, %c0_i32_14 : i32
    scf.if %21 {
      %c0_15 = arith.constant 0 : index
      %c0_16 = arith.constant 0 : index
      %22 = vector.load %arg7[%c0_15, %c0_16] : memref<128x256xf32, #tpu.memory_space<vmem>>, vector<128x256xf32>
      %23 = arith.truncf %22 : vector<128x256xf32> to vector<128x256xbf16>
      %c0_17 = arith.constant 0 : index
      %c0_18 = arith.constant 0 : index
      %24 = vector.load %arg6[%c0_17, %c0_18] : memref<128x256xbf16, #tpu.memory_space<vmem>>, vector<128x256xbf16>
      tpu.vector_store %arg6[%c0_17, %c0_18], %23 {strides = array<i32>} : memref<128x256xbf16, #tpu.memory_space<vmem>>, vector<128x256xbf16>,
    } else {
    }
    return
  }
  func.func @transform_0(%arg0: i32, %arg1: i32) -> (i32, i32) {
    %c0_i32 = arith.constant 0 : i32
    return %arg0, %arg1 : i32, i32
  }
  func.func @transform_1(%arg0: i32, %arg1: i32) -> (i32, i32) {
    %c0_i32 = arith.constant 0 : i32
    %c0_i32_0 = arith.constant 0 : i32
    return %c0_i32, %arg1 : i32, i32
  }
  func.func @transform_2(%arg0: i32, %arg1: i32) -> (i32, i32) {
    %c0_i32 = arith.constant 0 : i32
    %c0_i32_0 = arith.constant 0 : i32
    return %c0_i32, %arg1 : i32, i32
  }
  func.func @transform_3(%arg0: i32, %arg1: i32) -> (i32, i32) {
    %c0_i32 = arith.constant 0 : i32
    %c0_i32_0 = arith.constant 0 : i32
    return %arg1, %c0_i32 : i32, i32
  }
  func.func @transform_4(%arg0: i32, %arg1: i32) -> (i32, i32) {
    %c0_i32 = arith.constant 0 : i32
    %c0_i32_0 = arith.constant 0 : i32
    return %arg0, %c0_i32 : i32, i32
  }
}

module attributes {stable_mosaic.version = 11 : i64} {
  func.func @kernel(%arg0: i32, %arg1: i32, %arg2: memref<128x128xbf16, #tpu.memory_space<vmem>>, %arg3: memref<1x128xf32, #tpu.memory_space<vmem>>, %arg4: memref<1x128xf32, #tpu.memory_space<vmem>>, %arg5: memref<128x128xbf16, #tpu.memory_space<vmem>>, %arg6: memref<1x128xf32, #tpu.memory_space<vmem>>, %arg7: memref<1x128xf32, #tpu.memory_space<vmem>>, %arg8: memref<128x128xbf16, #tpu.memory_space<vmem>>, %arg9: memref<128x128xf32, #tpu.memory_space<vmem>>) attributes {dimension_semantics = [#tpu.dimension_semantics<parallel>, #tpu.dimension_semantics<arbitrary>], iteration_bounds = array<i64: 1, 1>, scalar_prefetch = 0 : i64, scratch_operands = 1 : i64, tpu.core_type = #tpu.core_type<tc>, window_params = [{transform_indices = @transform_0, window_bounds = array<i64: 128, 128>}, {transform_indices = @transform_1, window_bounds = array<i64: 1, 128>}, {transform_indices = @transform_2, window_bounds = array<i64: 1, 128>}, {transform_indices = @transform_3, window_bounds = array<i64: 128, 128>}, {pipeline_mode = #tpu.pipeline_mode<synchronous>, transform_indices = @transform_4, window_bounds = array<i64: 1, 128>}, {pipeline_mode = #tpu.pipeline_mode<synchronous>, transform_indices = @transform_5, window_bounds = array<i64: 1, 128>}, {transform_indices = @transform_6, window_bounds = array<i64: 128, 128>}]} {
    %c0_i32 = arith.constant 0 : i32
    %0 = arith.cmpi eq, %arg1, %c0_i32 : i32
    %1 = arith.extui %0 : i1 to i32
    %c0_i32_0 = arith.constant 0 : i32
    %2 = arith.cmpi ne, %1, %c0_i32_0 : i32
    scf.if %2 {
      %cst_15 = arith.constant 0.000000e+00 : f32
      %22 = vector.broadcast %cst_15 : f32 to vector<128x128xf32>
      %c0_16 = arith.constant 0 : index
      %c0_17 = arith.constant 0 : index
      %23 = vector.load %arg9[%c0_16, %c0_17] : memref<128x128xf32, #tpu.memory_space<vmem>>, vector<128x128xf32>
      tpu.vector_store %arg9[%c0_16, %c0_17], %22 {strides = array<i32>} : memref<128x128xf32, #tpu.memory_space<vmem>>, vector<128x128xf32>,
    } else {
    }
    %c0 = arith.constant 0 : index
    %c0_1 = arith.constant 0 : index
    %3 = vector.load %arg2[%c0, %c0_1] : memref<128x128xbf16, #tpu.memory_space<vmem>>, vector<128x128xbf16>
    %4 = arith.extf %3 : vector<128x128xbf16> to vector<128x128xf32>
    %c0_2 = arith.constant 0 : index
    %c0_3 = arith.constant 0 : index
    %5 = vector.load %arg3[%c0_2, %c0_3] : memref<1x128xf32, #tpu.memory_space<vmem>>, vector<1x128xf32>
    %6 = vector.broadcast %5 : vector<1x128xf32> to vector<128x128xf32>
    %7 = arith.mulf %4, %6 : vector<128x128xf32>
    %c0_4 = arith.constant 0 : index
    %c0_5 = arith.constant 0 : index
    %8 = vector.load %arg4[%c0_4, %c0_5] : memref<1x128xf32, #tpu.memory_space<vmem>>, vector<1x128xf32>
    %9 = vector.broadcast %8 : vector<1x128xf32> to vector<128x128xf32>
    %10 = arith.addf %7, %9 : vector<128x128xf32>
    %cst = arith.constant 0.000000e+00 : f32
    %11 = vector.broadcast %cst : f32 to vector<128x128xf32>
    %12 = arith.maximumf %10, %11 : vector<128x128xf32>
    %13 = arith.truncf %12 : vector<128x128xf32> to vector<128x128xbf16>
    %c0_6 = arith.constant 0 : index
    %c0_7 = arith.constant 0 : index
    %14 = vector.load %arg9[%c0_6, %c0_7] : memref<128x128xf32, #tpu.memory_space<vmem>>, vector<128x128xf32>
    %c0_8 = arith.constant 0 : index
    %c0_9 = arith.constant 0 : index
    %15 = vector.load %arg5[%c0_8, %c0_9] : memref<128x128xbf16, #tpu.memory_space<vmem>>, vector<128x128xbf16>
    %cst_10 = arith.constant dense<0.000000e+00> : vector<128x128xf32>
    %16 = tpu.matmul %13, %15, %cst_10 {dimension_numbers = #tpu.dot_dimension_numbers<[1], [0], [0], [1], [0, 0, 1, 1], [], []>} : vector<128x128xbf16>, vector<128x128xbf16>, vector<128x128xf32> -> vector<128x128xf32>
    %17 = arith.addf %14, %16 : vector<128x128xf32>
    %c0_11 = arith.constant 0 : index
    %c0_12 = arith.constant 0 : index
    %18 = vector.load %arg9[%c0_11, %c0_12] : memref<128x128xf32, #tpu.memory_space<vmem>>, vector<128x128xf32>
    tpu.vector_store %arg9[%c0_11, %c0_12], %17 {strides = array<i32>} : memref<128x128xf32, #tpu.memory_space<vmem>>, vector<128x128xf32>,
    %c0_i32_13 = arith.constant 0 : i32
    %19 = arith.cmpi eq, %arg1, %c0_i32_13 : i32
    %20 = arith.extui %19 : i1 to i32
    %c0_i32_14 = arith.constant 0 : i32
    %21 = arith.cmpi ne, %20, %c0_i32_14 : i32
    scf.if %21 {
      %c0_15 = arith.constant 0 : index
      %c0_16 = arith.constant 0 : index
      %22 = vector.load %arg9[%c0_15, %c0_16] : memref<128x128xf32, #tpu.memory_space<vmem>>, vector<128x128xf32>
      %c0_17 = arith.constant 0 : index
      %c0_18 = arith.constant 0 : index
      %23 = vector.load %arg6[%c0_17, %c0_18] : memref<1x128xf32, #tpu.memory_space<vmem>>, vector<1x128xf32>
      %24 = vector.broadcast %23 : vector<1x128xf32> to vector<128x128xf32>
      %25 = arith.mulf %22, %24 : vector<128x128xf32>
      %c0_19 = arith.constant 0 : index
      %c0_20 = arith.constant 0 : index
      %26 = vector.load %arg7[%c0_19, %c0_20] : memref<1x128xf32, #tpu.memory_space<vmem>>, vector<1x128xf32>
      %27 = vector.broadcast %26 : vector<1x128xf32> to vector<128x128xf32>
      %28 = arith.addf %25, %27 : vector<128x128xf32>
      %cst_21 = arith.constant 0.000000e+00 : f32
      %29 = vector.broadcast %cst_21 : f32 to vector<128x128xf32>
      %30 = arith.maximumf %28, %29 : vector<128x128xf32>
      %31 = arith.truncf %30 : vector<128x128xf32> to vector<128x128xbf16>
      %c0_22 = arith.constant 0 : index
      %c0_23 = arith.constant 0 : index
      %32 = vector.load %arg8[%c0_22, %c0_23] : memref<128x128xbf16, #tpu.memory_space<vmem>>, vector<128x128xbf16>
      tpu.vector_store %arg8[%c0_22, %c0_23], %31 {strides = array<i32>} : memref<128x128xbf16, #tpu.memory_space<vmem>>, vector<128x128xbf16>,
    } else {
    }
    return
  }
  func.func @transform_0(%arg0: i32, %arg1: i32) -> (i32, i32) {
    %c0_i32 = arith.constant 0 : i32
    return %arg0, %arg1 : i32, i32
  }
  func.func @transform_1(%arg0: i32, %arg1: i32) -> (i32, i32) {
    %c0_i32 = arith.constant 0 : i32
    %c0_i32_0 = arith.constant 0 : i32
    return %c0_i32, %arg1 : i32, i32
  }
  func.func @transform_2(%arg0: i32, %arg1: i32) -> (i32, i32) {
    %c0_i32 = arith.constant 0 : i32
    %c0_i32_0 = arith.constant 0 : i32
    return %c0_i32, %arg1 : i32, i32
  }
  func.func @transform_3(%arg0: i32, %arg1: i32) -> (i32, i32) {
    %c0_i32 = arith.constant 0 : i32
    %c0_i32_0 = arith.constant 0 : i32
    return %arg1, %c0_i32 : i32, i32
  }
  func.func @transform_4(%arg0: i32, %arg1: i32) -> (i32, i32) {
    %c0_i32 = arith.constant 0 : i32
    %c0_i32_0 = arith.constant 0 : i32
    %c0_i32_1 = arith.constant 0 : i32
    return %c0_i32, %c0_i32_0 : i32, i32
  }
  func.func @transform_5(%arg0: i32, %arg1: i32) -> (i32, i32) {
    %c0_i32 = arith.constant 0 : i32
    %c0_i32_0 = arith.constant 0 : i32
    %c0_i32_1 = arith.constant 0 : i32
    return %c0_i32, %c0_i32_0 : i32, i32
  }
  func.func @transform_6(%arg0: i32, %arg1: i32) -> (i32, i32) {
    %c0_i32 = arith.constant 0 : i32
    %c0_i32_0 = arith.constant 0 : i32
    return %arg0, %c0_i32 : i32, i32
  }
}

module attributes {stable_mosaic.version = 11 : i64} {
  func.func @kernel(%arg0: i32, %arg1: i32, %arg2: memref<128x128xbf16, #tpu.memory_space<vmem>>, %arg3: memref<128x256xbf16, #tpu.memory_space<vmem>>, %arg4: memref<128x128xbf16, #tpu.memory_space<vmem>>, %arg5: memref<128x256xbf16, #tpu.memory_space<vmem>>, %arg6: memref<128x256xf32, #tpu.memory_space<vmem>>) attributes {dimension_semantics = [#tpu.dimension_semantics<parallel>, #tpu.dimension_semantics<arbitrary>], iteration_bounds = array<i64: 1, 1>, scalar_prefetch = 0 : i64, scratch_operands = 1 : i64, tpu.core_type = #tpu.core_type<tc>, window_params = [{transform_indices = @transform_0, window_bounds = array<i64: 128, 128>}, {transform_indices = @transform_1, window_bounds = array<i64: 128, 256>}, {transform_indices = @transform_2, window_bounds = array<i64: 128, 128>}, {transform_indices = @transform_3, window_bounds = array<i64: 128, 256>}]} {
    %c0_i32 = arith.constant 0 : i32
    %0 = arith.cmpi eq, %arg1, %c0_i32 : i32
    %1 = arith.extui %0 : i1 to i32
    %c0_i32_0 = arith.constant 0 : i32
    %2 = arith.cmpi ne, %1, %c0_i32_0 : i32
    scf.if %2 {
      %cst_10 = arith.constant 0.000000e+00 : f32
      %12 = vector.broadcast %cst_10 : f32 to vector<128x256xf32>
      %c0_11 = arith.constant 0 : index
      %c0_12 = arith.constant 0 : index
      %13 = vector.load %arg6[%c0_11, %c0_12] : memref<128x256xf32, #tpu.memory_space<vmem>>, vector<128x256xf32>
      tpu.vector_store %arg6[%c0_11, %c0_12], %12 {strides = array<i32>} : memref<128x256xf32, #tpu.memory_space<vmem>>, vector<128x256xf32>,
    } else {
    }
    %c0 = arith.constant 0 : index
    %c0_1 = arith.constant 0 : index
    %3 = vector.load %arg2[%c0, %c0_1] : memref<128x128xbf16, #tpu.memory_space<vmem>>, vector<128x128xbf16>
    %c0_2 = arith.constant 0 : index
    %c0_3 = arith.constant 0 : index
    %4 = vector.load %arg6[%c0_2, %c0_3] : memref<128x256xf32, #tpu.memory_space<vmem>>, vector<128x256xf32>
    %c0_4 = arith.constant 0 : index
    %c0_5 = arith.constant 0 : index
    %5 = vector.load %arg3[%c0_4, %c0_5] : memref<128x256xbf16, #tpu.memory_space<vmem>>, vector<128x256xbf16>
    %cst = arith.constant dense<0.000000e+00> : vector<128x256xf32>
    %6 = tpu.matmul %3, %5, %cst {dimension_numbers = #tpu.dot_dimension_numbers<[1], [0], [0], [1], [0, 0, 1, 1], [], []>} : vector<128x128xbf16>, vector<128x256xbf16>, vector<128x256xf32> -> vector<128x256xf32>
    %7 = arith.addf %4, %6 : vector<128x256xf32>
    %c0_6 = arith.constant 0 : index
    %c0_7 = arith.constant 0 : index
    %8 = vector.load %arg6[%c0_6, %c0_7] : memref<128x256xf32, #tpu.memory_space<vmem>>, vector<128x256xf32>
    tpu.vector_store %arg6[%c0_6, %c0_7], %7 {strides = array<i32>} : memref<128x256xf32, #tpu.memory_space<vmem>>, vector<128x256xf32>,
    %c0_i32_8 = arith.constant 0 : i32
    %9 = arith.cmpi eq, %arg1, %c0_i32_8 : i32
    %10 = arith.extui %9 : i1 to i32
    %c0_i32_9 = arith.constant 0 : i32
    %11 = arith.cmpi ne, %10, %c0_i32_9 : i32
    scf.if %11 {
      %c0_10 = arith.constant 0 : index
      %c0_11 = arith.constant 0 : index
      %12 = vector.load %arg6[%c0_10, %c0_11] : memref<128x256xf32, #tpu.memory_space<vmem>>, vector<128x256xf32>
      %c0_12 = arith.constant 0 : index
      %c0_13 = arith.constant 0 : index
      %13 = vector.load %arg4[%c0_12, %c0_13] : memref<128x128xbf16, #tpu.memory_space<vmem>>, vector<128x128xbf16>
      %14 = arith.extf %13 : vector<128x128xbf16> to vector<128x128xf32>
      %15 = vector.extract_strided_slice %12 {offsets = [0, 0], sizes = [128, 128], strides = [1, 1]} : vector<128x256xf32> to vector<128x128xf32>
      %16 = arith.addf %15, %14 : vector<128x128xf32>
      %17 = vector.extract_strided_slice %12 {offsets = [0, 128], sizes = [128, 128], strides = [1, 1]} : vector<128x256xf32> to vector<128x128xf32>
      %18 = tpu.concatenate %16, %17 in 1 : vector<128x128xf32>, vector<128x128xf32> -> vector<128x256xf32>
      %19 = arith.truncf %18 : vector<128x256xf32> to vector<128x256xbf16>
      %c0_14 = arith.constant 0 : index
      %c0_15 = arith.constant 0 : index
      %20 = vector.load %arg5[%c0_14, %c0_15] : memref<128x256xbf16, #tpu.memory_space<vmem>>, vector<128x256xbf16>
      tpu.vector_store %arg5[%c0_14, %c0_15], %19 {strides = array<i32>} : memref<128x256xbf16, #tpu.memory_space<vmem>>, vector<128x256xbf16>,
    } else {
    }
    return
  }
  func.func @transform_0(%arg0: i32, %arg1: i32) -> (i32, i32) {
    %c0_i32 = arith.constant 0 : i32
    return %arg0, %arg1 : i32, i32
  }
  func.func @transform_1(%arg0: i32, %arg1: i32) -> (i32, i32) {
    %c0_i32 = arith.constant 0 : i32
    %c0_i32_0 = arith.constant 0 : i32
    return %arg1, %c0_i32 : i32, i32
  }
  func.func @transform_2(%arg0: i32, %arg1: i32) -> (i32, i32) {
    %c0_i32 = arith.constant 0 : i32
    %c0_i32_0 = arith.constant 0 : i32
    return %arg0, %c0_i32 : i32, i32
  }
  func.func @transform_3(%arg0: i32, %arg1: i32) -> (i32, i32) {
    %c0_i32 = arith.constant 0 : i32
    %c0_i32_0 = arith.constant 0 : i32
    return %arg0, %c0_i32 : i32, i32
  }
}

module attributes {stable_mosaic.version = 11 : i64} {
  func.func @kernel(%arg0: i32, %arg1: memref<224x128xbf16, #tpu.memory_space<vmem>>, %arg2: memref<9x128x128xbf16, #tpu.memory_space<vmem>>, %arg3: memref<1x128xf32, #tpu.memory_space<vmem>>, %arg4: memref<1x128xf32, #tpu.memory_space<vmem>>, %arg5: memref<200x128xbf16, #tpu.memory_space<vmem>>, %arg6: memref<200x128xf32, #tpu.memory_space<vmem>>) attributes {dimension_semantics = [#tpu.dimension_semantics<parallel>], iteration_bounds = array<i64: 1>, scalar_prefetch = 0 : i64, scratch_operands = 1 : i64, tpu.core_type = #tpu.core_type<tc>, window_params = [{pipeline_mode = #tpu.pipeline_mode<synchronous>, transform_indices = @transform_0, window_bounds = array<i64: 224, 128>}, {pipeline_mode = #tpu.pipeline_mode<synchronous>, transform_indices = @transform_1, window_bounds = array<i64: 9, 128, 128>}, {pipeline_mode = #tpu.pipeline_mode<synchronous>, transform_indices = @transform_2, window_bounds = array<i64: 1, 128>}, {pipeline_mode = #tpu.pipeline_mode<synchronous>, transform_indices = @transform_3, window_bounds = array<i64: 1, 128>}, {transform_indices = @transform_4, window_bounds = array<i64: 200, 128>}]} {
    %c200_i32 = arith.constant 200 : i32
    %0 = arith.muli %arg0, %c200_i32 : i32
    %1 = tpu.assume_multiple %0, 8 : i32
    %2 = arith.index_cast %1 : i32 to index
    %c0 = arith.constant 0 : index
    %3 = vector.load %arg1[%2, %c0] : memref<224x128xbf16, #tpu.memory_space<vmem>>, vector<224x128xbf16>
    %cst = arith.constant 0.000000e+00 : f32
    %4 = vector.broadcast %cst : f32 to vector<200x128xf32>
    %c0_0 = arith.constant 0 : index
    %c0_1 = arith.constant 0 : index
    %5 = vector.load %arg6[%c0_0, %c0_1] : memref<200x128xf32, #tpu.memory_space<vmem>>, vector<200x128xf32>
    tpu.vector_store %arg6[%c0_0, %c0_1], %4 {strides = array<i32>} : memref<200x128xf32, #tpu.memory_space<vmem>>, vector<200x128xf32>,
    %c0_2 = arith.constant 0 : index
    %c0_3 = arith.constant 0 : index
    %6 = vector.load %arg6[%c0_2, %c0_3] : memref<200x128xf32, #tpu.memory_space<vmem>>, vector<200x128xf32>
    %7 = vector.extract_strided_slice %3 {offsets = [0, 0], sizes = [200, 128], strides = [1, 1]} : vector<224x128xbf16> to vector<200x128xbf16>
    %c0_4 = arith.constant 0 : index
    %c0_5 = arith.constant 0 : index
    %c0_6 = arith.constant 0 : index
    %8 = vector.load %arg2[%c0_4, %c0_5, %c0_6] : memref<9x128x128xbf16, #tpu.memory_space<vmem>>, vector<1x128x128xbf16>
    %9 = vector.shape_cast %8 : vector<1x128x128xbf16> to vector<128x128xbf16>
    %cst_7 = arith.constant dense<0.000000e+00> : vector<200x128xf32>
    %10 = tpu.matmul %7, %9, %cst_7 {dimension_numbers = #tpu.dot_dimension_numbers<[1], [0], [0], [1], [0, 0, 1, 1], [], []>} : vector<200x128xbf16>, vector<128x128xbf16>, vector<200x128xf32> -> vector<200x128xf32>
    %11 = arith.addf %6, %10 : vector<200x128xf32>
    %c0_8 = arith.constant 0 : index
    %c0_9 = arith.constant 0 : index
    %12 = vector.load %arg6[%c0_8, %c0_9] : memref<200x128xf32, #tpu.memory_space<vmem>>, vector<200x128xf32>
    tpu.vector_store %arg6[%c0_8, %c0_9], %11 {strides = array<i32>} : memref<200x128xf32, #tpu.memory_space<vmem>>, vector<200x128xf32>,
    %c0_10 = arith.constant 0 : index
    %c0_11 = arith.constant 0 : index
    %13 = vector.load %arg6[%c0_10, %c0_11] : memref<200x128xf32, #tpu.memory_space<vmem>>, vector<200x128xf32>
    %14 = vector.extract_strided_slice %3 {offsets = [1, 0], sizes = [200, 128], strides = [1, 1]} : vector<224x128xbf16> to vector<200x128xbf16>
    %c1 = arith.constant 1 : index
    %c0_12 = arith.constant 0 : index
    %c0_13 = arith.constant 0 : index
    %15 = vector.load %arg2[%c1, %c0_12, %c0_13] : memref<9x128x128xbf16, #tpu.memory_space<vmem>>, vector<1x128x128xbf16>
    %16 = vector.shape_cast %15 : vector<1x128x128xbf16> to vector<128x128xbf16>
    %cst_14 = arith.constant dense<0.000000e+00> : vector<200x128xf32>
    %17 = tpu.matmul %14, %16, %cst_14 {dimension_numbers = #tpu.dot_dimension_numbers<[1], [0], [0], [1], [0, 0, 1, 1], [], []>} : vector<200x128xbf16>, vector<128x128xbf16>, vector<200x128xf32> -> vector<200x128xf32>
    %18 = arith.addf %13, %17 : vector<200x128xf32>
    %c0_15 = arith.constant 0 : index
    %c0_16 = arith.constant 0 : index
    %19 = vector.load %arg6[%c0_15, %c0_16] : memref<200x128xf32, #tpu.memory_space<vmem>>, vector<200x128xf32>
    tpu.vector_store %arg6[%c0_15, %c0_16], %18 {strides = array<i32>} : memref<200x128xf32, #tpu.memory_space<vmem>>, vector<200x128xf32>,
    %c0_17 = arith.constant 0 : index
    %c0_18 = arith.constant 0 : index
    %20 = vector.load %arg6[%c0_17, %c0_18] : memref<200x128xf32, #tpu.memory_space<vmem>>, vector<200x128xf32>
    %21 = vector.extract_strided_slice %3 {offsets = [2, 0], sizes = [200, 128], strides = [1, 1]} : vector<224x128xbf16> to vector<200x128xbf16>
    %c2 = arith.constant 2 : index
    %c0_19 = arith.constant 0 : index
    %c0_20 = arith.constant 0 : index
    %22 = vector.load %arg2[%c2, %c0_19, %c0_20] : memref<9x128x128xbf16, #tpu.memory_space<vmem>>, vector<1x128x128xbf16>
    %23 = vector.shape_cast %22 : vector<1x128x128xbf16> to vector<128x128xbf16>
    %cst_21 = arith.constant dense<0.000000e+00> : vector<200x128xf32>
    %24 = tpu.matmul %21, %23, %cst_21 {dimension_numbers = #tpu.dot_dimension_numbers<[1], [0], [0], [1], [0, 0, 1, 1], [], []>} : vector<200x128xbf16>, vector<128x128xbf16>, vector<200x128xf32> -> vector<200x128xf32>
    %25 = arith.addf %20, %24 : vector<200x128xf32>
    %c0_22 = arith.constant 0 : index
    %c0_23 = arith.constant 0 : index
    %26 = vector.load %arg6[%c0_22, %c0_23] : memref<200x128xf32, #tpu.memory_space<vmem>>, vector<200x128xf32>
    tpu.vector_store %arg6[%c0_22, %c0_23], %25 {strides = array<i32>} : memref<200x128xf32, #tpu.memory_space<vmem>>, vector<200x128xf32>,
    %c0_24 = arith.constant 0 : index
    %c0_25 = arith.constant 0 : index
    %27 = vector.load %arg6[%c0_24, %c0_25] : memref<200x128xf32, #tpu.memory_space<vmem>>, vector<200x128xf32>
    %28 = vector.extract_strided_slice %3 {offsets = [10, 0], sizes = [200, 128], strides = [1, 1]} : vector<224x128xbf16> to vector<200x128xbf16>
    %c3 = arith.constant 3 : index
    %c0_26 = arith.constant 0 : index
    %c0_27 = arith.constant 0 : index
    %29 = vector.load %arg2[%c3, %c0_26, %c0_27] : memref<9x128x128xbf16, #tpu.memory_space<vmem>>, vector<1x128x128xbf16>
    %30 = vector.shape_cast %29 : vector<1x128x128xbf16> to vector<128x128xbf16>
    %cst_28 = arith.constant dense<0.000000e+00> : vector<200x128xf32>
    %31 = tpu.matmul %28, %30, %cst_28 {dimension_numbers = #tpu.dot_dimension_numbers<[1], [0], [0], [1], [0, 0, 1, 1], [], []>} : vector<200x128xbf16>, vector<128x128xbf16>, vector<200x128xf32> -> vector<200x128xf32>
    %32 = arith.addf %27, %31 : vector<200x128xf32>
    %c0_29 = arith.constant 0 : index
    %c0_30 = arith.constant 0 : index
    %33 = vector.load %arg6[%c0_29, %c0_30] : memref<200x128xf32, #tpu.memory_space<vmem>>, vector<200x128xf32>
    tpu.vector_store %arg6[%c0_29, %c0_30], %32 {strides = array<i32>} : memref<200x128xf32, #tpu.memory_space<vmem>>, vector<200x128xf32>,
    %c0_31 = arith.constant 0 : index
    %c0_32 = arith.constant 0 : index
    %34 = vector.load %arg6[%c0_31, %c0_32] : memref<200x128xf32, #tpu.memory_space<vmem>>, vector<200x128xf32>
    %35 = vector.extract_strided_slice %3 {offsets = [11, 0], sizes = [200, 128], strides = [1, 1]} : vector<224x128xbf16> to vector<200x128xbf16>
    %c4 = arith.constant 4 : index
    %c0_33 = arith.constant 0 : index
    %c0_34 = arith.constant 0 : index
    %36 = vector.load %arg2[%c4, %c0_33, %c0_34] : memref<9x128x128xbf16, #tpu.memory_space<vmem>>, vector<1x128x128xbf16>
    %37 = vector.shape_cast %36 : vector<1x128x128xbf16> to vector<128x128xbf16>
    %cst_35 = arith.constant dense<0.000000e+00> : vector<200x128xf32>
    %38 = tpu.matmul %35, %37, %cst_35 {dimension_numbers = #tpu.dot_dimension_numbers<[1], [0], [0], [1], [0, 0, 1, 1], [], []>} : vector<200x128xbf16>, vector<128x128xbf16>, vector<200x128xf32> -> vector<200x128xf32>
    %39 = arith.addf %34, %38 : vector<200x128xf32>
    %c0_36 = arith.constant 0 : index
    %c0_37 = arith.constant 0 : index
    %40 = vector.load %arg6[%c0_36, %c0_37] : memref<200x128xf32, #tpu.memory_space<vmem>>, vector<200x128xf32>
    tpu.vector_store %arg6[%c0_36, %c0_37], %39 {strides = array<i32>} : memref<200x128xf32, #tpu.memory_space<vmem>>, vector<200x128xf32>,
    %c0_38 = arith.constant 0 : index
    %c0_39 = arith.constant 0 : index
    %41 = vector.load %arg6[%c0_38, %c0_39] : memref<200x128xf32, #tpu.memory_space<vmem>>, vector<200x128xf32>
    %42 = vector.extract_strided_slice %3 {offsets = [12, 0], sizes = [200, 128], strides = [1, 1]} : vector<224x128xbf16> to vector<200x128xbf16>
    %c5 = arith.constant 5 : index
    %c0_40 = arith.constant 0 : index
    %c0_41 = arith.constant 0 : index
    %43 = vector.load %arg2[%c5, %c0_40, %c0_41] : memref<9x128x128xbf16, #tpu.memory_space<vmem>>, vector<1x128x128xbf16>
    %44 = vector.shape_cast %43 : vector<1x128x128xbf16> to vector<128x128xbf16>
    %cst_42 = arith.constant dense<0.000000e+00> : vector<200x128xf32>
    %45 = tpu.matmul %42, %44, %cst_42 {dimension_numbers = #tpu.dot_dimension_numbers<[1], [0], [0], [1], [0, 0, 1, 1], [], []>} : vector<200x128xbf16>, vector<128x128xbf16>, vector<200x128xf32> -> vector<200x128xf32>
    %46 = arith.addf %41, %45 : vector<200x128xf32>
    %c0_43 = arith.constant 0 : index
    %c0_44 = arith.constant 0 : index
    %47 = vector.load %arg6[%c0_43, %c0_44] : memref<200x128xf32, #tpu.memory_space<vmem>>, vector<200x128xf32>
    tpu.vector_store %arg6[%c0_43, %c0_44], %46 {strides = array<i32>} : memref<200x128xf32, #tpu.memory_space<vmem>>, vector<200x128xf32>,
    %c0_45 = arith.constant 0 : index
    %c0_46 = arith.constant 0 : index
    %48 = vector.load %arg6[%c0_45, %c0_46] : memref<200x128xf32, #tpu.memory_space<vmem>>, vector<200x128xf32>
    %49 = vector.extract_strided_slice %3 {offsets = [20, 0], sizes = [200, 128], strides = [1, 1]} : vector<224x128xbf16> to vector<200x128xbf16>
    %c6 = arith.constant 6 : index
    %c0_47 = arith.constant 0 : index
    %c0_48 = arith.constant 0 : index
    %50 = vector.load %arg2[%c6, %c0_47, %c0_48] : memref<9x128x128xbf16, #tpu.memory_space<vmem>>, vector<1x128x128xbf16>
    %51 = vector.shape_cast %50 : vector<1x128x128xbf16> to vector<128x128xbf16>
    %cst_49 = arith.constant dense<0.000000e+00> : vector<200x128xf32>
    %52 = tpu.matmul %49, %51, %cst_49 {dimension_numbers = #tpu.dot_dimension_numbers<[1], [0], [0], [1], [0, 0, 1, 1], [], []>} : vector<200x128xbf16>, vector<128x128xbf16>, vector<200x128xf32> -> vector<200x128xf32>
    %53 = arith.addf %48, %52 : vector<200x128xf32>
    %c0_50 = arith.constant 0 : index
    %c0_51 = arith.constant 0 : index
    %54 = vector.load %arg6[%c0_50, %c0_51] : memref<200x128xf32, #tpu.memory_space<vmem>>, vector<200x128xf32>
    tpu.vector_store %arg6[%c0_50, %c0_51], %53 {strides = array<i32>} : memref<200x128xf32, #tpu.memory_space<vmem>>, vector<200x128xf32>,
    %c0_52 = arith.constant 0 : index
    %c0_53 = arith.constant 0 : index
    %55 = vector.load %arg6[%c0_52, %c0_53] : memref<200x128xf32, #tpu.memory_space<vmem>>, vector<200x128xf32>
    %56 = vector.extract_strided_slice %3 {offsets = [21, 0], sizes = [200, 128], strides = [1, 1]} : vector<224x128xbf16> to vector<200x128xbf16>
    %c7 = arith.constant 7 : index
    %c0_54 = arith.constant 0 : index
    %c0_55 = arith.constant 0 : index
    %57 = vector.load %arg2[%c7, %c0_54, %c0_55] : memref<9x128x128xbf16, #tpu.memory_space<vmem>>, vector<1x128x128xbf16>
    %58 = vector.shape_cast %57 : vector<1x128x128xbf16> to vector<128x128xbf16>
    %cst_56 = arith.constant dense<0.000000e+00> : vector<200x128xf32>
    %59 = tpu.matmul %56, %58, %cst_56 {dimension_numbers = #tpu.dot_dimension_numbers<[1], [0], [0], [1], [0, 0, 1, 1], [], []>} : vector<200x128xbf16>, vector<128x128xbf16>, vector<200x128xf32> -> vector<200x128xf32>
    %60 = arith.addf %55, %59 : vector<200x128xf32>
    %c0_57 = arith.constant 0 : index
    %c0_58 = arith.constant 0 : index
    %61 = vector.load %arg6[%c0_57, %c0_58] : memref<200x128xf32, #tpu.memory_space<vmem>>, vector<200x128xf32>
    tpu.vector_store %arg6[%c0_57, %c0_58], %60 {strides = array<i32>} : memref<200x128xf32, #tpu.memory_space<vmem>>, vector<200x128xf32>,
    %c0_59 = arith.constant 0 : index
    %c0_60 = arith.constant 0 : index
    %62 = vector.load %arg6[%c0_59, %c0_60] : memref<200x128xf32, #tpu.memory_space<vmem>>, vector<200x128xf32>
    %63 = vector.extract_strided_slice %3 {offsets = [22, 0], sizes = [200, 128], strides = [1, 1]} : vector<224x128xbf16> to vector<200x128xbf16>
    %c8 = arith.constant 8 : index
    %c0_61 = arith.constant 0 : index
    %c0_62 = arith.constant 0 : index
    %64 = vector.load %arg2[%c8, %c0_61, %c0_62] : memref<9x128x128xbf16, #tpu.memory_space<vmem>>, vector<1x128x128xbf16>
    %65 = vector.shape_cast %64 : vector<1x128x128xbf16> to vector<128x128xbf16>
    %cst_63 = arith.constant dense<0.000000e+00> : vector<200x128xf32>
    %66 = tpu.matmul %63, %65, %cst_63 {dimension_numbers = #tpu.dot_dimension_numbers<[1], [0], [0], [1], [0, 0, 1, 1], [], []>} : vector<200x128xbf16>, vector<128x128xbf16>, vector<200x128xf32> -> vector<200x128xf32>
    %67 = arith.addf %62, %66 : vector<200x128xf32>
    %c0_64 = arith.constant 0 : index
    %c0_65 = arith.constant 0 : index
    %68 = vector.load %arg6[%c0_64, %c0_65] : memref<200x128xf32, #tpu.memory_space<vmem>>, vector<200x128xf32>
    tpu.vector_store %arg6[%c0_64, %c0_65], %67 {strides = array<i32>} : memref<200x128xf32, #tpu.memory_space<vmem>>, vector<200x128xf32>,
    %c0_66 = arith.constant 0 : index
    %c0_67 = arith.constant 0 : index
    %69 = vector.load %arg6[%c0_66, %c0_67] : memref<200x128xf32, #tpu.memory_space<vmem>>, vector<200x128xf32>
    %c0_68 = arith.constant 0 : index
    %c0_69 = arith.constant 0 : index
    %70 = vector.load %arg3[%c0_68, %c0_69] : memref<1x128xf32, #tpu.memory_space<vmem>>, vector<1x128xf32>
    %71 = vector.broadcast %70 : vector<1x128xf32> to vector<200x128xf32>
    %72 = arith.mulf %69, %71 : vector<200x128xf32>
    %c0_70 = arith.constant 0 : index
    %c0_71 = arith.constant 0 : index
    %73 = vector.load %arg4[%c0_70, %c0_71] : memref<1x128xf32, #tpu.memory_space<vmem>>, vector<1x128xf32>
    %74 = vector.broadcast %73 : vector<1x128xf32> to vector<200x128xf32>
    %75 = arith.addf %72, %74 : vector<200x128xf32>
    %cst_72 = arith.constant 0.000000e+00 : f32
    %76 = vector.broadcast %cst_72 : f32 to vector<200x128xf32>
    %77 = arith.maximumf %75, %76 : vector<200x128xf32>
    %78 = arith.truncf %77 : vector<200x128xf32> to vector<200x128xbf16>
    %c0_73 = arith.constant 0 : index
    %c0_74 = arith.constant 0 : index
    %79 = vector.load %arg5[%c0_73, %c0_74] : memref<200x128xbf16, #tpu.memory_space<vmem>>, vector<200x128xbf16>
    tpu.vector_store %arg5[%c0_73, %c0_74], %78 {strides = array<i32>} : memref<200x128xbf16, #tpu.memory_space<vmem>>, vector<200x128xbf16>,
    return
  }
  func.func @transform_0(%arg0: i32) -> (i32, i32) {
    %c0_i32 = arith.constant 0 : i32
    %c0_i32_0 = arith.constant 0 : i32
    %c0_i32_1 = arith.constant 0 : i32
    return %c0_i32, %c0_i32_0 : i32, i32
  }
  func.func @transform_1(%arg0: i32) -> (i32, i32, i32) {
    %c0_i32 = arith.constant 0 : i32
    %c0_i32_0 = arith.constant 0 : i32
    %c0_i32_1 = arith.constant 0 : i32
    %c0_i32_2 = arith.constant 0 : i32
    return %c0_i32, %c0_i32_0, %c0_i32_1 : i32, i32, i32
  }
  func.func @transform_2(%arg0: i32) -> (i32, i32) {
    %c0_i32 = arith.constant 0 : i32
    %c0_i32_0 = arith.constant 0 : i32
    %c0_i32_1 = arith.constant 0 : i32
    return %c0_i32, %c0_i32_0 : i32, i32
  }
  func.func @transform_3(%arg0: i32) -> (i32, i32) {
    %c0_i32 = arith.constant 0 : i32
    %c0_i32_0 = arith.constant 0 : i32
    %c0_i32_1 = arith.constant 0 : i32
    return %c0_i32, %c0_i32_0 : i32, i32
  }
  func.func @transform_4(%arg0: i32) -> (i32, i32) {
    %c0_i32 = arith.constant 0 : i32
    %c0_i32_0 = arith.constant 0 : i32
    return %arg0, %c0_i32 : i32, i32
  }
}

module attributes {stable_mosaic.version = 11 : i64} {
  func.func @kernel(%arg0: i32, %arg1: i32, %arg2: memref<32x256xbf16, #tpu.memory_space<vmem>>, %arg3: memref<1x256xf32, #tpu.memory_space<vmem>>, %arg4: memref<1x256xf32, #tpu.memory_space<vmem>>, %arg5: memref<256x256xbf16, #tpu.memory_space<vmem>>, %arg6: memref<32x256xbf16, #tpu.memory_space<vmem>>, %arg7: memref<32x256xf32, #tpu.memory_space<vmem>>) attributes {dimension_semantics = [#tpu.dimension_semantics<parallel>, #tpu.dimension_semantics<arbitrary>], iteration_bounds = array<i64: 1, 1>, scalar_prefetch = 0 : i64, scratch_operands = 1 : i64, tpu.core_type = #tpu.core_type<tc>, window_params = [{transform_indices = @transform_0, window_bounds = array<i64: 32, 256>}, {transform_indices = @transform_1, window_bounds = array<i64: 1, 256>}, {transform_indices = @transform_2, window_bounds = array<i64: 1, 256>}, {transform_indices = @transform_3, window_bounds = array<i64: 256, 256>}, {transform_indices = @transform_4, window_bounds = array<i64: 32, 256>}]} {
    %c0_i32 = arith.constant 0 : i32
    %0 = arith.cmpi eq, %arg1, %c0_i32 : i32
    %1 = arith.extui %0 : i1 to i32
    %c0_i32_0 = arith.constant 0 : i32
    %2 = arith.cmpi ne, %1, %c0_i32_0 : i32
    scf.if %2 {
      %cst_15 = arith.constant 0.000000e+00 : f32
      %22 = vector.broadcast %cst_15 : f32 to vector<32x256xf32>
      %c0_16 = arith.constant 0 : index
      %c0_17 = arith.constant 0 : index
      %23 = vector.load %arg7[%c0_16, %c0_17] : memref<32x256xf32, #tpu.memory_space<vmem>>, vector<32x256xf32>
      tpu.vector_store %arg7[%c0_16, %c0_17], %22 {strides = array<i32>} : memref<32x256xf32, #tpu.memory_space<vmem>>, vector<32x256xf32>,
    } else {
    }
    %c0 = arith.constant 0 : index
    %c0_1 = arith.constant 0 : index
    %3 = vector.load %arg2[%c0, %c0_1] : memref<32x256xbf16, #tpu.memory_space<vmem>>, vector<32x256xbf16>
    %4 = arith.extf %3 : vector<32x256xbf16> to vector<32x256xf32>
    %c0_2 = arith.constant 0 : index
    %c0_3 = arith.constant 0 : index
    %5 = vector.load %arg3[%c0_2, %c0_3] : memref<1x256xf32, #tpu.memory_space<vmem>>, vector<1x256xf32>
    %6 = vector.broadcast %5 : vector<1x256xf32> to vector<32x256xf32>
    %7 = arith.mulf %4, %6 : vector<32x256xf32>
    %c0_4 = arith.constant 0 : index
    %c0_5 = arith.constant 0 : index
    %8 = vector.load %arg4[%c0_4, %c0_5] : memref<1x256xf32, #tpu.memory_space<vmem>>, vector<1x256xf32>
    %9 = vector.broadcast %8 : vector<1x256xf32> to vector<32x256xf32>
    %10 = arith.addf %7, %9 : vector<32x256xf32>
    %cst = arith.constant 0.000000e+00 : f32
    %11 = vector.broadcast %cst : f32 to vector<32x256xf32>
    %12 = arith.maximumf %10, %11 : vector<32x256xf32>
    %13 = arith.truncf %12 : vector<32x256xf32> to vector<32x256xbf16>
    %c0_6 = arith.constant 0 : index
    %c0_7 = arith.constant 0 : index
    %14 = vector.load %arg7[%c0_6, %c0_7] : memref<32x256xf32, #tpu.memory_space<vmem>>, vector<32x256xf32>
    %c0_8 = arith.constant 0 : index
    %c0_9 = arith.constant 0 : index
    %15 = vector.load %arg5[%c0_8, %c0_9] : memref<256x256xbf16, #tpu.memory_space<vmem>>, vector<256x256xbf16>
    %cst_10 = arith.constant dense<0.000000e+00> : vector<32x256xf32>
    %16 = tpu.matmul %13, %15, %cst_10 {dimension_numbers = #tpu.dot_dimension_numbers<[1], [0], [0], [1], [0, 0, 1, 1], [], []>} : vector<32x256xbf16>, vector<256x256xbf16>, vector<32x256xf32> -> vector<32x256xf32>
    %17 = arith.addf %14, %16 : vector<32x256xf32>
    %c0_11 = arith.constant 0 : index
    %c0_12 = arith.constant 0 : index
    %18 = vector.load %arg7[%c0_11, %c0_12] : memref<32x256xf32, #tpu.memory_space<vmem>>, vector<32x256xf32>
    tpu.vector_store %arg7[%c0_11, %c0_12], %17 {strides = array<i32>} : memref<32x256xf32, #tpu.memory_space<vmem>>, vector<32x256xf32>,
    %c0_i32_13 = arith.constant 0 : i32
    %19 = arith.cmpi eq, %arg1, %c0_i32_13 : i32
    %20 = arith.extui %19 : i1 to i32
    %c0_i32_14 = arith.constant 0 : i32
    %21 = arith.cmpi ne, %20, %c0_i32_14 : i32
    scf.if %21 {
      %c0_15 = arith.constant 0 : index
      %c0_16 = arith.constant 0 : index
      %22 = vector.load %arg7[%c0_15, %c0_16] : memref<32x256xf32, #tpu.memory_space<vmem>>, vector<32x256xf32>
      %23 = arith.truncf %22 : vector<32x256xf32> to vector<32x256xbf16>
      %c0_17 = arith.constant 0 : index
      %c0_18 = arith.constant 0 : index
      %24 = vector.load %arg6[%c0_17, %c0_18] : memref<32x256xbf16, #tpu.memory_space<vmem>>, vector<32x256xbf16>
      tpu.vector_store %arg6[%c0_17, %c0_18], %23 {strides = array<i32>} : memref<32x256xbf16, #tpu.memory_space<vmem>>, vector<32x256xbf16>,
    } else {
    }
    return
  }
  func.func @transform_0(%arg0: i32, %arg1: i32) -> (i32, i32) {
    %c0_i32 = arith.constant 0 : i32
    return %arg0, %arg1 : i32, i32
  }
  func.func @transform_1(%arg0: i32, %arg1: i32) -> (i32, i32) {
    %c0_i32 = arith.constant 0 : i32
    %c0_i32_0 = arith.constant 0 : i32
    return %c0_i32, %arg1 : i32, i32
  }
  func.func @transform_2(%arg0: i32, %arg1: i32) -> (i32, i32) {
    %c0_i32 = arith.constant 0 : i32
    %c0_i32_0 = arith.constant 0 : i32
    return %c0_i32, %arg1 : i32, i32
  }
  func.func @transform_3(%arg0: i32, %arg1: i32) -> (i32, i32) {
    %c0_i32 = arith.constant 0 : i32
    %c0_i32_0 = arith.constant 0 : i32
    return %arg1, %c0_i32 : i32, i32
  }
  func.func @transform_4(%arg0: i32, %arg1: i32) -> (i32, i32) {
    %c0_i32 = arith.constant 0 : i32
    %c0_i32_0 = arith.constant 0 : i32
    return %arg0, %c0_i32 : i32, i32
  }
}

module attributes {stable_mosaic.version = 11 : i64} {
  func.func @kernel(%arg0: i32, %arg1: i32, %arg2: memref<128x256xbf16, #tpu.memory_space<vmem>>, %arg3: memref<1x256xf32, #tpu.memory_space<vmem>>, %arg4: memref<1x256xf32, #tpu.memory_space<vmem>>, %arg5: memref<256x128xbf16, #tpu.memory_space<vmem>>, %arg6: memref<1x128xf32, #tpu.memory_space<vmem>>, %arg7: memref<1x128xf32, #tpu.memory_space<vmem>>, %arg8: memref<128x128xbf16, #tpu.memory_space<vmem>>, %arg9: memref<128x128xf32, #tpu.memory_space<vmem>>) attributes {dimension_semantics = [#tpu.dimension_semantics<parallel>, #tpu.dimension_semantics<arbitrary>], iteration_bounds = array<i64: 1, 1>, scalar_prefetch = 0 : i64, scratch_operands = 1 : i64, tpu.core_type = #tpu.core_type<tc>, window_params = [{transform_indices = @transform_0, window_bounds = array<i64: 128, 256>}, {transform_indices = @transform_1, window_bounds = array<i64: 1, 256>}, {transform_indices = @transform_2, window_bounds = array<i64: 1, 256>}, {transform_indices = @transform_3, window_bounds = array<i64: 256, 128>}, {pipeline_mode = #tpu.pipeline_mode<synchronous>, transform_indices = @transform_4, window_bounds = array<i64: 1, 128>}, {pipeline_mode = #tpu.pipeline_mode<synchronous>, transform_indices = @transform_5, window_bounds = array<i64: 1, 128>}, {transform_indices = @transform_6, window_bounds = array<i64: 128, 128>}]} {
    %c0_i32 = arith.constant 0 : i32
    %0 = arith.cmpi eq, %arg1, %c0_i32 : i32
    %1 = arith.extui %0 : i1 to i32
    %c0_i32_0 = arith.constant 0 : i32
    %2 = arith.cmpi ne, %1, %c0_i32_0 : i32
    scf.if %2 {
      %cst_15 = arith.constant 0.000000e+00 : f32
      %22 = vector.broadcast %cst_15 : f32 to vector<128x128xf32>
      %c0_16 = arith.constant 0 : index
      %c0_17 = arith.constant 0 : index
      %23 = vector.load %arg9[%c0_16, %c0_17] : memref<128x128xf32, #tpu.memory_space<vmem>>, vector<128x128xf32>
      tpu.vector_store %arg9[%c0_16, %c0_17], %22 {strides = array<i32>} : memref<128x128xf32, #tpu.memory_space<vmem>>, vector<128x128xf32>,
    } else {
    }
    %c0 = arith.constant 0 : index
    %c0_1 = arith.constant 0 : index
    %3 = vector.load %arg2[%c0, %c0_1] : memref<128x256xbf16, #tpu.memory_space<vmem>>, vector<128x256xbf16>
    %4 = arith.extf %3 : vector<128x256xbf16> to vector<128x256xf32>
    %c0_2 = arith.constant 0 : index
    %c0_3 = arith.constant 0 : index
    %5 = vector.load %arg3[%c0_2, %c0_3] : memref<1x256xf32, #tpu.memory_space<vmem>>, vector<1x256xf32>
    %6 = vector.broadcast %5 : vector<1x256xf32> to vector<128x256xf32>
    %7 = arith.mulf %4, %6 : vector<128x256xf32>
    %c0_4 = arith.constant 0 : index
    %c0_5 = arith.constant 0 : index
    %8 = vector.load %arg4[%c0_4, %c0_5] : memref<1x256xf32, #tpu.memory_space<vmem>>, vector<1x256xf32>
    %9 = vector.broadcast %8 : vector<1x256xf32> to vector<128x256xf32>
    %10 = arith.addf %7, %9 : vector<128x256xf32>
    %cst = arith.constant 0.000000e+00 : f32
    %11 = vector.broadcast %cst : f32 to vector<128x256xf32>
    %12 = arith.maximumf %10, %11 : vector<128x256xf32>
    %13 = arith.truncf %12 : vector<128x256xf32> to vector<128x256xbf16>
    %c0_6 = arith.constant 0 : index
    %c0_7 = arith.constant 0 : index
    %14 = vector.load %arg9[%c0_6, %c0_7] : memref<128x128xf32, #tpu.memory_space<vmem>>, vector<128x128xf32>
    %c0_8 = arith.constant 0 : index
    %c0_9 = arith.constant 0 : index
    %15 = vector.load %arg5[%c0_8, %c0_9] : memref<256x128xbf16, #tpu.memory_space<vmem>>, vector<256x128xbf16>
    %cst_10 = arith.constant dense<0.000000e+00> : vector<128x128xf32>
    %16 = tpu.matmul %13, %15, %cst_10 {dimension_numbers = #tpu.dot_dimension_numbers<[1], [0], [0], [1], [0, 0, 1, 1], [], []>} : vector<128x256xbf16>, vector<256x128xbf16>, vector<128x128xf32> -> vector<128x128xf32>
    %17 = arith.addf %14, %16 : vector<128x128xf32>
    %c0_11 = arith.constant 0 : index
    %c0_12 = arith.constant 0 : index
    %18 = vector.load %arg9[%c0_11, %c0_12] : memref<128x128xf32, #tpu.memory_space<vmem>>, vector<128x128xf32>
    tpu.vector_store %arg9[%c0_11, %c0_12], %17 {strides = array<i32>} : memref<128x128xf32, #tpu.memory_space<vmem>>, vector<128x128xf32>,
    %c0_i32_13 = arith.constant 0 : i32
    %19 = arith.cmpi eq, %arg1, %c0_i32_13 : i32
    %20 = arith.extui %19 : i1 to i32
    %c0_i32_14 = arith.constant 0 : i32
    %21 = arith.cmpi ne, %20, %c0_i32_14 : i32
    scf.if %21 {
      %c0_15 = arith.constant 0 : index
      %c0_16 = arith.constant 0 : index
      %22 = vector.load %arg9[%c0_15, %c0_16] : memref<128x128xf32, #tpu.memory_space<vmem>>, vector<128x128xf32>
      %c0_17 = arith.constant 0 : index
      %c0_18 = arith.constant 0 : index
      %23 = vector.load %arg6[%c0_17, %c0_18] : memref<1x128xf32, #tpu.memory_space<vmem>>, vector<1x128xf32>
      %24 = vector.broadcast %23 : vector<1x128xf32> to vector<128x128xf32>
      %25 = arith.mulf %22, %24 : vector<128x128xf32>
      %c0_19 = arith.constant 0 : index
      %c0_20 = arith.constant 0 : index
      %26 = vector.load %arg7[%c0_19, %c0_20] : memref<1x128xf32, #tpu.memory_space<vmem>>, vector<1x128xf32>
      %27 = vector.broadcast %26 : vector<1x128xf32> to vector<128x128xf32>
      %28 = arith.addf %25, %27 : vector<128x128xf32>
      %cst_21 = arith.constant 0.000000e+00 : f32
      %29 = vector.broadcast %cst_21 : f32 to vector<128x128xf32>
      %30 = arith.maximumf %28, %29 : vector<128x128xf32>
      %31 = arith.truncf %30 : vector<128x128xf32> to vector<128x128xbf16>
      %c0_22 = arith.constant 0 : index
      %c0_23 = arith.constant 0 : index
      %32 = vector.load %arg8[%c0_22, %c0_23] : memref<128x128xbf16, #tpu.memory_space<vmem>>, vector<128x128xbf16>
      tpu.vector_store %arg8[%c0_22, %c0_23], %31 {strides = array<i32>} : memref<128x128xbf16, #tpu.memory_space<vmem>>, vector<128x128xbf16>,
    } else {
    }
    return
  }
  func.func @transform_0(%arg0: i32, %arg1: i32) -> (i32, i32) {
    %c0_i32 = arith.constant 0 : i32
    return %arg0, %arg1 : i32, i32
  }
  func.func @transform_1(%arg0: i32, %arg1: i32) -> (i32, i32) {
    %c0_i32 = arith.constant 0 : i32
    %c0_i32_0 = arith.constant 0 : i32
    return %c0_i32, %arg1 : i32, i32
  }
  func.func @transform_2(%arg0: i32, %arg1: i32) -> (i32, i32) {
    %c0_i32 = arith.constant 0 : i32
    %c0_i32_0 = arith.constant 0 : i32
    return %c0_i32, %arg1 : i32, i32
  }
  func.func @transform_3(%arg0: i32, %arg1: i32) -> (i32, i32) {
    %c0_i32 = arith.constant 0 : i32
    %c0_i32_0 = arith.constant 0 : i32
    return %arg1, %c0_i32 : i32, i32
  }
  func.func @transform_4(%arg0: i32, %arg1: i32) -> (i32, i32) {
    %c0_i32 = arith.constant 0 : i32
    %c0_i32_0 = arith.constant 0 : i32
    %c0_i32_1 = arith.constant 0 : i32
    return %c0_i32, %c0_i32_0 : i32, i32
  }
  func.func @transform_5(%arg0: i32, %arg1: i32) -> (i32, i32) {
    %c0_i32 = arith.constant 0 : i32
    %c0_i32_0 = arith.constant 0 : i32
    %c0_i32_1 = arith.constant 0 : i32
    return %c0_i32, %c0_i32_0 : i32, i32
  }
  func.func @transform_6(%arg0: i32, %arg1: i32) -> (i32, i32) {
    %c0_i32 = arith.constant 0 : i32
    %c0_i32_0 = arith.constant 0 : i32
    return %arg0, %c0_i32 : i32, i32
  }
}

module attributes {stable_mosaic.version = 11 : i64} {
  func.func @kernel(%arg0: i32, %arg1: i32, %arg2: memref<32x128xbf16, #tpu.memory_space<vmem>>, %arg3: memref<128x256xbf16, #tpu.memory_space<vmem>>, %arg4: memref<32x128xbf16, #tpu.memory_space<vmem>>, %arg5: memref<32x256xbf16, #tpu.memory_space<vmem>>, %arg6: memref<32x256xf32, #tpu.memory_space<vmem>>) attributes {dimension_semantics = [#tpu.dimension_semantics<parallel>, #tpu.dimension_semantics<arbitrary>], iteration_bounds = array<i64: 1, 1>, scalar_prefetch = 0 : i64, scratch_operands = 1 : i64, tpu.core_type = #tpu.core_type<tc>, window_params = [{transform_indices = @transform_0, window_bounds = array<i64: 32, 128>}, {transform_indices = @transform_1, window_bounds = array<i64: 128, 256>}, {transform_indices = @transform_2, window_bounds = array<i64: 32, 128>}, {transform_indices = @transform_3, window_bounds = array<i64: 32, 256>}]} {
    %c0_i32 = arith.constant 0 : i32
    %0 = arith.cmpi eq, %arg1, %c0_i32 : i32
    %1 = arith.extui %0 : i1 to i32
    %c0_i32_0 = arith.constant 0 : i32
    %2 = arith.cmpi ne, %1, %c0_i32_0 : i32
    scf.if %2 {
      %cst_10 = arith.constant 0.000000e+00 : f32
      %12 = vector.broadcast %cst_10 : f32 to vector<32x256xf32>
      %c0_11 = arith.constant 0 : index
      %c0_12 = arith.constant 0 : index
      %13 = vector.load %arg6[%c0_11, %c0_12] : memref<32x256xf32, #tpu.memory_space<vmem>>, vector<32x256xf32>
      tpu.vector_store %arg6[%c0_11, %c0_12], %12 {strides = array<i32>} : memref<32x256xf32, #tpu.memory_space<vmem>>, vector<32x256xf32>,
    } else {
    }
    %c0 = arith.constant 0 : index
    %c0_1 = arith.constant 0 : index
    %3 = vector.load %arg2[%c0, %c0_1] : memref<32x128xbf16, #tpu.memory_space<vmem>>, vector<32x128xbf16>
    %c0_2 = arith.constant 0 : index
    %c0_3 = arith.constant 0 : index
    %4 = vector.load %arg6[%c0_2, %c0_3] : memref<32x256xf32, #tpu.memory_space<vmem>>, vector<32x256xf32>
    %c0_4 = arith.constant 0 : index
    %c0_5 = arith.constant 0 : index
    %5 = vector.load %arg3[%c0_4, %c0_5] : memref<128x256xbf16, #tpu.memory_space<vmem>>, vector<128x256xbf16>
    %cst = arith.constant dense<0.000000e+00> : vector<32x256xf32>
    %6 = tpu.matmul %3, %5, %cst {dimension_numbers = #tpu.dot_dimension_numbers<[1], [0], [0], [1], [0, 0, 1, 1], [], []>} : vector<32x128xbf16>, vector<128x256xbf16>, vector<32x256xf32> -> vector<32x256xf32>
    %7 = arith.addf %4, %6 : vector<32x256xf32>
    %c0_6 = arith.constant 0 : index
    %c0_7 = arith.constant 0 : index
    %8 = vector.load %arg6[%c0_6, %c0_7] : memref<32x256xf32, #tpu.memory_space<vmem>>, vector<32x256xf32>
    tpu.vector_store %arg6[%c0_6, %c0_7], %7 {strides = array<i32>} : memref<32x256xf32, #tpu.memory_space<vmem>>, vector<32x256xf32>,
    %c0_i32_8 = arith.constant 0 : i32
    %9 = arith.cmpi eq, %arg1, %c0_i32_8 : i32
    %10 = arith.extui %9 : i1 to i32
    %c0_i32_9 = arith.constant 0 : i32
    %11 = arith.cmpi ne, %10, %c0_i32_9 : i32
    scf.if %11 {
      %c0_10 = arith.constant 0 : index
      %c0_11 = arith.constant 0 : index
      %12 = vector.load %arg6[%c0_10, %c0_11] : memref<32x256xf32, #tpu.memory_space<vmem>>, vector<32x256xf32>
      %c0_12 = arith.constant 0 : index
      %c0_13 = arith.constant 0 : index
      %13 = vector.load %arg4[%c0_12, %c0_13] : memref<32x128xbf16, #tpu.memory_space<vmem>>, vector<32x128xbf16>
      %14 = arith.extf %13 : vector<32x128xbf16> to vector<32x128xf32>
      %15 = vector.extract_strided_slice %12 {offsets = [0, 0], sizes = [32, 128], strides = [1, 1]} : vector<32x256xf32> to vector<32x128xf32>
      %16 = arith.addf %15, %14 : vector<32x128xf32>
      %17 = vector.extract_strided_slice %12 {offsets = [0, 128], sizes = [32, 128], strides = [1, 1]} : vector<32x256xf32> to vector<32x128xf32>
      %18 = tpu.concatenate %16, %17 in 1 : vector<32x128xf32>, vector<32x128xf32> -> vector<32x256xf32>
      %19 = arith.truncf %18 : vector<32x256xf32> to vector<32x256xbf16>
      %c0_14 = arith.constant 0 : index
      %c0_15 = arith.constant 0 : index
      %20 = vector.load %arg5[%c0_14, %c0_15] : memref<32x256xbf16, #tpu.memory_space<vmem>>, vector<32x256xbf16>
      tpu.vector_store %arg5[%c0_14, %c0_15], %19 {strides = array<i32>} : memref<32x256xbf16, #tpu.memory_space<vmem>>, vector<32x256xbf16>,
    } else {
    }
    return
  }
  func.func @transform_0(%arg0: i32, %arg1: i32) -> (i32, i32) {
    %c0_i32 = arith.constant 0 : i32
    return %arg0, %arg1 : i32, i32
  }
  func.func @transform_1(%arg0: i32, %arg1: i32) -> (i32, i32) {
    %c0_i32 = arith.constant 0 : i32
    %c0_i32_0 = arith.constant 0 : i32
    return %arg1, %c0_i32 : i32, i32
  }
  func.func @transform_2(%arg0: i32, %arg1: i32) -> (i32, i32) {
    %c0_i32 = arith.constant 0 : i32
    %c0_i32_0 = arith.constant 0 : i32
    return %arg0, %c0_i32 : i32, i32
  }
  func.func @transform_3(%arg0: i32, %arg1: i32) -> (i32, i32) {
    %c0_i32 = arith.constant 0 : i32
    %c0_i32_0 = arith.constant 0 : i32
    return %arg0, %c0_i32 : i32, i32
  }
}

module attributes {stable_mosaic.version = 11 : i64} {
  func.func @kernel(%arg0: i32, %arg1: i32, %arg2: memref<8x256xbf16, #tpu.memory_space<vmem>>, %arg3: memref<1x256xf32, #tpu.memory_space<vmem>>, %arg4: memref<1x256xf32, #tpu.memory_space<vmem>>, %arg5: memref<256x384xbf16, #tpu.memory_space<vmem>>, %arg6: memref<8x384xbf16, #tpu.memory_space<vmem>>, %arg7: memref<8x384xf32, #tpu.memory_space<vmem>>) attributes {dimension_semantics = [#tpu.dimension_semantics<parallel>, #tpu.dimension_semantics<arbitrary>], iteration_bounds = array<i64: 1, 1>, scalar_prefetch = 0 : i64, scratch_operands = 1 : i64, tpu.core_type = #tpu.core_type<tc>, window_params = [{transform_indices = @transform_0, window_bounds = array<i64: 8, 256>}, {transform_indices = @transform_1, window_bounds = array<i64: 1, 256>}, {transform_indices = @transform_2, window_bounds = array<i64: 1, 256>}, {transform_indices = @transform_3, window_bounds = array<i64: 256, 384>}, {transform_indices = @transform_4, window_bounds = array<i64: 8, 384>}]} {
    %c0_i32 = arith.constant 0 : i32
    %0 = arith.cmpi eq, %arg1, %c0_i32 : i32
    %1 = arith.extui %0 : i1 to i32
    %c0_i32_0 = arith.constant 0 : i32
    %2 = arith.cmpi ne, %1, %c0_i32_0 : i32
    scf.if %2 {
      %cst_15 = arith.constant 0.000000e+00 : f32
      %22 = vector.broadcast %cst_15 : f32 to vector<8x384xf32>
      %c0_16 = arith.constant 0 : index
      %c0_17 = arith.constant 0 : index
      %23 = vector.load %arg7[%c0_16, %c0_17] : memref<8x384xf32, #tpu.memory_space<vmem>>, vector<8x384xf32>
      tpu.vector_store %arg7[%c0_16, %c0_17], %22 {strides = array<i32>} : memref<8x384xf32, #tpu.memory_space<vmem>>, vector<8x384xf32>,
    } else {
    }
    %c0 = arith.constant 0 : index
    %c0_1 = arith.constant 0 : index
    %3 = vector.load %arg2[%c0, %c0_1] : memref<8x256xbf16, #tpu.memory_space<vmem>>, vector<8x256xbf16>
    %4 = arith.extf %3 : vector<8x256xbf16> to vector<8x256xf32>
    %c0_2 = arith.constant 0 : index
    %c0_3 = arith.constant 0 : index
    %5 = vector.load %arg3[%c0_2, %c0_3] : memref<1x256xf32, #tpu.memory_space<vmem>>, vector<1x256xf32>
    %6 = vector.broadcast %5 : vector<1x256xf32> to vector<8x256xf32>
    %7 = arith.mulf %4, %6 : vector<8x256xf32>
    %c0_4 = arith.constant 0 : index
    %c0_5 = arith.constant 0 : index
    %8 = vector.load %arg4[%c0_4, %c0_5] : memref<1x256xf32, #tpu.memory_space<vmem>>, vector<1x256xf32>
    %9 = vector.broadcast %8 : vector<1x256xf32> to vector<8x256xf32>
    %10 = arith.addf %7, %9 : vector<8x256xf32>
    %cst = arith.constant 0.000000e+00 : f32
    %11 = vector.broadcast %cst : f32 to vector<8x256xf32>
    %12 = arith.maximumf %10, %11 : vector<8x256xf32>
    %13 = arith.truncf %12 : vector<8x256xf32> to vector<8x256xbf16>
    %c0_6 = arith.constant 0 : index
    %c0_7 = arith.constant 0 : index
    %14 = vector.load %arg7[%c0_6, %c0_7] : memref<8x384xf32, #tpu.memory_space<vmem>>, vector<8x384xf32>
    %c0_8 = arith.constant 0 : index
    %c0_9 = arith.constant 0 : index
    %15 = vector.load %arg5[%c0_8, %c0_9] : memref<256x384xbf16, #tpu.memory_space<vmem>>, vector<256x384xbf16>
    %cst_10 = arith.constant dense<0.000000e+00> : vector<8x384xf32>
    %16 = tpu.matmul %13, %15, %cst_10 {dimension_numbers = #tpu.dot_dimension_numbers<[1], [0], [0], [1], [0, 0, 1, 1], [], []>} : vector<8x256xbf16>, vector<256x384xbf16>, vector<8x384xf32> -> vector<8x384xf32>
    %17 = arith.addf %14, %16 : vector<8x384xf32>
    %c0_11 = arith.constant 0 : index
    %c0_12 = arith.constant 0 : index
    %18 = vector.load %arg7[%c0_11, %c0_12] : memref<8x384xf32, #tpu.memory_space<vmem>>, vector<8x384xf32>
    tpu.vector_store %arg7[%c0_11, %c0_12], %17 {strides = array<i32>} : memref<8x384xf32, #tpu.memory_space<vmem>>, vector<8x384xf32>,
    %c0_i32_13 = arith.constant 0 : i32
    %19 = arith.cmpi eq, %arg1, %c0_i32_13 : i32
    %20 = arith.extui %19 : i1 to i32
    %c0_i32_14 = arith.constant 0 : i32
    %21 = arith.cmpi ne, %20, %c0_i32_14 : i32
    scf.if %21 {
      %c0_15 = arith.constant 0 : index
      %c0_16 = arith.constant 0 : index
      %22 = vector.load %arg7[%c0_15, %c0_16] : memref<8x384xf32, #tpu.memory_space<vmem>>, vector<8x384xf32>
      %23 = arith.truncf %22 : vector<8x384xf32> to vector<8x384xbf16>
      %c0_17 = arith.constant 0 : index
      %c0_18 = arith.constant 0 : index
      %24 = vector.load %arg6[%c0_17, %c0_18] : memref<8x384xbf16, #tpu.memory_space<vmem>>, vector<8x384xbf16>
      tpu.vector_store %arg6[%c0_17, %c0_18], %23 {strides = array<i32>} : memref<8x384xbf16, #tpu.memory_space<vmem>>, vector<8x384xbf16>,
    } else {
    }
    return
  }
  func.func @transform_0(%arg0: i32, %arg1: i32) -> (i32, i32) {
    %c0_i32 = arith.constant 0 : i32
    return %arg0, %arg1 : i32, i32
  }
  func.func @transform_1(%arg0: i32, %arg1: i32) -> (i32, i32) {
    %c0_i32 = arith.constant 0 : i32
    %c0_i32_0 = arith.constant 0 : i32
    return %c0_i32, %arg1 : i32, i32
  }
  func.func @transform_2(%arg0: i32, %arg1: i32) -> (i32, i32) {
    %c0_i32 = arith.constant 0 : i32
    %c0_i32_0 = arith.constant 0 : i32
    return %c0_i32, %arg1 : i32, i32
  }
  func.func @transform_3(%arg0: i32, %arg1: i32) -> (i32, i32) {
    %c0_i32 = arith.constant 0 : i32
    %c0_i32_0 = arith.constant 0 : i32
    return %arg1, %c0_i32 : i32, i32
  }
  func.func @transform_4(%arg0: i32, %arg1: i32) -> (i32, i32) {
    %c0_i32 = arith.constant 0 : i32
    %c0_i32_0 = arith.constant 0 : i32
    return %arg0, %c0_i32 : i32, i32
  }
}

module attributes {stable_mosaic.version = 11 : i64} {
  func.func @kernel(%arg0: i32, %arg1: i32, %arg2: memref<32x256xbf16, #tpu.memory_space<vmem>>, %arg3: memref<1x256xf32, #tpu.memory_space<vmem>>, %arg4: memref<1x256xf32, #tpu.memory_space<vmem>>, %arg5: memref<256x128xbf16, #tpu.memory_space<vmem>>, %arg6: memref<1x128xf32, #tpu.memory_space<vmem>>, %arg7: memref<1x128xf32, #tpu.memory_space<vmem>>, %arg8: memref<32x128xbf16, #tpu.memory_space<vmem>>, %arg9: memref<32x128xf32, #tpu.memory_space<vmem>>) attributes {dimension_semantics = [#tpu.dimension_semantics<parallel>, #tpu.dimension_semantics<arbitrary>], iteration_bounds = array<i64: 1, 1>, scalar_prefetch = 0 : i64, scratch_operands = 1 : i64, tpu.core_type = #tpu.core_type<tc>, window_params = [{transform_indices = @transform_0, window_bounds = array<i64: 32, 256>}, {transform_indices = @transform_1, window_bounds = array<i64: 1, 256>}, {transform_indices = @transform_2, window_bounds = array<i64: 1, 256>}, {transform_indices = @transform_3, window_bounds = array<i64: 256, 128>}, {pipeline_mode = #tpu.pipeline_mode<synchronous>, transform_indices = @transform_4, window_bounds = array<i64: 1, 128>}, {pipeline_mode = #tpu.pipeline_mode<synchronous>, transform_indices = @transform_5, window_bounds = array<i64: 1, 128>}, {transform_indices = @transform_6, window_bounds = array<i64: 32, 128>}]} {
    %c0_i32 = arith.constant 0 : i32
    %0 = arith.cmpi eq, %arg1, %c0_i32 : i32
    %1 = arith.extui %0 : i1 to i32
    %c0_i32_0 = arith.constant 0 : i32
    %2 = arith.cmpi ne, %1, %c0_i32_0 : i32
    scf.if %2 {
      %cst_15 = arith.constant 0.000000e+00 : f32
      %22 = vector.broadcast %cst_15 : f32 to vector<32x128xf32>
      %c0_16 = arith.constant 0 : index
      %c0_17 = arith.constant 0 : index
      %23 = vector.load %arg9[%c0_16, %c0_17] : memref<32x128xf32, #tpu.memory_space<vmem>>, vector<32x128xf32>
      tpu.vector_store %arg9[%c0_16, %c0_17], %22 {strides = array<i32>} : memref<32x128xf32, #tpu.memory_space<vmem>>, vector<32x128xf32>,
    } else {
    }
    %c0 = arith.constant 0 : index
    %c0_1 = arith.constant 0 : index
    %3 = vector.load %arg2[%c0, %c0_1] : memref<32x256xbf16, #tpu.memory_space<vmem>>, vector<32x256xbf16>
    %4 = arith.extf %3 : vector<32x256xbf16> to vector<32x256xf32>
    %c0_2 = arith.constant 0 : index
    %c0_3 = arith.constant 0 : index
    %5 = vector.load %arg3[%c0_2, %c0_3] : memref<1x256xf32, #tpu.memory_space<vmem>>, vector<1x256xf32>
    %6 = vector.broadcast %5 : vector<1x256xf32> to vector<32x256xf32>
    %7 = arith.mulf %4, %6 : vector<32x256xf32>
    %c0_4 = arith.constant 0 : index
    %c0_5 = arith.constant 0 : index
    %8 = vector.load %arg4[%c0_4, %c0_5] : memref<1x256xf32, #tpu.memory_space<vmem>>, vector<1x256xf32>
    %9 = vector.broadcast %8 : vector<1x256xf32> to vector<32x256xf32>
    %10 = arith.addf %7, %9 : vector<32x256xf32>
    %cst = arith.constant 0.000000e+00 : f32
    %11 = vector.broadcast %cst : f32 to vector<32x256xf32>
    %12 = arith.maximumf %10, %11 : vector<32x256xf32>
    %13 = arith.truncf %12 : vector<32x256xf32> to vector<32x256xbf16>
    %c0_6 = arith.constant 0 : index
    %c0_7 = arith.constant 0 : index
    %14 = vector.load %arg9[%c0_6, %c0_7] : memref<32x128xf32, #tpu.memory_space<vmem>>, vector<32x128xf32>
    %c0_8 = arith.constant 0 : index
    %c0_9 = arith.constant 0 : index
    %15 = vector.load %arg5[%c0_8, %c0_9] : memref<256x128xbf16, #tpu.memory_space<vmem>>, vector<256x128xbf16>
    %cst_10 = arith.constant dense<0.000000e+00> : vector<32x128xf32>
    %16 = tpu.matmul %13, %15, %cst_10 {dimension_numbers = #tpu.dot_dimension_numbers<[1], [0], [0], [1], [0, 0, 1, 1], [], []>} : vector<32x256xbf16>, vector<256x128xbf16>, vector<32x128xf32> -> vector<32x128xf32>
    %17 = arith.addf %14, %16 : vector<32x128xf32>
    %c0_11 = arith.constant 0 : index
    %c0_12 = arith.constant 0 : index
    %18 = vector.load %arg9[%c0_11, %c0_12] : memref<32x128xf32, #tpu.memory_space<vmem>>, vector<32x128xf32>
    tpu.vector_store %arg9[%c0_11, %c0_12], %17 {strides = array<i32>} : memref<32x128xf32, #tpu.memory_space<vmem>>, vector<32x128xf32>,
    %c0_i32_13 = arith.constant 0 : i32
    %19 = arith.cmpi eq, %arg1, %c0_i32_13 : i32
    %20 = arith.extui %19 : i1 to i32
    %c0_i32_14 = arith.constant 0 : i32
    %21 = arith.cmpi ne, %20, %c0_i32_14 : i32
    scf.if %21 {
      %c0_15 = arith.constant 0 : index
      %c0_16 = arith.constant 0 : index
      %22 = vector.load %arg9[%c0_15, %c0_16] : memref<32x128xf32, #tpu.memory_space<vmem>>, vector<32x128xf32>
      %c0_17 = arith.constant 0 : index
      %c0_18 = arith.constant 0 : index
      %23 = vector.load %arg6[%c0_17, %c0_18] : memref<1x128xf32, #tpu.memory_space<vmem>>, vector<1x128xf32>
      %24 = vector.broadcast %23 : vector<1x128xf32> to vector<32x128xf32>
      %25 = arith.mulf %22, %24 : vector<32x128xf32>
      %c0_19 = arith.constant 0 : index
      %c0_20 = arith.constant 0 : index
      %26 = vector.load %arg7[%c0_19, %c0_20] : memref<1x128xf32, #tpu.memory_space<vmem>>, vector<1x128xf32>
      %27 = vector.broadcast %26 : vector<1x128xf32> to vector<32x128xf32>
      %28 = arith.addf %25, %27 : vector<32x128xf32>
      %cst_21 = arith.constant 0.000000e+00 : f32
      %29 = vector.broadcast %cst_21 : f32 to vector<32x128xf32>
      %30 = arith.maximumf %28, %29 : vector<32x128xf32>
      %31 = arith.truncf %30 : vector<32x128xf32> to vector<32x128xbf16>
      %c0_22 = arith.constant 0 : index
      %c0_23 = arith.constant 0 : index
      %32 = vector.load %arg8[%c0_22, %c0_23] : memref<32x128xbf16, #tpu.memory_space<vmem>>, vector<32x128xbf16>
      tpu.vector_store %arg8[%c0_22, %c0_23], %31 {strides = array<i32>} : memref<32x128xbf16, #tpu.memory_space<vmem>>, vector<32x128xbf16>,
    } else {
    }
    return
  }
  func.func @transform_0(%arg0: i32, %arg1: i32) -> (i32, i32) {
    %c0_i32 = arith.constant 0 : i32
    return %arg0, %arg1 : i32, i32
  }
  func.func @transform_1(%arg0: i32, %arg1: i32) -> (i32, i32) {
    %c0_i32 = arith.constant 0 : i32
    %c0_i32_0 = arith.constant 0 : i32
    return %c0_i32, %arg1 : i32, i32
  }
  func.func @transform_2(%arg0: i32, %arg1: i32) -> (i32, i32) {
    %c0_i32 = arith.constant 0 : i32
    %c0_i32_0 = arith.constant 0 : i32
    return %c0_i32, %arg1 : i32, i32
  }
  func.func @transform_3(%arg0: i32, %arg1: i32) -> (i32, i32) {
    %c0_i32 = arith.constant 0 : i32
    %c0_i32_0 = arith.constant 0 : i32
    return %arg1, %c0_i32 : i32, i32
  }
  func.func @transform_4(%arg0: i32, %arg1: i32) -> (i32, i32) {
    %c0_i32 = arith.constant 0 : i32
    %c0_i32_0 = arith.constant 0 : i32
    %c0_i32_1 = arith.constant 0 : i32
    return %c0_i32, %c0_i32_0 : i32, i32
  }
  func.func @transform_5(%arg0: i32, %arg1: i32) -> (i32, i32) {
    %c0_i32 = arith.constant 0 : i32
    %c0_i32_0 = arith.constant 0 : i32
    %c0_i32_1 = arith.constant 0 : i32
    return %c0_i32, %c0_i32_0 : i32, i32
  }
  func.func @transform_6(%arg0: i32, %arg1: i32) -> (i32, i32) {
    %c0_i32 = arith.constant 0 : i32
    %c0_i32_0 = arith.constant 0 : i32
    return %arg0, %c0_i32 : i32, i32
  }
}

module attributes {stable_mosaic.version = 11 : i64} {
  func.func @kernel(%arg0: i32, %arg1: memref<88x128xbf16, #tpu.memory_space<vmem>>, %arg2: memref<9x128x128xbf16, #tpu.memory_space<vmem>>, %arg3: memref<1x128xf32, #tpu.memory_space<vmem>>, %arg4: memref<1x128xf32, #tpu.memory_space<vmem>>, %arg5: memref<72x128xbf16, #tpu.memory_space<vmem>>, %arg6: memref<72x128xf32, #tpu.memory_space<vmem>>) attributes {dimension_semantics = [#tpu.dimension_semantics<parallel>], iteration_bounds = array<i64: 1>, scalar_prefetch = 0 : i64, scratch_operands = 1 : i64, tpu.core_type = #tpu.core_type<tc>, window_params = [{pipeline_mode = #tpu.pipeline_mode<synchronous>, transform_indices = @transform_0, window_bounds = array<i64: 88, 128>}, {pipeline_mode = #tpu.pipeline_mode<synchronous>, transform_indices = @transform_1, window_bounds = array<i64: 9, 128, 128>}, {pipeline_mode = #tpu.pipeline_mode<synchronous>, transform_indices = @transform_2, window_bounds = array<i64: 1, 128>}, {pipeline_mode = #tpu.pipeline_mode<synchronous>, transform_indices = @transform_3, window_bounds = array<i64: 1, 128>}, {transform_indices = @transform_4, window_bounds = array<i64: 72, 128>}]} {
    %c72_i32 = arith.constant 72 : i32
    %0 = arith.muli %arg0, %c72_i32 : i32
    %1 = tpu.assume_multiple %0, 8 : i32
    %2 = arith.index_cast %1 : i32 to index
    %c0 = arith.constant 0 : index
    %3 = vector.load %arg1[%2, %c0] : memref<88x128xbf16, #tpu.memory_space<vmem>>, vector<88x128xbf16>
    %cst = arith.constant 0.000000e+00 : f32
    %4 = vector.broadcast %cst : f32 to vector<72x128xf32>
    %c0_0 = arith.constant 0 : index
    %c0_1 = arith.constant 0 : index
    %5 = vector.load %arg6[%c0_0, %c0_1] : memref<72x128xf32, #tpu.memory_space<vmem>>, vector<72x128xf32>
    tpu.vector_store %arg6[%c0_0, %c0_1], %4 {strides = array<i32>} : memref<72x128xf32, #tpu.memory_space<vmem>>, vector<72x128xf32>,
    %c0_2 = arith.constant 0 : index
    %c0_3 = arith.constant 0 : index
    %6 = vector.load %arg6[%c0_2, %c0_3] : memref<72x128xf32, #tpu.memory_space<vmem>>, vector<72x128xf32>
    %7 = vector.extract_strided_slice %3 {offsets = [0, 0], sizes = [72, 128], strides = [1, 1]} : vector<88x128xbf16> to vector<72x128xbf16>
    %c0_4 = arith.constant 0 : index
    %c0_5 = arith.constant 0 : index
    %c0_6 = arith.constant 0 : index
    %8 = vector.load %arg2[%c0_4, %c0_5, %c0_6] : memref<9x128x128xbf16, #tpu.memory_space<vmem>>, vector<1x128x128xbf16>
    %9 = vector.shape_cast %8 : vector<1x128x128xbf16> to vector<128x128xbf16>
    %cst_7 = arith.constant dense<0.000000e+00> : vector<72x128xf32>
    %10 = tpu.matmul %7, %9, %cst_7 {dimension_numbers = #tpu.dot_dimension_numbers<[1], [0], [0], [1], [0, 0, 1, 1], [], []>} : vector<72x128xbf16>, vector<128x128xbf16>, vector<72x128xf32> -> vector<72x128xf32>
    %11 = arith.addf %6, %10 : vector<72x128xf32>
    %c0_8 = arith.constant 0 : index
    %c0_9 = arith.constant 0 : index
    %12 = vector.load %arg6[%c0_8, %c0_9] : memref<72x128xf32, #tpu.memory_space<vmem>>, vector<72x128xf32>
    tpu.vector_store %arg6[%c0_8, %c0_9], %11 {strides = array<i32>} : memref<72x128xf32, #tpu.memory_space<vmem>>, vector<72x128xf32>,
    %c0_10 = arith.constant 0 : index
    %c0_11 = arith.constant 0 : index
    %13 = vector.load %arg6[%c0_10, %c0_11] : memref<72x128xf32, #tpu.memory_space<vmem>>, vector<72x128xf32>
    %14 = vector.extract_strided_slice %3 {offsets = [1, 0], sizes = [72, 128], strides = [1, 1]} : vector<88x128xbf16> to vector<72x128xbf16>
    %c1 = arith.constant 1 : index
    %c0_12 = arith.constant 0 : index
    %c0_13 = arith.constant 0 : index
    %15 = vector.load %arg2[%c1, %c0_12, %c0_13] : memref<9x128x128xbf16, #tpu.memory_space<vmem>>, vector<1x128x128xbf16>
    %16 = vector.shape_cast %15 : vector<1x128x128xbf16> to vector<128x128xbf16>
    %cst_14 = arith.constant dense<0.000000e+00> : vector<72x128xf32>
    %17 = tpu.matmul %14, %16, %cst_14 {dimension_numbers = #tpu.dot_dimension_numbers<[1], [0], [0], [1], [0, 0, 1, 1], [], []>} : vector<72x128xbf16>, vector<128x128xbf16>, vector<72x128xf32> -> vector<72x128xf32>
    %18 = arith.addf %13, %17 : vector<72x128xf32>
    %c0_15 = arith.constant 0 : index
    %c0_16 = arith.constant 0 : index
    %19 = vector.load %arg6[%c0_15, %c0_16] : memref<72x128xf32, #tpu.memory_space<vmem>>, vector<72x128xf32>
    tpu.vector_store %arg6[%c0_15, %c0_16], %18 {strides = array<i32>} : memref<72x128xf32, #tpu.memory_space<vmem>>, vector<72x128xf32>,
    %c0_17 = arith.constant 0 : index
    %c0_18 = arith.constant 0 : index
    %20 = vector.load %arg6[%c0_17, %c0_18] : memref<72x128xf32, #tpu.memory_space<vmem>>, vector<72x128xf32>
    %21 = vector.extract_strided_slice %3 {offsets = [2, 0], sizes = [72, 128], strides = [1, 1]} : vector<88x128xbf16> to vector<72x128xbf16>
    %c2 = arith.constant 2 : index
    %c0_19 = arith.constant 0 : index
    %c0_20 = arith.constant 0 : index
    %22 = vector.load %arg2[%c2, %c0_19, %c0_20] : memref<9x128x128xbf16, #tpu.memory_space<vmem>>, vector<1x128x128xbf16>
    %23 = vector.shape_cast %22 : vector<1x128x128xbf16> to vector<128x128xbf16>
    %cst_21 = arith.constant dense<0.000000e+00> : vector<72x128xf32>
    %24 = tpu.matmul %21, %23, %cst_21 {dimension_numbers = #tpu.dot_dimension_numbers<[1], [0], [0], [1], [0, 0, 1, 1], [], []>} : vector<72x128xbf16>, vector<128x128xbf16>, vector<72x128xf32> -> vector<72x128xf32>
    %25 = arith.addf %20, %24 : vector<72x128xf32>
    %c0_22 = arith.constant 0 : index
    %c0_23 = arith.constant 0 : index
    %26 = vector.load %arg6[%c0_22, %c0_23] : memref<72x128xf32, #tpu.memory_space<vmem>>, vector<72x128xf32>
    tpu.vector_store %arg6[%c0_22, %c0_23], %25 {strides = array<i32>} : memref<72x128xf32, #tpu.memory_space<vmem>>, vector<72x128xf32>,
    %c0_24 = arith.constant 0 : index
    %c0_25 = arith.constant 0 : index
    %27 = vector.load %arg6[%c0_24, %c0_25] : memref<72x128xf32, #tpu.memory_space<vmem>>, vector<72x128xf32>
    %28 = vector.extract_strided_slice %3 {offsets = [6, 0], sizes = [72, 128], strides = [1, 1]} : vector<88x128xbf16> to vector<72x128xbf16>
    %c3 = arith.constant 3 : index
    %c0_26 = arith.constant 0 : index
    %c0_27 = arith.constant 0 : index
    %29 = vector.load %arg2[%c3, %c0_26, %c0_27] : memref<9x128x128xbf16, #tpu.memory_space<vmem>>, vector<1x128x128xbf16>
    %30 = vector.shape_cast %29 : vector<1x128x128xbf16> to vector<128x128xbf16>
    %cst_28 = arith.constant dense<0.000000e+00> : vector<72x128xf32>
    %31 = tpu.matmul %28, %30, %cst_28 {dimension_numbers = #tpu.dot_dimension_numbers<[1], [0], [0], [1], [0, 0, 1, 1], [], []>} : vector<72x128xbf16>, vector<128x128xbf16>, vector<72x128xf32> -> vector<72x128xf32>
    %32 = arith.addf %27, %31 : vector<72x128xf32>
    %c0_29 = arith.constant 0 : index
    %c0_30 = arith.constant 0 : index
    %33 = vector.load %arg6[%c0_29, %c0_30] : memref<72x128xf32, #tpu.memory_space<vmem>>, vector<72x128xf32>
    tpu.vector_store %arg6[%c0_29, %c0_30], %32 {strides = array<i32>} : memref<72x128xf32, #tpu.memory_space<vmem>>, vector<72x128xf32>,
    %c0_31 = arith.constant 0 : index
    %c0_32 = arith.constant 0 : index
    %34 = vector.load %arg6[%c0_31, %c0_32] : memref<72x128xf32, #tpu.memory_space<vmem>>, vector<72x128xf32>
    %35 = vector.extract_strided_slice %3 {offsets = [7, 0], sizes = [72, 128], strides = [1, 1]} : vector<88x128xbf16> to vector<72x128xbf16>
    %c4 = arith.constant 4 : index
    %c0_33 = arith.constant 0 : index
    %c0_34 = arith.constant 0 : index
    %36 = vector.load %arg2[%c4, %c0_33, %c0_34] : memref<9x128x128xbf16, #tpu.memory_space<vmem>>, vector<1x128x128xbf16>
    %37 = vector.shape_cast %36 : vector<1x128x128xbf16> to vector<128x128xbf16>
    %cst_35 = arith.constant dense<0.000000e+00> : vector<72x128xf32>
    %38 = tpu.matmul %35, %37, %cst_35 {dimension_numbers = #tpu.dot_dimension_numbers<[1], [0], [0], [1], [0, 0, 1, 1], [], []>} : vector<72x128xbf16>, vector<128x128xbf16>, vector<72x128xf32> -> vector<72x128xf32>
    %39 = arith.addf %34, %38 : vector<72x128xf32>
    %c0_36 = arith.constant 0 : index
    %c0_37 = arith.constant 0 : index
    %40 = vector.load %arg6[%c0_36, %c0_37] : memref<72x128xf32, #tpu.memory_space<vmem>>, vector<72x128xf32>
    tpu.vector_store %arg6[%c0_36, %c0_37], %39 {strides = array<i32>} : memref<72x128xf32, #tpu.memory_space<vmem>>, vector<72x128xf32>,
    %c0_38 = arith.constant 0 : index
    %c0_39 = arith.constant 0 : index
    %41 = vector.load %arg6[%c0_38, %c0_39] : memref<72x128xf32, #tpu.memory_space<vmem>>, vector<72x128xf32>
    %42 = vector.extract_strided_slice %3 {offsets = [8, 0], sizes = [72, 128], strides = [1, 1]} : vector<88x128xbf16> to vector<72x128xbf16>
    %c5 = arith.constant 5 : index
    %c0_40 = arith.constant 0 : index
    %c0_41 = arith.constant 0 : index
    %43 = vector.load %arg2[%c5, %c0_40, %c0_41] : memref<9x128x128xbf16, #tpu.memory_space<vmem>>, vector<1x128x128xbf16>
    %44 = vector.shape_cast %43 : vector<1x128x128xbf16> to vector<128x128xbf16>
    %cst_42 = arith.constant dense<0.000000e+00> : vector<72x128xf32>
    %45 = tpu.matmul %42, %44, %cst_42 {dimension_numbers = #tpu.dot_dimension_numbers<[1], [0], [0], [1], [0, 0, 1, 1], [], []>} : vector<72x128xbf16>, vector<128x128xbf16>, vector<72x128xf32> -> vector<72x128xf32>
    %46 = arith.addf %41, %45 : vector<72x128xf32>
    %c0_43 = arith.constant 0 : index
    %c0_44 = arith.constant 0 : index
    %47 = vector.load %arg6[%c0_43, %c0_44] : memref<72x128xf32, #tpu.memory_space<vmem>>, vector<72x128xf32>
    tpu.vector_store %arg6[%c0_43, %c0_44], %46 {strides = array<i32>} : memref<72x128xf32, #tpu.memory_space<vmem>>, vector<72x128xf32>,
    %c0_45 = arith.constant 0 : index
    %c0_46 = arith.constant 0 : index
    %48 = vector.load %arg6[%c0_45, %c0_46] : memref<72x128xf32, #tpu.memory_space<vmem>>, vector<72x128xf32>
    %49 = vector.extract_strided_slice %3 {offsets = [12, 0], sizes = [72, 128], strides = [1, 1]} : vector<88x128xbf16> to vector<72x128xbf16>
    %c6 = arith.constant 6 : index
    %c0_47 = arith.constant 0 : index
    %c0_48 = arith.constant 0 : index
    %50 = vector.load %arg2[%c6, %c0_47, %c0_48] : memref<9x128x128xbf16, #tpu.memory_space<vmem>>, vector<1x128x128xbf16>
    %51 = vector.shape_cast %50 : vector<1x128x128xbf16> to vector<128x128xbf16>
    %cst_49 = arith.constant dense<0.000000e+00> : vector<72x128xf32>
    %52 = tpu.matmul %49, %51, %cst_49 {dimension_numbers = #tpu.dot_dimension_numbers<[1], [0], [0], [1], [0, 0, 1, 1], [], []>} : vector<72x128xbf16>, vector<128x128xbf16>, vector<72x128xf32> -> vector<72x128xf32>
    %53 = arith.addf %48, %52 : vector<72x128xf32>
    %c0_50 = arith.constant 0 : index
    %c0_51 = arith.constant 0 : index
    %54 = vector.load %arg6[%c0_50, %c0_51] : memref<72x128xf32, #tpu.memory_space<vmem>>, vector<72x128xf32>
    tpu.vector_store %arg6[%c0_50, %c0_51], %53 {strides = array<i32>} : memref<72x128xf32, #tpu.memory_space<vmem>>, vector<72x128xf32>,
    %c0_52 = arith.constant 0 : index
    %c0_53 = arith.constant 0 : index
    %55 = vector.load %arg6[%c0_52, %c0_53] : memref<72x128xf32, #tpu.memory_space<vmem>>, vector<72x128xf32>
    %56 = vector.extract_strided_slice %3 {offsets = [13, 0], sizes = [72, 128], strides = [1, 1]} : vector<88x128xbf16> to vector<72x128xbf16>
    %c7 = arith.constant 7 : index
    %c0_54 = arith.constant 0 : index
    %c0_55 = arith.constant 0 : index
    %57 = vector.load %arg2[%c7, %c0_54, %c0_55] : memref<9x128x128xbf16, #tpu.memory_space<vmem>>, vector<1x128x128xbf16>
    %58 = vector.shape_cast %57 : vector<1x128x128xbf16> to vector<128x128xbf16>
    %cst_56 = arith.constant dense<0.000000e+00> : vector<72x128xf32>
    %59 = tpu.matmul %56, %58, %cst_56 {dimension_numbers = #tpu.dot_dimension_numbers<[1], [0], [0], [1], [0, 0, 1, 1], [], []>} : vector<72x128xbf16>, vector<128x128xbf16>, vector<72x128xf32> -> vector<72x128xf32>
    %60 = arith.addf %55, %59 : vector<72x128xf32>
    %c0_57 = arith.constant 0 : index
    %c0_58 = arith.constant 0 : index
    %61 = vector.load %arg6[%c0_57, %c0_58] : memref<72x128xf32, #tpu.memory_space<vmem>>, vector<72x128xf32>
    tpu.vector_store %arg6[%c0_57, %c0_58], %60 {strides = array<i32>} : memref<72x128xf32, #tpu.memory_space<vmem>>, vector<72x128xf32>,
    %c0_59 = arith.constant 0 : index
    %c0_60 = arith.constant 0 : index
    %62 = vector.load %arg6[%c0_59, %c0_60] : memref<72x128xf32, #tpu.memory_space<vmem>>, vector<72x128xf32>
    %63 = vector.extract_strided_slice %3 {offsets = [14, 0], sizes = [72, 128], strides = [1, 1]} : vector<88x128xbf16> to vector<72x128xbf16>
    %c8 = arith.constant 8 : index
    %c0_61 = arith.constant 0 : index
    %c0_62 = arith.constant 0 : index
    %64 = vector.load %arg2[%c8, %c0_61, %c0_62] : memref<9x128x128xbf16, #tpu.memory_space<vmem>>, vector<1x128x128xbf16>
    %65 = vector.shape_cast %64 : vector<1x128x128xbf16> to vector<128x128xbf16>
    %cst_63 = arith.constant dense<0.000000e+00> : vector<72x128xf32>
    %66 = tpu.matmul %63, %65, %cst_63 {dimension_numbers = #tpu.dot_dimension_numbers<[1], [0], [0], [1], [0, 0, 1, 1], [], []>} : vector<72x128xbf16>, vector<128x128xbf16>, vector<72x128xf32> -> vector<72x128xf32>
    %67 = arith.addf %62, %66 : vector<72x128xf32>
    %c0_64 = arith.constant 0 : index
    %c0_65 = arith.constant 0 : index
    %68 = vector.load %arg6[%c0_64, %c0_65] : memref<72x128xf32, #tpu.memory_space<vmem>>, vector<72x128xf32>
    tpu.vector_store %arg6[%c0_64, %c0_65], %67 {strides = array<i32>} : memref<72x128xf32, #tpu.memory_space<vmem>>, vector<72x128xf32>,
    %c0_66 = arith.constant 0 : index
    %c0_67 = arith.constant 0 : index
    %69 = vector.load %arg6[%c0_66, %c0_67] : memref<72x128xf32, #tpu.memory_space<vmem>>, vector<72x128xf32>
    %c0_68 = arith.constant 0 : index
    %c0_69 = arith.constant 0 : index
    %70 = vector.load %arg3[%c0_68, %c0_69] : memref<1x128xf32, #tpu.memory_space<vmem>>, vector<1x128xf32>
    %71 = vector.broadcast %70 : vector<1x128xf32> to vector<72x128xf32>
    %72 = arith.mulf %69, %71 : vector<72x128xf32>
    %c0_70 = arith.constant 0 : index
    %c0_71 = arith.constant 0 : index
    %73 = vector.load %arg4[%c0_70, %c0_71] : memref<1x128xf32, #tpu.memory_space<vmem>>, vector<1x128xf32>
    %74 = vector.broadcast %73 : vector<1x128xf32> to vector<72x128xf32>
    %75 = arith.addf %72, %74 : vector<72x128xf32>
    %cst_72 = arith.constant 0.000000e+00 : f32
    %76 = vector.broadcast %cst_72 : f32 to vector<72x128xf32>
    %77 = arith.maximumf %75, %76 : vector<72x128xf32>
    %78 = arith.truncf %77 : vector<72x128xf32> to vector<72x128xbf16>
    %c0_73 = arith.constant 0 : index
    %c0_74 = arith.constant 0 : index
    %79 = vector.load %arg5[%c0_73, %c0_74] : memref<72x128xbf16, #tpu.memory_space<vmem>>, vector<72x128xbf16>
    tpu.vector_store %arg5[%c0_73, %c0_74], %78 {strides = array<i32>} : memref<72x128xbf16, #tpu.memory_space<vmem>>, vector<72x128xbf16>,
    return
  }
  func.func @transform_0(%arg0: i32) -> (i32, i32) {
    %c0_i32 = arith.constant 0 : i32
    %c0_i32_0 = arith.constant 0 : i32
    %c0_i32_1 = arith.constant 0 : i32
    return %c0_i32, %c0_i32_0 : i32, i32
  }
  func.func @transform_1(%arg0: i32) -> (i32, i32, i32) {
    %c0_i32 = arith.constant 0 : i32
    %c0_i32_0 = arith.constant 0 : i32
    %c0_i32_1 = arith.constant 0 : i32
    %c0_i32_2 = arith.constant 0 : i32
    return %c0_i32, %c0_i32_0, %c0_i32_1 : i32, i32, i32
  }
  func.func @transform_2(%arg0: i32) -> (i32, i32) {
    %c0_i32 = arith.constant 0 : i32
    %c0_i32_0 = arith.constant 0 : i32
    %c0_i32_1 = arith.constant 0 : i32
    return %c0_i32, %c0_i32_0 : i32, i32
  }
  func.func @transform_3(%arg0: i32) -> (i32, i32) {
    %c0_i32 = arith.constant 0 : i32
    %c0_i32_0 = arith.constant 0 : i32
    %c0_i32_1 = arith.constant 0 : i32
    return %c0_i32, %c0_i32_0 : i32, i32
  }
  func.func @transform_4(%arg0: i32) -> (i32, i32) {
    %c0_i32 = arith.constant 0 : i32
    %c0_i32_0 = arith.constant 0 : i32
    return %arg0, %c0_i32 : i32, i32
  }
}

module attributes {stable_mosaic.version = 11 : i64} {
  func.func @kernel(%arg0: i32, %arg1: i32, %arg2: memref<8x128xbf16, #tpu.memory_space<vmem>>, %arg3: memref<128x384xbf16, #tpu.memory_space<vmem>>, %arg4: memref<8x256xbf16, #tpu.memory_space<vmem>>, %arg5: memref<8x384xbf16, #tpu.memory_space<vmem>>, %arg6: memref<8x384xf32, #tpu.memory_space<vmem>>) attributes {dimension_semantics = [#tpu.dimension_semantics<parallel>, #tpu.dimension_semantics<arbitrary>], iteration_bounds = array<i64: 1, 1>, scalar_prefetch = 0 : i64, scratch_operands = 1 : i64, tpu.core_type = #tpu.core_type<tc>, window_params = [{transform_indices = @transform_0, window_bounds = array<i64: 8, 128>}, {transform_indices = @transform_1, window_bounds = array<i64: 128, 384>}, {transform_indices = @transform_2, window_bounds = array<i64: 8, 256>}, {transform_indices = @transform_3, window_bounds = array<i64: 8, 384>}]} {
    %c0_i32 = arith.constant 0 : i32
    %0 = arith.cmpi eq, %arg1, %c0_i32 : i32
    %1 = arith.extui %0 : i1 to i32
    %c0_i32_0 = arith.constant 0 : i32
    %2 = arith.cmpi ne, %1, %c0_i32_0 : i32
    scf.if %2 {
      %cst_10 = arith.constant 0.000000e+00 : f32
      %12 = vector.broadcast %cst_10 : f32 to vector<8x384xf32>
      %c0_11 = arith.constant 0 : index
      %c0_12 = arith.constant 0 : index
      %13 = vector.load %arg6[%c0_11, %c0_12] : memref<8x384xf32, #tpu.memory_space<vmem>>, vector<8x384xf32>
      tpu.vector_store %arg6[%c0_11, %c0_12], %12 {strides = array<i32>} : memref<8x384xf32, #tpu.memory_space<vmem>>, vector<8x384xf32>,
    } else {
    }
    %c0 = arith.constant 0 : index
    %c0_1 = arith.constant 0 : index
    %3 = vector.load %arg2[%c0, %c0_1] : memref<8x128xbf16, #tpu.memory_space<vmem>>, vector<8x128xbf16>
    %c0_2 = arith.constant 0 : index
    %c0_3 = arith.constant 0 : index
    %4 = vector.load %arg6[%c0_2, %c0_3] : memref<8x384xf32, #tpu.memory_space<vmem>>, vector<8x384xf32>
    %c0_4 = arith.constant 0 : index
    %c0_5 = arith.constant 0 : index
    %5 = vector.load %arg3[%c0_4, %c0_5] : memref<128x384xbf16, #tpu.memory_space<vmem>>, vector<128x384xbf16>
    %cst = arith.constant dense<0.000000e+00> : vector<8x384xf32>
    %6 = tpu.matmul %3, %5, %cst {dimension_numbers = #tpu.dot_dimension_numbers<[1], [0], [0], [1], [0, 0, 1, 1], [], []>} : vector<8x128xbf16>, vector<128x384xbf16>, vector<8x384xf32> -> vector<8x384xf32>
    %7 = arith.addf %4, %6 : vector<8x384xf32>
    %c0_6 = arith.constant 0 : index
    %c0_7 = arith.constant 0 : index
    %8 = vector.load %arg6[%c0_6, %c0_7] : memref<8x384xf32, #tpu.memory_space<vmem>>, vector<8x384xf32>
    tpu.vector_store %arg6[%c0_6, %c0_7], %7 {strides = array<i32>} : memref<8x384xf32, #tpu.memory_space<vmem>>, vector<8x384xf32>,
    %c0_i32_8 = arith.constant 0 : i32
    %9 = arith.cmpi eq, %arg1, %c0_i32_8 : i32
    %10 = arith.extui %9 : i1 to i32
    %c0_i32_9 = arith.constant 0 : i32
    %11 = arith.cmpi ne, %10, %c0_i32_9 : i32
    scf.if %11 {
      %c0_10 = arith.constant 0 : index
      %c0_11 = arith.constant 0 : index
      %12 = vector.load %arg6[%c0_10, %c0_11] : memref<8x384xf32, #tpu.memory_space<vmem>>, vector<8x384xf32>
      %c0_12 = arith.constant 0 : index
      %c0_13 = arith.constant 0 : index
      %13 = vector.load %arg4[%c0_12, %c0_13] : memref<8x256xbf16, #tpu.memory_space<vmem>>, vector<8x256xbf16>
      %14 = arith.extf %13 : vector<8x256xbf16> to vector<8x256xf32>
      %15 = vector.extract_strided_slice %12 {offsets = [0, 0], sizes = [8, 256], strides = [1, 1]} : vector<8x384xf32> to vector<8x256xf32>
      %16 = arith.addf %15, %14 : vector<8x256xf32>
      %17 = vector.extract_strided_slice %12 {offsets = [0, 256], sizes = [8, 128], strides = [1, 1]} : vector<8x384xf32> to vector<8x128xf32>
      %18 = tpu.concatenate %16, %17 in 1 : vector<8x256xf32>, vector<8x128xf32> -> vector<8x384xf32>
      %19 = arith.truncf %18 : vector<8x384xf32> to vector<8x384xbf16>
      %c0_14 = arith.constant 0 : index
      %c0_15 = arith.constant 0 : index
      %20 = vector.load %arg5[%c0_14, %c0_15] : memref<8x384xbf16, #tpu.memory_space<vmem>>, vector<8x384xbf16>
      tpu.vector_store %arg5[%c0_14, %c0_15], %19 {strides = array<i32>} : memref<8x384xbf16, #tpu.memory_space<vmem>>, vector<8x384xbf16>,
    } else {
    }
    return
  }
  func.func @transform_0(%arg0: i32, %arg1: i32) -> (i32, i32) {
    %c0_i32 = arith.constant 0 : i32
    return %arg0, %arg1 : i32, i32
  }
  func.func @transform_1(%arg0: i32, %arg1: i32) -> (i32, i32) {
    %c0_i32 = arith.constant 0 : i32
    %c0_i32_0 = arith.constant 0 : i32
    return %arg1, %c0_i32 : i32, i32
  }
  func.func @transform_2(%arg0: i32, %arg1: i32) -> (i32, i32) {
    %c0_i32 = arith.constant 0 : i32
    %c0_i32_0 = arith.constant 0 : i32
    return %arg0, %c0_i32 : i32, i32
  }
  func.func @transform_3(%arg0: i32, %arg1: i32) -> (i32, i32) {
    %c0_i32 = arith.constant 0 : i32
    %c0_i32_0 = arith.constant 0 : i32
    return %arg0, %c0_i32 : i32, i32
  }
}

module attributes {stable_mosaic.version = 11 : i64} {
  func.func @kernel(%arg0: i32, %arg1: i32, %arg2: memref<8x128xbf16, #tpu.memory_space<vmem>>, %arg3: memref<1x128xf32, #tpu.memory_space<vmem>>, %arg4: memref<1x128xf32, #tpu.memory_space<vmem>>, %arg5: memref<128x640xbf16, #tpu.memory_space<vmem>>, %arg6: memref<8x640xbf16, #tpu.memory_space<vmem>>, %arg7: memref<8x640xf32, #tpu.memory_space<vmem>>) attributes {dimension_semantics = [#tpu.dimension_semantics<parallel>, #tpu.dimension_semantics<arbitrary>], iteration_bounds = array<i64: 1, 3>, scalar_prefetch = 0 : i64, scratch_operands = 1 : i64, tpu.core_type = #tpu.core_type<tc>, window_params = [{transform_indices = @transform_0, window_bounds = array<i64: 8, 128>}, {transform_indices = @transform_1, window_bounds = array<i64: 1, 128>}, {transform_indices = @transform_2, window_bounds = array<i64: 1, 128>}, {transform_indices = @transform_3, window_bounds = array<i64: 128, 640>}, {transform_indices = @transform_4, window_bounds = array<i64: 8, 640>}]} {
    %c0_i32 = arith.constant 0 : i32
    %0 = arith.cmpi eq, %arg1, %c0_i32 : i32
    %1 = arith.extui %0 : i1 to i32
    %c0_i32_0 = arith.constant 0 : i32
    %2 = arith.cmpi ne, %1, %c0_i32_0 : i32
    scf.if %2 {
      %cst_14 = arith.constant 0.000000e+00 : f32
      %22 = vector.broadcast %cst_14 : f32 to vector<8x640xf32>
      %c0_15 = arith.constant 0 : index
      %c0_16 = arith.constant 0 : index
      %23 = vector.load %arg7[%c0_15, %c0_16] : memref<8x640xf32, #tpu.memory_space<vmem>>, vector<8x640xf32>
      tpu.vector_store %arg7[%c0_15, %c0_16], %22 {strides = array<i32>} : memref<8x640xf32, #tpu.memory_space<vmem>>, vector<8x640xf32>,
    } else {
    }
    %c0 = arith.constant 0 : index
    %c0_1 = arith.constant 0 : index
    %3 = vector.load %arg2[%c0, %c0_1] : memref<8x128xbf16, #tpu.memory_space<vmem>>, vector<8x128xbf16>
    %4 = arith.extf %3 : vector<8x128xbf16> to vector<8x128xf32>
    %c0_2 = arith.constant 0 : index
    %c0_3 = arith.constant 0 : index
    %5 = vector.load %arg3[%c0_2, %c0_3] : memref<1x128xf32, #tpu.memory_space<vmem>>, vector<1x128xf32>
    %6 = vector.broadcast %5 : vector<1x128xf32> to vector<8x128xf32>
    %7 = arith.mulf %4, %6 : vector<8x128xf32>
    %c0_4 = arith.constant 0 : index
    %c0_5 = arith.constant 0 : index
    %8 = vector.load %arg4[%c0_4, %c0_5] : memref<1x128xf32, #tpu.memory_space<vmem>>, vector<1x128xf32>
    %9 = vector.broadcast %8 : vector<1x128xf32> to vector<8x128xf32>
    %10 = arith.addf %7, %9 : vector<8x128xf32>
    %cst = arith.constant 0.000000e+00 : f32
    %11 = vector.broadcast %cst : f32 to vector<8x128xf32>
    %12 = arith.maximumf %10, %11 : vector<8x128xf32>
    %13 = arith.truncf %12 : vector<8x128xf32> to vector<8x128xbf16>
    %c0_6 = arith.constant 0 : index
    %c0_7 = arith.constant 0 : index
    %14 = vector.load %arg7[%c0_6, %c0_7] : memref<8x640xf32, #tpu.memory_space<vmem>>, vector<8x640xf32>
    %c0_8 = arith.constant 0 : index
    %c0_9 = arith.constant 0 : index
    %15 = vector.load %arg5[%c0_8, %c0_9] : memref<128x640xbf16, #tpu.memory_space<vmem>>, vector<128x640xbf16>
    %cst_10 = arith.constant dense<0.000000e+00> : vector<8x640xf32>
    %16 = tpu.matmul %13, %15, %cst_10 {dimension_numbers = #tpu.dot_dimension_numbers<[1], [0], [0], [1], [0, 0, 1, 1], [], []>} : vector<8x128xbf16>, vector<128x640xbf16>, vector<8x640xf32> -> vector<8x640xf32>
    %17 = arith.addf %14, %16 : vector<8x640xf32>
    %c0_11 = arith.constant 0 : index
    %c0_12 = arith.constant 0 : index
    %18 = vector.load %arg7[%c0_11, %c0_12] : memref<8x640xf32, #tpu.memory_space<vmem>>, vector<8x640xf32>
    tpu.vector_store %arg7[%c0_11, %c0_12], %17 {strides = array<i32>} : memref<8x640xf32, #tpu.memory_space<vmem>>, vector<8x640xf32>,
    %c2_i32 = arith.constant 2 : i32
    %19 = arith.cmpi eq, %arg1, %c2_i32 : i32
    %20 = arith.extui %19 : i1 to i32
    %c0_i32_13 = arith.constant 0 : i32
    %21 = arith.cmpi ne, %20, %c0_i32_13 : i32
    scf.if %21 {
      %c0_14 = arith.constant 0 : index
      %c0_15 = arith.constant 0 : index
      %22 = vector.load %arg7[%c0_14, %c0_15] : memref<8x640xf32, #tpu.memory_space<vmem>>, vector<8x640xf32>
      %23 = arith.truncf %22 : vector<8x640xf32> to vector<8x640xbf16>
      %c0_16 = arith.constant 0 : index
      %c0_17 = arith.constant 0 : index
      %24 = vector.load %arg6[%c0_16, %c0_17] : memref<8x640xbf16, #tpu.memory_space<vmem>>, vector<8x640xbf16>
      tpu.vector_store %arg6[%c0_16, %c0_17], %23 {strides = array<i32>} : memref<8x640xbf16, #tpu.memory_space<vmem>>, vector<8x640xbf16>,
    } else {
    }
    return
  }
  func.func @transform_0(%arg0: i32, %arg1: i32) -> (i32, i32) {
    %c0_i32 = arith.constant 0 : i32
    return %arg0, %arg1 : i32, i32
  }
  func.func @transform_1(%arg0: i32, %arg1: i32) -> (i32, i32) {
    %c0_i32 = arith.constant 0 : i32
    %c0_i32_0 = arith.constant 0 : i32
    return %c0_i32, %arg1 : i32, i32
  }
  func.func @transform_2(%arg0: i32, %arg1: i32) -> (i32, i32) {
    %c0_i32 = arith.constant 0 : i32
    %c0_i32_0 = arith.constant 0 : i32
    return %c0_i32, %arg1 : i32, i32
  }
  func.func @transform_3(%arg0: i32, %arg1: i32) -> (i32, i32) {
    %c0_i32 = arith.constant 0 : i32
    %c0_i32_0 = arith.constant 0 : i32
    return %arg1, %c0_i32 : i32, i32
  }
  func.func @transform_4(%arg0: i32, %arg1: i32) -> (i32, i32) {
    %c0_i32 = arith.constant 0 : i32
    %c0_i32_0 = arith.constant 0 : i32
    return %arg0, %c0_i32 : i32, i32
  }
}

module attributes {stable_mosaic.version = 11 : i64} {
  func.func @kernel(%arg0: i32, %arg1: i32, %arg2: memref<8x128xbf16, #tpu.memory_space<vmem>>, %arg3: memref<1x128xf32, #tpu.memory_space<vmem>>, %arg4: memref<1x128xf32, #tpu.memory_space<vmem>>, %arg5: memref<128x128xbf16, #tpu.memory_space<vmem>>, %arg6: memref<1x128xf32, #tpu.memory_space<vmem>>, %arg7: memref<1x128xf32, #tpu.memory_space<vmem>>, %arg8: memref<8x128xbf16, #tpu.memory_space<vmem>>, %arg9: memref<8x128xf32, #tpu.memory_space<vmem>>) attributes {dimension_semantics = [#tpu.dimension_semantics<parallel>, #tpu.dimension_semantics<arbitrary>], iteration_bounds = array<i64: 1, 3>, scalar_prefetch = 0 : i64, scratch_operands = 1 : i64, tpu.core_type = #tpu.core_type<tc>, window_params = [{transform_indices = @transform_0, window_bounds = array<i64: 8, 128>}, {transform_indices = @transform_1, window_bounds = array<i64: 1, 128>}, {transform_indices = @transform_2, window_bounds = array<i64: 1, 128>}, {transform_indices = @transform_3, window_bounds = array<i64: 128, 128>}, {pipeline_mode = #tpu.pipeline_mode<synchronous>, transform_indices = @transform_4, window_bounds = array<i64: 1, 128>}, {pipeline_mode = #tpu.pipeline_mode<synchronous>, transform_indices = @transform_5, window_bounds = array<i64: 1, 128>}, {transform_indices = @transform_6, window_bounds = array<i64: 8, 128>}]} {
    %c0_i32 = arith.constant 0 : i32
    %0 = arith.cmpi eq, %arg1, %c0_i32 : i32
    %1 = arith.extui %0 : i1 to i32
    %c0_i32_0 = arith.constant 0 : i32
    %2 = arith.cmpi ne, %1, %c0_i32_0 : i32
    scf.if %2 {
      %cst_14 = arith.constant 0.000000e+00 : f32
      %22 = vector.broadcast %cst_14 : f32 to vector<8x128xf32>
      %c0_15 = arith.constant 0 : index
      %c0_16 = arith.constant 0 : index
      %23 = vector.load %arg9[%c0_15, %c0_16] : memref<8x128xf32, #tpu.memory_space<vmem>>, vector<8x128xf32>
      tpu.vector_store %arg9[%c0_15, %c0_16], %22 {strides = array<i32>} : memref<8x128xf32, #tpu.memory_space<vmem>>, vector<8x128xf32>,
    } else {
    }
    %c0 = arith.constant 0 : index
    %c0_1 = arith.constant 0 : index
    %3 = vector.load %arg2[%c0, %c0_1] : memref<8x128xbf16, #tpu.memory_space<vmem>>, vector<8x128xbf16>
    %4 = arith.extf %3 : vector<8x128xbf16> to vector<8x128xf32>
    %c0_2 = arith.constant 0 : index
    %c0_3 = arith.constant 0 : index
    %5 = vector.load %arg3[%c0_2, %c0_3] : memref<1x128xf32, #tpu.memory_space<vmem>>, vector<1x128xf32>
    %6 = vector.broadcast %5 : vector<1x128xf32> to vector<8x128xf32>
    %7 = arith.mulf %4, %6 : vector<8x128xf32>
    %c0_4 = arith.constant 0 : index
    %c0_5 = arith.constant 0 : index
    %8 = vector.load %arg4[%c0_4, %c0_5] : memref<1x128xf32, #tpu.memory_space<vmem>>, vector<1x128xf32>
    %9 = vector.broadcast %8 : vector<1x128xf32> to vector<8x128xf32>
    %10 = arith.addf %7, %9 : vector<8x128xf32>
    %cst = arith.constant 0.000000e+00 : f32
    %11 = vector.broadcast %cst : f32 to vector<8x128xf32>
    %12 = arith.maximumf %10, %11 : vector<8x128xf32>
    %13 = arith.truncf %12 : vector<8x128xf32> to vector<8x128xbf16>
    %c0_6 = arith.constant 0 : index
    %c0_7 = arith.constant 0 : index
    %14 = vector.load %arg9[%c0_6, %c0_7] : memref<8x128xf32, #tpu.memory_space<vmem>>, vector<8x128xf32>
    %c0_8 = arith.constant 0 : index
    %c0_9 = arith.constant 0 : index
    %15 = vector.load %arg5[%c0_8, %c0_9] : memref<128x128xbf16, #tpu.memory_space<vmem>>, vector<128x128xbf16>
    %cst_10 = arith.constant dense<0.000000e+00> : vector<8x128xf32>
    %16 = tpu.matmul %13, %15, %cst_10 {dimension_numbers = #tpu.dot_dimension_numbers<[1], [0], [0], [1], [0, 0, 1, 1], [], []>} : vector<8x128xbf16>, vector<128x128xbf16>, vector<8x128xf32> -> vector<8x128xf32>
    %17 = arith.addf %14, %16 : vector<8x128xf32>
    %c0_11 = arith.constant 0 : index
    %c0_12 = arith.constant 0 : index
    %18 = vector.load %arg9[%c0_11, %c0_12] : memref<8x128xf32, #tpu.memory_space<vmem>>, vector<8x128xf32>
    tpu.vector_store %arg9[%c0_11, %c0_12], %17 {strides = array<i32>} : memref<8x128xf32, #tpu.memory_space<vmem>>, vector<8x128xf32>,
    %c2_i32 = arith.constant 2 : i32
    %19 = arith.cmpi eq, %arg1, %c2_i32 : i32
    %20 = arith.extui %19 : i1 to i32
    %c0_i32_13 = arith.constant 0 : i32
    %21 = arith.cmpi ne, %20, %c0_i32_13 : i32
    scf.if %21 {
      %c0_14 = arith.constant 0 : index
      %c0_15 = arith.constant 0 : index
      %22 = vector.load %arg9[%c0_14, %c0_15] : memref<8x128xf32, #tpu.memory_space<vmem>>, vector<8x128xf32>
      %c0_16 = arith.constant 0 : index
      %c0_17 = arith.constant 0 : index
      %23 = vector.load %arg6[%c0_16, %c0_17] : memref<1x128xf32, #tpu.memory_space<vmem>>, vector<1x128xf32>
      %24 = vector.broadcast %23 : vector<1x128xf32> to vector<8x128xf32>
      %25 = arith.mulf %22, %24 : vector<8x128xf32>
      %c0_18 = arith.constant 0 : index
      %c0_19 = arith.constant 0 : index
      %26 = vector.load %arg7[%c0_18, %c0_19] : memref<1x128xf32, #tpu.memory_space<vmem>>, vector<1x128xf32>
      %27 = vector.broadcast %26 : vector<1x128xf32> to vector<8x128xf32>
      %28 = arith.addf %25, %27 : vector<8x128xf32>
      %cst_20 = arith.constant 0.000000e+00 : f32
      %29 = vector.broadcast %cst_20 : f32 to vector<8x128xf32>
      %30 = arith.maximumf %28, %29 : vector<8x128xf32>
      %31 = arith.truncf %30 : vector<8x128xf32> to vector<8x128xbf16>
      %c0_21 = arith.constant 0 : index
      %c0_22 = arith.constant 0 : index
      %32 = vector.load %arg8[%c0_21, %c0_22] : memref<8x128xbf16, #tpu.memory_space<vmem>>, vector<8x128xbf16>
      tpu.vector_store %arg8[%c0_21, %c0_22], %31 {strides = array<i32>} : memref<8x128xbf16, #tpu.memory_space<vmem>>, vector<8x128xbf16>,
    } else {
    }
    return
  }
  func.func @transform_0(%arg0: i32, %arg1: i32) -> (i32, i32) {
    %c0_i32 = arith.constant 0 : i32
    return %arg0, %arg1 : i32, i32
  }
  func.func @transform_1(%arg0: i32, %arg1: i32) -> (i32, i32) {
    %c0_i32 = arith.constant 0 : i32
    %c0_i32_0 = arith.constant 0 : i32
    return %c0_i32, %arg1 : i32, i32
  }
  func.func @transform_2(%arg0: i32, %arg1: i32) -> (i32, i32) {
    %c0_i32 = arith.constant 0 : i32
    %c0_i32_0 = arith.constant 0 : i32
    return %c0_i32, %arg1 : i32, i32
  }
  func.func @transform_3(%arg0: i32, %arg1: i32) -> (i32, i32) {
    %c0_i32 = arith.constant 0 : i32
    %c0_i32_0 = arith.constant 0 : i32
    return %arg1, %c0_i32 : i32, i32
  }
  func.func @transform_4(%arg0: i32, %arg1: i32) -> (i32, i32) {
    %c0_i32 = arith.constant 0 : i32
    %c0_i32_0 = arith.constant 0 : i32
    %c0_i32_1 = arith.constant 0 : i32
    return %c0_i32, %c0_i32_0 : i32, i32
  }
  func.func @transform_5(%arg0: i32, %arg1: i32) -> (i32, i32) {
    %c0_i32 = arith.constant 0 : i32
    %c0_i32_0 = arith.constant 0 : i32
    %c0_i32_1 = arith.constant 0 : i32
    return %c0_i32, %c0_i32_0 : i32, i32
  }
  func.func @transform_6(%arg0: i32, %arg1: i32) -> (i32, i32) {
    %c0_i32 = arith.constant 0 : i32
    %c0_i32_0 = arith.constant 0 : i32
    return %arg0, %c0_i32 : i32, i32
  }
}

module attributes {stable_mosaic.version = 11 : i64} {
  func.func @kernel(%arg0: i32, %arg1: memref<48x128xbf16, #tpu.memory_space<vmem>>, %arg2: memref<9x128x128xbf16, #tpu.memory_space<vmem>>, %arg3: memref<1x128xf32, #tpu.memory_space<vmem>>, %arg4: memref<1x128xf32, #tpu.memory_space<vmem>>, %arg5: memref<32x128xbf16, #tpu.memory_space<vmem>>, %arg6: memref<32x128xf32, #tpu.memory_space<vmem>>) attributes {dimension_semantics = [#tpu.dimension_semantics<parallel>], iteration_bounds = array<i64: 1>, scalar_prefetch = 0 : i64, scratch_operands = 1 : i64, tpu.core_type = #tpu.core_type<tc>, window_params = [{pipeline_mode = #tpu.pipeline_mode<synchronous>, transform_indices = @transform_0, window_bounds = array<i64: 48, 128>}, {pipeline_mode = #tpu.pipeline_mode<synchronous>, transform_indices = @transform_1, window_bounds = array<i64: 9, 128, 128>}, {pipeline_mode = #tpu.pipeline_mode<synchronous>, transform_indices = @transform_2, window_bounds = array<i64: 1, 128>}, {pipeline_mode = #tpu.pipeline_mode<synchronous>, transform_indices = @transform_3, window_bounds = array<i64: 1, 128>}, {transform_indices = @transform_4, window_bounds = array<i64: 32, 128>}]} {
    %c32_i32 = arith.constant 32 : i32
    %0 = arith.muli %arg0, %c32_i32 : i32
    %1 = tpu.assume_multiple %0, 8 : i32
    %2 = arith.index_cast %1 : i32 to index
    %c0 = arith.constant 0 : index
    %3 = vector.load %arg1[%2, %c0] : memref<48x128xbf16, #tpu.memory_space<vmem>>, vector<48x128xbf16>
    %cst = arith.constant 0.000000e+00 : f32
    %4 = vector.broadcast %cst : f32 to vector<32x128xf32>
    %c0_0 = arith.constant 0 : index
    %c0_1 = arith.constant 0 : index
    %5 = vector.load %arg6[%c0_0, %c0_1] : memref<32x128xf32, #tpu.memory_space<vmem>>, vector<32x128xf32>
    tpu.vector_store %arg6[%c0_0, %c0_1], %4 {strides = array<i32>} : memref<32x128xf32, #tpu.memory_space<vmem>>, vector<32x128xf32>,
    %c0_2 = arith.constant 0 : index
    %c0_3 = arith.constant 0 : index
    %6 = vector.load %arg6[%c0_2, %c0_3] : memref<32x128xf32, #tpu.memory_space<vmem>>, vector<32x128xf32>
    %7 = vector.extract_strided_slice %3 {offsets = [0, 0], sizes = [32, 128], strides = [1, 1]} : vector<48x128xbf16> to vector<32x128xbf16>
    %c0_4 = arith.constant 0 : index
    %c0_5 = arith.constant 0 : index
    %c0_6 = arith.constant 0 : index
    %8 = vector.load %arg2[%c0_4, %c0_5, %c0_6] : memref<9x128x128xbf16, #tpu.memory_space<vmem>>, vector<1x128x128xbf16>
    %9 = vector.shape_cast %8 : vector<1x128x128xbf16> to vector<128x128xbf16>
    %cst_7 = arith.constant dense<0.000000e+00> : vector<32x128xf32>
    %10 = tpu.matmul %7, %9, %cst_7 {dimension_numbers = #tpu.dot_dimension_numbers<[1], [0], [0], [1], [0, 0, 1, 1], [], []>} : vector<32x128xbf16>, vector<128x128xbf16>, vector<32x128xf32> -> vector<32x128xf32>
    %11 = arith.addf %6, %10 : vector<32x128xf32>
    %c0_8 = arith.constant 0 : index
    %c0_9 = arith.constant 0 : index
    %12 = vector.load %arg6[%c0_8, %c0_9] : memref<32x128xf32, #tpu.memory_space<vmem>>, vector<32x128xf32>
    tpu.vector_store %arg6[%c0_8, %c0_9], %11 {strides = array<i32>} : memref<32x128xf32, #tpu.memory_space<vmem>>, vector<32x128xf32>,
    %c0_10 = arith.constant 0 : index
    %c0_11 = arith.constant 0 : index
    %13 = vector.load %arg6[%c0_10, %c0_11] : memref<32x128xf32, #tpu.memory_space<vmem>>, vector<32x128xf32>
    %14 = vector.extract_strided_slice %3 {offsets = [1, 0], sizes = [32, 128], strides = [1, 1]} : vector<48x128xbf16> to vector<32x128xbf16>
    %c1 = arith.constant 1 : index
    %c0_12 = arith.constant 0 : index
    %c0_13 = arith.constant 0 : index
    %15 = vector.load %arg2[%c1, %c0_12, %c0_13] : memref<9x128x128xbf16, #tpu.memory_space<vmem>>, vector<1x128x128xbf16>
    %16 = vector.shape_cast %15 : vector<1x128x128xbf16> to vector<128x128xbf16>
    %cst_14 = arith.constant dense<0.000000e+00> : vector<32x128xf32>
    %17 = tpu.matmul %14, %16, %cst_14 {dimension_numbers = #tpu.dot_dimension_numbers<[1], [0], [0], [1], [0, 0, 1, 1], [], []>} : vector<32x128xbf16>, vector<128x128xbf16>, vector<32x128xf32> -> vector<32x128xf32>
    %18 = arith.addf %13, %17 : vector<32x128xf32>
    %c0_15 = arith.constant 0 : index
    %c0_16 = arith.constant 0 : index
    %19 = vector.load %arg6[%c0_15, %c0_16] : memref<32x128xf32, #tpu.memory_space<vmem>>, vector<32x128xf32>
    tpu.vector_store %arg6[%c0_15, %c0_16], %18 {strides = array<i32>} : memref<32x128xf32, #tpu.memory_space<vmem>>, vector<32x128xf32>,
    %c0_17 = arith.constant 0 : index
    %c0_18 = arith.constant 0 : index
    %20 = vector.load %arg6[%c0_17, %c0_18] : memref<32x128xf32, #tpu.memory_space<vmem>>, vector<32x128xf32>
    %21 = vector.extract_strided_slice %3 {offsets = [2, 0], sizes = [32, 128], strides = [1, 1]} : vector<48x128xbf16> to vector<32x128xbf16>
    %c2 = arith.constant 2 : index
    %c0_19 = arith.constant 0 : index
    %c0_20 = arith.constant 0 : index
    %22 = vector.load %arg2[%c2, %c0_19, %c0_20] : memref<9x128x128xbf16, #tpu.memory_space<vmem>>, vector<1x128x128xbf16>
    %23 = vector.shape_cast %22 : vector<1x128x128xbf16> to vector<128x128xbf16>
    %cst_21 = arith.constant dense<0.000000e+00> : vector<32x128xf32>
    %24 = tpu.matmul %21, %23, %cst_21 {dimension_numbers = #tpu.dot_dimension_numbers<[1], [0], [0], [1], [0, 0, 1, 1], [], []>} : vector<32x128xbf16>, vector<128x128xbf16>, vector<32x128xf32> -> vector<32x128xf32>
    %25 = arith.addf %20, %24 : vector<32x128xf32>
    %c0_22 = arith.constant 0 : index
    %c0_23 = arith.constant 0 : index
    %26 = vector.load %arg6[%c0_22, %c0_23] : memref<32x128xf32, #tpu.memory_space<vmem>>, vector<32x128xf32>
    tpu.vector_store %arg6[%c0_22, %c0_23], %25 {strides = array<i32>} : memref<32x128xf32, #tpu.memory_space<vmem>>, vector<32x128xf32>,
    %c0_24 = arith.constant 0 : index
    %c0_25 = arith.constant 0 : index
    %27 = vector.load %arg6[%c0_24, %c0_25] : memref<32x128xf32, #tpu.memory_space<vmem>>, vector<32x128xf32>
    %28 = vector.extract_strided_slice %3 {offsets = [4, 0], sizes = [32, 128], strides = [1, 1]} : vector<48x128xbf16> to vector<32x128xbf16>
    %c3 = arith.constant 3 : index
    %c0_26 = arith.constant 0 : index
    %c0_27 = arith.constant 0 : index
    %29 = vector.load %arg2[%c3, %c0_26, %c0_27] : memref<9x128x128xbf16, #tpu.memory_space<vmem>>, vector<1x128x128xbf16>
    %30 = vector.shape_cast %29 : vector<1x128x128xbf16> to vector<128x128xbf16>
    %cst_28 = arith.constant dense<0.000000e+00> : vector<32x128xf32>
    %31 = tpu.matmul %28, %30, %cst_28 {dimension_numbers = #tpu.dot_dimension_numbers<[1], [0], [0], [1], [0, 0, 1, 1], [], []>} : vector<32x128xbf16>, vector<128x128xbf16>, vector<32x128xf32> -> vector<32x128xf32>
    %32 = arith.addf %27, %31 : vector<32x128xf32>
    %c0_29 = arith.constant 0 : index
    %c0_30 = arith.constant 0 : index
    %33 = vector.load %arg6[%c0_29, %c0_30] : memref<32x128xf32, #tpu.memory_space<vmem>>, vector<32x128xf32>
    tpu.vector_store %arg6[%c0_29, %c0_30], %32 {strides = array<i32>} : memref<32x128xf32, #tpu.memory_space<vmem>>, vector<32x128xf32>,
    %c0_31 = arith.constant 0 : index
    %c0_32 = arith.constant 0 : index
    %34 = vector.load %arg6[%c0_31, %c0_32] : memref<32x128xf32, #tpu.memory_space<vmem>>, vector<32x128xf32>
    %35 = vector.extract_strided_slice %3 {offsets = [5, 0], sizes = [32, 128], strides = [1, 1]} : vector<48x128xbf16> to vector<32x128xbf16>
    %c4 = arith.constant 4 : index
    %c0_33 = arith.constant 0 : index
    %c0_34 = arith.constant 0 : index
    %36 = vector.load %arg2[%c4, %c0_33, %c0_34] : memref<9x128x128xbf16, #tpu.memory_space<vmem>>, vector<1x128x128xbf16>
    %37 = vector.shape_cast %36 : vector<1x128x128xbf16> to vector<128x128xbf16>
    %cst_35 = arith.constant dense<0.000000e+00> : vector<32x128xf32>
    %38 = tpu.matmul %35, %37, %cst_35 {dimension_numbers = #tpu.dot_dimension_numbers<[1], [0], [0], [1], [0, 0, 1, 1], [], []>} : vector<32x128xbf16>, vector<128x128xbf16>, vector<32x128xf32> -> vector<32x128xf32>
    %39 = arith.addf %34, %38 : vector<32x128xf32>
    %c0_36 = arith.constant 0 : index
    %c0_37 = arith.constant 0 : index
    %40 = vector.load %arg6[%c0_36, %c0_37] : memref<32x128xf32, #tpu.memory_space<vmem>>, vector<32x128xf32>
    tpu.vector_store %arg6[%c0_36, %c0_37], %39 {strides = array<i32>} : memref<32x128xf32, #tpu.memory_space<vmem>>, vector<32x128xf32>,
    %c0_38 = arith.constant 0 : index
    %c0_39 = arith.constant 0 : index
    %41 = vector.load %arg6[%c0_38, %c0_39] : memref<32x128xf32, #tpu.memory_space<vmem>>, vector<32x128xf32>
    %42 = vector.extract_strided_slice %3 {offsets = [6, 0], sizes = [32, 128], strides = [1, 1]} : vector<48x128xbf16> to vector<32x128xbf16>
    %c5 = arith.constant 5 : index
    %c0_40 = arith.constant 0 : index
    %c0_41 = arith.constant 0 : index
    %43 = vector.load %arg2[%c5, %c0_40, %c0_41] : memref<9x128x128xbf16, #tpu.memory_space<vmem>>, vector<1x128x128xbf16>
    %44 = vector.shape_cast %43 : vector<1x128x128xbf16> to vector<128x128xbf16>
    %cst_42 = arith.constant dense<0.000000e+00> : vector<32x128xf32>
    %45 = tpu.matmul %42, %44, %cst_42 {dimension_numbers = #tpu.dot_dimension_numbers<[1], [0], [0], [1], [0, 0, 1, 1], [], []>} : vector<32x128xbf16>, vector<128x128xbf16>, vector<32x128xf32> -> vector<32x128xf32>
    %46 = arith.addf %41, %45 : vector<32x128xf32>
    %c0_43 = arith.constant 0 : index
    %c0_44 = arith.constant 0 : index
    %47 = vector.load %arg6[%c0_43, %c0_44] : memref<32x128xf32, #tpu.memory_space<vmem>>, vector<32x128xf32>
    tpu.vector_store %arg6[%c0_43, %c0_44], %46 {strides = array<i32>} : memref<32x128xf32, #tpu.memory_space<vmem>>, vector<32x128xf32>,
    %c0_45 = arith.constant 0 : index
    %c0_46 = arith.constant 0 : index
    %48 = vector.load %arg6[%c0_45, %c0_46] : memref<32x128xf32, #tpu.memory_space<vmem>>, vector<32x128xf32>
    %49 = vector.extract_strided_slice %3 {offsets = [8, 0], sizes = [32, 128], strides = [1, 1]} : vector<48x128xbf16> to vector<32x128xbf16>
    %c6 = arith.constant 6 : index
    %c0_47 = arith.constant 0 : index
    %c0_48 = arith.constant 0 : index
    %50 = vector.load %arg2[%c6, %c0_47, %c0_48] : memref<9x128x128xbf16, #tpu.memory_space<vmem>>, vector<1x128x128xbf16>
    %51 = vector.shape_cast %50 : vector<1x128x128xbf16> to vector<128x128xbf16>
    %cst_49 = arith.constant dense<0.000000e+00> : vector<32x128xf32>
    %52 = tpu.matmul %49, %51, %cst_49 {dimension_numbers = #tpu.dot_dimension_numbers<[1], [0], [0], [1], [0, 0, 1, 1], [], []>} : vector<32x128xbf16>, vector<128x128xbf16>, vector<32x128xf32> -> vector<32x128xf32>
    %53 = arith.addf %48, %52 : vector<32x128xf32>
    %c0_50 = arith.constant 0 : index
    %c0_51 = arith.constant 0 : index
    %54 = vector.load %arg6[%c0_50, %c0_51] : memref<32x128xf32, #tpu.memory_space<vmem>>, vector<32x128xf32>
    tpu.vector_store %arg6[%c0_50, %c0_51], %53 {strides = array<i32>} : memref<32x128xf32, #tpu.memory_space<vmem>>, vector<32x128xf32>,
    %c0_52 = arith.constant 0 : index
    %c0_53 = arith.constant 0 : index
    %55 = vector.load %arg6[%c0_52, %c0_53] : memref<32x128xf32, #tpu.memory_space<vmem>>, vector<32x128xf32>
    %56 = vector.extract_strided_slice %3 {offsets = [9, 0], sizes = [32, 128], strides = [1, 1]} : vector<48x128xbf16> to vector<32x128xbf16>
    %c7 = arith.constant 7 : index
    %c0_54 = arith.constant 0 : index
    %c0_55 = arith.constant 0 : index
    %57 = vector.load %arg2[%c7, %c0_54, %c0_55] : memref<9x128x128xbf16, #tpu.memory_space<vmem>>, vector<1x128x128xbf16>
    %58 = vector.shape_cast %57 : vector<1x128x128xbf16> to vector<128x128xbf16>
    %cst_56 = arith.constant dense<0.000000e+00> : vector<32x128xf32>
    %59 = tpu.matmul %56, %58, %cst_56 {dimension_numbers = #tpu.dot_dimension_numbers<[1], [0], [0], [1], [0, 0, 1, 1], [], []>} : vector<32x128xbf16>, vector<128x128xbf16>, vector<32x128xf32> -> vector<32x128xf32>
    %60 = arith.addf %55, %59 : vector<32x128xf32>
    %c0_57 = arith.constant 0 : index
    %c0_58 = arith.constant 0 : index
    %61 = vector.load %arg6[%c0_57, %c0_58] : memref<32x128xf32, #tpu.memory_space<vmem>>, vector<32x128xf32>
    tpu.vector_store %arg6[%c0_57, %c0_58], %60 {strides = array<i32>} : memref<32x128xf32, #tpu.memory_space<vmem>>, vector<32x128xf32>,
    %c0_59 = arith.constant 0 : index
    %c0_60 = arith.constant 0 : index
    %62 = vector.load %arg6[%c0_59, %c0_60] : memref<32x128xf32, #tpu.memory_space<vmem>>, vector<32x128xf32>
    %63 = vector.extract_strided_slice %3 {offsets = [10, 0], sizes = [32, 128], strides = [1, 1]} : vector<48x128xbf16> to vector<32x128xbf16>
    %c8 = arith.constant 8 : index
    %c0_61 = arith.constant 0 : index
    %c0_62 = arith.constant 0 : index
    %64 = vector.load %arg2[%c8, %c0_61, %c0_62] : memref<9x128x128xbf16, #tpu.memory_space<vmem>>, vector<1x128x128xbf16>
    %65 = vector.shape_cast %64 : vector<1x128x128xbf16> to vector<128x128xbf16>
    %cst_63 = arith.constant dense<0.000000e+00> : vector<32x128xf32>
    %66 = tpu.matmul %63, %65, %cst_63 {dimension_numbers = #tpu.dot_dimension_numbers<[1], [0], [0], [1], [0, 0, 1, 1], [], []>} : vector<32x128xbf16>, vector<128x128xbf16>, vector<32x128xf32> -> vector<32x128xf32>
    %67 = arith.addf %62, %66 : vector<32x128xf32>
    %c0_64 = arith.constant 0 : index
    %c0_65 = arith.constant 0 : index
    %68 = vector.load %arg6[%c0_64, %c0_65] : memref<32x128xf32, #tpu.memory_space<vmem>>, vector<32x128xf32>
    tpu.vector_store %arg6[%c0_64, %c0_65], %67 {strides = array<i32>} : memref<32x128xf32, #tpu.memory_space<vmem>>, vector<32x128xf32>,
    %c0_66 = arith.constant 0 : index
    %c0_67 = arith.constant 0 : index
    %69 = vector.load %arg6[%c0_66, %c0_67] : memref<32x128xf32, #tpu.memory_space<vmem>>, vector<32x128xf32>
    %c0_68 = arith.constant 0 : index
    %c0_69 = arith.constant 0 : index
    %70 = vector.load %arg3[%c0_68, %c0_69] : memref<1x128xf32, #tpu.memory_space<vmem>>, vector<1x128xf32>
    %71 = vector.broadcast %70 : vector<1x128xf32> to vector<32x128xf32>
    %72 = arith.mulf %69, %71 : vector<32x128xf32>
    %c0_70 = arith.constant 0 : index
    %c0_71 = arith.constant 0 : index
    %73 = vector.load %arg4[%c0_70, %c0_71] : memref<1x128xf32, #tpu.memory_space<vmem>>, vector<1x128xf32>
    %74 = vector.broadcast %73 : vector<1x128xf32> to vector<32x128xf32>
    %75 = arith.addf %72, %74 : vector<32x128xf32>
    %cst_72 = arith.constant 0.000000e+00 : f32
    %76 = vector.broadcast %cst_72 : f32 to vector<32x128xf32>
    %77 = arith.maximumf %75, %76 : vector<32x128xf32>
    %78 = arith.truncf %77 : vector<32x128xf32> to vector<32x128xbf16>
    %c0_73 = arith.constant 0 : index
    %c0_74 = arith.constant 0 : index
    %79 = vector.load %arg5[%c0_73, %c0_74] : memref<32x128xbf16, #tpu.memory_space<vmem>>, vector<32x128xbf16>
    tpu.vector_store %arg5[%c0_73, %c0_74], %78 {strides = array<i32>} : memref<32x128xbf16, #tpu.memory_space<vmem>>, vector<32x128xbf16>,
    return
  }
  func.func @transform_0(%arg0: i32) -> (i32, i32) {
    %c0_i32 = arith.constant 0 : i32
    %c0_i32_0 = arith.constant 0 : i32
    %c0_i32_1 = arith.constant 0 : i32
    return %c0_i32, %c0_i32_0 : i32, i32
  }
  func.func @transform_1(%arg0: i32) -> (i32, i32, i32) {
    %c0_i32 = arith.constant 0 : i32
    %c0_i32_0 = arith.constant 0 : i32
    %c0_i32_1 = arith.constant 0 : i32
    %c0_i32_2 = arith.constant 0 : i32
    return %c0_i32, %c0_i32_0, %c0_i32_1 : i32, i32, i32
  }
  func.func @transform_2(%arg0: i32) -> (i32, i32) {
    %c0_i32 = arith.constant 0 : i32
    %c0_i32_0 = arith.constant 0 : i32
    %c0_i32_1 = arith.constant 0 : i32
    return %c0_i32, %c0_i32_0 : i32, i32
  }
  func.func @transform_3(%arg0: i32) -> (i32, i32) {
    %c0_i32 = arith.constant 0 : i32
    %c0_i32_0 = arith.constant 0 : i32
    %c0_i32_1 = arith.constant 0 : i32
    return %c0_i32, %c0_i32_0 : i32, i32
  }
  func.func @transform_4(%arg0: i32) -> (i32, i32) {
    %c0_i32 = arith.constant 0 : i32
    %c0_i32_0 = arith.constant 0 : i32
    return %arg0, %c0_i32 : i32, i32
  }
}

module attributes {stable_mosaic.version = 11 : i64} {
  func.func @kernel(%arg0: i32, %arg1: i32, %arg2: memref<8x128xbf16, #tpu.memory_space<vmem>>, %arg3: memref<128x640xbf16, #tpu.memory_space<vmem>>, %arg4: memref<8x512xbf16, #tpu.memory_space<vmem>>, %arg5: memref<8x640xbf16, #tpu.memory_space<vmem>>, %arg6: memref<8x640xf32, #tpu.memory_space<vmem>>) attributes {dimension_semantics = [#tpu.dimension_semantics<parallel>, #tpu.dimension_semantics<arbitrary>], iteration_bounds = array<i64: 1, 1>, scalar_prefetch = 0 : i64, scratch_operands = 1 : i64, tpu.core_type = #tpu.core_type<tc>, window_params = [{transform_indices = @transform_0, window_bounds = array<i64: 8, 128>}, {transform_indices = @transform_1, window_bounds = array<i64: 128, 640>}, {transform_indices = @transform_2, window_bounds = array<i64: 8, 512>}, {transform_indices = @transform_3, window_bounds = array<i64: 8, 640>}]} {
    %c0_i32 = arith.constant 0 : i32
    %0 = arith.cmpi eq, %arg1, %c0_i32 : i32
    %1 = arith.extui %0 : i1 to i32
    %c0_i32_0 = arith.constant 0 : i32
    %2 = arith.cmpi ne, %1, %c0_i32_0 : i32
    scf.if %2 {
      %cst_10 = arith.constant 0.000000e+00 : f32
      %12 = vector.broadcast %cst_10 : f32 to vector<8x640xf32>
      %c0_11 = arith.constant 0 : index
      %c0_12 = arith.constant 0 : index
      %13 = vector.load %arg6[%c0_11, %c0_12] : memref<8x640xf32, #tpu.memory_space<vmem>>, vector<8x640xf32>
      tpu.vector_store %arg6[%c0_11, %c0_12], %12 {strides = array<i32>} : memref<8x640xf32, #tpu.memory_space<vmem>>, vector<8x640xf32>,
    } else {
    }
    %c0 = arith.constant 0 : index
    %c0_1 = arith.constant 0 : index
    %3 = vector.load %arg2[%c0, %c0_1] : memref<8x128xbf16, #tpu.memory_space<vmem>>, vector<8x128xbf16>
    %c0_2 = arith.constant 0 : index
    %c0_3 = arith.constant 0 : index
    %4 = vector.load %arg6[%c0_2, %c0_3] : memref<8x640xf32, #tpu.memory_space<vmem>>, vector<8x640xf32>
    %c0_4 = arith.constant 0 : index
    %c0_5 = arith.constant 0 : index
    %5 = vector.load %arg3[%c0_4, %c0_5] : memref<128x640xbf16, #tpu.memory_space<vmem>>, vector<128x640xbf16>
    %cst = arith.constant dense<0.000000e+00> : vector<8x640xf32>
    %6 = tpu.matmul %3, %5, %cst {dimension_numbers = #tpu.dot_dimension_numbers<[1], [0], [0], [1], [0, 0, 1, 1], [], []>} : vector<8x128xbf16>, vector<128x640xbf16>, vector<8x640xf32> -> vector<8x640xf32>
    %7 = arith.addf %4, %6 : vector<8x640xf32>
    %c0_6 = arith.constant 0 : index
    %c0_7 = arith.constant 0 : index
    %8 = vector.load %arg6[%c0_6, %c0_7] : memref<8x640xf32, #tpu.memory_space<vmem>>, vector<8x640xf32>
    tpu.vector_store %arg6[%c0_6, %c0_7], %7 {strides = array<i32>} : memref<8x640xf32, #tpu.memory_space<vmem>>, vector<8x640xf32>,
    %c0_i32_8 = arith.constant 0 : i32
    %9 = arith.cmpi eq, %arg1, %c0_i32_8 : i32
    %10 = arith.extui %9 : i1 to i32
    %c0_i32_9 = arith.constant 0 : i32
    %11 = arith.cmpi ne, %10, %c0_i32_9 : i32
    scf.if %11 {
      %c0_10 = arith.constant 0 : index
      %c0_11 = arith.constant 0 : index
      %12 = vector.load %arg6[%c0_10, %c0_11] : memref<8x640xf32, #tpu.memory_space<vmem>>, vector<8x640xf32>
      %c0_12 = arith.constant 0 : index
      %c0_13 = arith.constant 0 : index
      %13 = vector.load %arg4[%c0_12, %c0_13] : memref<8x512xbf16, #tpu.memory_space<vmem>>, vector<8x512xbf16>
      %14 = arith.extf %13 : vector<8x512xbf16> to vector<8x512xf32>
      %15 = vector.extract_strided_slice %12 {offsets = [0, 0], sizes = [8, 512], strides = [1, 1]} : vector<8x640xf32> to vector<8x512xf32>
      %16 = arith.addf %15, %14 : vector<8x512xf32>
      %17 = vector.extract_strided_slice %12 {offsets = [0, 512], sizes = [8, 128], strides = [1, 1]} : vector<8x640xf32> to vector<8x128xf32>
      %18 = tpu.concatenate %16, %17 in 1 : vector<8x512xf32>, vector<8x128xf32> -> vector<8x640xf32>
      %19 = arith.truncf %18 : vector<8x640xf32> to vector<8x640xbf16>
      %c0_14 = arith.constant 0 : index
      %c0_15 = arith.constant 0 : index
      %20 = vector.load %arg5[%c0_14, %c0_15] : memref<8x640xbf16, #tpu.memory_space<vmem>>, vector<8x640xbf16>
      tpu.vector_store %arg5[%c0_14, %c0_15], %19 {strides = array<i32>} : memref<8x640xbf16, #tpu.memory_space<vmem>>, vector<8x640xbf16>,
    } else {
    }
    return
  }
  func.func @transform_0(%arg0: i32, %arg1: i32) -> (i32, i32) {
    %c0_i32 = arith.constant 0 : i32
    return %arg0, %arg1 : i32, i32
  }
  func.func @transform_1(%arg0: i32, %arg1: i32) -> (i32, i32) {
    %c0_i32 = arith.constant 0 : i32
    %c0_i32_0 = arith.constant 0 : i32
    return %arg1, %c0_i32 : i32, i32
  }
  func.func @transform_2(%arg0: i32, %arg1: i32) -> (i32, i32) {
    %c0_i32 = arith.constant 0 : i32
    %c0_i32_0 = arith.constant 0 : i32
    return %arg0, %c0_i32 : i32, i32
  }
  func.func @transform_3(%arg0: i32, %arg1: i32) -> (i32, i32) {
    %c0_i32 = arith.constant 0 : i32
    %c0_i32_0 = arith.constant 0 : i32
    return %arg0, %c0_i32 : i32, i32
  }
}

module attributes {stable_mosaic.version = 11 : i64} {
  func.func @kernel(%arg0: i32, %arg1: i32, %arg2: memref<8x128xbf16, #tpu.memory_space<vmem>>, %arg3: memref<1x128xf32, #tpu.memory_space<vmem>>, %arg4: memref<1x128xf32, #tpu.memory_space<vmem>>, %arg5: memref<128x128xbf16, #tpu.memory_space<vmem>>, %arg6: memref<1x128xf32, #tpu.memory_space<vmem>>, %arg7: memref<8x128xf32, #tpu.memory_space<vmem>>, %arg8: memref<8x128xf32, #tpu.memory_space<vmem>>) attributes {dimension_semantics = [#tpu.dimension_semantics<parallel>, #tpu.dimension_semantics<arbitrary>], iteration_bounds = array<i64: 1, 5>, scalar_prefetch = 0 : i64, scratch_operands = 1 : i64, tpu.core_type = #tpu.core_type<tc>, window_params = [{transform_indices = @transform_0, window_bounds = array<i64: 8, 128>}, {transform_indices = @transform_1, window_bounds = array<i64: 1, 128>}, {transform_indices = @transform_2, window_bounds = array<i64: 1, 128>}, {transform_indices = @transform_3, window_bounds = array<i64: 128, 128>}, {pipeline_mode = #tpu.pipeline_mode<synchronous>, transform_indices = @transform_4, window_bounds = array<i64: 1, 128>}, {transform_indices = @transform_5, window_bounds = array<i64: 8, 128>}]} {
    %c0_i32 = arith.constant 0 : i32
    %0 = arith.cmpi eq, %arg1, %c0_i32 : i32
    %1 = arith.extui %0 : i1 to i32
    %c0_i32_0 = arith.constant 0 : i32
    %2 = arith.cmpi ne, %1, %c0_i32_0 : i32
    scf.if %2 {
      %cst_14 = arith.constant 0.000000e+00 : f32
      %22 = vector.broadcast %cst_14 : f32 to vector<8x128xf32>
      %c0_15 = arith.constant 0 : index
      %c0_16 = arith.constant 0 : index
      %23 = vector.load %arg8[%c0_15, %c0_16] : memref<8x128xf32, #tpu.memory_space<vmem>>, vector<8x128xf32>
      tpu.vector_store %arg8[%c0_15, %c0_16], %22 {strides = array<i32>} : memref<8x128xf32, #tpu.memory_space<vmem>>, vector<8x128xf32>,
    } else {
    }
    %c0 = arith.constant 0 : index
    %c0_1 = arith.constant 0 : index
    %3 = vector.load %arg2[%c0, %c0_1] : memref<8x128xbf16, #tpu.memory_space<vmem>>, vector<8x128xbf16>
    %4 = arith.extf %3 : vector<8x128xbf16> to vector<8x128xf32>
    %c0_2 = arith.constant 0 : index
    %c0_3 = arith.constant 0 : index
    %5 = vector.load %arg3[%c0_2, %c0_3] : memref<1x128xf32, #tpu.memory_space<vmem>>, vector<1x128xf32>
    %6 = vector.broadcast %5 : vector<1x128xf32> to vector<8x128xf32>
    %7 = arith.mulf %4, %6 : vector<8x128xf32>
    %c0_4 = arith.constant 0 : index
    %c0_5 = arith.constant 0 : index
    %8 = vector.load %arg4[%c0_4, %c0_5] : memref<1x128xf32, #tpu.memory_space<vmem>>, vector<1x128xf32>
    %9 = vector.broadcast %8 : vector<1x128xf32> to vector<8x128xf32>
    %10 = arith.addf %7, %9 : vector<8x128xf32>
    %cst = arith.constant 0.000000e+00 : f32
    %11 = vector.broadcast %cst : f32 to vector<8x128xf32>
    %12 = arith.maximumf %10, %11 : vector<8x128xf32>
    %13 = arith.truncf %12 : vector<8x128xf32> to vector<8x128xbf16>
    %c0_6 = arith.constant 0 : index
    %c0_7 = arith.constant 0 : index
    %14 = vector.load %arg8[%c0_6, %c0_7] : memref<8x128xf32, #tpu.memory_space<vmem>>, vector<8x128xf32>
    %c0_8 = arith.constant 0 : index
    %c0_9 = arith.constant 0 : index
    %15 = vector.load %arg5[%c0_8, %c0_9] : memref<128x128xbf16, #tpu.memory_space<vmem>>, vector<128x128xbf16>
    %cst_10 = arith.constant dense<0.000000e+00> : vector<8x128xf32>
    %16 = tpu.matmul %13, %15, %cst_10 {dimension_numbers = #tpu.dot_dimension_numbers<[1], [0], [0], [1], [0, 0, 1, 1], [], []>} : vector<8x128xbf16>, vector<128x128xbf16>, vector<8x128xf32> -> vector<8x128xf32>
    %17 = arith.addf %14, %16 : vector<8x128xf32>
    %c0_11 = arith.constant 0 : index
    %c0_12 = arith.constant 0 : index
    %18 = vector.load %arg8[%c0_11, %c0_12] : memref<8x128xf32, #tpu.memory_space<vmem>>, vector<8x128xf32>
    tpu.vector_store %arg8[%c0_11, %c0_12], %17 {strides = array<i32>} : memref<8x128xf32, #tpu.memory_space<vmem>>, vector<8x128xf32>,
    %c4_i32 = arith.constant 4 : i32
    %19 = arith.cmpi eq, %arg1, %c4_i32 : i32
    %20 = arith.extui %19 : i1 to i32
    %c0_i32_13 = arith.constant 0 : i32
    %21 = arith.cmpi ne, %20, %c0_i32_13 : i32
    scf.if %21 {
      %c0_14 = arith.constant 0 : index
      %c0_15 = arith.constant 0 : index
      %22 = vector.load %arg8[%c0_14, %c0_15] : memref<8x128xf32, #tpu.memory_space<vmem>>, vector<8x128xf32>
      %c0_16 = arith.constant 0 : index
      %c0_17 = arith.constant 0 : index
      %23 = vector.load %arg6[%c0_16, %c0_17] : memref<1x128xf32, #tpu.memory_space<vmem>>, vector<1x128xf32>
      %24 = vector.broadcast %23 : vector<1x128xf32> to vector<8x128xf32>
      %25 = arith.addf %22, %24 : vector<8x128xf32>
      %c0_18 = arith.constant 0 : index
      %c0_19 = arith.constant 0 : index
      %26 = vector.load %arg7[%c0_18, %c0_19] : memref<8x128xf32, #tpu.memory_space<vmem>>, vector<8x128xf32>
      tpu.vector_store %arg7[%c0_18, %c0_19], %25 {strides = array<i32>} : memref<8x128xf32, #tpu.memory_space<vmem>>, vector<8x128xf32>,
    } else {
    }
    return
  }
  func.func @transform_0(%arg0: i32, %arg1: i32) -> (i32, i32) {
    %c0_i32 = arith.constant 0 : i32
    return %arg0, %arg1 : i32, i32
  }
  func.func @transform_1(%arg0: i32, %arg1: i32) -> (i32, i32) {
    %c0_i32 = arith.constant 0 : i32
    %c0_i32_0 = arith.constant 0 : i32
    return %c0_i32, %arg1 : i32, i32
  }
  func.func @transform_2(%arg0: i32, %arg1: i32) -> (i32, i32) {
    %c0_i32 = arith.constant 0 : i32
    %c0_i32_0 = arith.constant 0 : i32
    return %c0_i32, %arg1 : i32, i32
  }
  func.func @transform_3(%arg0: i32, %arg1: i32) -> (i32, i32) {
    %c0_i32 = arith.constant 0 : i32
    %c0_i32_0 = arith.constant 0 : i32
    return %arg1, %c0_i32 : i32, i32
  }
  func.func @transform_4(%arg0: i32, %arg1: i32) -> (i32, i32) {
    %c0_i32 = arith.constant 0 : i32
    %c0_i32_0 = arith.constant 0 : i32
    %c0_i32_1 = arith.constant 0 : i32
    return %c0_i32, %c0_i32_0 : i32, i32
  }
  func.func @transform_5(%arg0: i32, %arg1: i32) -> (i32, i32) {
    %c0_i32 = arith.constant 0 : i32
    %c0_i32_0 = arith.constant 0 : i32
    return %arg0, %c0_i32 : i32, i32
  }
}

</mosaic_0001>

<bundles_post_ra>
// kernel: _lambda_.19
= control target key start
LH: loop header
LB: loop body
LE: loop exit
PB: predicated region body
PF: predicated region fallthrough
CT: control target
= control target key end

     0   :  { %v742_v1 = vmov 0   ;;  %s938_s3 = inlined_call_operand.vmem [shape: bf16[128,256], index: 3, kind: input, shape index: {}]   ;;  %s939_s0 = inlined_call_operand.vmem [shape: bf16[128,128], index: 0, kind: input, shape index: {}]   ;;  %s940_s1 = inlined_call_operand.vmem [shape: f32[1,128], index: 1, kind: input, shape index: {}]   ;;  %s941_s2 = inlined_call_operand.vmem [shape: f32[1,128], index: 2, kind: input, shape index: {}]   ;;  %s942_s4 = inlined_call_operand.vmem [shape: bf16[128,256], index: 4, kind: output, shape index: {}]  }
   0x1   :  { %v718_v0 = vld [vmem:[%s938_s3 + $0x4] ss:$8 sps:$4 sm:$0xff]   ;;  %316 = vmatprep.mubr.bf16.mxu0 %v742_v1  ;;  %356 = vmatprep.mubr.bf16.mxu1 %v742_v1  ;;  %v720_v2 = vld [vmem:[%s938_s3] ss:$8 sps:$4 sm:$0xff]   ;;  %v721_v3 = vld [vmem:[%s938_s3 + $0x14] ss:$8 sps:$4 sm:$0xff]  }
   0x2   :  { %284 = vmatprep.subr.bf16.mxu0 %v718_v0  ;;  %701 = vmatprep.subr.bf16.mxu1 %v718_v0  ;;  %v723_v4 = vld [vmem:[%s938_s3 + $0x10] ss:$8 sps:$4 sm:$0xff]   ;;  %v724_v5 = vld [vmem:[%s938_s3 + $0x24] ss:$8 sps:$4 sm:$0xff]   ;;  %v726_v6 = vld [vmem:[%s938_s3 + $0x20] ss:$8 sps:$4 sm:$0xff]  }
   0x3   :  { %285 = vmatpush1.bf16.msra.mxu0 %v720_v2  ;;  %709 = vmatpush1.bf16.msra.mxu1 %v720_v2  ;;  %v727_v7 = vld [vmem:[%s938_s3 + $0x34] ss:$8 sps:$4 sm:$0xff]   ;;  %v729_v8 = vld [vmem:[%s938_s3 + $0x30] ss:$8 sps:$4 sm:$0xff]   ;;  %v663_v9 = vld [vmem:[%s939_s0] sm:$0xff]  }
   0x4   :  { %286 = vmatprep.subr.bf16.mxu0 %v721_v3  ;;  %702 = vmatprep.subr.bf16.mxu1 %v721_v3  ;;  %v697_v10 = vld [vmem:[%s939_s0 + $0x20] sm:$0xff]   ;;  %v664_v12 = vunpack.c.l.bf16 %v663_v9  ;;  %v665_v13 = vunpack.c.h.bf16 %v663_v9  ;;  %v733_v18 = vld [vmem:[%s938_s3 + $0x54] ss:$8 sps:$4 sm:$0xff]   ;;  %v694_v19 = vld [vmem:[%s939_s0 + $0x8] sm:$0xff]  }
   0x5   :  { %v730_v11 = vld [vmem:[%s938_s3 + $0x44] ss:$8 sps:$4 sm:$0xff]   ;;  %v680_v14 = vunpack.c.l.bf16 %v697_v10  ;;  %v681_v15 = vunpack.c.h.bf16 %v697_v10  ;;  %v732_v16 = vld [vmem:[%s938_s3 + $0x40] ss:$8 sps:$4 sm:$0xff]   ;;  %v735_v25 = vld [vmem:[%s938_s3 + $0x50] ss:$8 sps:$4 sm:$0xff]   ;;  %v668_v28 = vunpack.c.l.bf16 %v694_v19  ;;  %v669_v29 = vunpack.c.h.bf16 %v694_v19 }
   0x6   :  { %v809_v17 = vld [vmem:[%s940_s1] ss:$0 sm:$0xff]  ;;  %v698_v24 = vld [vmem:[%s939_s0 + $0x28] sm:$0xff]   ;;  %v739_v37 = vld [vmem:[%s938_s3 + $0x74] ss:$8 sps:$4 sm:$0xff]  }
   0x7   :  { %287 = vmatpush1.bf16.msra.mxu0 %v723_v4  ;;  %710 = vmatpush1.bf16.msra.mxu1 %v723_v4  ;;  %v93_v20 = vmul.f32 %v664_v12, %v809_v17  ;;  %v94_v21 = vmul.f32 %v665_v13, %v809_v17  ;;  %v101_v22 = vmul.f32 %v680_v14, %v809_v17  ;;  %v830_v26 = vld [vmem:[%s941_s2] ss:$0 sm:$0xff]  ;;  %v736_v27 = vld [vmem:[%s938_s3 + $0x64] ss:$8 sps:$4 sm:$0xff]   ;;  %v684_v30 = vunpack.c.l.bf16 %v698_v24  ;;  %v695_v42 = vld [vmem:[%s939_s0 + $0x10] sm:$0xff]  }
   0x8   :  { %288 = vmatprep.subr.bf16.mxu0 %v724_v5  ;;  %703 = vmatprep.subr.bf16.mxu1 %v724_v5  ;;  %v102_v23 = vmul.f32 %v681_v15, %v809_v17  ;;  %v685_v31 = vunpack.c.h.bf16 %v698_v24  ;;  %v738_v36 = vld [vmem:[%s938_s3 + $0x60] ss:$8 sps:$4 sm:$0xff]   ;;  %v95_v38 = vmul.f32 %v668_v28, %v809_v17  ;;  %v96_v39 = vmul.f32 %v669_v29, %v809_v17  ;;  %v741_v47 = vld [vmem:[%s938_s3 + $0x70] ss:$8 sps:$4 sm:$0xff]  }
   0x9   :  { %v116_v32 = vadd.f32 %v830_v26, %v93_v20  ;;  %v117_v33 = vadd.f32 %v830_v26, %v94_v21  ;;  %v124_v34 = vadd.f32 %v830_v26, %v101_v22  ;;  %v103_v40 = vmul.f32 %v684_v30, %v809_v17  ;;  %v699_v48 = vld [vmem:[%s939_s0 + $0x30] sm:$0xff]   ;;  %v696_v4 = vld [vmem:[%s939_s0 + $0x18] sm:$0xff]  }
   0xa   :  { %v125_v35 = vadd.f32 %v830_v26, %v102_v23  ;;  %v104_v41 = vmul.f32 %v685_v31, %v809_v17  ;;  %v118_v49 = vadd.f32 %v830_v26, %v95_v38  ;;  %v119_v50 = vadd.f32 %v830_v26, %v96_v39  ;;  %v700_v5 = vld [vmem:[%s939_s0 + $0x38] sm:$0xff]  }
   0xb   :  { %289 = vmatpush1.bf16.msra.mxu0 %v726_v6  ;;  %711 = vmatpush1.bf16.msra.mxu1 %v726_v6  ;;  %v132_v43 = vmax.f32 %v116_v32, 0.0  ;;  %v133_v44 = vmax.f32 %v117_v33, 0.0  ;;  %v140_v45 = vmax.f32 %v124_v34, 0.0  ;;  %v672_v51 = vunpack.c.l.bf16 %v695_v42 }
   0xc   :  { %290 = vmatprep.subr.bf16.mxu0 %v727_v7  ;;  %704 = vmatprep.subr.bf16.mxu1 %v727_v7  ;;  %v141_v46 = vmax.f32 %v125_v35, 0.0  ;;  %v126_v52 = vadd.f32 %v830_v26, %v103_v40  ;;  %v127_v53 = vadd.f32 %v830_v26, %v104_v41  ;;  %v673_v54 = vunpack.c.h.bf16 %v695_v42 }
   0xd   :  { %v148_v55 = vpack.c.bf16 %v133_v44, %v132_v43  ;;  %v688_v57 = vunpack.c.l.bf16 %v699_v48  ;;  %v689_v58 = vunpack.c.h.bf16 %v699_v48  ;;  %v134_v59 = vmax.f32 %v118_v49, 0.0 }
   0xe   :  { %v152_v56 = vpack.c.bf16 %v141_v46, %v140_v45  ;;  %v135_v60 = vmax.f32 %v119_v50, 0.0  ;;  %v97_v61 = vmul.f32 %v672_v51, %v809_v17  ;;  %v142_v62 = vmax.f32 %v126_v52, 0.0 }
   0xf   :  { %291 = vmatpush1.bf16.msra.mxu0 %v729_v8  ;;  %712 = vmatpush1.bf16.msra.mxu1 %v729_v8  ;;  %v143_v63 = vmax.f32 %v127_v53, 0.0  ;;  %v98_v0 = vmul.f32 %v673_v54, %v809_v17  ;;  %v105_v2 = vmul.f32 %v688_v57, %v809_v17  ;;  %v106_v3 = vmul.f32 %v689_v58, %v809_v17 }
  0x10   :  { %292 = vmatprep.subr.bf16.mxu0 %v730_v11  ;;  %705 = vmatprep.subr.bf16.mxu1 %v730_v11  ;;  %v149_v6 = vpack.c.bf16 %v135_v60, %v134_v59  ;;  %v120_v7 = vadd.f32 %v830_v26, %v97_v61  ;;  %v676_v10 = vunpack.c.l.bf16 %v696_v4  ;;  %v677_v11 = vunpack.c.h.bf16 %v696_v4 }
  0x11   :  { %v153_v8 = vpack.c.bf16 %v143_v63, %v142_v62  ;;  %v121_v9 = vadd.f32 %v830_v26, %v98_v0  ;;  %v128_v12 = vadd.f32 %v830_v26, %v105_v2  ;;  %v129_v13 = vadd.f32 %v830_v26, %v106_v3 }
  0x12   :  { %v692_v14 = vunpack.c.l.bf16 %v700_v5  ;;  %v693_v15 = vunpack.c.h.bf16 %v700_v5  ;;  %v99_v19 = vmul.f32 %v676_v10, %v809_v17  ;;  %v100_v20 = vmul.f32 %v677_v11, %v809_v17 }
  0x13   :  { %293 = vmatpush1.bf16.msra.mxu0 %v732_v16  ;;  %713 = vmatpush1.bf16.msra.mxu1 %v732_v16  ;;  %v136_v16 = vmax.f32 %v120_v7, 0.0  ;;  %v144_v21 = vmax.f32 %v128_v12, 0.0  ;;  %v145_v22 = vmax.f32 %v129_v13, 0.0 }
  0x14   :  { %294 = vmatprep.subr.bf16.mxu0 %v733_v18  ;;  %706 = vmatprep.subr.bf16.mxu1 %v733_v18  ;;  %v137_v18 = vmax.f32 %v121_v9, 0.0  ;;  %v107_v23 = vmul.f32 %v692_v14, %v809_v17  ;;  %v108_v24 = vmul.f32 %v693_v15, %v809_v17  ;;  %v123_v29 = vadd.f32 %v830_v26, %v100_v20 }
  0x15   :  { %v154_v28 = vpack.c.bf16 %v145_v22, %v144_v21 }
  0x16   :  { %v130_v30 = vadd.f32 %v830_v26, %v107_v23  ;;  %v131_v31 = vadd.f32 %v830_v26, %v108_v24  ;;  %v139_v33 = vmax.f32 %v123_v29, 0.0 }
  0x17   :  { %295 = vmatpush1.bf16.msra.mxu0 %v735_v25  ;;  %714 = vmatpush1.bf16.msra.mxu1 %v735_v25  ;;  %v150_v25 = vpack.c.bf16 %v137_v18, %v136_v16 }
  0x18   :  { %296 = vmatprep.subr.bf16.mxu0 %v736_v27  ;;  %707 = vmatprep.subr.bf16.mxu1 %v736_v27  ;;  %v122_v27 = vadd.f32 %v830_v26, %v99_v19  ;;  %v146_v34 = vmax.f32 %v130_v30, 0.0  ;;  %v147_v17 = vmax.f32 %v131_v31, 0.0 }
  0x1a   :  { %v138_v32 = vmax.f32 %v122_v27, 0.0 }
  0x1b   :  { %297 = vmatpush1.bf16.msra.mxu0 %v738_v36  ;;  %715 = vmatpush1.bf16.msra.mxu1 %v738_v36  ;;  %v155_v36 = vpack.c.bf16 %v147_v17, %v146_v34 }
  0x1c   :  { %298 = vmatprep.subr.bf16.mxu0 %v739_v37  ;;  %708 = vmatprep.subr.bf16.mxu1 %v739_v37  ;;  %v151_v35 = vpack.c.bf16 %v139_v33, %v138_v32 }
  0x1f   :  { %299 = vmatpush1.bf16.msra.mxu0 %v741_v47  ;;  %716 = vmatpush1.bf16.msra.mxu1 %v741_v47 }
  0x22   :  { %317 = vmatmul.mubr.bf16.vlgmr.msra.gmra.mrb[0].mxu0 %v148_v55  ;;  %357 = vmatmul.mubr.bf16.vlgmr.msra.gmra.mrb[0].mxu1 %v152_v56 }
  0x23   :  { %326 = vmatprep.mubr.bf16.mxu0 %v742_v1  ;;  %366 = vmatprep.mubr.bf16.mxu1 %v742_v1 }
  0x2a   :  { %327 = vmatmul.mubr.bf16.gmra.mrb[4].mxu0 %v149_v6  ;;  %367 = vmatmul.mubr.bf16.gmra.mrb[4].mxu1 %v153_v8 }
  0x2b   :  { %336 = vmatprep.mubr.bf16.mxu0 %v742_v1  ;;  %376 = vmatprep.mubr.bf16.mxu1 %v742_v1 }
  0x32   :  { %337 = vmatmul.mubr.bf16.gmra.mrb[8].mxu0 %v150_v25  ;;  %377 = vmatmul.mubr.bf16.gmra.mrb[8].mxu1 %v154_v28 }
  0x33   :  { %346 = vmatprep.mubr.bf16.mxu0 %v742_v1  ;;  %386 = vmatprep.mubr.bf16.mxu1 %v742_v1 }
  0x3a   :  { %347 = vmatmul.mubr.bf16.gmra.mrb[12].mxu0 %v151_v35  ;;  %387 = vmatmul.mubr.bf16.gmra.mrb[12].mxu1 %v155_v36 }
  0xf5   :  { %v318_v37 = vpop.f32.mrb[0].mxu0  ;;  %v358_v38 = vpop.f32.mrb[0].mxu1 }
  0xf6   :  { %v320_v39 = vpop.f32.mrb[1].mxu0  ;;  %v360_v40 = vpop.f32.mrb[1].mxu1 }
  0xf7   :  { %v646_v41 = vpack.c.bf16 %v320_v39, %v318_v37  ;;  %v654_v26 = vpack.c.bf16 %v360_v40, %v358_v38  ;;  %v322_v42 = vpop.f32.mrb[2].mxu0  ;;  %v362_v43 = vpop.f32.mrb[2].mxu1 }
  0xf8   :  { %v324_v44 = vpop.f32.mrb[3].mxu0  ;;  %v364_v45 = vpop.f32.mrb[3].mxu1 }
  0xf9   :  { %592 = vst [vmem:[%s942_s4] sm:$0xff] %v646_v41  ;;  %600 = vst [vmem:[%s942_s4 + $0x40] sm:$0xff] %v654_v26  ;;  %v647_v1 = vpack.c.bf16 %v324_v44, %v322_v42  ;;  %v655_v46 = vpack.c.bf16 %v364_v45, %v362_v43 }
  0xfb   :  { %593 = vst [vmem:[%s942_s4 + $0x8] sm:$0xff] %v647_v1  ;;  %601 = vst [vmem:[%s942_s4 + $0x48] sm:$0xff] %v655_v46 }
  0xfd   :  { %v328_v47 = vpop.f32.mrb[4].mxu0  ;;  %v368_v48 = vpop.f32.mrb[4].mxu1 }
  0xfe   :  { %v330_v49 = vpop.f32.mrb[5].mxu0  ;;  %v370_v50 = vpop.f32.mrb[5].mxu1 }
  0xff   :  { %v648_v51 = vpack.c.bf16 %v330_v49, %v328_v47  ;;  %v656_v52 = vpack.c.bf16 %v370_v50, %v368_v48  ;;  %v332_v53 = vpop.f32.mrb[6].mxu0  ;;  %v372_v54 = vpop.f32.mrb[6].mxu1 }
 0x100   :  { %v334_v55 = vpop.f32.mrb[7].mxu0  ;;  %v374_v56 = vpop.f32.mrb[7].mxu1 }
 0x101   :  { %594 = vst [vmem:[%s942_s4 + $0x10] sm:$0xff] %v648_v51  ;;  %602 = vst [vmem:[%s942_s4 + $0x50] sm:$0xff] %v656_v52  ;;  %v649_v57 = vpack.c.bf16 %v334_v55, %v332_v53  ;;  %v657_v58 = vpack.c.bf16 %v374_v56, %v372_v54 }
 0x103   :  { %595 = vst [vmem:[%s942_s4 + $0x18] sm:$0xff] %v649_v57  ;;  %603 = vst [vmem:[%s942_s4 + $0x58] sm:$0xff] %v657_v58 }
 0x105   :  { %v338_v59 = vpop.f32.mrb[8].mxu0  ;;  %v378_v60 = vpop.f32.mrb[8].mxu1 }
 0x106   :  { %v340_v61 = vpop.f32.mrb[9].mxu0  ;;  %v380_v62 = vpop.f32.mrb[9].mxu1 }
 0x107   :  { %v650_v63 = vpack.c.bf16 %v340_v61, %v338_v59  ;;  %v658_v0 = vpack.c.bf16 %v380_v62, %v378_v60  ;;  %v342_v2 = vpop.f32.mrb[10].mxu0  ;;  %v382_v3 = vpop.f32.mrb[10].mxu1 }
 0x108   :  { %v344_v4 = vpop.f32.mrb[11].mxu0  ;;  %v384_v5 = vpop.f32.mrb[11].mxu1 }
 0x109   :  { %596 = vst [vmem:[%s942_s4 + $0x20] sm:$0xff] %v650_v63  ;;  %604 = vst [vmem:[%s942_s4 + $0x60] sm:$0xff] %v658_v0  ;;  %v651_v6 = vpack.c.bf16 %v344_v4, %v342_v2  ;;  %v659_v7 = vpack.c.bf16 %v384_v5, %v382_v3 }
 0x10b   :  { %597 = vst [vmem:[%s942_s4 + $0x28] sm:$0xff] %v651_v6  ;;  %605 = vst [vmem:[%s942_s4 + $0x68] sm:$0xff] %v659_v7 }
 0x10d   :  { %v348_v8 = vpop.f32.mrb[12].mxu0  ;;  %v388_v9 = vpop.f32.mrb[12].mxu1 }
 0x10e   :  { %v350_v10 = vpop.f32.mrb[13].mxu0  ;;  %v390_v11 = vpop.f32.mrb[13].mxu1 }
 0x10f   :  { %v652_v12 = vpack.c.bf16 %v350_v10, %v348_v8  ;;  %v660_v13 = vpack.c.bf16 %v390_v11, %v388_v9  ;;  %v352_v14 = vpop.f32.mrb[14].mxu0  ;;  %v392_v15 = vpop.f32.mrb[14].mxu1 }
 0x110   :  { %v354_v16 = vpop.f32.mrb[15].mxu0  ;;  %v394_v18 = vpop.f32.mrb[15].mxu1 }
 0x111   :  { %598 = vst [vmem:[%s942_s4 + $0x30] sm:$0xff] %v652_v12  ;;  %606 = vst [vmem:[%s942_s4 + $0x70] sm:$0xff] %v660_v13  ;;  %v653_v19 = vpack.c.bf16 %v354_v16, %v352_v14  ;;  %v661_v20 = vpack.c.bf16 %v394_v18, %v392_v15 }
 0x113   :  { %599 = vst [vmem:[%s942_s4 + $0x38] sm:$0xff] %v653_v19  ;;  %607 = vst [vmem:[%s942_s4 + $0x78] sm:$0xff] %v661_v20 }

// kernel: _lambda_.20
= control target key start
LH: loop header
LB: loop body
LE: loop exit
PB: predicated region body
PF: predicated region fallthrough
CT: control target
= control target key end

     0   :  { %s895_s3 = inlined_call_operand.vmem [shape: bf16[128,128], index: 3, kind: input, shape index: {}]   ;;  %s896_s0 = inlined_call_operand.vmem [shape: bf16[128,128], index: 0, kind: input, shape index: {}]   ;;  %s897_s1 = inlined_call_operand.vmem [shape: f32[1,128], index: 1, kind: input, shape index: {}]   ;;  %s898_s2 = inlined_call_operand.vmem [shape: f32[1,128], index: 2, kind: input, shape index: {}]   ;;  %s899_s4 = inlined_call_operand.vmem [shape: f32[1,128], index: 4, kind: input, shape index: {}]   ;;  %s900_s5 = inlined_call_operand.vmem [shape: f32[1,128], index: 5, kind: input, shape index: {}]   ;;  %s901_s6 = inlined_call_operand.vmem [shape: bf16[128,128], index: 6, kind: output, shape index: {}]  }
   0x1   :  { %v714_v0 = vld [vmem:[%s895_s3] sm:$0xff]   ;;  %v715_v1 = vld [vmem:[%s895_s3 + $0x8] sm:$0xff]   ;;  %v716_v2 = vld [vmem:[%s895_s3 + $0x10] sm:$0xff]  }
   0x2   :  { %666 = vmatprep.subr.bf16.mxu0 %v714_v0  ;;  %698 = vmatprep.subr.bf16.mxu1 %v714_v0  ;;  %v717_v3 = vld [vmem:[%s895_s3 + $0x18] sm:$0xff]   ;;  %v565_v4 = vld [vmem:[%s896_s0] sm:$0xff]   ;;  %v636_v9 = vld [vmem:[%s896_s0 + $0x8] sm:$0xff]  }
   0x3   :  { %667 = vmatpush3.bf16.msra.mxu0 %v714_v0  ;;  %706 = vmatpush3.bf16.msra.mxu1 %v714_v0  ;;  %v775_v5 = vld [vmem:[%s897_s1] ss:$0 sm:$0xff]  ;;  %v566_v6 = vunpack.c.l.bf16 %v565_v4  ;;  %v567_v7 = vunpack.c.h.bf16 %v565_v4  ;;  %v640_v13 = vld [vmem:[%s896_s0 + $0x28] sm:$0xff]   ;;  %v637_v16 = vld [vmem:[%s896_s0 + $0x10] sm:$0xff]   ;;  %v570_v20 = vunpack.c.l.bf16 %v636_v9  ;;  %v571_v21 = vunpack.c.h.bf16 %v636_v9 }
   0x4   :  { %668 = vmatprep.subr.bf16.mxu0 %v715_v1  ;;  %699 = vmatprep.subr.bf16.mxu1 %v715_v1  ;;  %v639_v8 = vld [vmem:[%s896_s0 + $0x20] sm:$0xff]   ;;  %v586_v24 = vunpack.c.l.bf16 %v640_v13  ;;  %v587_v25 = vunpack.c.h.bf16 %v640_v13  ;;  %v574_v28 = vunpack.c.l.bf16 %v637_v16  ;;  %v641_v31 = vld [vmem:[%s896_s0 + $0x30] sm:$0xff]   ;;  %v719_v32 = vld [vmem:[%s895_s3 + $0x28] sm:$0xff]   ;;  %v575_v40 = vunpack.c.h.bf16 %v637_v16 }
   0x5   :  { %v786_v10 = vld [vmem:[%s898_s2] ss:$0 sm:$0xff]  ;;  %v582_v11 = vunpack.c.l.bf16 %v639_v8  ;;  %v583_v12 = vunpack.c.h.bf16 %v639_v8  ;;  %v83_v14 = vmul.f32 %v566_v6, %v775_v5  ;;  %v84_v15 = vmul.f32 %v567_v7, %v775_v5  ;;  %v638_v44 = vld [vmem:[%s896_s0 + $0x18] sm:$0xff]   ;;  %v720_v48 = vld [vmem:[%s895_s3 + $0x30] sm:$0xff]  }
   0x6   :  { %v718_v17 = vld [vmem:[%s895_s3 + $0x20] sm:$0xff]   ;;  %v85_v35 = vmul.f32 %v570_v20, %v775_v5  ;;  %v86_v36 = vmul.f32 %v571_v21, %v775_v5  ;;  %v93_v38 = vmul.f32 %v586_v24, %v775_v5  ;;  %v94_v39 = vmul.f32 %v587_v25, %v775_v5  ;;  %v642_v47 = vld [vmem:[%s896_s0 + $0x38] sm:$0xff]  }
   0x7   :  { %669 = vmatpush3.bf16.msra.mxu0 %v715_v1  ;;  %707 = vmatpush3.bf16.msra.mxu1 %v715_v1  ;;  %v91_v18 = vmul.f32 %v582_v11, %v775_v5  ;;  %v92_v19 = vmul.f32 %v583_v12, %v775_v5  ;;  %v106_v22 = vadd.f32 %v786_v10, %v83_v14  ;;  %v590_v43 = vunpack.c.l.bf16 %v641_v31  ;;  %v721_v63 = vld [vmem:[%s895_s3 + $0x38] sm:$0xff]  }
   0x8   :  { %670 = vmatprep.subr.bf16.mxu0 %v716_v2  ;;  %700 = vmatprep.subr.bf16.mxu1 %v716_v2  ;;  %v107_v23 = vadd.f32 %v786_v10, %v84_v15  ;;  %v87_v42 = vmul.f32 %v574_v28, %v775_v5  ;;  %v88_v45 = vmul.f32 %v575_v40, %v775_v5  ;;  %v591_v46 = vunpack.c.h.bf16 %v641_v31  ;;  %v853_v28 = vld [vmem:[%s900_s5] ss:$0 sm:$0xff] }
   0x9   :  { %v114_v26 = vadd.f32 %v786_v10, %v91_v18  ;;  %v115_v27 = vadd.f32 %v786_v10, %v92_v19  ;;  %v122_v29 = vmax.f32 %v106_v22, 0.0  ;;  %v108_v49 = vadd.f32 %v786_v10, %v85_v35 }
   0xa   :  { %v123_v30 = vmax.f32 %v107_v23, 0.0  ;;  %v109_v50 = vadd.f32 %v786_v10, %v86_v36  ;;  %v95_v51 = vmul.f32 %v590_v43, %v775_v5  ;;  %v116_v52 = vadd.f32 %v786_v10, %v93_v38 }
   0xb   :  { %671 = vmatpush3.bf16.msra.mxu0 %v716_v2  ;;  %708 = vmatpush3.bf16.msra.mxu1 %v716_v2  ;;  %v130_v33 = vmax.f32 %v114_v26, 0.0  ;;  %v131_v34 = vmax.f32 %v115_v27, 0.0  ;;  %v117_v53 = vadd.f32 %v786_v10, %v94_v39  ;;  %v96_v54 = vmul.f32 %v591_v46, %v775_v5 }
   0xc   :  { %672 = vmatprep.subr.bf16.mxu0 %v717_v3  ;;  %701 = vmatprep.subr.bf16.mxu1 %v717_v3  ;;  %v138_v37 = vpack.c.bf16 %v123_v30, %v122_v29  ;;  %v578_v55 = vunpack.c.l.bf16 %v638_v44  ;;  %v110_v56 = vadd.f32 %v786_v10, %v87_v42  ;;  %v579_v57 = vunpack.c.h.bf16 %v638_v44 }
   0xd   :  { %v142_v41 = vpack.c.bf16 %v131_v34, %v130_v33  ;;  %v594_v58 = vunpack.c.l.bf16 %v642_v47  ;;  %v595_v59 = vunpack.c.h.bf16 %v642_v47  ;;  %v111_v60 = vadd.f32 %v786_v10, %v88_v45 }
   0xe   :  { %682 = vmatprep.mubr.bf16.mxu0 %v138_v37  ;;  %v118_v61 = vadd.f32 %v786_v10, %v95_v51  ;;  %v119_v62 = vadd.f32 %v786_v10, %v96_v54  ;;  %v124_v0 = vmax.f32 %v108_v49, 0.0  ;;  %v125_v1 = vmax.f32 %v109_v50, 0.0 }
   0xf   :  { %673 = vmatpush3.bf16.msra.mxu0 %v717_v3  ;;  %709 = vmatpush3.bf16.msra.mxu1 %v717_v3  ;;  %v132_v2 = vmax.f32 %v116_v52, 0.0  ;;  %v133_v3 = vmax.f32 %v117_v53, 0.0  ;;  %v89_v4 = vmul.f32 %v578_v55, %v775_v5  ;;  %v90_v6 = vmul.f32 %v579_v57, %v775_v5 }
  0x10   :  { %674 = vmatprep.subr.bf16.mxu0 %v718_v17  ;;  %702 = vmatprep.subr.bf16.mxu1 %v718_v17  ;;  %v97_v7 = vmul.f32 %v594_v58, %v775_v5  ;;  %v98_v8 = vmul.f32 %v595_v59, %v775_v5  ;;  %v126_v9 = vmax.f32 %v110_v56, 0.0  ;;  %v127_v11 = vmax.f32 %v111_v60, 0.0 }
  0x11   :  { %690 = vmatprep.mubr.bf16.mxu1 %v142_v41  ;;  %v134_v12 = vmax.f32 %v118_v61, 0.0  ;;  %v135_v13 = vmax.f32 %v119_v62, 0.0  ;;  %v139_v14 = vpack.c.bf16 %v125_v1, %v124_v0  ;;  %v143_v15 = vpack.c.bf16 %v133_v3, %v132_v2 }
  0x12   :  { %v112_v16 = vadd.f32 %v786_v10, %v89_v4  ;;  %v120_v18 = vadd.f32 %v786_v10, %v97_v7  ;;  %v121_v19 = vadd.f32 %v786_v10, %v98_v8  ;;  %v140_v5 = vpack.c.bf16 %v127_v11, %v126_v9 }
  0x13   :  { %675 = vmatpush3.bf16.msra.mxu0 %v718_v17  ;;  %710 = vmatpush3.bf16.msra.mxu1 %v718_v17  ;;  %v113_v17 = vadd.f32 %v786_v10, %v90_v6  ;;  %v144_v20 = vpack.c.bf16 %v135_v13, %v134_v12  ;;  %v530_v10 = vld [vmem:[%s899_s4] ss:$0 sm:$0xff] }
  0x14   :  { %676 = vmatprep.subr.bf16.mxu0 %v719_v32  ;;  %703 = vmatprep.subr.bf16.mxu1 %v719_v32  ;;  %v128_v21 = vmax.f32 %v112_v16, 0.0  ;;  %v136_v23 = vmax.f32 %v120_v18, 0.0  ;;  %v137_v24 = vmax.f32 %v121_v19, 0.0 }
  0x15   :  { %v129_v22 = vmax.f32 %v113_v17, 0.0 }
  0x16   :  { %v145_v26 = vpack.c.bf16 %v137_v24, %v136_v23 }
  0x17   :  { %677 = vmatpush3.bf16.msra.mxu0 %v719_v32  ;;  %711 = vmatpush3.bf16.msra.mxu1 %v719_v32  ;;  %v141_v25 = vpack.c.bf16 %v129_v22, %v128_v21 }
  0x18   :  { %678 = vmatprep.subr.bf16.mxu0 %v720_v48  ;;  %704 = vmatprep.subr.bf16.mxu1 %v720_v48 }
  0x1b   :  { %679 = vmatpush3.bf16.msra.mxu0 %v720_v48  ;;  %712 = vmatpush3.bf16.msra.mxu1 %v720_v48 }
  0x1c   :  { %680 = vmatprep.subr.bf16.mxu0 %v721_v63  ;;  %705 = vmatprep.subr.bf16.mxu1 %v721_v63 }
  0x1f   :  { %681 = vmatpush3.bf16.msra.mxu0 %v721_v63  ;;  %713 = vmatpush3.bf16.msra.mxu1 %v721_v63 }
  0x22   :  { %683 = vmatmul.mubr.bf16.vlgmr.msra.gmra.mrb[0].mxu0 %v139_v14  ;;  %691 = vmatmul.mubr.bf16.vlgmr.msra.gmra.mrb[0].mxu1 %v143_v15 }
  0x23   :  { %686 = vmatprep.mubr.bf16.mxu0 %v140_v5  ;;  %694 = vmatprep.mubr.bf16.mxu1 %v144_v20 }
  0x2a   :  { %687 = vmatmul.mubr.bf16.gmra.mrb[4].mxu0 %v141_v25  ;;  %695 = vmatmul.mubr.bf16.gmra.mrb[4].mxu1 %v145_v26 }
  0xf5   :  { %v684_v27 = vpop.f32.mrb[0].mxu0  ;;  %v692_v29 = vpop.f32.mrb[0].mxu1 }
  0xf6   :  { %v383_v30 = vmul.f32 %v684_v27, %v530_v10  ;;  %v391_v31 = vmul.f32 %v692_v29, %v530_v10  ;;  %v260_v32 = vpop.f32.mrb[1].mxu0  ;;  %v292_v33 = vpop.f32.mrb[1].mxu1 }
  0xf7   :  { %v381_v34 = vmul.f32 %v530_v10, %v260_v32  ;;  %v389_v35 = vmul.f32 %v530_v10, %v292_v33  ;;  %v685_v36 = vpop.f32.mrb[2].mxu0  ;;  %v693_v37 = vpop.f32.mrb[2].mxu1 }
  0xf8   :  { %v406_v38 = vadd.f32 %v853_v28, %v383_v30  ;;  %v414_v39 = vadd.f32 %v853_v28, %v391_v31  ;;  %v384_v40 = vmul.f32 %v685_v36, %v530_v10  ;;  %v392_v41 = vmul.f32 %v693_v37, %v530_v10  ;;  %v263_v42 = vpop.f32.mrb[3].mxu0  ;;  %v295_v43 = vpop.f32.mrb[3].mxu1 }
  0xf9   :  { %v404_v44 = vadd.f32 %v853_v28, %v381_v34  ;;  %v412_v45 = vadd.f32 %v853_v28, %v389_v35  ;;  %v382_v46 = vmul.f32 %v530_v10, %v263_v42  ;;  %v390_v47 = vmul.f32 %v530_v10, %v295_v43 }
  0xfa   :  { %v407_v48 = vadd.f32 %v853_v28, %v384_v40  ;;  %v415_v49 = vadd.f32 %v853_v28, %v392_v41  ;;  %v422_v52 = vmax.f32 %v406_v38, 0.0  ;;  %v430_v53 = vmax.f32 %v414_v39, 0.0 }
  0xfb   :  { %v405_v50 = vadd.f32 %v853_v28, %v382_v46  ;;  %v413_v51 = vadd.f32 %v853_v28, %v390_v47  ;;  %v420_v56 = vmax.f32 %v404_v44, 0.0  ;;  %v428_v57 = vmax.f32 %v412_v45, 0.0 }
  0xfc   :  { %v423_v54 = vmax.f32 %v407_v48, 0.0  ;;  %v431_v55 = vmax.f32 %v415_v49, 0.0 }
  0xfd   :  { %v421_v58 = vmax.f32 %v405_v50, 0.0  ;;  %v429_v59 = vmax.f32 %v413_v51, 0.0  ;;  %v688_v60 = vpop.f32.mrb[4].mxu0  ;;  %v696_v61 = vpop.f32.mrb[4].mxu1 }
  0xfe   :  { %v604_v62 = vpack.c.bf16 %v423_v54, %v422_v52  ;;  %v624_v63 = vpack.c.bf16 %v431_v55, %v430_v53  ;;  %v387_v0 = vmul.f32 %v688_v60, %v530_v10  ;;  %v395_v1 = vmul.f32 %v696_v61, %v530_v10  ;;  %v276_v2 = vpop.f32.mrb[5].mxu0  ;;  %v308_v3 = vpop.f32.mrb[5].mxu1 }
  0xff   :  { %v599_v4 = vpack.c.bf16 %v421_v58, %v420_v56  ;;  %v619_v6 = vpack.c.bf16 %v429_v59, %v428_v57  ;;  %v385_v7 = vmul.f32 %v530_v10, %v276_v2  ;;  %v393_v8 = vmul.f32 %v530_v10, %v308_v3  ;;  %v689_v9 = vpop.f32.mrb[6].mxu0  ;;  %v697_v11 = vpop.f32.mrb[6].mxu1 }
 0x100   :  { %643 = vst [vmem:[%s901_s6 + $0x8] sm:$0xff] %v604_v62   ;;  %647 = vst [vmem:[%s901_s6 + $0x28] sm:$0xff] %v624_v63   ;;  %v410_v12 = vadd.f32 %v853_v28, %v387_v0  ;;  %v418_v13 = vadd.f32 %v853_v28, %v395_v1  ;;  %v388_v14 = vmul.f32 %v689_v9, %v530_v10  ;;  %v279_v16 = vpop.f32.mrb[7].mxu0  ;;  %v311_v17 = vpop.f32.mrb[7].mxu1 }
 0x101   :  { %v396_v15 = vmul.f32 %v697_v11, %v530_v10  ;;  %600 = vst [vmem:[%s901_s6] sm:$0xff] %v599_v4   ;;  %646 = vst [vmem:[%s901_s6 + $0x20] sm:$0xff] %v619_v6   ;;  %v408_v18 = vadd.f32 %v853_v28, %v385_v7  ;;  %v416_v19 = vadd.f32 %v853_v28, %v393_v8 }
 0x102   :  { %v386_v5 = vmul.f32 %v530_v10, %v279_v16  ;;  %v394_v20 = vmul.f32 %v530_v10, %v311_v17  ;;  %v411_v21 = vadd.f32 %v853_v28, %v388_v14  ;;  %v426_v25 = vmax.f32 %v410_v12, 0.0 }
 0x103   :  { %v419_v22 = vadd.f32 %v853_v28, %v396_v15  ;;  %v434_v26 = vmax.f32 %v418_v13, 0.0  ;;  %v424_v30 = vmax.f32 %v408_v18, 0.0  ;;  %v432_v31 = vmax.f32 %v416_v19, 0.0 }
 0x104   :  { %v409_v23 = vadd.f32 %v853_v28, %v386_v5  ;;  %v417_v24 = vadd.f32 %v853_v28, %v394_v20  ;;  %v427_v27 = vmax.f32 %v411_v21, 0.0 }
 0x105   :  { %v435_v29 = vmax.f32 %v419_v22, 0.0 }
 0x106   :  { %v425_v32 = vmax.f32 %v409_v23, 0.0  ;;  %v433_v33 = vmax.f32 %v417_v24, 0.0  ;;  %v614_v34 = vpack.c.bf16 %v427_v27, %v426_v25 }
 0x107   :  { %v634_v35 = vpack.c.bf16 %v435_v29, %v434_v26 }
 0x108   :  { %v609_v36 = vpack.c.bf16 %v425_v32, %v424_v30  ;;  %v629_v10 = vpack.c.bf16 %v433_v33, %v432_v31  ;;  %645 = vst [vmem:[%s901_s6 + $0x18] sm:$0xff] %v614_v34  }
 0x109   :  { %649 = vst [vmem:[%s901_s6 + $0x38] sm:$0xff] %v634_v35  }
 0x10a   :  { %644 = vst [vmem:[%s901_s6 + $0x10] sm:$0xff] %v609_v36   ;;  %648 = vst [vmem:[%s901_s6 + $0x30] sm:$0xff] %v629_v10  }

// kernel: _lambda_.18
= control target key start
LH: loop header
LB: loop body
LE: loop exit
PB: predicated region body
PF: predicated region fallthrough
CT: control target
= control target key end

     0   :  { %s5604_s15 = smov 0   ;;  %s6651_s0 = inlined_call_operand.vmem [shape: bf16[2632,128], index: 0, kind: input, shape index: {}]   ;;  %s6652_s1 = inlined_call_operand.vmem [shape: bf16[9,128,128], index: 1, kind: input, shape index: {}]   ;;  %s6653_s2 = inlined_call_operand.vmem [shape: f32[1,128], index: 2, kind: input, shape index: {}]   ;;  %s6654_s3 = inlined_call_operand.vmem [shape: f32[1,128], index: 3, kind: input, shape index: {}]   ;;  %s6655_s4 = inlined_call_operand.vmem [shape: bf16[2560,128], index: 4, kind: output, shape index: {}]  }
   0x1 LB: > { %s4139_s16 = sadd.s32 4294967295, %s5577_s15   ;;  %p4142_p0 = scmp.ge.s32.totalorder %s5577_s15, 1  ;;  %s5577_s15 = sphi %s5604_s15, %s14_s15  }
   0x2   : > { %p152_p1 = scmp.lt.s32.totalorder %s5577_s15, 11 }
   0x4   : > { %p153_p2 = pnand %p4142_p0, %p152_p1 }
   0x5   : > { %v5461_v0 = vld [vmem:[%s6652_s1] sm:$0xff] (!%p153_p2)   ;;  %v5463_v2 = vld [vmem:[%s6652_s1 + $0x8] sm:$0xff] (!%p153_p2)   ;;  %v5465_v4 = vld [vmem:[%s6652_s1 + $0x10] sm:$0xff] (!%p153_p2)   ;;  %s4145_s29 = sshll.u32 (!%p153_p2), %s4139_s16, 8  ;;  %vm1912_vm0 = vsmask.f32 (!%p153_p2), 6400 }
   0x6   : > { %156 = sbr.rel (%p153_p2) target bundleno = 545 (0x221), region = 36  ;;  %v5462_v1 = vld [vmem:[%s6652_s1 + $0x100] sm:$0xff] (!%p153_p2)   ;;  %4749 = vmatprep.subr.bf16.mxu1 (!%p153_p2), %v5461_v0  ;;  %v5464_v3 = vld [vmem:[%s6652_s1 + $0x108] sm:$0xff] (!%p153_p2)   ;;  %v5466_v5 = vld [vmem:[%s6652_s1 + $0x110] sm:$0xff] (!%p153_p2)   ;;  %s181_s8 = sshra.s32 (!%p153_p2), %s4145_s29, 3  ;;  %vm2333_vm1 = vcmask (!%p153_p2), 1045504  }
   0x7   : > { %4941 = vmatprep.subr.bf16.mxu0 (!%p153_p2), %v5462_v1  ;;  %4750 = vmatpush3.bf16.msra.mxu1 (!%p153_p2), %v5461_v0  ;;  %v5467_v6 = vld [vmem:[%s6652_s1 + $0x18] sm:$0xff] (!%p153_p2)   ;;  %v5469_v8 = vld [vmem:[%s6652_s1 + $0x20] sm:$0xff] (!%p153_p2)   ;;  %s4146_s11 = sshll.u32 (!%p153_p2), %s181_s8, 2  ;;  %v5471_v10 = vld [vmem:[%s6652_s1 + $0x28] sm:$0xff] (!%p153_p2)   ;;  %vm727_vm2 = vsmask.f32 (!%p153_p2), 7424 }
   0x8   : > { %4942 = vmatpush3.bf16.msra.mxu0 (!%p153_p2), %v5462_v1  ;;  %4751 = vmatprep.subr.bf16.mxu1 (!%p153_p2), %v5463_v2  ;;  %v5468_v7 = vld [vmem:[%s6652_s1 + $0x118] sm:$0xff] (!%p153_p2)   ;;  %v5470_v9 = vld [vmem:[%s6652_s1 + $0x120] sm:$0xff] (!%p153_p2)   ;;  %v5472_v11 = vld [vmem:[%s6652_s1 + $0x128] sm:$0xff] (!%p153_p2)   ;;  %s5653_s22 = scalar_lea.vmem (!%p153_p2), %s6651_s0, %s4146_s11  ;;  %vm1198_vm3 = vcmask (!%p153_p2), 1046528   ;;  %vm3047_vm4 = vsmask.f32 (!%p153_p2), 5376 }
   0x9   : > { %4943 = vmatprep.subr.bf16.mxu0 (!%p153_p2), %v5464_v3  ;;  %v5656_v12 = vld [vmem:[%s5653_s22] sm:$0xff] (!%p153_p2)   ;;  %v5473_v13 = vld [vmem:[%s6652_s1 + $0x30] sm:$0xff] (!%p153_p2)   ;;  %v5666_v15 = vld [vmem:[%s5653_s22 + $0x18] sm:$0xff] (!%p153_p2)   ;;  %vm3468_vm5 = vcmask (!%p153_p2), 1044480  }
   0xa   : > { %4765 = vmatprep.mubr.bf16.mxu1 (!%p153_p2), %v5656_v12  ;;  %v5663_v14 = vld [vmem:[%s5653_s22 + $0x10] sm:$0xff] (!%p153_p2)   ;;  %v752_v19 = vshll.u32 (!%p153_p2), %v5666_v15, 16  ;;  %v756_v20 = vshrl.u32 (!%p153_p2), %v5666_v15, 16  ;;  %v5684_v25 = vld [vmem:[%s5653_s22 + $0x20] sm:$0xff] (!%p153_p2)   ;;  %v5475_v26 = vld [vmem:[%s6652_s1 + $0x38] sm:$0xff] (!%p153_p2)  }
   0xb   : > { %4752 = vmatpush3.bf16.msra.mxu1 (!%p153_p2), %v5463_v2  ;;  %v5474_v16 = vld [vmem:[%s6652_s1 + $0x130] sm:$0xff] (!%p153_p2)   ;;  %v744_v17 = vshll.u32 (!%p153_p2), %v5663_v14, 16  ;;  %v748_v18 = vshrl.u32 (!%p153_p2), %v5663_v14, 16  ;;  %v5476_v29 = vld [vmem:[%s6652_s1 + $0x138] sm:$0xff] (!%p153_p2)   ;;  %v5693_v30 = vshll.u32 (!%p153_p2), %v5684_v25, 16  ;;  %v5696_v31 = vshrl.u32 (!%p153_p2), %v5684_v25, 16 }
   0xc   : > { %4944 = vmatpush3.bf16.msra.mxu0 (!%p153_p2), %v5464_v3  ;;  %4753 = vmatprep.subr.bf16.mxu1 (!%p153_p2), %v5465_v4  ;;  %v1916_v23 = vrot.slane (!%p153_p2), %v756_v20, 1  ;;  %v1917_v24 = vrot.slane (!%p153_p2), %v752_v19, 2  ;;  %v5699_v32 = vld [vmem:[%s5653_s22 + $0x28] sm:$0xff] (!%p153_p2)   ;;  %v5481_v34 = vld [vmem:[%s6652_s1 + $0x40] sm:$0xff] (!%p153_p2)   ;;  %v5714_v39 = vld [vmem:[%s5653_s22 + $0x30] sm:$0xff] (!%p153_p2)  }
   0xd   : > { %4945 = vmatprep.subr.bf16.mxu0 %v5466_v5  ;;  %v1913_v21 = vrot.slane %v748_v18, 1  ;;  %v1914_v22 = vrot.slane %v744_v17, 2  ;;  %v1920_v35 = vrot.slane %v5696_v31, 1  ;;  %v1921_v36 = vrot.slane %v5693_v30, 2  ;;  %v5483_v41 = vld [vmem:[%s6652_s1 + $0x140] sm:$0xff]   ;;  %v5725_v45 = vld [vmem:[%s5653_s22 + $0x8] sm:$0xff]  }
   0xe   : > { %v1918_v28 = vor.u32 %v1917_v24, %v1916_v23  ;;  %v5708_v37 = vshll.u32 %v5699_v32, 16  ;;  %v5711_v38 = vshrl.u32 %v5699_v32, 16  ;;  %v5722_v44 = vshll.u32 %v5714_v39, 16  ;;  %v5484_v47 = vld [vmem:[%s6652_s1 + $0x148] sm:$0xff]   ;;  %v5734_v49 = vld [vmem:[%s5653_s22 + $0x38] sm:$0xff]   ;;  %v5751_v57 = vld [vmem:[%s5653_s22 + $0x40] sm:$0xff]  }
   0xf   : > { %4754 = vmatpush3.bf16.msra.mxu1 %v5465_v4  ;;  %v1915_v27 = vor.u32 %v1914_v22, %v1913_v21  ;;  %v1922_v40 = vor.u32 %v1921_v36, %v1920_v35  ;;  %v5728_v46 = vshrl.u32 %v5714_v39, 16  ;;  %v5486_v51 = vld [vmem:[%s6652_s1 + $0x48] sm:$0xff]   ;;  %v5743_v54 = vshll.u32 %v5734_v49, 16  ;;  %v5488_v58 = vld [vmem:[%s6652_s1 + $0x150] sm:$0xff]   ;;  %v5493_v24 = vld [vmem:[%s6652_s1 + $0x160] sm:$0xff]  }
  0x10   : > { %4946 = vmatpush3.bf16.msra.mxu0 %v5466_v5  ;;  %4755 = vmatprep.subr.bf16.mxu1 %v5467_v6  ;;  %v1924_v42 = vrot.slane %v5711_v38, 1  ;;  %v1925_v43 = vrot.slane %v5708_v37, 2  ;;  %v1929_v53 = vrot.slane %v5722_v44, 2  ;;  %v5746_v55 = vshrl.u32 %v5734_v49, 16  ;;  %v5491_v61 = vld [vmem:[%s6652_s1 + $0x50] sm:$0xff]   ;;  %v5769_v2 = vld [vmem:[%s5653_s22 + $0x48] sm:$0xff]  }
  0x11   : > { %4947 = vmatprep.subr.bf16.mxu0 %v5468_v7  ;;  %v1919_v33 = vsel %vm1912_vm0, %v1915_v27, %v1918_v28  ;;  %v1923_v50 = vsel %vm1912_vm0, %v1918_v28, %v1922_v40  ;;  %v1928_v52 = vrot.slane %v5728_v46, 1  ;;  %v1933_v60 = vrot.slane %v5743_v54, 2  ;;  %v5500_v27 = vld [vmem:[%s6652_s1 + $0x60] sm:$0xff]   ;;  %v5503_v36 = vld [vmem:[%s6652_s1 + $0x68] sm:$0xff]  }
  0x12   : > { %4957 = vmatprep.mubr.bf16.mxu0 %v1919_v33  ;;  %v1926_v48 = vor.u32 %v1925_v43, %v1924_v42  ;;  %v1932_v59 = vrot.slane %v5746_v55, 1  ;;  %v5763_v63 = vshll.u32 %v5751_v57, 16  ;;  %v5766_v0 = vshrl.u32 %v5751_v57, 16  ;;  %v5498_v43 = vld [vmem:[%s6652_s1 + $0x170] sm:$0xff]  }
  0x13   : > { %4756 = vmatpush3.bf16.msra.mxu1 %v5467_v6  ;;  %v1930_v62 = vor.u32 %v1929_v53, %v1928_v52  ;;  %v5773_v4 = vshll.u32 %v5769_v2, 16  ;;  %v5776_v5 = vshrl.u32 %v5769_v2, 16  ;;  %v2335_v42 = vrot.slane %v5666_v15, 2  ;;  %v5511_v53 = vld [vmem:[%s6652_s1 + $0x78] sm:$0xff]  }
  0x14   : > { %4948 = vmatpush3.bf16.msra.mxu0 %v5468_v7  ;;  %4757 = vmatprep.subr.bf16.mxu1 %v5469_v8  ;;  %v1927_v56 = vsel %vm1912_vm0, %v1922_v40, %v1926_v48  ;;  %v1934_v1 = vor.u32 %v1933_v60, %v1932_v59  ;;  %v1936_v3 = vrot.slane %v5766_v0, 1  ;;  %v1937_v7 = vrot.slane %v5763_v63, 2 }
  0x15   : > { %4949 = vmatprep.subr.bf16.mxu0 %v5470_v9  ;;  %v1931_v6 = vsel %vm1912_vm0, %v1926_v48, %v1930_v62  ;;  %v5507_v48 = vld [vmem:[%s6652_s1 + $0x70] sm:$0xff]   ;;  %v770_v60 = vrot.slane %v5708_v37, 1 }
  0x16   : > { %v1938_v21 = vor.u32 %v1937_v7, %v1936_v3  ;;  %v2339_v3 = vrot.slane %v5699_v32, 2  ;;  %v786_v7 = vrot.slane %v5743_v54, 1 }
  0x17   : > { %4758 = vmatpush3.bf16.msra.mxu1 %v5469_v8  ;;  %v5781_v8 = vld [vmem:[%s5653_s22 + $0x50] sm:$0xff]  }
  0x18   : > { %4950 = vmatpush3.bf16.msra.mxu0 %v5470_v9  ;;  %4759 = vmatprep.subr.bf16.mxu1 %v5471_v10  ;;  %v5489_v9 = vld [vmem:[%s6652_s1 + $0x158] sm:$0xff]   ;;  %v5795_v22 = vshll.u32 %v5781_v8, 16  ;;  %v5798_v23 = vshrl.u32 %v5781_v8, 16  ;;  %v1939_v28 = vsel %vm1912_vm0, %v1934_v1, %v1938_v21 }
  0x19   : > { %4951 = vmatprep.subr.bf16.mxu0 %v5472_v11 }
  0x1a   : > { %v1945_v33 = vrot.slane %v5795_v22, 2 }
  0x1b   : > { %4760 = vmatpush3.bf16.msra.mxu1 %v5471_v10  ;;  %v1935_v10 = vsel %vm1912_vm0, %v1930_v62, %v1934_v1  ;;  %v778_v62 = vrot.slane %v5722_v44, 1  ;;  %v5501_v1 = vld [vmem:[%s6652_s1 + $0x180] sm:$0xff]  }
  0x1c   : > { %4952 = vmatpush3.bf16.msra.mxu0 %v5472_v11  ;;  %4761 = vmatprep.subr.bf16.mxu1 %v5473_v13  ;;  %v1940_v11 = vrot.slane %v5776_v5, 1 }
  0x1d   : > { %4953 = vmatprep.subr.bf16.mxu0 %v5474_v16 }
  0x1f   : > { %4762 = vmatpush3.bf16.msra.mxu1 %v5473_v13  ;;  %v1941_v13 = vrot.slane %v5773_v4, 2 }
  0x20   : > { %4954 = vmatpush3.bf16.msra.mxu0 %v5474_v16  ;;  %4763 = vmatprep.subr.bf16.mxu1 %v5475_v26  ;;  %v5496_v16 = vld [vmem:[%s6652_s1 + $0x58] sm:$0xff]  }
  0x21   : > { %4955 = vmatprep.subr.bf16.mxu0 %v5476_v29 }
  0x23   : > { %4764 = vmatpush3.bf16.msra.mxu1 %v5475_v26  ;;  %v1942_v26 = vor.u32 %v1941_v13, %v1940_v11  ;;  %v790_v11 = vor.u32 %v5746_v55, %v786_v7  ;;  %v794_v13 = vrot.slane %v5763_v63, 1 }
  0x24   : > { %4956 = vmatpush3.bf16.msra.mxu0 %v5476_v29  ;;  %4797 = vmatprep.subr.bf16.mxu1 %v5481_v34  ;;  %v1944_v29 = vrot.slane %v5798_v23, 1 }
  0x25   : > { %4989 = vmatprep.subr.bf16.mxu0 %v5483_v41  ;;  %v1943_v35 = vsel %vm1912_vm0, %v1938_v21, %v1942_v26 }
  0x26   : > { %4766 = vmatmul.mubr.bf16.vlgmr.msra.gmra.mrb[0].mxu1 %v5725_v45  ;;  %v5818_v40 = vor.u32 %v1945_v33, %v1944_v29  ;;  %v802_v29 = vrot.slane %v5773_v4, 1  ;;  %v810_v33 = vrot.slane %v5795_v22, 1 }
  0x27   : > { %4958 = vmatmul.mubr.bf16.vlgmr.msra.gmra.mrb[0].mxu0 %v1923_v50  ;;  %4798 = vmatpush3.bf16.msra.mxu1 %v5481_v34  ;;  %v5494_v34 = vld [vmem:[%s6652_s1 + $0x168] sm:$0xff]  }
  0x28   : > { %4990 = vmatpush3.bf16.msra.mxu0 %v5483_v41  ;;  %4769 = vmatprep.mubr.bf16.mxu1 %v5663_v14  ;;  %v2334_v41 = vrot.slane %v5663_v14, 2 }
  0x29   : > { %4991 = vmatprep.subr.bf16.mxu0 %v5484_v47  ;;  %4961 = vmatprep.mubr.bf16.mxu0 %v1927_v56  ;;  %v754_v56 = vrot.slane %v752_v19, 1  ;;  %v2337_v19 = vrot.slane %v5684_v25, 2 }
  0x2a   : > { %4799 = vmatprep.subr.bf16.mxu1 %v5486_v51  ;;  %v2336_v52 = vsel %vm2333_vm1, %v2334_v41, %v2335_v42  ;;  %v5907_v41 = vor.u32 %v5798_v23, %v810_v33 }
  0x2b   : > { %4800 = vmatpush3.bf16.msra.mxu1 %v5486_v51  ;;  %v1947_v51 = vsel %vm1912_vm0, %v1942_v26, %v5818_v40  ;;  %v758_v59 = vor.u32 %v756_v20, %v754_v56  ;;  %v5504_v26 = vld [vmem:[%s6652_s1 + $0x188] sm:$0xff]  }
  0x2c   : > { %4992 = vmatpush3.bf16.msra.mxu0 %v5484_v47  ;;  %4801 = vmatprep.subr.bf16.mxu1 %v5491_v61  ;;  %v5827_v47 = vrot.slane %v744_v17, 1  ;;  %v5499_v17 = vld [vmem:[%s6652_s1 + $0x178] sm:$0xff]  }
  0x2d   : > { %4993 = vmatprep.subr.bf16.mxu0 %v5488_v58 }
  0x2e   : > { %4770 = vmatmul.mubr.bf16.gmra.mrb[4].mxu1 %v5666_v15  ;;  %v750_v50 = vor.u32 %v748_v18, %v5827_v47  ;;  %v762_v18 = vrot.slane %v5693_v30, 1 }
  0x2f   : > { %4962 = vmatmul.mubr.bf16.gmra.mrb[4].mxu0 %v1931_v6  ;;  %4773 = vmatprep.mubr.bf16.mxu1 %v5684_v25  ;;  %v774_v6 = vor.u32 %v5711_v38, %v770_v60  ;;  %v5870_v25 = vld [vmem:[%s6652_s1 + $0x80] sm:$0xff]  }
  0x30   : > { %4994 = vmatpush3.bf16.msra.mxu0 %v5488_v58  ;;  %4965 = vmatprep.mubr.bf16.mxu0 %v1935_v10  ;;  %v5850_v58 = vsel %vm727_vm2, %v750_v50, %v754_v56  ;;  %v5863_v20 = vsel %vm727_vm2, %v758_v59, %v762_v18  ;;  %v782_v10 = vor.u32 %v5728_v46, %v778_v62  ;;  %v2345_v56 = vrot.slane %v5751_v57, 2 }
  0x31   : > { %4995 = vmatprep.subr.bf16.mxu0 %v5489_v9  ;;  %4802 = vmatpush3.bf16.msra.mxu1 %v5491_v61  ;;  %v766_v61 = vor.u32 %v5696_v31, %v762_v18  ;;  %v2347_v18 = vrot.slane %v5769_v2, 2  ;;  %v1199_v59 = vrot.slane %v5656_v12, 1 }
  0x32   : > { %4803 = vmatprep.subr.bf16.mxu1 %v5496_v16  ;;  %v5883_v21 = vsel %vm727_vm2, %v782_v10, %v786_v7 }
  0x34   : > { %4996 = vmatpush3.bf16.msra.mxu0 %v5489_v9  ;;  %v5873_v9 = vsel %vm727_vm2, %v766_v61, %v770_v60  ;;  %v5941_v60 = vld [vmem:[%s5653_s22 + $0x68] sm:$0xff]   ;;  %v1200_v61 = vrot.slane %v5725_v45, 1 }
  0x35   : > { %4997 = vmatprep.subr.bf16.mxu0 %v5493_v24  ;;  %4804 = vmatpush3.bf16.msra.mxu1 %v5496_v16  ;;  %v2338_v16 = vsel %vm2333_vm1, %v2335_v42, %v2337_v19  ;;  %v2343_v42 = vrot.slane %v5734_v49, 2 }
  0x36   : > { %4774 = vmatmul.mubr.bf16.gmra.mrb[8].mxu1 %v5699_v32  ;;  %4805 = vmatprep.subr.bf16.mxu1 %v5500_v27  ;;  %v5877_v32 = vsel %vm727_vm2, %v774_v6, %v778_v62  ;;  %v1202_v62 = vrot.slane %v5663_v14, 1  ;;  %v5956_v6 = vsel %vm1198_vm3, %v1199_v59, %v1200_v61  ;;  %v736_v14 = vshll.u32 %v5725_v45, 16 }
  0x37   : > { %4966 = vmatmul.mubr.bf16.gmra.mrb[8].mxu0 %v1939_v28  ;;  %4777 = vmatprep.mubr.bf16.mxu1 %v5714_v39  ;;  %v798_v28 = vor.u32 %v5766_v0, %v794_v13  ;;  %v5962_v10 = vsel %vm2333_vm1, %v2343_v42, %v2345_v56 }
  0x38   : > { %4998 = vmatpush3.bf16.msra.mxu0 %v5493_v24  ;;  %4969 = vmatprep.mubr.bf16.mxu0 %v1943_v35  ;;  %v5886_v24 = vsel %vm2333_vm1, %v2337_v19, %v2339_v3  ;;  %v5514_v19 = vld [vmem:[%s6652_s1 + $0x1a0] sm:$0xff]   ;;  %v5959_v7 = vsel %vm1198_vm3, %v1200_v61, %v1202_v62  ;;  %v3048_v61 = vrot.slane %v5696_v31, 2  ;;  %v3055_v31 = vrot.slane %v5728_v46, 2 }
  0x39   : > { %4999 = vmatprep.subr.bf16.mxu0 %v5494_v34  ;;  %4806 = vmatpush3.bf16.msra.mxu1 %v5500_v27  ;;  %v5892_v27 = vsel %vm727_vm2, %v790_v11, %v794_v13  ;;  %v5903_v35 = vsel %vm727_vm2, %v798_v28, %v802_v29  ;;  %v5966_v11 = vld [vmem:[%s5653_s22 + $0x88] sm:$0xff]   ;;  %v222_v28 = vld [vmem:[%s5653_s22 + $0x94] sm:$0xf]  ;;  %v3063_v46 = vrot.slane %v5766_v0, 2 }
  0x3a   : > { %4807 = vmatprep.subr.bf16.mxu1 %v5503_v36 }
  0x3c   : > { %5000 = vmatpush3.bf16.msra.mxu0 %v5494_v34  ;;  %v2341_v34 = vrot.slane %v5714_v39, 2  ;;  %v5920_v39 = vld [vmem:[%s5653_s22 + $0x60] sm:$0xff]  }
  0x3d   : > { %5001 = vmatprep.subr.bf16.mxu0 %v5498_v43  ;;  %4808 = vmatpush3.bf16.msra.mxu1 %v5503_v36  ;;  %v806_v36 = vor.u32 %v5776_v5, %v802_v29  ;;  %v2349_v29 = vrot.slane %v5781_v8, 2 }
  0x3e   : > { %4778 = vmatmul.mubr.bf16.gmra.mrb[12].mxu1 %v5734_v49  ;;  %4809 = vmatprep.subr.bf16.mxu1 %v5507_v48  ;;  %v5512_v49 = vld [vmem:[%s6652_s1 + $0x198] sm:$0xff]  }
  0x3f   : > { %4970 = vmatmul.mubr.bf16.gmra.mrb[12].mxu0 %v1947_v51  ;;  %4781 = vmatprep.mubr.bf16.mxu1 %v5751_v57  ;;  %v5917_v50 = vsel %vm727_vm2, %v806_v36, %v810_v33  ;;  %v5923_v51 = vsel %vm2333_vm1, %v2339_v3, %v2341_v34  ;;  %v5949_v57 = vld [vmem:[%s5653_s22 + $0x70] sm:$0xff]   ;;  %v738_v36 = vrot.slane %v736_v14, 1  ;;  %v6000_v59 = vsel %vm2333_vm1, %v2347_v18, %v2349_v29 }
  0x40   : > { %5002 = vmatpush3.bf16.msra.mxu0 %v5498_v43  ;;  %5005 = vmatprep.mubr.bf16.mxu0 %v2336_v52  ;;  %v5508_v43 = vld [vmem:[%s6652_s1 + $0x190] sm:$0xff]   ;;  %v729_v52 = vshrl.u32 %v5656_v12, 16  ;;  %v3051_v14 = vrot.slane %v5711_v38, 2 }
  0x41   : > { %5003 = vmatprep.subr.bf16.mxu0 %v5499_v17  ;;  %4810 = vmatpush3.bf16.msra.mxu1 %v5507_v48  ;;  %v5914_v48 = vld [vmem:[%s5653_s22 + $0x58] sm:$0xff]  }
  0x42   : > { %4811 = vmatprep.subr.bf16.mxu1 %v5511_v53 }
  0x44   : > { %5004 = vmatpush3.bf16.msra.mxu0 %v5499_v17  ;;  %v5926_v17 = vsel %vm2333_vm1, %v2341_v34, %v2343_v42  ;;  %v2351_v42 = vrot.slane %v5914_v48, 2 }
  0x45   : > { %5037 = vmatprep.subr.bf16.mxu0 %v5501_v1  ;;  %4812 = vmatpush3.bf16.msra.mxu1 %v5511_v53  ;;  %v731_v53 = vshll.u32 %v5656_v12, 16  ;;  %v5516_v12 = vld [vmem:[%s6652_s1 + $0x1a8] sm:$0xff]  }
  0x46   : > { %4782 = vmatmul.mubr.bf16.gmra.mrb[16].mxu1 %v5769_v2  ;;  %4845 = vmatprep.subr.bf16.mxu1 %v5870_v25 }
  0x47   : > { %5006 = vmatmul.mubr.bf16.vlgmr.msra.gmra.mrb[0].mxu0 %v2338_v16  ;;  %4785 = vmatprep.mubr.bf16.mxu1 %v5781_v8  ;;  %v733_v3 = vrot.slane %v731_v53, 1  ;;  %v5974_v16 = vsel %vm2333_vm1, %v2345_v56, %v2347_v18  ;;  %v5997_v56 = vld [vmem:[%s5653_s22 + $0x78] sm:$0xff]   ;;  %v3049_v18 = vrot.slane %v5693_v30, 3 }
  0x48   : > { %5038 = vmatpush3.bf16.msra.mxu0 %v5501_v1  ;;  %5009 = vmatprep.mubr.bf16.mxu0 %v5886_v24  ;;  %v6657_v1 = vrot.slane %v5666_v15, 1 }
  0x49   : > { %5039 = vmatprep.subr.bf16.mxu0 %v5504_v26  ;;  %v734_v34 = vor.u32 %v733_v3, %v729_v52  ;;  %v740_v52 = vshrl.u32 %v5725_v45, 16  ;;  %v5523_v3 = vld [vmem:[%s6652_s1 + $0x1b8] sm:$0xff]   ;;  %v3052_v45 = vrot.slane %v5708_v37, 3  ;;  %v2353_v37 = vrot.slane %v5920_v39, 2 }
  0x4a   : > { %v5971_v13 = vsel %vm1198_vm3, %v1202_v62, %v6657_v1  ;;  %v3059_v1 = vrot.slane %v5746_v55, 2  ;;  %v2355_v55 = vrot.slane %v5941_v60, 2 }
  0x4b   : > { %v739_v62 = vsel %vm727_vm2, %v734_v34, %v738_v36  ;;  %v3056_v34 = vrot.slane %v5722_v44, 3  ;;  %v742_v30 = vor.u32 %v740_v52, %v738_v36  ;;  %v6037_v36 = vld [vmem:[%s6652_s1 + $0x1c0] sm:$0xff]  }
  0x4c   : > { %5040 = vmatpush3.bf16.msra.mxu0 %v5504_v26  ;;  %v5977_v26 = vld [vmem:[%s5653_s22 + $0x90] sm:$0xf] }
  0x4d   : > { %5041 = vmatprep.subr.bf16.mxu0 %v5508_v43  ;;  %v5985_v33 = vcombine.low %v5977_v26, %v222_v28  ;;  %v6018_v28 = vsel %vm2333_vm1, %v2349_v29, %v2351_v42  ;;  %v3057_v38 = vor.u32 %v3056_v34, %v3055_v31  ;;  %v3060_v29 = vrot.slane %v5743_v54, 3  ;;  %v5517_v34 = vld [vmem:[%s6652_s1 + $0x90] sm:$0xff]  }
  0x4e   : > { %4786 = vmatmul.mubr.bf16.gmra.mrb[20].mxu1 %v5914_v48  ;;  %v6052_v31 = vsel %vm2333_vm1, %v2351_v42, %v2353_v37 }
  0x4f   : > { %5010 = vmatmul.mubr.bf16.gmra.mrb[4].mxu0 %v5923_v51  ;;  %4789 = vmatprep.mubr.bf16.mxu1 %v5920_v39  ;;  %v6656_v53 = vrot.slane %v5985_v33, 2  ;;  %v3061_v52 = vor.u32 %v3060_v29, %v3059_v1 }
  0x50   : > { %5013 = vmatprep.mubr.bf16.mxu0 %v5926_v17  ;;  %5042 = vmatpush3.bf16.msra.mxu0 %v5508_v43  ;;  %v5519_v43 = vld [vmem:[%s6652_s1 + $0x1b0] sm:$0xff]  }
  0x51   : > { %5043 = vmatprep.subr.bf16.mxu0 %v5512_v49  ;;  %v6047_v0 = vsel %vm3047_vm4, %v3057_v38, %v3061_v52 }
  0x54   : > { %5044 = vmatpush3.bf16.msra.mxu0 %v5512_v49  ;;  %v5993_v49 = vrot.slane %v5966_v11, 2 }
  0x55   : > { %5045 = vmatprep.subr.bf16.mxu0 %v5514_v19 }
  0x56   : > { %4790 = vmatmul.mubr.bf16.gmra.mrb[24].mxu1 %v5941_v60 }
  0x57   : > { %5014 = vmatmul.mubr.bf16.gmra.mrb[8].mxu0 %v5962_v10  ;;  %4793 = vmatprep.mubr.bf16.mxu1 %v5949_v57 }
  0x58   : > { %5017 = vmatprep.mubr.bf16.mxu0 %v5974_v16  ;;  %5046 = vmatpush3.bf16.msra.mxu0 %v5514_v19  ;;  %v6007_v19 = vsel %vm2333_vm1, %v5993_v49, %v6656_v53  ;;  %v3053_v53 = vor.u32 %v3052_v45, %v3051_v14  ;;  %v3071_v14 = vrot.slane %v5798_v23, 2  ;;  %v3072_v45 = vrot.slane %v5795_v22, 3 }
  0x59   : > { %5047 = vmatprep.subr.bf16.mxu0 %v5516_v12 }
  0x5a   : > { %v6040_v54 = vsel %vm3047_vm4, %v3053_v53, %v3057_v38  ;;  %v6064_v22 = vor.u32 %v3072_v45, %v3071_v14  ;;  %v5521_v38 = vld [vmem:[%s6652_s1 + $0x98] sm:$0xff]   ;;  %v5527_v14 = vld [vmem:[%s6652_s1 + $0x1c8] sm:$0xff]  }
  0x5c   : > { %5048 = vmatpush3.bf16.msra.mxu0 %v5516_v12  ;;  %v3050_v12 = vor.u32 %v3049_v18, %v3048_v61  ;;  %v3064_v61 = vrot.slane %v5763_v63, 3  ;;  %v3068_v18 = vrot.slane %v5773_v4, 3  ;;  %v747_v63 = vsel %vm727_vm2, %v742_v30, %v5827_v47  ;;  %v5515_v47 = vld [vmem:[%s6652_s1 + $0x88] sm:$0xff]  }
  0x5d   : > { %5049 = vmatprep.subr.bf16.mxu0 %v5519_v43  ;;  %v6058_v4 = vsel %vm2333_vm1, %v2353_v37, %v2355_v55 }
  0x5e   : > { %4794 = vmatmul.mubr.bf16.gmra.mrb[28].mxu1 %v5997_v56  ;;  %v6029_v44 = vsel %vm3047_vm4, %v3050_v12, %v3053_v53  ;;  %v2357_v53 = vrot.slane %v5949_v57, 2  ;;  %v6083_v12 = vld [vmem:[%s5653_s22 + $0x80] sm:$0xf] }
  0x5f   : > { %5018 = vmatmul.mubr.bf16.gmra.mrb[12].mxu0 %v6000_v59  ;;  %4813 = vmatprep.mubr.bf16.mxu1 %v739_v62  ;;  %v3067_v62 = vrot.slane %v5776_v5, 2 }
  0x60   : > { %5021 = vmatprep.mubr.bf16.mxu0 %v6018_v28  ;;  %5050 = vmatpush3.bf16.msra.mxu0 %v5519_v43  ;;  %v3065_v43 = vor.u32 %v3064_v61, %v3063_v46  ;;  %v6087_v30 = vsel %vm2333_vm1, %v2355_v55, %v2357_v53  ;;  %v5524_v46 = vld [vmem:[%s6652_s1 + $0xa0] sm:$0xff]   ;;  %v5526_v55 = vld [vmem:[%s6652_s1 + $0xa8] sm:$0xff]  }
  0x61   : > { %5051 = vmatprep.subr.bf16.mxu0 %v5523_v3  ;;  %v3069_v5 = vor.u32 %v3068_v18, %v3067_v62  ;;  %v6131_v62 = vshll.u32 %v5914_v48, 16  ;;  %v6146_v18 = vshll.u32 %v5920_v39, 16 }
  0x62   : > { %v6055_v1 = vsel %vm3047_vm4, %v3061_v52, %v3065_v43  ;;  %v5528_v52 = vld [vmem:[%s6652_s1 + $0xb0] sm:$0xff]  }
  0x63   : > { %v6067_v23 = vsel %vm3047_vm4, %v3065_v43, %v3069_v5  ;;  %v6073_v42 = vsel %vm3047_vm4, %v3069_v5, %v6064_v22  ;;  %v826_v45 = vrot.slane %v6146_v18, 1 }
  0x64   : > { %5052 = vmatpush3.bf16.msra.mxu0 %v5523_v3  ;;  %v2359_v3 = vrot.slane %v5997_v56, 2 }
  0x65   : > { %5085 = vmatprep.subr.bf16.mxu0 %v6037_v36 }
  0x66   : > { %4814 = vmatmul.mubr.bf16.vlgmr.msra.gmra.mrb[0].mxu1 %v747_v63  ;;  %v6093_v37 = vsel %vm2333_vm1, %v2357_v53, %v2359_v3  ;;  %v6149_v63 = vshrl.u32 %v5914_v48, 16  ;;  %v6175_v53 = vshll.u32 %v5949_v57, 16 }
  0x67   : > { %5022 = vmatmul.mubr.bf16.gmra.mrb[16].mxu0 %v6052_v31  ;;  %4846 = vmatpush3.bf16.msra.mxu1 %v5870_v25  ;;  %v218_v25 = vld [vmem:[%s5653_s22 + $0x84] sm:$0xf] }
  0x68   : > { %4817 = vmatprep.mubr.bf16.mxu1 %v5850_v58  ;;  %5025 = vmatprep.mubr.bf16.mxu0 %v6058_v4  ;;  %v6090_v58 = vcombine.low %v6083_v12, %v218_v25  ;;  %v5532_v25 = vld [vmem:[%s6652_s1 + $0x1d8] sm:$0xff]  }
  0x69   : > { %4847 = vmatprep.subr.bf16.mxu1 %v5515_v47 }
  0x6a   : > { %v2361_v29 = vrot.slane %v6090_v58, 2 }
  0x6b   : > { %4848 = vmatpush3.bf16.msra.mxu1 %v5515_v47 }
  0x6c   : > { %4849 = vmatprep.subr.bf16.mxu1 %v5517_v34  ;;  %v6107_v61 = vsel %vm2333_vm1, %v2359_v3, %v2361_v29  ;;  %v6179_v3 = vshrl.u32 %v5941_v60, 16 }
  0x6e   : > { %4818 = vmatmul.mubr.bf16.gmra.mrb[4].mxu1 %v5863_v20  ;;  %v6111_v20 = vcombine.low %v5977_v26, %v5977_v26 }
  0x6f   : > { %5026 = vmatmul.mubr.bf16.gmra.mrb[20].mxu0 %v6087_v30  ;;  %4821 = vmatprep.mubr.bf16.mxu1 %v5873_v9  ;;  %v6115_v9 = vsel %vm2333_vm1, %v2361_v29, %v5993_v49 }
  0x70   : > { %5029 = vmatprep.mubr.bf16.mxu0 %v6093_v37  ;;  %4850 = vmatpush3.bf16.msra.mxu1 %v5517_v34  ;;  %v2365_v26 = vrot.slane %v6111_v20, 2  ;;  %v6186_v34 = vshll.u32 %v5997_v56, 16 }
  0x71   : > { %4851 = vmatprep.subr.bf16.mxu1 %v5521_v38 }
  0x72   : > { %v2366_v43 = vsel %vm2333_vm1, %v5993_v49, %v2365_v26  ;;  %v6143_v49 = vld [vmem:[%s6652_s1 + $0xc0] sm:$0xff]   ;;  %v850_v26 = vrot.slane %v6186_v34, 1 }
  0x74   : > { %4852 = vmatpush3.bf16.msra.mxu1 %v5521_v38  ;;  %v842_v38 = vrot.slane %v6175_v53, 1 }
  0x75   : > { %4853 = vmatprep.subr.bf16.mxu1 %v5524_v46 }
  0x76   : > { %4822 = vmatmul.mubr.bf16.gmra.mrb[8].mxu1 %v5877_v32  ;;  %v5531_v32 = vld [vmem:[%s6652_s1 + $0xb8] sm:$0xff]  }
  0x77   : > { %5030 = vmatmul.mubr.bf16.gmra.mrb[24].mxu0 %v6107_v61  ;;  %4825 = vmatprep.mubr.bf16.mxu1 %v5883_v21  ;;  %v818_v21 = vrot.slane %v6131_v62, 1 }
  0x78   : > { %5033 = vmatprep.mubr.bf16.mxu0 %v6115_v9  ;;  %4854 = vmatpush3.bf16.msra.mxu1 %v5524_v46  ;;  %v6196_v46 = vcombine.low %v6083_v12, %v6083_v12 }
  0x79   : > { %4855 = vmatprep.subr.bf16.mxu1 %v5526_v55 }
  0x7a   : > { %v856_v12 = vshll.u32 %v6196_v46, 16 }
  0x7c   : > { %4856 = vmatpush3.bf16.msra.mxu1 %v5526_v55 }
  0x7d   : > { %4857 = vmatprep.subr.bf16.mxu1 %v5528_v52 }
  0x7e   : > { %4826 = vmatmul.mubr.bf16.gmra.mrb[12].mxu1 %v5892_v27  ;;  %v819_v27 = vsel %vm727_vm2, %v5907_v41, %v818_v21  ;;  %v822_v41 = vor.u32 %v6149_v63, %v818_v21 }
  0x7f   : > { %5034 = vmatmul.mubr.bf16.gmra.mrb[28].mxu0 %v2366_v43  ;;  %4829 = vmatprep.mubr.bf16.mxu1 %v5903_v35  ;;  %v6157_v35 = vshll.u32 %v5941_v60, 16  ;;  %v6206_v43 = vshrl.u32 %v5997_v56, 16 }
  0x80   : > { %5053 = vmatprep.mubr.bf16.mxu0 %v5886_v24  ;;  %4858 = vmatpush3.bf16.msra.mxu1 %v5528_v52  ;;  %v6154_v24 = vshrl.u32 %v5920_v39, 16  ;;  %v5534_v52 = vld [vmem:[%s6652_s1 + $0x1e0] sm:$0xff]  }
  0x81   : > { %4859 = vmatprep.subr.bf16.mxu1 %v5531_v32  ;;  %v834_v47 = vrot.slane %v6157_v35, 1  ;;  %v854_v21 = vor.u32 %v6206_v43, %v850_v26 }
  0x82   : > { %v830_v5 = vor.u32 %v6154_v24, %v826_v45 }
  0x83   : > { %v838_v29 = vor.u32 %v6179_v3, %v834_v47 }
  0x84   : > { %4860 = vmatpush3.bf16.msra.mxu1 %v5531_v32 }
  0x85   : > { %4893 = vmatprep.subr.bf16.mxu1 %v6143_v49 }
  0x86   : > { %4830 = vmatmul.mubr.bf16.gmra.mrb[16].mxu1 %v5917_v50  ;;  %v5529_v50 = vld [vmem:[%s6652_s1 + $0x1d0] sm:$0xff]  }
  0x87   : > { %5054 = vmatmul.mubr.bf16.vlgmr.msra.gmra.mrb[0].mxu0 %v5923_v51  ;;  %4833 = vmatprep.mubr.bf16.mxu1 %v819_v27  ;;  %v827_v51 = vsel %vm727_vm2, %v822_v41, %v826_v45  ;;  %v858_v27 = vrot.slane %v856_v12, 1  ;;  %v5535_v41 = vld [vmem:[%s6652_s1 + $0xc8] sm:$0xff]   ;;  %v6300_v12 = vld [vmem:[%s5653_s22 + $0x40] sm:$0xff]  }
  0x88   : > { %5086 = vmatpush3.bf16.msra.mxu0 %v6037_v36  ;;  %5057 = vmatprep.mubr.bf16.mxu0 %v5926_v17  ;;  %v835_v17 = vsel %vm727_vm2, %v830_v5, %v834_v47  ;;  %v6183_v36 = vshrl.u32 %v5949_v57, 16 }
  0x89   : > { %5087 = vmatprep.subr.bf16.mxu0 %v5527_v14  ;;  %v859_v45 = vsel %vm727_vm2, %v854_v21, %v858_v27  ;;  %v1216_v21 = vrot.slane %v5769_v2, 1  ;;  %v5548_v27 = vld [vmem:[%s6652_s1 + $0xf0] sm:$0xff]   ;;  %v5550_v2 = vld [vmem:[%s6652_s1 + $0xf8] sm:$0xff]  }
  0x8a   : > { %v846_v55 = vor.u32 %v6183_v36, %v842_v38 }
  0x8c   : > { %5088 = vmatpush3.bf16.msra.mxu0 %v5527_v14  ;;  %v851_v32 = vsel %vm727_vm2, %v846_v55, %v850_v26  ;;  %v5539_v14 = vld [vmem:[%s6652_s1 + $0x1f0] sm:$0xff]   ;;  %v6659_v26 = vrot.slane %v5985_v33, 2 }
  0x8d   : > { %5089 = vmatprep.subr.bf16.mxu0 %v5529_v50 }
  0x8e   : > { %4834 = vmatmul.mubr.bf16.gmra.mrb[20].mxu1 %v827_v51 }
  0x8f   : > { %5058 = vmatmul.mubr.bf16.gmra.mrb[4].mxu0 %v5962_v10  ;;  %4837 = vmatprep.mubr.bf16.mxu1 %v835_v17  ;;  %v843_v10 = vsel %vm727_vm2, %v838_v29, %v842_v38  ;;  %v6274_v17 = vld [vmem:[%s5653_s22 + $0x38] sm:$0xff]  }
  0x90   : > { %5061 = vmatprep.mubr.bf16.mxu0 %v5974_v16  ;;  %5090 = vmatpush3.bf16.msra.mxu0 %v5529_v50  ;;  %v5536_v16 = vld [vmem:[%s6652_s1 + $0x1e8] sm:$0xff]   ;;  %v5541_v50 = vld [vmem:[%s6652_s1 + $0xd8] sm:$0xff]  }
  0x91   : > { %5091 = vmatprep.subr.bf16.mxu0 %v5532_v25 }
  0x94   : > { %5092 = vmatpush3.bf16.msra.mxu0 %v5532_v25  ;;  %v1212_v25 = vrot.slane %v6274_v17, 1 }
  0x95   : > { %5093 = vmatprep.subr.bf16.mxu0 %v5534_v52 }
  0x96   : > { %4838 = vmatmul.mubr.bf16.gmra.mrb[24].mxu1 %v843_v10  ;;  %v5546_v10 = vld [vmem:[%s6652_s1 + $0xe8] sm:$0xff]  }
  0x97   : > { %5062 = vmatmul.mubr.bf16.gmra.mrb[8].mxu0 %v6000_v59  ;;  %4841 = vmatprep.mubr.bf16.mxu1 %v851_v32  ;;  %v5543_v59 = vld [vmem:[%s6652_s1 + $0x1f8] sm:$0xff]   ;;  %v1214_v32 = vrot.slane %v6300_v12, 1 }
  0x98   : > { %5065 = vmatprep.mubr.bf16.mxu0 %v6018_v28  ;;  %5094 = vmatpush3.bf16.msra.mxu0 %v5534_v52  ;;  %v6229_v28 = vld [vmem:[%s6652_s1 + $0x200] sm:$0xff]  }
  0x99   : > { %5095 = vmatprep.subr.bf16.mxu0 %v5536_v16 }
  0x9c   : > { %5096 = vmatpush3.bf16.msra.mxu0 %v5536_v16 }
  0x9d   : > { %5097 = vmatprep.subr.bf16.mxu0 %v5539_v14 }
  0x9e   : > { %4842 = vmatmul.mubr.bf16.gmra.mrb[28].mxu1 %v859_v45  ;;  %v6313_v45 = vsel %vm1198_vm3, %v1214_v32, %v1216_v21 }
  0x9f   : > { %5066 = vmatmul.mubr.bf16.gmra.mrb[12].mxu0 %v6052_v31  ;;  %4861 = vmatprep.mubr.bf16.mxu1 %v5956_v6  ;;  %v6239_v6 = vld [vmem:[%s5653_s22 + $0x20] sm:$0xff]  }
  0xa0   : > { %5069 = vmatprep.mubr.bf16.mxu0 %v6058_v4  ;;  %5098 = vmatpush3.bf16.msra.mxu0 %v5539_v14  ;;  %v1206_v31 = vrot.slane %v6239_v6, 1  ;;  %v6245_v4 = vld [vmem:[%s5653_s22 + $0x28] sm:$0xff]   ;;  %v6309_v14 = vsel %vm1198_vm3, %v1212_v25, %v1214_v32  ;;  %v3079_v32 = vrot.slane %v6154_v24, 2 }
  0xa1   : > { %5099 = vmatprep.subr.bf16.mxu0 %v5543_v59  ;;  %v1208_v5 = vrot.slane %v6245_v4, 1 }
  0xa3   : > { %v6257_v47 = vsel %vm1198_vm3, %v1206_v31, %v1208_v5 }
  0xa4   : > { %5100 = vmatpush3.bf16.msra.mxu0 %v5543_v59  ;;  %v1218_v59 = vrot.slane %v5781_v8, 1  ;;  %v6335_v8 = vld [vmem:[%s6652_s1 + $0x100] sm:$0xff]  }
  0xa5   : > { %5133 = vmatprep.subr.bf16.mxu0 %v6229_v28 }
  0xa6   : > { %4862 = vmatmul.mubr.bf16.vlgmr.msra.gmra.mrb[0].mxu1 %v5959_v7  ;;  %v5537_v7 = vld [vmem:[%s6652_s1 + $0xd0] sm:$0xff]  }
  0xa7   : > { %5070 = vmatmul.mubr.bf16.gmra.mrb[16].mxu0 %v6087_v30  ;;  %4894 = vmatpush3.bf16.msra.mxu1 %v6143_v49  ;;  %v6658_v30 = vrot.slane %v5666_v15, 1  ;;  %v6269_v15 = vld [vmem:[%s5653_s22 + $0x30] sm:$0xff]  }
  0xa8   : > { %4865 = vmatprep.mubr.bf16.mxu1 %v5971_v13  ;;  %5073 = vmatprep.mubr.bf16.mxu0 %v6093_v37  ;;  %v6260_v37 = vld [vmem:[%s5653_s22 + $0x98] sm:$0xff]   ;;  %v1210_v51 = vrot.slane %v6269_v15, 1 }
  0xa9   : > { %4895 = vmatprep.subr.bf16.mxu1 %v5535_v41  ;;  %v6254_v49 = vsel %vm1198_vm3, %v6658_v30, %v1206_v31  ;;  %v2718_v38 = vrot.slane %v6260_v37, 2  ;;  %v6324_v31 = vsel %vm1198_vm3, %v1216_v21, %v1218_v59  ;;  %v1224_v30 = vrot.slane %v5941_v60, 1 }
  0xaa   : > { %v6282_v29 = vsel %vm1198_vm3, %v1208_v5, %v1210_v51  ;;  %v6285_v55 = vsel %vm1198_vm3, %v1210_v51, %v1212_v25  ;;  %v3075_v25 = vrot.slane %v6149_v63, 2  ;;  %v3083_v21 = vrot.slane %v6179_v3, 2 }
  0xab   : > { %4896 = vmatpush3.bf16.msra.mxu1 %v5535_v41  ;;  %v2719_v52 = vsel %vm2333_vm1, %v6659_v26, %v2718_v38  ;;  %v1220_v41 = vrot.slane %v5914_v48, 1 }
  0xac   : > { %4897 = vmatprep.subr.bf16.mxu1 %v5537_v7 }
  0xad   : > { %v6327_v5 = vsel %vm1198_vm3, %v1218_v59, %v1220_v41 }
  0xae   : > { %4866 = vmatmul.mubr.bf16.gmra.mrb[4].mxu1 %v6254_v49 }
  0xaf   : > { %5074 = vmatmul.mubr.bf16.gmra.mrb[20].mxu0 %v6107_v61  ;;  %4869 = vmatprep.mubr.bf16.mxu1 %v6257_v47  ;;  %v5544_v61 = vld [vmem:[%s6652_s1 + $0xe0] sm:$0xff]  }
  0xb0   : > { %5077 = vmatprep.mubr.bf16.mxu0 %v6115_v9  ;;  %4898 = vmatpush3.bf16.msra.mxu1 %v5537_v7  ;;  %v6288_v9 = vld [vmem:[%s5653_s22 + $0xa0] ss:$0 sps:$4 sm:$0xff]   ;;  %v5547_v7 = vld [vmem:[%s6652_s1 + $0x208] sm:$0xff]  }
  0xb1   : > { %4899 = vmatprep.subr.bf16.mxu1 %v5541_v50  ;;  %v2720_v16 = vrot.slane %v6288_v9, 2 }
  0xb4   : > { %4900 = vmatpush3.bf16.msra.mxu1 %v5541_v50  ;;  %v5549_v50 = vld [vmem:[%s6652_s1 + $0x210] sm:$0xff]  }
  0xb5   : > { %4901 = vmatprep.subr.bf16.mxu1 %v5544_v61 }
  0xb6   : > { %4870 = vmatmul.mubr.bf16.gmra.mrb[8].mxu1 %v6282_v29 }
  0xb7   : > { %5078 = vmatmul.mubr.bf16.gmra.mrb[24].mxu0 %v6007_v19  ;;  %4873 = vmatprep.mubr.bf16.mxu1 %v6285_v55  ;;  %v2721_v19 = vsel %vm2333_vm1, %v2718_v38, %v2720_v16  ;;  %v1226_v38 = vrot.slane %v5949_v57, 1 }
  0xb8   : > { %5081 = vmatprep.mubr.bf16.mxu0 %v2719_v52  ;;  %4902 = vmatpush3.bf16.msra.mxu1 %v5544_v61  ;;  %v6365_v61 = vrot.slane %v5997_v56, 1  ;;  %v5552_v52 = vld [vmem:[%s6652_s1 + $0x220] sm:$0xff]  }
  0xb9   : > { %4903 = vmatprep.subr.bf16.mxu1 %v5546_v10 }
  0xbc   : > { %4904 = vmatpush3.bf16.msra.mxu1 %v5546_v10  ;;  %v6371_v10 = vsel %vm1198_vm3, %v1224_v30, %v1226_v38 }
  0xbd   : > { %4905 = vmatprep.subr.bf16.mxu1 %v5548_v27 }
  0xbe   : > { %4874 = vmatmul.mubr.bf16.gmra.mrb[12].mxu1 %v6309_v14 }
  0xbf   : > { %5082 = vmatmul.mubr.bf16.gmra.mrb[28].mxu0 %v2721_v19  ;;  %4877 = vmatprep.mubr.bf16.mxu1 %v6313_v45  ;;  %v5553_v19 = vld [vmem:[%s6652_s1 + $0x228] sm:$0xff]  }
  0xc0   : > { %5101 = vmatprep.mubr.bf16.mxu0 %v6029_v44  ;;  %4906 = vmatpush3.bf16.msra.mxu1 %v5548_v27  ;;  %v1222_v44 = vrot.slane %v5920_v39, 1  ;;  %v3084_v27 = vrot.slane %v6157_v35, 3 }
  0xc1   : > { %4907 = vmatprep.subr.bf16.mxu1 %v5550_v2 }
  0xc2   : > { %v6349_v51 = vsel %vm1198_vm3, %v1220_v41, %v1222_v44  ;;  %v5554_v41 = vld [vmem:[%s6652_s1 + $0x230] sm:$0xff]  }
  0xc4   : > { %4908 = vmatpush3.bf16.msra.mxu1 %v5550_v2  ;;  %v1230_v2 = vrot.slane %v6196_v46, 1 }
  0xc5   : > { %5181 = vmatprep.subr.bf16.mxu1 %v6335_v8 }
  0xc6   : > { %4878 = vmatmul.mubr.bf16.gmra.mrb[16].mxu1 %v6324_v31 }
  0xc7   : > { %5102 = vmatmul.mubr.bf16.vlgmr.msra.gmra.mrb[0].mxu0 %v6040_v54  ;;  %4881 = vmatprep.mubr.bf16.mxu1 %v6327_v5  ;;  %v6352_v54 = vsel %vm1198_vm3, %v1222_v44, %v1224_v30  ;;  %v3088_v30 = vrot.slane %v6175_v53, 3 }
  0xc8   : > { %5134 = vmatpush3.bf16.msra.mxu0 %v6229_v28  ;;  %5105 = vmatprep.mubr.bf16.mxu0 %v6047_v0  ;;  %v3076_v28 = vrot.slane %v6131_v62, 3  ;;  %v5551_v0 = vld [vmem:[%s6652_s1 + $0x218] sm:$0xff]  }
  0xc9   : > { %5135 = vmatprep.subr.bf16.mxu0 %v5547_v7 }
  0xca   : > { %v3077_v26 = vor.u32 %v3076_v28, %v3075_v25  ;;  %v3092_v25 = vrot.slane %v6186_v34, 3  ;;  %v5555_v28 = vld [vmem:[%s6652_s1 + $0x238] sm:$0xff]  }
  0xcc   : > { %5136 = vmatpush3.bf16.msra.mxu0 %v5547_v7  ;;  %v3078_v16 = vsel %vm3047_vm4, %v6064_v22, %v3077_v26  ;;  %v3085_v22 = vor.u32 %v3084_v27, %v3083_v21  ;;  %v1231_v7 = vsel %vm1198_vm3, %v6365_v61, %v1230_v2 }
  0xcd   : > { %5137 = vmatprep.subr.bf16.mxu0 %v5549_v50 }
  0xce   : > { %4882 = vmatmul.mubr.bf16.gmra.mrb[20].mxu1 %v6349_v51 }
  0xcf   : > { %5106 = vmatmul.mubr.bf16.gmra.mrb[4].mxu0 %v6055_v1  ;;  %4885 = vmatprep.mubr.bf16.mxu1 %v6352_v54  ;;  %v6375_v1 = vsel %vm1198_vm3, %v1226_v38, %v6365_v61  ;;  %v1969_v38 = vshrl.u32 %v6090_v58, 16 }
  0xd0   : > { %5109 = vmatprep.mubr.bf16.mxu0 %v6067_v23  ;;  %5138 = vmatpush3.bf16.msra.mxu0 %v5549_v50  ;;  %v3080_v23 = vrot.slane %v6146_v18, 3  ;;  %v3091_v50 = vrot.slane %v6206_v43, 2 }
  0xd1   : > { %5139 = vmatprep.subr.bf16.mxu0 %v5551_v0  ;;  %v3095_v21 = vrot.slane %v1969_v38, 2 }
  0xd2   : > { %v3081_v59 = vor.u32 %v3080_v23, %v3079_v32  ;;  %v1978_v32 = vshrl.u32 %v5966_v11, 16  ;;  %v1981_v23 = vshll.u32 %v5966_v11, 16 }
  0xd4   : > { %5140 = vmatpush3.bf16.msra.mxu0 %v5551_v0  ;;  %v3082_v44 = vsel %vm3047_vm4, %v3077_v26, %v3081_v59  ;;  %v3086_v46 = vsel %vm3047_vm4, %v3081_v59, %v3085_v22  ;;  %v1972_v26 = vshll.u32 %v6090_v58, 16  ;;  %v3100_v2 = vrot.slane %v1981_v23, 3 }
  0xd5   : > { %5141 = vmatprep.subr.bf16.mxu0 %v5552_v52 }
  0xd6   : > { %4886 = vmatmul.mubr.bf16.gmra.mrb[24].mxu1 %v6371_v10 }
  0xd7   : > { %5110 = vmatmul.mubr.bf16.gmra.mrb[8].mxu0 %v6073_v42  ;;  %4889 = vmatprep.mubr.bf16.mxu1 %v6375_v1  ;;  %v3087_v42 = vrot.slane %v6183_v36, 2 }
  0xd8   : > { %5113 = vmatprep.mubr.bf16.mxu0 %v3078_v16  ;;  %5142 = vmatpush3.bf16.msra.mxu0 %v5552_v52  ;;  %v3093_v52 = vor.u32 %v3092_v25, %v3091_v50 }
  0xd9   : > { %5143 = vmatprep.subr.bf16.mxu0 %v5553_v19  ;;  %v3089_v0 = vor.u32 %v3088_v30, %v3087_v42  ;;  %v3113_v42 = vshrl.u32 %v6260_v37, 16 }
  0xdb   : > { %v3090_v16 = vsel %vm3047_vm4, %v3085_v22, %v3089_v0  ;;  %v3094_v27 = vsel %vm3047_vm4, %v3089_v0, %v3093_v52  ;;  %v3104_v22 = vshrl.u32 %v5985_v33, 16  ;;  %v3115_v25 = vrot.slane %v3113_v42, 2  ;;  %v5568_v42 = vld [vmem:[%s6652_s1 + $0x138] sm:$0xff]  }
  0xdc   : > { %5144 = vmatpush3.bf16.msra.mxu0 %v5553_v19  ;;  %v3099_v19 = vrot.slane %v1978_v32, 2 }
  0xdd   : > { %5145 = vmatprep.subr.bf16.mxu0 %v5554_v41  ;;  %v3106_v30 = vrot.slane %v3104_v22, 2  ;;  %v3469_v22 = vrot.slane %v6239_v6, 3  ;;  %v3472_v6 = vrot.slane %v6269_v15, 3  ;;  %v3476_v15 = vrot.slane %v6300_v12, 3 }
  0xde   : > { %4890 = vmatmul.mubr.bf16.gmra.mrb[28].mxu1 %v1231_v7  ;;  %v5562_v7 = vld [vmem:[%s6652_s1 + $0x108] sm:$0xff]   ;;  %v3482_v12 = vrot.slane %v5914_v48, 3  ;;  %v3484_v48 = vrot.slane %v5920_v39, 3 }
  0xdf   : > { %5114 = vmatmul.mubr.bf16.gmra.mrb[12].mxu0 %v3082_v44  ;;  %4909 = vmatprep.mubr.bf16.mxu1 %v5971_v13  ;;  %v3096_v13 = vrot.slane %v1972_v26, 3  ;;  %v3101_v44 = vor.u32 %v3100_v2, %v3099_v19  ;;  %v5565_v2 = vld [vmem:[%s6652_s1 + $0x120] sm:$0xff]  }
  0xe0   : > { %5117 = vmatprep.mubr.bf16.mxu0 %v3086_v46  ;;  %5146 = vmatpush3.bf16.msra.mxu0 %v5554_v41  ;;  %v3107_v41 = vshll.u32 %v5985_v33, 16 }
  0xe1   : > { %5147 = vmatprep.subr.bf16.mxu0 %v5555_v28  ;;  %v3097_v59 = vor.u32 %v3096_v13, %v3095_v21  ;;  %v5564_v13 = vld [vmem:[%s6652_s1 + $0x118] sm:$0xff]  }
  0xe2   : > { %v3109_v46 = vrot.slane %v3107_v41, 3  ;;  %v3470_v41 = vrot.slane %v6245_v4, 3  ;;  %v3474_v4 = vrot.slane %v6274_v17, 3  ;;  %v5569_v17 = vld [vmem:[%s5653_s22 + $0x48] sm:$0xff]  }
  0xe3   : > { %v3102_v50 = vsel %vm3047_vm4, %v3097_v59, %v3101_v44 }
  0xe4   : > { %5148 = vmatpush3.bf16.msra.mxu0 %v5555_v28  ;;  %v3110_v0 = vor.u32 %v3109_v46, %v3106_v30  ;;  %v1581_v30 = vrot.slane %v6090_v58, 1 }
  0xe6   : > { %4910 = vmatmul.mubr.bf16.vlgmr.msra.gmra.mrb[0].mxu1 %v6254_v49  ;;  %v3116_v49 = vshll.u32 %v6260_v37, 16 }
  0xe7   : > { %5118 = vmatmul.mubr.bf16.gmra.mrb[16].mxu0 %v3090_v16  ;;  %5189 = vmatpush3.bf16.msra.mxu1 %v6335_v8  ;;  %v3098_v8 = vsel %vm3047_vm4, %v3093_v52, %v3097_v59  ;;  %v3122_v52 = vshrl.u32 %v6288_v9, 16  ;;  %v3125_v16 = vshll.u32 %v6288_v9, 16 }
  0xe8   : > { %4913 = vmatprep.mubr.bf16.mxu1 %v6257_v47  ;;  %5121 = vmatprep.mubr.bf16.mxu0 %v3094_v27  ;;  %v5563_v47 = vld [vmem:[%s6652_s1 + $0x110] sm:$0xff]   ;;  %v3118_v28 = vrot.slane %v3116_v49, 3  ;;  %v3111_v27 = vsel %vm3047_vm4, %v3101_v44, %v3110_v0  ;;  %v3473_v49 = vsel %vm3468_vm5, %v3470_v41, %v3472_v6 }
  0xe9   : > { %5182 = vmatprep.subr.bf16.mxu1 %v5562_v7  ;;  %v3124_v19 = vrot.slane %v3122_v52, 2  ;;  %v1585_v52 = vrot.slane %v6111_v20, 1 }
  0xea   : > { %v3119_v21 = vor.u32 %v3118_v28, %v3115_v25 }
  0xeb   : > { %5190 = vmatpush3.bf16.msra.mxu1 %v5562_v7  ;;  %v5566_v7 = vld [vmem:[%s6652_s1 + $0x128] sm:$0xff]  }
  0xec   : > { %5183 = vmatprep.subr.bf16.mxu1 %v5563_v47 }
  0xee   : > { %4914 = vmatmul.mubr.bf16.gmra.mrb[4].mxu1 %v6282_v29  ;;  %v3127_v29 = vrot.slane %v3125_v16, 3 }
  0xef   : > { %5122 = vmatmul.mubr.bf16.gmra.mrb[20].mxu0 %v3098_v8  ;;  %4917 = vmatprep.mubr.bf16.mxu1 %v6285_v55  ;;  %v3120_v55 = vsel %vm3047_vm4, %v3110_v0, %v3119_v21  ;;  %v3477_v8 = vsel %vm3468_vm5, %v3474_v4, %v3476_v15 }
  0xf0   : > { %5125 = vmatprep.mubr.bf16.mxu0 %v3102_v50  ;;  %5191 = vmatpush3.bf16.msra.mxu1 %v5563_v47  ;;  %v3128_v59 = vor.u32 %v3127_v29, %v3124_v19  ;;  %v1582_v50 = vsel %vm1198_vm3, %v6365_v61, %v1581_v30  ;;  %v3486_v61 = vrot.slane %v5941_v60, 3  ;;  %v1956_v19 = vrot.slane %v6179_v3, 1 }
  0xf1   : > { %5184 = vmatprep.subr.bf16.mxu1 %v5564_v13  ;;  %v1957_v29 = vrot.slane %v6157_v35, 2  ;;  %v1961_v3 = vrot.slane %v6175_v53, 2  ;;  %v3494_v53 = vrot.slane %v5966_v11, 3 }
  0xf2   : > { %v3129_v44 = vsel %vm3047_vm4, %v3119_v21, %v3128_v59  ;;  %v3487_v39 = vsel %vm3468_vm5, %v3484_v48, %v3486_v61 }
  0xf4   : > { %5192 = vmatpush3.bf16.msra.mxu1 %v5564_v13  ;;  %v1952_v13 = vrot.slane %v6154_v24, 1  ;;  %v3488_v24 = vrot.slane %v5949_v57, 3 }
  0xf5   : > { %5185 = vmatprep.subr.bf16.mxu1 %v5565_v2 }
  0xf6   : > { %4918 = vmatmul.mubr.bf16.gmra.mrb[8].mxu1 %v6309_v14  ;;  %v3471_v14 = vsel %vm3468_vm5, %v3469_v22, %v3470_v41  ;;  %v3489_v35 = vsel %vm3468_vm5, %v3486_v61, %v3488_v24  ;;  %v1964_v22 = vrot.slane %v6206_v43, 1  ;;  %v1965_v41 = vrot.slane %v6186_v34, 2 }
  0xf7   : > { %5126 = vmatmul.mubr.bf16.gmra.mrb[24].mxu0 %v3111_v27  ;;  %4921 = vmatprep.mubr.bf16.mxu1 %v6313_v45  ;;  %v5567_v45 = vld [vmem:[%s6652_s1 + $0x130] sm:$0xff]   ;;  %v1974_v34 = vrot.slane %v1972_v26, 2  ;;  %v3496_v26 = vrot.slane %v5985_v33, 3  ;;  %v3500_v33 = vrot.slane %v6288_v9, 3 }
  0xf8   : > { %5129 = vmatprep.mubr.bf16.mxu0 %v3120_v55  ;;  %5193 = vmatpush3.bf16.msra.mxu1 %v5565_v2  ;;  %v1958_v55 = vor.u32 %v1957_v29, %v1956_v19 }
  0xf9   : > { %5186 = vmatprep.subr.bf16.mxu1 %v5566_v7 }
  0xfc   : > { %5194 = vmatpush3.bf16.msra.mxu1 %v5566_v7 }
  0xfd   : > { %5187 = vmatprep.subr.bf16.mxu1 %v5567_v45 }
  0xfe   : > { %4922 = vmatmul.mubr.bf16.gmra.mrb[12].mxu1 %v6324_v31  ;;  %v3475_v31 = vsel %vm3468_vm5, %v3472_v6, %v3474_v4  ;;  %v1980_v6 = vrot.slane %v1978_v32, 1  ;;  %v1983_v4 = vrot.slane %v1981_v23, 2 }
  0xff   : > { %5130 = vmatmul.mubr.bf16.gmra.mrb[28].mxu0 %v3129_v44  ;;  %4925 = vmatprep.mubr.bf16.mxu1 %v6327_v5  ;;  %v3478_v5 = vrot.slane %v5569_v17, 3  ;;  %v3497_v17 = vsel %vm3468_vm5, %v3494_v53, %v3496_v26 }
 0x100   : > { %5149 = vmatprep.mubr.bf16.mxu0 %v3471_v14  ;;  %5195 = vmatpush3.bf16.msra.mxu1 %v5567_v45  ;;  %v1971_v14 = vrot.slane %v1969_v38, 1  ;;  %v1987_v38 = vshrl.u32 %v6111_v20, 16 }
 0x101   : > { %5188 = vmatprep.subr.bf16.mxu1 %v5568_v42  ;;  %v3479_v47 = vsel %vm3468_vm5, %v3476_v15, %v3478_v5  ;;  %v3498_v15 = vrot.slane %v6260_v37, 3 }
 0x103   : > { %v3501_v37 = vsel %vm3468_vm5, %v3498_v15, %v3500_v33 }
 0x104   : > { %5196 = vmatpush3.bf16.msra.mxu1 %v5568_v42 }
 0x106   : > { %4926 = vmatmul.mubr.bf16.gmra.mrb[16].mxu1 %v6349_v51  ;;  %v5570_v51 = vld [vmem:[%s5653_s22 + $0x50] sm:$0xff]   ;;  %s4143_s22 = sshll.u32 %s4139_s16, 5 }
 0x107   : > { %5150 = vmatmul.mubr.bf16.vlgmr.msra.gmra.mrb[0].mxu0 %v3473_v49  ;;  %4929 = vmatprep.mubr.bf16.mxu1 %v6352_v54  ;;  %v3480_v46 = vrot.slane %v5570_v51, 3  ;;  %v1583_v54 = vrot.slane %v5966_v11, 1  ;;  %v1975_v49 = vor.u32 %v1974_v34, %v1971_v14  ;;  %v1989_v11 = vrot.slane %v1987_v38, 1  ;;  %p174_p3 = scmp.lt.s32.totalorder %s4143_s22, 319 }
 0x108   : > { %5153 = vmatprep.mubr.bf16.mxu0 %v3475_v31  ;;  %v1984_v31 = vor.u32 %v1983_v4, %v1980_v6 }
 0x109   : > { %v3481_v25 = vsel %vm3468_vm5, %v3478_v5, %v3480_v46  ;;  %v1584_v28 = vsel %vm1198_vm3, %v1581_v30, %v1583_v54  ;;  %v3483_v0 = vsel %vm3468_vm5, %v3480_v46, %v3482_v12  ;;  %v1586_v21 = vsel %vm1198_vm3, %v1583_v54, %v1585_v52  ;;  %s6661_s22 = smov (!%p174_p3, %s4143_s22), 319 }
 0x10a   : > { %v1985_v5 = vsel %vm1912_vm0, %v1975_v49, %v1984_v31  ;;  %s4144_s16 = sshll.u32 %s6661_s22, 2 }
 0x10b   : > { %s6568_s27 = scalar_lea.vmem %s6655_s4, %s4144_s16 }
 0x10e   : > { %4930 = vmatmul.mubr.bf16.gmra.mrb[20].mxu1 %v6371_v10  ;;  %v1948_v10 = vrot.slane %v6149_v63, 1  ;;  %v1953_v63 = vrot.slane %v6146_v18, 2  ;;  %v3490_v18 = vrot.slane %v5997_v56, 3  ;;  %v3492_v56 = vrot.slane %v6090_v58, 3 }
 0x10f   : > { %5154 = vmatmul.mubr.bf16.gmra.mrb[4].mxu0 %v3477_v8  ;;  %4933 = vmatprep.mubr.bf16.mxu1 %v6375_v1  ;;  %v1949_v1 = vrot.slane %v6131_v62, 2  ;;  %v3485_v62 = vsel %vm3468_vm5, %v3482_v12, %v3484_v48  ;;  %v1990_v58 = vshll.u32 %v6111_v20, 16  ;;  %v3499_v8 = vsel %vm3468_vm5, %v3496_v26, %v3498_v15 }
 0x110   : > { %5157 = vmatprep.mubr.bf16.mxu0 %v3479_v47  ;;  %v1954_v60 = vor.u32 %v1953_v63, %v1952_v13  ;;  %v3491_v7 = vsel %vm3468_vm5, %v3488_v24, %v3490_v18  ;;  %v3493_v43 = vsel %vm3468_vm5, %v3490_v18, %v3492_v56  ;;  %v3495_v42 = vsel %vm3468_vm5, %v3492_v56, %v3494_v53  ;;  %v6550_v13 = vld [vmem:[%s6653_s2] ss:$0 sm:$0xff] }
 0x111   : > { %v1950_v16 = vor.u32 %v1949_v1, %v1948_v10  ;;  %v1992_v23 = vrot.slane %v1990_v58, 2 }
 0x112   : > { %v1959_v59 = vsel %vm1912_vm0, %v1954_v60, %v1958_v55 }
 0x113   : > { %v1951_v27 = vsel %vm1912_vm0, %v5818_v40, %v1950_v16  ;;  %v1955_v2 = vsel %vm1912_vm0, %v1950_v16, %v1954_v60  ;;  %v1960_v40 = vrot.slane %v6183_v36, 1  ;;  %v1966_v36 = vor.u32 %v1965_v41, %v1964_v22 }
 0x114   : > { %v1993_v20 = vor.u32 %v1992_v23, %v1989_v11 }
 0x115   : > { %v1962_v57 = vor.u32 %v1961_v3, %v1960_v40  ;;  %v1976_v32 = vsel %vm1912_vm0, %v1966_v36, %v1975_v49 }
 0x116   : > { %4934 = vmatmul.mubr.bf16.gmra.mrb[24].mxu1 %v1582_v50  ;;  %v1994_v47 = vsel %vm1912_vm0, %v1984_v31, %v1993_v20 }
 0x117   : > { %5158 = vmatmul.mubr.bf16.gmra.mrb[8].mxu0 %v3481_v25  ;;  %4937 = vmatprep.mubr.bf16.mxu1 %v1584_v28  ;;  %v1963_v44 = vsel %vm1912_vm0, %v1958_v55, %v1962_v57  ;;  %v1967_v45 = vsel %vm1912_vm0, %v1962_v57, %v1966_v36 }
 0x118   : > { %5161 = vmatprep.mubr.bf16.mxu0 %v3483_v0 }
 0x11e   : > { %4938 = vmatmul.mubr.bf16.gmra.mrb[28].mxu1 %v1586_v21 }
 0x11f   : > { %5162 = vmatmul.mubr.bf16.gmra.mrb[12].mxu0 %v3485_v62  ;;  %4973 = vmatprep.mubr.bf16.mxu1 %v1951_v27  ;;  %v6555_v27 = vld [vmem:[%s6654_s3] ss:$0 sm:$0xff] }
 0x120   : > { %5165 = vmatprep.mubr.bf16.mxu0 %v3487_v39 }
 0x126   : > { %4974 = vmatmul.mubr.bf16.vlgmr.msra.gmra.mrb[16].mxu1 %v1955_v2 }
 0x127   : > { %5166 = vmatmul.mubr.bf16.gmra.mrb[16].mxu0 %v3489_v35  ;;  %4977 = vmatprep.mubr.bf16.mxu1 %v1959_v59 }
 0x128   : > { %5169 = vmatprep.mubr.bf16.mxu0 %v3491_v7 }
 0x12e   : > { %4978 = vmatmul.mubr.bf16.gmra.mrb[20].mxu1 %v1963_v44 }
 0x12f   : > { %5170 = vmatmul.mubr.bf16.gmra.mrb[20].mxu0 %v3493_v43  ;;  %4981 = vmatprep.mubr.bf16.mxu1 %v1967_v45 }
 0x130   : > { %5173 = vmatprep.mubr.bf16.mxu0 %v3495_v42 }
 0x136   : > { %4982 = vmatmul.mubr.bf16.gmra.mrb[24].mxu1 %v1976_v32 }
 0x137   : > { %5174 = vmatmul.mubr.bf16.gmra.mrb[24].mxu0 %v3497_v17  ;;  %4985 = vmatprep.mubr.bf16.mxu1 %v1985_v5 }
 0x138   : > { %5177 = vmatprep.mubr.bf16.mxu0 %v3499_v8 }
 0x13e   : > { %4986 = vmatmul.mubr.bf16.gmra.mrb[28].mxu1 %v1994_v47 }
 0x13f   : > { %5178 = vmatmul.mubr.bf16.gmra.mrb[28].mxu0 %v3501_v37 }
 0x1b9   : > { %v4911_v30 = vpop.f32.mrb[0].mxu1 }
 0x1ba   : > { %v1672_v51 = vpop.f32.mrb[1].mxu1 }
 0x1bb   : > { %v4912_v46 = vpop.f32.mrb[2].mxu1 }
 0x1bc   : > { %v1675_v54 = vpop.f32.mrb[3].mxu1 }
 0x1c1   : > { %v4915_v12 = vpop.f32.mrb[4].mxu1 }
 0x1c2   : > { %v1688_v50 = vpop.f32.mrb[5].mxu1 }
 0x1c3   : > { %v4916_v25 = vpop.f32.mrb[6].mxu1 }
 0x1c4   : > { %v1691_v28 = vpop.f32.mrb[7].mxu1 }
 0x1c9   : > { %v4919_v10 = vpop.f32.mrb[8].mxu1 }
 0x1ca   : > { %v1704_v1 = vpop.f32.mrb[9].mxu1 }
 0x1cb   : > { %v6533_v0 = vpop.f32.mrb[10].mxu1 }
 0x1cc   : > { %v6535_v9 = vpop.f32.mrb[11].mxu1 }
 0x1d1   : > { %v6537_v52 = vpop.f32.mrb[12].mxu1 }
 0x1d2   : > { %v6539_v48 = vpop.f32.mrb[13].mxu1 }
 0x1d3   : > { %v6541_v16 = vpop.f32.mrb[14].mxu1 }
 0x1d4   : > { %v6543_v61 = vpop.f32.mrb[15].mxu1 }
 0x1da   : > { %v5151_v21 = vpop.f32.mrb[0].mxu0 }
 0x1db   : > { %v5197_v63 = vadd.f32 %v5151_v21, %v4911_v30  ;;  %v3600_v62 = vpop.f32.mrb[1].mxu0 }
 0x1dc   : > { %v5198_v19 = vadd.f32 %v3600_v62, %v1672_v51  ;;  %v5152_v29 = vpop.f32.mrb[2].mxu0 }
 0x1dd   : > { %v3832_v39 = vmul.f32 %v5197_v63, %v6550_v13  ;;  %v5199_v60 = vadd.f32 %v5152_v29, %v4912_v46  ;;  %v3603_v24 = vpop.f32.mrb[3].mxu0 }
 0x1de   : > { %v3830_v55 = vmul.f32 %v5198_v19, %v6550_v13  ;;  %v5200_v18 = vadd.f32 %v3603_v24, %v1675_v54 }
 0x1df   : > { %v3871_v2 = vadd.f32 %v6555_v27, %v3832_v39  ;;  %v3833_v40 = vmul.f32 %v5199_v60, %v6550_v13 }
 0x1e0   : > { %v3869_v3 = vadd.f32 %v6555_v27, %v3830_v55  ;;  %v3831_v35 = vmul.f32 %v5200_v18, %v6550_v13 }
 0x1e1   : > { %v3872_v59 = vadd.f32 %v6555_v27, %v3833_v40  ;;  %v3903_v7 = vmax.f32 %v3871_v2, 0.0 }
 0x1e2   : > { %v3870_v22 = vadd.f32 %v6555_v27, %v3831_v35  ;;  %v5155_v41 = vpop.f32.mrb[4].mxu0  ;;  %v3901_v53 = vmax.f32 %v3869_v3, 0.0 }
 0x1e3   : > { %v3904_v57 = vmax.f32 %v3872_v59, 0.0  ;;  %v5201_v56 = vadd.f32 %v5155_v41, %v4915_v12  ;;  %v3616_v36 = vpop.f32.mrb[5].mxu0 }
 0x1e4   : > { %v3902_v44 = vmax.f32 %v3870_v22, 0.0  ;;  %v5202_v14 = vadd.f32 %v3616_v36, %v1688_v50  ;;  %v5156_v34 = vpop.f32.mrb[6].mxu0 }
 0x1e5   : > { %v4446_v43 = vpack.c.bf16 %v3904_v57, %v3903_v7  ;;  %v3836_v45 = vmul.f32 %v5201_v56, %v6550_v13  ;;  %v5203_v6 = vadd.f32 %v5156_v34, %v4916_v25  ;;  %v3619_v4 = vpop.f32.mrb[7].mxu0 }
 0x1e6   : > { %v4441_v42 = vpack.c.bf16 %v3902_v44, %v3901_v53  ;;  %v3834_v49 = vmul.f32 %v5202_v14, %v6550_v13  ;;  %v5204_v38 = vadd.f32 %v3619_v4, %v1691_v28 }
 0x1e7   : > { %4518 = vst [vmem:[%s6568_s27 + $0x8] sm:$0xff] %v4446_v43   ;;  %v3875_v58 = vadd.f32 %v6555_v27, %v3836_v45  ;;  %v3837_v26 = vmul.f32 %v5203_v6, %v6550_v13 }
 0x1e8   : > { %4442 = vst [vmem:[%s6568_s27] sm:$0xff] %v4441_v42   ;;  %v3873_v31 = vadd.f32 %v6555_v27, %v3834_v49  ;;  %v3835_v15 = vmul.f32 %v5204_v38, %v6550_v13 }
 0x1e9   : > { %v3876_v32 = vadd.f32 %v6555_v27, %v3837_v26  ;;  %v3907_v17 = vmax.f32 %v3875_v58, 0.0 }
 0x1ea   : > { %v3874_v11 = vadd.f32 %v6555_v27, %v3835_v15  ;;  %v5159_v23 = vpop.f32.mrb[8].mxu0  ;;  %v3905_v33 = vmax.f32 %v3873_v31, 0.0 }
 0x1eb   : > { %v3908_v5 = vmax.f32 %v3876_v32, 0.0  ;;  %v5205_v8 = vadd.f32 %v5159_v23, %v4919_v10  ;;  %v3632_v20 = vpop.f32.mrb[9].mxu0 }
 0x1ec   : > { %v3906_v47 = vmax.f32 %v3874_v11, 0.0  ;;  %v5206_v37 = vadd.f32 %v3632_v20, %v1704_v1  ;;  %v5160_v30 = vpop.f32.mrb[10].mxu0 }
 0x1ed   : > { %v4456_v51 = vpack.c.bf16 %v3908_v5, %v3907_v17  ;;  %v3840_v46 = vmul.f32 %v5205_v8, %v6550_v13  ;;  %v5207_v54 = vadd.f32 %v5160_v30, %v6533_v0  ;;  %v3635_v12 = vpop.f32.mrb[11].mxu0 }
 0x1ee   : > { %v4451_v50 = vpack.c.bf16 %v3906_v47, %v3905_v33  ;;  %v3838_v25 = vmul.f32 %v5206_v37, %v6550_v13  ;;  %v5208_v28 = vadd.f32 %v3635_v12, %v6535_v9 }
 0x1ef   : > { %4520 = vst [vmem:[%s6568_s27 + $0x18] sm:$0xff] %v4456_v51   ;;  %v3879_v10 = vadd.f32 %v6555_v27, %v3840_v46  ;;  %v3841_v21 = vmul.f32 %v5207_v54, %v6550_v13 }
 0x1f0   : > { %4519 = vst [vmem:[%s6568_s27 + $0x10] sm:$0xff] %v4451_v50   ;;  %v3877_v1 = vadd.f32 %v6555_v27, %v3838_v25  ;;  %v3839_v63 = vmul.f32 %v5208_v28, %v6550_v13 }
 0x1f1   : > { %v3880_v62 = vadd.f32 %v6555_v27, %v3841_v21  ;;  %v3911_v29 = vmax.f32 %v3879_v10, 0.0 }
 0x1f2   : > { %v3878_v0 = vadd.f32 %v6555_v27, %v3839_v63  ;;  %v5163_v19 = vpop.f32.mrb[12].mxu0  ;;  %v3909_v24 = vmax.f32 %v3877_v1, 0.0 }
 0x1f3   : > { %v3912_v39 = vmax.f32 %v3880_v62, 0.0  ;;  %v5209_v9 = vadd.f32 %v5163_v19, %v6537_v52  ;;  %v3648_v60 = vpop.f32.mrb[13].mxu0 }
 0x1f4   : > { %v3910_v55 = vmax.f32 %v3878_v0, 0.0  ;;  %v5210_v18 = vadd.f32 %v3648_v60, %v6539_v48  ;;  %v5164_v2 = vpop.f32.mrb[14].mxu0 }
 0x1f5   : > { %v4466_v40 = vpack.c.bf16 %v3912_v39, %v3911_v29  ;;  %v3844_v3 = vmul.f32 %v5209_v9, %v6550_v13  ;;  %v5211_v35 = vadd.f32 %v5164_v2, %v6541_v16  ;;  %v3651_v59 = vpop.f32.mrb[15].mxu0 }
 0x1f6   : > { %v4461_v22 = vpack.c.bf16 %v3910_v55, %v3909_v24  ;;  %v3842_v41 = vmul.f32 %v5210_v18, %v6550_v13  ;;  %v5212_v7 = vadd.f32 %v3651_v59, %v6543_v61 }
 0x1f7   : > { %4522 = vst [vmem:[%s6568_s27 + $0x28] sm:$0xff] %v4466_v40   ;;  %v3883_v52 = vadd.f32 %v6555_v27, %v3844_v3  ;;  %v3845_v57 = vmul.f32 %v5211_v35, %v6550_v13 }
 0x1f8   : > { %4521 = vst [vmem:[%s6568_s27 + $0x20] sm:$0xff] %v4461_v22   ;;  %v3881_v48 = vadd.f32 %v6555_v27, %v3842_v41  ;;  %v3843_v56 = vmul.f32 %v5212_v7, %v6550_v13 }
 0x1f9   : > { %v3884_v36 = vadd.f32 %v6555_v27, %v3845_v57  ;;  %v4975_v53 = vpop.f32.mrb[16].mxu1  ;;  %v3915_v34 = vmax.f32 %v3883_v52, 0.0 }
 0x1fa   : > { %v3882_v16 = vadd.f32 %v6555_v27, %v3843_v56  ;;  %v5167_v44 = vpop.f32.mrb[16].mxu0  ;;  %v2157_v14 = vpop.f32.mrb[17].mxu1  ;;  %v3913_v4 = vmax.f32 %v3881_v48, 0.0 }
 0x1fb   : > { %v3916_v43 = vmax.f32 %v3884_v36, 0.0  ;;  %v5213_v61 = vadd.f32 %v5167_v44, %v4975_v53  ;;  %v3664_v45 = vpop.f32.mrb[17].mxu0  ;;  %v4976_v6 = vpop.f32.mrb[18].mxu1 }
 0x1fc   : > { %v3914_v42 = vmax.f32 %v3882_v16, 0.0  ;;  %v5214_v49 = vadd.f32 %v3664_v45, %v2157_v14  ;;  %v5168_v38 = vpop.f32.mrb[18].mxu0  ;;  %v2160_v58 = vpop.f32.mrb[19].mxu1 }
 0x1fd   : > { %v4476_v26 = vpack.c.bf16 %v3916_v43, %v3915_v34  ;;  %v3848_v31 = vmul.f32 %v5213_v61, %v6550_v13  ;;  %v5215_v15 = vadd.f32 %v5168_v38, %v4976_v6  ;;  %v3667_v32 = vpop.f32.mrb[19].mxu0 }
 0x1fe   : > { %v4471_v11 = vpack.c.bf16 %v3914_v42, %v3913_v4  ;;  %v3846_v23 = vmul.f32 %v5214_v49, %v6550_v13  ;;  %v5216_v17 = vadd.f32 %v3667_v32, %v2160_v58 }
 0x1ff   : > { %4524 = vst [vmem:[%s6568_s27 + $0x38] sm:$0xff] %v4476_v26   ;;  %v3887_v5 = vadd.f32 %v6555_v27, %v3848_v31  ;;  %v3849_v8 = vmul.f32 %v5215_v15, %v6550_v13 }
 0x200   : > { %4523 = vst [vmem:[%s6568_s27 + $0x30] sm:$0xff] %v4471_v11   ;;  %v3885_v20 = vadd.f32 %v6555_v27, %v3846_v23  ;;  %v3847_v33 = vmul.f32 %v5216_v17, %v6550_v13 }
 0x201   : > { %v3888_v47 = vadd.f32 %v6555_v27, %v3849_v8  ;;  %v4979_v37 = vpop.f32.mrb[20].mxu1  ;;  %v3919_v54 = vmax.f32 %v3887_v5, 0.0 }
 0x202   : > { %v3886_v30 = vadd.f32 %v6555_v27, %v3847_v33  ;;  %v5171_v51 = vpop.f32.mrb[20].mxu0  ;;  %v2173_v46 = vpop.f32.mrb[21].mxu1  ;;  %v3917_v10 = vmax.f32 %v3885_v20, 0.0 }
 0x203   : > { %v3920_v12 = vmax.f32 %v3888_v47, 0.0  ;;  %v5217_v50 = vadd.f32 %v5171_v51, %v4979_v37  ;;  %v3680_v25 = vpop.f32.mrb[21].mxu0  ;;  %v4980_v28 = vpop.f32.mrb[22].mxu1 }
 0x204   : > { %v3918_v21 = vmax.f32 %v3886_v30, 0.0  ;;  %v5218_v1 = vadd.f32 %v3680_v25, %v2173_v46  ;;  %v5172_v63 = vpop.f32.mrb[22].mxu0  ;;  %v2176_v62 = vpop.f32.mrb[23].mxu1 }
 0x205   : > { %v4486_v0 = vpack.c.bf16 %v3920_v12, %v3919_v54  ;;  %v3852_v19 = vmul.f32 %v5217_v50, %v6550_v13  ;;  %v5219_v29 = vadd.f32 %v5172_v63, %v4980_v28  ;;  %v3683_v39 = vpop.f32.mrb[23].mxu0 }
 0x206   : > { %v4481_v9 = vpack.c.bf16 %v3918_v21, %v3917_v10  ;;  %v3850_v60 = vmul.f32 %v5218_v1, %v6550_v13  ;;  %v5220_v24 = vadd.f32 %v3683_v39, %v2176_v62 }
 0x207   : > { %4526 = vst [vmem:[%s6568_s27 + $0x48] sm:$0xff] %v4486_v0   ;;  %v3891_v55 = vadd.f32 %v6555_v27, %v3852_v19  ;;  %v3853_v18 = vmul.f32 %v5219_v29, %v6550_v13 }
 0x208   : > { %4525 = vst [vmem:[%s6568_s27 + $0x40] sm:$0xff] %v4481_v9   ;;  %v3889_v2 = vadd.f32 %v6555_v27, %v3850_v60  ;;  %v3851_v40 = vmul.f32 %v5220_v24, %v6550_v13 }
 0x209   : > { %v3892_v3 = vadd.f32 %v6555_v27, %v3853_v18  ;;  %v4983_v35 = vpop.f32.mrb[24].mxu1  ;;  %v3923_v7 = vmax.f32 %v3891_v55, 0.0 }
 0x20a   : > { %v3890_v59 = vadd.f32 %v6555_v27, %v3851_v40  ;;  %v5175_v22 = vpop.f32.mrb[24].mxu0  ;;  %v2189_v41 = vpop.f32.mrb[25].mxu1  ;;  %v3921_v36 = vmax.f32 %v3889_v2, 0.0 }
 0x20b   : > { %v3924_v52 = vmax.f32 %v3892_v3, 0.0  ;;  %v5221_v57 = vadd.f32 %v5175_v22, %v4983_v35  ;;  %v3696_v48 = vpop.f32.mrb[25].mxu0  ;;  %v4984_v56 = vpop.f32.mrb[26].mxu1 }
 0x20c   : > { %v3922_v53 = vmax.f32 %v3890_v59, 0.0  ;;  %v5222_v16 = vadd.f32 %v3696_v48, %v2189_v41  ;;  %v5176_v44 = vpop.f32.mrb[26].mxu0  ;;  %v2192_v14 = vpop.f32.mrb[27].mxu1 }
 0x20d   : > { %v4496_v34 = vpack.c.bf16 %v3924_v52, %v3923_v7  ;;  %v3856_v43 = vmul.f32 %v5221_v57, %v6550_v13  ;;  %v5223_v61 = vadd.f32 %v5176_v44, %v4984_v56  ;;  %v3699_v45 = vpop.f32.mrb[27].mxu0 }
 0x20e   : > { %v4491_v6 = vpack.c.bf16 %v3922_v53, %v3921_v36  ;;  %v3854_v4 = vmul.f32 %v5222_v16, %v6550_v13  ;;  %v5224_v42 = vadd.f32 %v3699_v45, %v2192_v14 }
 0x20f   : > { %4528 = vst [vmem:[%s6568_s27 + $0x58] sm:$0xff] %v4496_v34   ;;  %v3895_v49 = vadd.f32 %v6555_v27, %v3856_v43  ;;  %v3857_v38 = vmul.f32 %v5223_v61, %v6550_v13 }
 0x210   : > { %4527 = vst [vmem:[%s6568_s27 + $0x50] sm:$0xff] %v4491_v6   ;;  %v3893_v58 = vadd.f32 %v6555_v27, %v3854_v4  ;;  %v3855_v26 = vmul.f32 %v5224_v42, %v6550_v13 }
 0x211   : > { %v3896_v31 = vadd.f32 %v6555_v27, %v3857_v38  ;;  %v4987_v15 = vpop.f32.mrb[28].mxu1  ;;  %v3927_v17 = vmax.f32 %v3895_v49, 0.0 }
 0x212   : > { %v3894_v32 = vadd.f32 %v6555_v27, %v3855_v26  ;;  %v5179_v11 = vpop.f32.mrb[28].mxu0  ;;  %v2205_v23 = vpop.f32.mrb[29].mxu1  ;;  %v3925_v47 = vmax.f32 %v3893_v58, 0.0 }
 0x213   : > { %v3928_v5 = vmax.f32 %v3896_v31, 0.0  ;;  %v5225_v8 = vadd.f32 %v5179_v11, %v4987_v15  ;;  %v3712_v20 = vpop.f32.mrb[29].mxu0  ;;  %v4988_v33 = vpop.f32.mrb[30].mxu1 }
 0x214   : > { %v3926_v37 = vmax.f32 %v3894_v32, 0.0  ;;  %v5226_v30 = vadd.f32 %v3712_v20, %v2205_v23  ;;  %v5180_v51 = vpop.f32.mrb[30].mxu0  ;;  %v2208_v46 = vpop.f32.mrb[31].mxu1 }
 0x215   : > { %v4506_v54 = vpack.c.bf16 %v3928_v5, %v3927_v17  ;;  %v3860_v12 = vmul.f32 %v5225_v8, %v6550_v13  ;;  %v5227_v50 = vadd.f32 %v5180_v51, %v4988_v33  ;;  %v3715_v25 = vpop.f32.mrb[31].mxu0 }
 0x216   : > { %v4501_v28 = vpack.c.bf16 %v3926_v37, %v3925_v47  ;;  %v3858_v10 = vmul.f32 %v5226_v30, %v6550_v13  ;;  %v5228_v21 = vadd.f32 %v3715_v25, %v2208_v46 }
 0x217   : > { %4530 = vst [vmem:[%s6568_s27 + $0x68] sm:$0xff] %v4506_v54   ;;  %v3899_v1 = vadd.f32 %v6555_v27, %v3860_v12  ;;  %v3861_v63 = vmul.f32 %v5227_v50, %v6550_v13 }
 0x218   : > { %4529 = vst [vmem:[%s6568_s27 + $0x60] sm:$0xff] %v4501_v28   ;;  %v3897_v62 = vadd.f32 %v6555_v27, %v3858_v10  ;;  %v3859_v0 = vmul.f32 %v5228_v21, %v6550_v13 }
 0x219   : > { %v3900_v19 = vadd.f32 %v6555_v27, %v3861_v63  ;;  %v3931_v39 = vmax.f32 %v3899_v1, 0.0 }
 0x21a   : > { %v3898_v29 = vadd.f32 %v6555_v27, %v3859_v0  ;;  %v3929_v60 = vmax.f32 %v3897_v62, 0.0 }
 0x21b   : > { %v3932_v9 = vmax.f32 %v3900_v19, 0.0 }
 0x21c   : > { %v3930_v24 = vmax.f32 %v3898_v29, 0.0 }
 0x21d   : > { %v4516_v55 = vpack.c.bf16 %v3932_v9, %v3931_v39 }
 0x21e   : > { %v4511_v18 = vpack.c.bf16 %v3930_v24, %v3929_v60 }
 0x21f   : > { %4532 = vst [vmem:[%s6568_s27 + $0x78] sm:$0xff] %v4516_v55  }
 0x220   : > { %4531 = vst [vmem:[%s6568_s27 + $0x70] sm:$0xff] %v4511_v18  }
 0x221 PF: > { %s14_s15 = sadd.s32 1, %s5577_s15  }
 0x222   : > { %p11_p4 = scmp.ge.s32.totalorder %s14_s15, 12  }
 0x224   :  { %13 = sbr.rel (!%p11_p4) target bundleno = 1 (0x1), region = 72 }

// kernel: _lambda_.22
= control target key start
LH: loop header
LB: loop body
LE: loop exit
PB: predicated region body
PF: predicated region fallthrough
CT: control target
= control target key end

     0   :  { %v763_v1 = vmov 0   ;;  %s936_s1 = inlined_call_operand.vmem [shape: bf16[128,256], index: 1, kind: input, shape index: {}]   ;;  %s937_s0 = inlined_call_operand.vmem [shape: bf16[128,128], index: 0, kind: input, shape index: {}]   ;;  %s938_s2 = inlined_call_operand.vmem [shape: bf16[128,128], index: 2, kind: input, shape index: {}]   ;;  %s939_s3 = inlined_call_operand.vmem [shape: bf16[128,256], index: 3, kind: output, shape index: {}]  }
   0x1   :  { %v731_v0 = vld [vmem:[%s936_s1 + $0x4] ss:$8 sps:$4 sm:$0xff]   ;;  %275 = vmatprep.mubr.bf16.mxu0 %v763_v1  ;;  %315 = vmatprep.mubr.bf16.mxu1 %v763_v1  ;;  %v733_v2 = vld [vmem:[%s936_s1] ss:$8 sps:$4 sm:$0xff]   ;;  %v734_v3 = vld [vmem:[%s936_s1 + $0x14] ss:$8 sps:$4 sm:$0xff]  }
   0x2   :  { %243 = vmatprep.subr.bf16.mxu0 %v731_v0  ;;  %714 = vmatprep.subr.bf16.mxu1 %v731_v0  ;;  %v736_v4 = vld [vmem:[%s936_s1 + $0x10] ss:$8 sps:$4 sm:$0xff]   ;;  %v737_v5 = vld [vmem:[%s936_s1 + $0x24] ss:$8 sps:$4 sm:$0xff]   ;;  %v739_v6 = vld [vmem:[%s936_s1 + $0x20] ss:$8 sps:$4 sm:$0xff]  }
   0x3   :  { %244 = vmatpush1.bf16.msra.mxu0 %v733_v2  ;;  %722 = vmatpush1.bf16.msra.mxu1 %v733_v2  ;;  %v740_v7 = vld [vmem:[%s936_s1 + $0x34] ss:$8 sps:$4 sm:$0xff]   ;;  %v742_v8 = vld [vmem:[%s936_s1 + $0x30] ss:$8 sps:$4 sm:$0xff]   ;;  %v743_v9 = vld [vmem:[%s936_s1 + $0x44] ss:$8 sps:$4 sm:$0xff]  }
   0x4   :  { %245 = vmatprep.subr.bf16.mxu0 %v734_v3  ;;  %715 = vmatprep.subr.bf16.mxu1 %v734_v3  ;;  %v745_v10 = vld [vmem:[%s936_s1 + $0x40] ss:$8 sps:$4 sm:$0xff]   ;;  %v746_v11 = vld [vmem:[%s936_s1 + $0x54] ss:$8 sps:$4 sm:$0xff]   ;;  %v748_v12 = vld [vmem:[%s936_s1 + $0x50] ss:$8 sps:$4 sm:$0xff]  }
   0x5   :  { %v749_v13 = vld [vmem:[%s936_s1 + $0x64] ss:$8 sps:$4 sm:$0xff]   ;;  %v751_v14 = vld [vmem:[%s936_s1 + $0x60] ss:$8 sps:$4 sm:$0xff]   ;;  %v752_v15 = vld [vmem:[%s936_s1 + $0x74] ss:$8 sps:$4 sm:$0xff]  }
   0x6   :  { %v754_v16 = vld [vmem:[%s936_s1 + $0x70] ss:$8 sps:$4 sm:$0xff]   ;;  %v755_v17 = vld [vmem:[%s937_s0] sm:$0xff]   ;;  %v757_v19 = vld [vmem:[%s937_s0 + $0x8] sm:$0xff]  }
   0x7   :  { %246 = vmatpush1.bf16.msra.mxu0 %v736_v4  ;;  %723 = vmatpush1.bf16.msra.mxu1 %v736_v4  ;;  %v756_v18 = vld [vmem:[%s937_s0 + $0x20] sm:$0xff]   ;;  %v758_v20 = vld [vmem:[%s937_s0 + $0x28] sm:$0xff]   ;;  %v759_v21 = vld [vmem:[%s937_s0 + $0x10] sm:$0xff]  }
   0x8   :  { %247 = vmatprep.subr.bf16.mxu0 %v737_v5  ;;  %716 = vmatprep.subr.bf16.mxu1 %v737_v5  ;;  %v760_v22 = vld [vmem:[%s937_s0 + $0x30] sm:$0xff]   ;;  %v761_v23 = vld [vmem:[%s937_s0 + $0x18] sm:$0xff]   ;;  %v676_v25 = vld [vmem:[%s938_s2] sm:$0xff]  }
   0x9   :  { %v762_v24 = vld [vmem:[%s937_s0 + $0x38] sm:$0xff]   ;;  %v710_v26 = vld [vmem:[%s938_s2 + $0x20] sm:$0xff]   ;;  %v677_v27 = vunpack.c.l.bf16 %v676_v25  ;;  %v678_v29 = vunpack.c.h.bf16 %v676_v25  ;;  %v707_v39 = vld [vmem:[%s938_s2 + $0x8] sm:$0xff]  }
   0xa   :  { %v693_v28 = vunpack.c.l.bf16 %v710_v26  ;;  %v694_v30 = vunpack.c.h.bf16 %v710_v26  ;;  %v711_v40 = vld [vmem:[%s938_s2 + $0x28] sm:$0xff]   ;;  %v681_v49 = vunpack.c.l.bf16 %v707_v39  ;;  %v682_v51 = vunpack.c.h.bf16 %v707_v39  ;;  %v708_v61 = vld [vmem:[%s938_s2 + $0x10] sm:$0xff]  }
   0xb   :  { %248 = vmatpush1.bf16.msra.mxu0 %v739_v6  ;;  %724 = vmatpush1.bf16.msra.mxu1 %v739_v6  ;;  %v697_v50 = vunpack.c.l.bf16 %v711_v40  ;;  %v698_v52 = vunpack.c.h.bf16 %v711_v40  ;;  %v712_v62 = vld [vmem:[%s938_s2 + $0x30] sm:$0xff]  }
   0xc   :  { %249 = vmatprep.subr.bf16.mxu0 %v740_v7  ;;  %717 = vmatprep.subr.bf16.mxu1 %v740_v7  ;;  %v685_v7 = vunpack.c.l.bf16 %v708_v61 }
   0xf   :  { %250 = vmatpush1.bf16.msra.mxu0 %v742_v8  ;;  %725 = vmatpush1.bf16.msra.mxu1 %v742_v8  ;;  %v701_v8 = vunpack.c.l.bf16 %v712_v62 }
  0x10   :  { %251 = vmatprep.subr.bf16.mxu0 %v743_v9  ;;  %718 = vmatprep.subr.bf16.mxu1 %v743_v9  ;;  %v686_v9 = vunpack.c.h.bf16 %v708_v61 }
  0x13   :  { %252 = vmatpush1.bf16.msra.mxu0 %v745_v10  ;;  %726 = vmatpush1.bf16.msra.mxu1 %v745_v10  ;;  %v702_v10 = vunpack.c.h.bf16 %v712_v62 }
  0x14   :  { %253 = vmatprep.subr.bf16.mxu0 %v746_v11  ;;  %719 = vmatprep.subr.bf16.mxu1 %v746_v11 }
  0x17   :  { %254 = vmatpush1.bf16.msra.mxu0 %v748_v12  ;;  %727 = vmatpush1.bf16.msra.mxu1 %v748_v12 }
  0x18   :  { %255 = vmatprep.subr.bf16.mxu0 %v749_v13  ;;  %720 = vmatprep.subr.bf16.mxu1 %v749_v13 }
  0x1b   :  { %256 = vmatpush1.bf16.msra.mxu0 %v751_v14  ;;  %728 = vmatpush1.bf16.msra.mxu1 %v751_v14 }
  0x1c   :  { %257 = vmatprep.subr.bf16.mxu0 %v752_v15  ;;  %721 = vmatprep.subr.bf16.mxu1 %v752_v15 }
  0x1f   :  { %258 = vmatpush1.bf16.msra.mxu0 %v754_v16  ;;  %729 = vmatpush1.bf16.msra.mxu1 %v754_v16 }
  0x22   :  { %276 = vmatmul.mubr.bf16.vlgmr.msra.gmra.mrb[0].mxu0 %v755_v17  ;;  %316 = vmatmul.mubr.bf16.vlgmr.msra.gmra.mrb[0].mxu1 %v756_v18 }
  0x23   :  { %285 = vmatprep.mubr.bf16.mxu0 %v763_v1  ;;  %325 = vmatprep.mubr.bf16.mxu1 %v763_v1 }
  0x2a   :  { %286 = vmatmul.mubr.bf16.gmra.mrb[4].mxu0 %v757_v19  ;;  %326 = vmatmul.mubr.bf16.gmra.mrb[4].mxu1 %v758_v20  ;;  %v709_v19 = vld [vmem:[%s938_s2 + $0x18] sm:$0xff]  }
  0x2b   :  { %295 = vmatprep.mubr.bf16.mxu0 %v763_v1  ;;  %335 = vmatprep.mubr.bf16.mxu1 %v763_v1  ;;  %v713_v20 = vld [vmem:[%s938_s2 + $0x38] sm:$0xff]  }
  0x32   :  { %296 = vmatmul.mubr.bf16.gmra.mrb[8].mxu0 %v759_v21  ;;  %336 = vmatmul.mubr.bf16.gmra.mrb[8].mxu1 %v760_v22 }
  0x33   :  { %305 = vmatprep.mubr.bf16.mxu0 %v763_v1  ;;  %345 = vmatprep.mubr.bf16.mxu1 %v763_v1 }
  0x3a   :  { %306 = vmatmul.mubr.bf16.gmra.mrb[12].mxu0 %v761_v23  ;;  %346 = vmatmul.mubr.bf16.gmra.mrb[12].mxu1 %v762_v24 }
  0xf5   :  { %v277_v31 = vpop.f32.mrb[0].mxu0  ;;  %v317_v32 = vpop.f32.mrb[0].mxu1 }
  0xf6   :  { %v487_v33 = vadd.f32 %v677_v27, %v277_v31  ;;  %v495_v34 = vadd.f32 %v693_v28, %v317_v32  ;;  %v279_v35 = vpop.f32.mrb[1].mxu0  ;;  %v319_v36 = vpop.f32.mrb[1].mxu1  ;;  %v690_v31 = vunpack.c.h.bf16 %v709_v19  ;;  %v706_v32 = vunpack.c.h.bf16 %v713_v20 }
  0xf7   :  { %v281_v37 = vpop.f32.mrb[2].mxu0  ;;  %v321_v38 = vpop.f32.mrb[2].mxu1 }
  0xf8   :  { %v659_v41 = vpack.c.bf16 %v279_v35, %v487_v33  ;;  %v667_v42 = vpack.c.bf16 %v319_v36, %v495_v34  ;;  %v488_v43 = vadd.f32 %v678_v29, %v281_v37  ;;  %v496_v44 = vadd.f32 %v694_v30, %v321_v38  ;;  %v283_v45 = vpop.f32.mrb[3].mxu0  ;;  %v323_v46 = vpop.f32.mrb[3].mxu1 }
  0xf9   :  { %v689_v29 = vunpack.c.l.bf16 %v709_v19  ;;  %v705_v30 = vunpack.c.l.bf16 %v713_v20 }
  0xfa   :  { %599 = vst [vmem:[%s939_s3] sm:$0xff] %v659_v41  ;;  %607 = vst [vmem:[%s939_s3 + $0x40] sm:$0xff] %v667_v42  ;;  %v660_v47 = vpack.c.bf16 %v283_v45, %v488_v43  ;;  %v668_v48 = vpack.c.bf16 %v323_v46, %v496_v44 }
  0xfc   :  { %600 = vst [vmem:[%s939_s3 + $0x8] sm:$0xff] %v660_v47  ;;  %608 = vst [vmem:[%s939_s3 + $0x48] sm:$0xff] %v668_v48 }
  0xfd   :  { %v287_v53 = vpop.f32.mrb[4].mxu0  ;;  %v327_v54 = vpop.f32.mrb[4].mxu1 }
  0xfe   :  { %v489_v55 = vadd.f32 %v681_v49, %v287_v53  ;;  %v497_v56 = vadd.f32 %v697_v50, %v327_v54  ;;  %v289_v57 = vpop.f32.mrb[5].mxu0  ;;  %v329_v58 = vpop.f32.mrb[5].mxu1 }
  0xff   :  { %v291_v59 = vpop.f32.mrb[6].mxu0  ;;  %v331_v60 = vpop.f32.mrb[6].mxu1 }
 0x100   :  { %v661_v63 = vpack.c.bf16 %v289_v57, %v489_v55  ;;  %v669_v0 = vpack.c.bf16 %v329_v58, %v497_v56  ;;  %v490_v1 = vadd.f32 %v682_v51, %v291_v59  ;;  %v498_v2 = vadd.f32 %v698_v52, %v331_v60  ;;  %v293_v3 = vpop.f32.mrb[7].mxu0  ;;  %v333_v4 = vpop.f32.mrb[7].mxu1 }
 0x102   :  { %601 = vst [vmem:[%s939_s3 + $0x10] sm:$0xff] %v661_v63  ;;  %609 = vst [vmem:[%s939_s3 + $0x50] sm:$0xff] %v669_v0  ;;  %v662_v5 = vpack.c.bf16 %v293_v3, %v490_v1  ;;  %v670_v6 = vpack.c.bf16 %v333_v4, %v498_v2 }
 0x104   :  { %602 = vst [vmem:[%s939_s3 + $0x18] sm:$0xff] %v662_v5  ;;  %610 = vst [vmem:[%s939_s3 + $0x58] sm:$0xff] %v670_v6 }
 0x105   :  { %v297_v11 = vpop.f32.mrb[8].mxu0  ;;  %v337_v12 = vpop.f32.mrb[8].mxu1 }
 0x106   :  { %v491_v13 = vadd.f32 %v685_v7, %v297_v11  ;;  %v499_v14 = vadd.f32 %v701_v8, %v337_v12  ;;  %v299_v15 = vpop.f32.mrb[9].mxu0  ;;  %v339_v16 = vpop.f32.mrb[9].mxu1 }
 0x107   :  { %v301_v17 = vpop.f32.mrb[10].mxu0  ;;  %v341_v18 = vpop.f32.mrb[10].mxu1 }
 0x108   :  { %v663_v21 = vpack.c.bf16 %v299_v15, %v491_v13  ;;  %v671_v22 = vpack.c.bf16 %v339_v16, %v499_v14  ;;  %v492_v23 = vadd.f32 %v686_v9, %v301_v17  ;;  %v500_v24 = vadd.f32 %v702_v10, %v341_v18  ;;  %v303_v25 = vpop.f32.mrb[11].mxu0  ;;  %v343_v26 = vpop.f32.mrb[11].mxu1 }
 0x10a   :  { %603 = vst [vmem:[%s939_s3 + $0x20] sm:$0xff] %v663_v21  ;;  %611 = vst [vmem:[%s939_s3 + $0x60] sm:$0xff] %v671_v22  ;;  %v664_v27 = vpack.c.bf16 %v303_v25, %v492_v23  ;;  %v672_v28 = vpack.c.bf16 %v343_v26, %v500_v24 }
 0x10c   :  { %604 = vst [vmem:[%s939_s3 + $0x28] sm:$0xff] %v664_v27  ;;  %612 = vst [vmem:[%s939_s3 + $0x68] sm:$0xff] %v672_v28 }
 0x10d   :  { %v307_v33 = vpop.f32.mrb[12].mxu0  ;;  %v347_v34 = vpop.f32.mrb[12].mxu1 }
 0x10e   :  { %v493_v35 = vadd.f32 %v689_v29, %v307_v33  ;;  %v501_v36 = vadd.f32 %v705_v30, %v347_v34  ;;  %v309_v37 = vpop.f32.mrb[13].mxu0  ;;  %v349_v38 = vpop.f32.mrb[13].mxu1 }
 0x10f   :  { %v311_v39 = vpop.f32.mrb[14].mxu0  ;;  %v351_v40 = vpop.f32.mrb[14].mxu1 }
 0x110   :  { %v665_v41 = vpack.c.bf16 %v309_v37, %v493_v35  ;;  %v673_v42 = vpack.c.bf16 %v349_v38, %v501_v36  ;;  %v494_v43 = vadd.f32 %v690_v31, %v311_v39  ;;  %v502_v44 = vadd.f32 %v706_v32, %v351_v40  ;;  %v313_v45 = vpop.f32.mrb[15].mxu0  ;;  %v353_v46 = vpop.f32.mrb[15].mxu1 }
 0x112   :  { %605 = vst [vmem:[%s939_s3 + $0x30] sm:$0xff] %v665_v41  ;;  %613 = vst [vmem:[%s939_s3 + $0x70] sm:$0xff] %v673_v42  ;;  %v666_v47 = vpack.c.bf16 %v313_v45, %v494_v43  ;;  %v674_v48 = vpack.c.bf16 %v353_v46, %v502_v44 }
 0x114   :  { %606 = vst [vmem:[%s939_s3 + $0x38] sm:$0xff] %v666_v47  ;;  %614 = vst [vmem:[%s939_s3 + $0x78] sm:$0xff] %v674_v48 }

// kernel: _lambda_.23
= control target key start
LH: loop header
LB: loop body
LE: loop exit
PB: predicated region body
PF: predicated region fallthrough
CT: control target
= control target key end

     0   :  { %v43_v8 = vlaneseq  ;;  %s704_s3 = inlined_call_operand.vmem [shape: bf16[256,256], index: 3, kind: input, shape index: {}]   ;;  %s705_s0 = inlined_call_operand.vmem [shape: bf16[32,256], index: 0, kind: input, shape index: {}]   ;;  %s706_s1 = inlined_call_operand.vmem [shape: f32[1,256], index: 1, kind: input, shape index: {}]   ;;  %s707_s2 = inlined_call_operand.vmem [shape: f32[1,256], index: 2, kind: input, shape index: {}]   ;;  %s708_s4 = inlined_call_operand.vmem [shape: bf16[32,256], index: 4, kind: output, shape index: {}]  }
   0x1   :  { %v477_v0 = vld [vmem:[%s704_s3 + $0x4] ss:$8 sps:$4 sm:$0xff]   ;;  %v479_v1 = vld [vmem:[%s704_s3] ss:$8 sps:$4 sm:$0xff]   ;;  %v480_v2 = vld [vmem:[%s704_s3 + $0x14] ss:$8 sps:$4 sm:$0xff]  }
   0x2   :  { %293 = vmatprep.subr.bf16.mxu0 %v477_v0  ;;  %445 = vmatprep.subr.bf16.mxu1 %v477_v0  ;;  %v482_v3 = vld [vmem:[%s704_s3 + $0x10] ss:$8 sps:$4 sm:$0xff]   ;;  %v483_v4 = vld [vmem:[%s704_s3 + $0x24] ss:$8 sps:$4 sm:$0xff]   ;;  %v485_v5 = vld [vmem:[%s704_s3 + $0x20] ss:$8 sps:$4 sm:$0xff]  }
   0x3   :  { %294 = vmatpush1.bf16.msra.mxu0 %v479_v1  ;;  %461 = vmatpush1.bf16.msra.mxu1 %v479_v1  ;;  %v486_v6 = vld [vmem:[%s704_s3 + $0x34] ss:$8 sps:$4 sm:$0xff]   ;;  %v488_v7 = vld [vmem:[%s704_s3 + $0x30] ss:$8 sps:$4 sm:$0xff]   ;;  %v489_v9 = vld [vmem:[%s704_s3 + $0x44] ss:$8 sps:$4 sm:$0xff]  }
   0x4   :  { %295 = vmatprep.subr.bf16.mxu0 %v480_v2  ;;  %446 = vmatprep.subr.bf16.mxu1 %v480_v2  ;;  %v491_v10 = vld [vmem:[%s704_s3 + $0x40] ss:$8 sps:$4 sm:$0xff]   ;;  %v580_v11 = vshrl.u32 %v43_v8, 7  ;;  %v492_v12 = vld [vmem:[%s704_s3 + $0x54] ss:$8 sps:$4 sm:$0xff]  }
   0x5   :  { %v494_v13 = vld [vmem:[%s704_s3 + $0x50] ss:$8 sps:$4 sm:$0xff]   ;;  %v495_v15 = vld [vmem:[%s704_s3 + $0x64] ss:$8 sps:$4 sm:$0xff]   ;;  %v607_v20 = vld [vmem:[%s706_s1] sm:$0x3] }
   0x6   :  { %v49_v14 = vsub.s32 1, %v580_v11  ;;  %v595_v16 = vld [vmem:[%s705_s0] sm:$0xff]  ;;  %v600_v17 = vld [vmem:[%s705_s0 + $0x8] sm:$0xff]  ;;  %v617_v22 = vld [vmem:[%s705_s0 + $0x10] sm:$0xff]  ;;  %v45_v52 = vsub.s32 0, %v580_v11 }
   0x7   :  { %296 = vmatpush1.bf16.msra.mxu0 %v482_v3  ;;  %462 = vmatpush1.bf16.msra.mxu1 %v482_v3  ;;  %v34_v18 = vunpack.c.h.bf16 %v595_v16  ;;  %v36_v19 = vunpack.c.h.bf16 %v600_v17  ;;  %v612_v21 = vld [vmem:[%s707_s2] sm:$0x3]  ;;  %v626_v25 = vld [vmem:[%s705_s0 + $0x18] sm:$0xff]  ;;  %v38_v28 = vunpack.c.h.bf16 %v617_v22  ;;  %v501_v37 = vld [vmem:[%s704_s3 + $0x84] ss:$8 sps:$4 sm:$0xff]   ;;  %v33_v55 = vunpack.c.l.bf16 %v595_v16 }
   0x8   :  { %297 = vmatprep.subr.bf16.mxu0 %v483_v4  ;;  %447 = vmatprep.subr.bf16.mxu1 %v483_v4  ;;  %v497_v23 = vld [vmem:[%s704_s3 + $0x60] ss:$8 sps:$4 sm:$0xff]   ;;  %v50_v24 = vrot.slane %v607_v20, %v49_v14  ;;  %v498_v26 = vld [vmem:[%s704_s3 + $0x74] ss:$8 sps:$4 sm:$0xff]   ;;  %v70_v27 = vrot.slane %v612_v21, %v49_v14  ;;  %v40_v29 = vunpack.c.h.bf16 %v626_v25  ;;  %v500_v34 = vld [vmem:[%s704_s3 + $0x70] ss:$8 sps:$4 sm:$0xff]   ;;  %v35_v56 = vunpack.c.l.bf16 %v600_v17 }
   0x9   :  { %v503_v44 = vld [vmem:[%s704_s3 + $0x80] ss:$8 sps:$4 sm:$0xff]   ;;  %v504_v46 = vld [vmem:[%s704_s3 + $0x94] ss:$8 sps:$4 sm:$0xff]   ;;  %v506_v48 = vld [vmem:[%s704_s3 + $0x90] ss:$8 sps:$4 sm:$0xff]   ;;  %v46_v57 = vrot.slane %v607_v20, %v45_v52  ;;  %v37_v58 = vunpack.c.l.bf16 %v617_v22  ;;  %v39_v59 = vunpack.c.l.bf16 %v626_v25  ;;  %v66_v62 = vrot.slane %v612_v21, %v45_v52 }
   0xa   :  { %v54_v30 = vmul.f32 %v50_v24, %v34_v18  ;;  %v56_v31 = vmul.f32 %v50_v24, %v36_v19  ;;  %v58_v32 = vmul.f32 %v50_v24, %v38_v28  ;;  %v60_v33 = vmul.f32 %v50_v24, %v40_v29  ;;  %v507_v49 = vld [vmem:[%s704_s3 + $0xa4] ss:$8 sps:$4 sm:$0xff]   ;;  %v509_v50 = vld [vmem:[%s704_s3 + $0xa0] ss:$8 sps:$4 sm:$0xff]   ;;  %v510_v51 = vld [vmem:[%s704_s3 + $0xb4] ss:$8 sps:$4 sm:$0xff]  }
   0xb   :  { %298 = vmatpush1.bf16.msra.mxu0 %v485_v5  ;;  %463 = vmatpush1.bf16.msra.mxu1 %v485_v5  ;;  %v512_v53 = vld [vmem:[%s704_s3 + $0xb0] ss:$8 sps:$4 sm:$0xff]   ;;  %v513_v54 = vld [vmem:[%s704_s3 + $0xc4] ss:$8 sps:$4 sm:$0xff]   ;;  %v515_v60 = vld [vmem:[%s704_s3 + $0xc0] ss:$8 sps:$4 sm:$0xff]   ;;  %v53_v63 = vmul.f32 %v46_v57, %v33_v55  ;;  %v55_v0 = vmul.f32 %v46_v57, %v35_v56  ;;  %v57_v1 = vmul.f32 %v46_v57, %v37_v58 }
   0xc   :  { %299 = vmatprep.subr.bf16.mxu0 %v486_v6  ;;  %448 = vmatprep.subr.bf16.mxu1 %v486_v6  ;;  %v74_v35 = vadd.f32 %v70_v27, %v54_v30  ;;  %v76_v36 = vadd.f32 %v70_v27, %v56_v31  ;;  %v78_v38 = vadd.f32 %v70_v27, %v58_v32  ;;  %v516_v61 = vld [vmem:[%s704_s3 + $0xd4] ss:$8 sps:$4 sm:$0xff]   ;;  %v518_v3 = vld [vmem:[%s704_s3 + $0xd0] ss:$8 sps:$4 sm:$0xff]   ;;  %v519_v4 = vld [vmem:[%s704_s3 + $0xe4] ss:$8 sps:$4 sm:$0xff]  }
   0xd   :  { %v80_v39 = vadd.f32 %v70_v27, %v60_v33  ;;  %v59_v2 = vmul.f32 %v46_v57, %v39_v59  ;;  %v73_v5 = vadd.f32 %v66_v62, %v53_v63  ;;  %v75_v6 = vadd.f32 %v66_v62, %v55_v0 }
   0xe   :  { %v82_v40 = vmax.f32 %v74_v35, 0.0  ;;  %v84_v41 = vmax.f32 %v76_v36, 0.0  ;;  %v86_v42 = vmax.f32 %v78_v38, 0.0 }
   0xf   :  { %300 = vmatpush1.bf16.msra.mxu0 %v488_v7  ;;  %464 = vmatpush1.bf16.msra.mxu1 %v488_v7  ;;  %v88_v43 = vmax.f32 %v80_v39, 0.0  ;;  %v77_v7 = vadd.f32 %v66_v62, %v57_v1  ;;  %v79_v8 = vadd.f32 %v66_v62, %v59_v2  ;;  %v81_v11 = vmax.f32 %v73_v5, 0.0 }
  0x10   :  { %301 = vmatprep.subr.bf16.mxu0 %v489_v9  ;;  %449 = vmatprep.subr.bf16.mxu1 %v489_v9  ;;  %v90_v45 = vpack.c.bf16 %v84_v41, %v82_v40  ;;  %v521_v9 = vld [vmem:[%s704_s3 + $0xe0] ss:$8 sps:$4 sm:$0xff]  }
  0x11   :  { %v92_v47 = vpack.c.bf16 %v88_v43, %v86_v42  ;;  %v87_v14 = vmax.f32 %v79_v8, 0.0 }
  0x12   :  { %325 = vmatprep.mubr.bf16.mxu0 %v90_v45 }
  0x13   :  { %302 = vmatpush1.bf16.msra.mxu0 %v491_v10  ;;  %465 = vmatpush1.bf16.msra.mxu1 %v491_v10  ;;  %v522_v10 = vld [vmem:[%s704_s3 + $0xf4] ss:$8 sps:$4 sm:$0xff]  }
  0x14   :  { %303 = vmatprep.subr.bf16.mxu0 %v492_v12  ;;  %450 = vmatprep.subr.bf16.mxu1 %v492_v12  ;;  %v83_v12 = vmax.f32 %v75_v6, 0.0 }
  0x15   :  { %335 = vmatprep.mubr.bf16.mxu1 %v92_v47 }
  0x16   :  { %v89_v16 = vpack.c.bf16 %v83_v12, %v81_v11 }
  0x17   :  { %304 = vmatpush1.bf16.msra.mxu0 %v494_v13  ;;  %466 = vmatpush1.bf16.msra.mxu1 %v494_v13  ;;  %v85_v13 = vmax.f32 %v77_v7, 0.0 }
  0x18   :  { %305 = vmatprep.subr.bf16.mxu0 %v495_v15  ;;  %451 = vmatprep.subr.bf16.mxu1 %v495_v15  ;;  %v524_v15 = vld [vmem:[%s704_s3 + $0xf0] ss:$8 sps:$4 sm:$0xff]  }
  0x19   :  { %v91_v17 = vpack.c.bf16 %v87_v14, %v85_v13 }
  0x1b   :  { %306 = vmatpush1.bf16.msra.mxu0 %v497_v23  ;;  %467 = vmatpush1.bf16.msra.mxu1 %v497_v23 }
  0x1c   :  { %307 = vmatprep.subr.bf16.mxu0 %v498_v26  ;;  %452 = vmatprep.subr.bf16.mxu1 %v498_v26 }
  0x1f   :  { %308 = vmatpush1.bf16.msra.mxu0 %v500_v34  ;;  %468 = vmatpush1.bf16.msra.mxu1 %v500_v34 }
  0x20   :  { %309 = vmatprep.subr.bf16.mxu0 %v501_v37  ;;  %453 = vmatprep.subr.bf16.mxu1 %v501_v37 }
  0x23   :  { %310 = vmatpush1.bf16.msra.mxu0 %v503_v44  ;;  %469 = vmatpush1.bf16.msra.mxu1 %v503_v44 }
  0x24   :  { %311 = vmatprep.subr.bf16.mxu0 %v504_v46  ;;  %454 = vmatprep.subr.bf16.mxu1 %v504_v46 }
  0x27   :  { %312 = vmatpush1.bf16.msra.mxu0 %v506_v48  ;;  %470 = vmatpush1.bf16.msra.mxu1 %v506_v48 }
  0x28   :  { %313 = vmatprep.subr.bf16.mxu0 %v507_v49  ;;  %455 = vmatprep.subr.bf16.mxu1 %v507_v49 }
  0x2b   :  { %314 = vmatpush1.bf16.msra.mxu0 %v509_v50  ;;  %471 = vmatpush1.bf16.msra.mxu1 %v509_v50 }
  0x2c   :  { %315 = vmatprep.subr.bf16.mxu0 %v510_v51  ;;  %456 = vmatprep.subr.bf16.mxu1 %v510_v51 }
  0x2f   :  { %316 = vmatpush1.bf16.msra.mxu0 %v512_v53  ;;  %472 = vmatpush1.bf16.msra.mxu1 %v512_v53 }
  0x30   :  { %317 = vmatprep.subr.bf16.mxu0 %v513_v54  ;;  %457 = vmatprep.subr.bf16.mxu1 %v513_v54 }
  0x33   :  { %318 = vmatpush1.bf16.msra.mxu0 %v515_v60  ;;  %473 = vmatpush1.bf16.msra.mxu1 %v515_v60 }
  0x34   :  { %319 = vmatprep.subr.bf16.mxu0 %v516_v61  ;;  %458 = vmatprep.subr.bf16.mxu1 %v516_v61 }
  0x37   :  { %320 = vmatpush1.bf16.msra.mxu0 %v518_v3  ;;  %474 = vmatpush1.bf16.msra.mxu1 %v518_v3 }
  0x38   :  { %321 = vmatprep.subr.bf16.mxu0 %v519_v4  ;;  %459 = vmatprep.subr.bf16.mxu1 %v519_v4 }
  0x3b   :  { %322 = vmatpush1.bf16.msra.mxu0 %v521_v9  ;;  %475 = vmatpush1.bf16.msra.mxu1 %v521_v9 }
  0x3c   :  { %323 = vmatprep.subr.bf16.mxu0 %v522_v10  ;;  %460 = vmatprep.subr.bf16.mxu1 %v522_v10 }
  0x3f   :  { %324 = vmatpush1.bf16.msra.mxu0 %v524_v15  ;;  %476 = vmatpush1.bf16.msra.mxu1 %v524_v15 }
  0x42   :  { %326 = vmatmul.mubr.bf16.vlgmr.msra.gmra.mrb[0].mxu0 %v89_v16  ;;  %336 = vmatmul.mubr.bf16.vlgmr.msra.gmra.mrb[0].mxu1 %v91_v17 }
 0x115   :  { %v327_v18 = vpop.f32.mrb[0].mxu0  ;;  %v337_v19 = vpop.f32.mrb[0].mxu1 }
 0x116   :  { %v329_v20 = vpop.f32.mrb[1].mxu0  ;;  %v339_v21 = vpop.f32.mrb[1].mxu1 }
 0x117   :  { %v441_v22 = vpack.c.bf16 %v329_v20, %v327_v18  ;;  %v443_v23 = vpack.c.bf16 %v339_v21, %v337_v19  ;;  %v331_v24 = vpop.f32.mrb[2].mxu0  ;;  %v341_v25 = vpop.f32.mrb[2].mxu1 }
 0x118   :  { %v333_v26 = vpop.f32.mrb[3].mxu0  ;;  %v343_v27 = vpop.f32.mrb[3].mxu1 }
 0x119   :  { %397 = vst [vmem:[%s708_s4] sm:$0xff] %v441_v22  ;;  %399 = vst [vmem:[%s708_s4 + $0x10] sm:$0xff] %v443_v23  ;;  %v442_v28 = vpack.c.bf16 %v333_v26, %v331_v24  ;;  %v444_v29 = vpack.c.bf16 %v343_v27, %v341_v25 }
 0x11b   :  { %398 = vst [vmem:[%s708_s4 + $0x8] sm:$0xff] %v442_v28  ;;  %400 = vst [vmem:[%s708_s4 + $0x18] sm:$0xff] %v444_v29 }

// kernel: _lambda_.26
= control target key start
LH: loop header
LB: loop body
LE: loop exit
PB: predicated region body
PF: predicated region fallthrough
CT: control target
= control target key end

     0   :  { %v349_v1 = vmov 0   ;;  %s442_s1 = inlined_call_operand.vmem [shape: bf16[128,256], index: 1, kind: input, shape index: {}]   ;;  %s443_s0 = inlined_call_operand.vmem [shape: bf16[32,128], index: 0, kind: input, shape index: {}]   ;;  %s444_s2 = inlined_call_operand.vmem [shape: bf16[32,128], index: 2, kind: input, shape index: {}]   ;;  %s445_s3 = inlined_call_operand.vmem [shape: bf16[32,256], index: 3, kind: output, shape index: {}]  }
   0x1   :  { %v323_v0 = vld [vmem:[%s442_s1 + $0x4] ss:$8 sps:$4 sm:$0xff]   ;;  %179 = vmatprep.mubr.bf16.mxu0 %v349_v1  ;;  %189 = vmatprep.mubr.bf16.mxu1 %v349_v1  ;;  %v325_v2 = vld [vmem:[%s442_s1] ss:$8 sps:$4 sm:$0xff]   ;;  %v326_v3 = vld [vmem:[%s442_s1 + $0x14] ss:$8 sps:$4 sm:$0xff]  }
   0x2   :  { %147 = vmatprep.subr.bf16.mxu0 %v323_v0  ;;  %306 = vmatprep.subr.bf16.mxu1 %v323_v0  ;;  %v328_v4 = vld [vmem:[%s442_s1 + $0x10] ss:$8 sps:$4 sm:$0xff]   ;;  %v329_v5 = vld [vmem:[%s442_s1 + $0x24] ss:$8 sps:$4 sm:$0xff]   ;;  %v331_v6 = vld [vmem:[%s442_s1 + $0x20] ss:$8 sps:$4 sm:$0xff]  }
   0x3   :  { %148 = vmatpush1.bf16.msra.mxu0 %v325_v2  ;;  %314 = vmatpush1.bf16.msra.mxu1 %v325_v2  ;;  %v332_v7 = vld [vmem:[%s442_s1 + $0x34] ss:$8 sps:$4 sm:$0xff]   ;;  %v334_v8 = vld [vmem:[%s442_s1 + $0x30] ss:$8 sps:$4 sm:$0xff]   ;;  %v335_v9 = vld [vmem:[%s442_s1 + $0x44] ss:$8 sps:$4 sm:$0xff]  }
   0x4   :  { %149 = vmatprep.subr.bf16.mxu0 %v326_v3  ;;  %307 = vmatprep.subr.bf16.mxu1 %v326_v3  ;;  %v337_v10 = vld [vmem:[%s442_s1 + $0x40] ss:$8 sps:$4 sm:$0xff]   ;;  %v338_v11 = vld [vmem:[%s442_s1 + $0x54] ss:$8 sps:$4 sm:$0xff]   ;;  %v340_v12 = vld [vmem:[%s442_s1 + $0x50] ss:$8 sps:$4 sm:$0xff]  }
   0x5   :  { %v341_v13 = vld [vmem:[%s442_s1 + $0x64] ss:$8 sps:$4 sm:$0xff]   ;;  %v343_v14 = vld [vmem:[%s442_s1 + $0x60] ss:$8 sps:$4 sm:$0xff]   ;;  %v344_v15 = vld [vmem:[%s442_s1 + $0x74] ss:$8 sps:$4 sm:$0xff]  }
   0x6   :  { %v346_v16 = vld [vmem:[%s442_s1 + $0x70] ss:$8 sps:$4 sm:$0xff]   ;;  %v347_v17 = vld [vmem:[%s443_s0] sm:$0xff]   ;;  %v348_v18 = vld [vmem:[%s443_s0 + $0x8] sm:$0xff]  }
   0x7   :  { %150 = vmatpush1.bf16.msra.mxu0 %v328_v4  ;;  %315 = vmatpush1.bf16.msra.mxu1 %v328_v4  ;;  %v298_v19 = vld [vmem:[%s444_s2] sm:$0xff]   ;;  %v305_v20 = vld [vmem:[%s444_s2 + $0x8] sm:$0xff]  }
   0x8   :  { %151 = vmatprep.subr.bf16.mxu0 %v329_v5  ;;  %308 = vmatprep.subr.bf16.mxu1 %v329_v5  ;;  %v299_v21 = vunpack.c.l.bf16 %v298_v19  ;;  %v303_v22 = vunpack.c.l.bf16 %v305_v20  ;;  %v300_v23 = vunpack.c.h.bf16 %v298_v19  ;;  %v304_v24 = vunpack.c.h.bf16 %v305_v20 }
   0xb   :  { %152 = vmatpush1.bf16.msra.mxu0 %v331_v6  ;;  %316 = vmatpush1.bf16.msra.mxu1 %v331_v6 }
   0xc   :  { %153 = vmatprep.subr.bf16.mxu0 %v332_v7  ;;  %309 = vmatprep.subr.bf16.mxu1 %v332_v7 }
   0xf   :  { %154 = vmatpush1.bf16.msra.mxu0 %v334_v8  ;;  %317 = vmatpush1.bf16.msra.mxu1 %v334_v8 }
  0x10   :  { %155 = vmatprep.subr.bf16.mxu0 %v335_v9  ;;  %310 = vmatprep.subr.bf16.mxu1 %v335_v9 }
  0x13   :  { %156 = vmatpush1.bf16.msra.mxu0 %v337_v10  ;;  %318 = vmatpush1.bf16.msra.mxu1 %v337_v10 }
  0x14   :  { %157 = vmatprep.subr.bf16.mxu0 %v338_v11  ;;  %311 = vmatprep.subr.bf16.mxu1 %v338_v11 }
  0x17   :  { %158 = vmatpush1.bf16.msra.mxu0 %v340_v12  ;;  %319 = vmatpush1.bf16.msra.mxu1 %v340_v12 }
  0x18   :  { %159 = vmatprep.subr.bf16.mxu0 %v341_v13  ;;  %312 = vmatprep.subr.bf16.mxu1 %v341_v13 }
  0x1b   :  { %160 = vmatpush1.bf16.msra.mxu0 %v343_v14  ;;  %320 = vmatpush1.bf16.msra.mxu1 %v343_v14 }
  0x1c   :  { %161 = vmatprep.subr.bf16.mxu0 %v344_v15  ;;  %313 = vmatprep.subr.bf16.mxu1 %v344_v15 }
  0x1f   :  { %162 = vmatpush1.bf16.msra.mxu0 %v346_v16  ;;  %321 = vmatpush1.bf16.msra.mxu1 %v346_v16 }
  0x22   :  { %180 = vmatmul.mubr.bf16.vlgmr.msra.gmra.mrb[0].mxu0 %v347_v17  ;;  %190 = vmatmul.mubr.bf16.vlgmr.msra.gmra.mrb[0].mxu1 %v348_v18 }
  0xf5   :  { %v181_v25 = vpop.f32.mrb[0].mxu0  ;;  %v191_v26 = vpop.f32.mrb[0].mxu1 }
  0xf6   :  { %v235_v27 = vadd.f32 %v299_v21, %v181_v25  ;;  %v237_v28 = vadd.f32 %v303_v22, %v191_v26  ;;  %v183_v29 = vpop.f32.mrb[1].mxu0  ;;  %v193_v30 = vpop.f32.mrb[1].mxu1 }
  0xf7   :  { %v185_v31 = vpop.f32.mrb[2].mxu0  ;;  %v195_v32 = vpop.f32.mrb[2].mxu1 }
  0xf8   :  { %v293_v33 = vpack.c.bf16 %v183_v29, %v235_v27  ;;  %v295_v34 = vpack.c.bf16 %v193_v30, %v237_v28  ;;  %v236_v35 = vadd.f32 %v300_v23, %v185_v31  ;;  %v238_v36 = vadd.f32 %v304_v24, %v195_v32  ;;  %v187_v37 = vpop.f32.mrb[3].mxu0  ;;  %v197_v38 = vpop.f32.mrb[3].mxu1 }
  0xfa   :  { %263 = vst [vmem:[%s445_s3] sm:$0xff] %v293_v33  ;;  %265 = vst [vmem:[%s445_s3 + $0x10] sm:$0xff] %v295_v34  ;;  %v294_v39 = vpack.c.bf16 %v187_v37, %v236_v35  ;;  %v296_v40 = vpack.c.bf16 %v197_v38, %v238_v36 }
  0xfc   :  { %264 = vst [vmem:[%s445_s3 + $0x8] sm:$0xff] %v294_v39  ;;  %266 = vst [vmem:[%s445_s3 + $0x18] sm:$0xff] %v296_v40 }

// kernel: _lambda_.24
= control target key start
LH: loop header
LB: loop body
LE: loop exit
PB: predicated region body
PF: predicated region fallthrough
CT: control target
= control target key end

     0   :  { %v94_v5 = vlaneseq  ;;  %s1138_s3 = inlined_call_operand.vmem [shape: bf16[256,128], index: 3, kind: input, shape index: {}]   ;;  %s1139_s0 = inlined_call_operand.vmem [shape: bf16[128,256], index: 0, kind: input, shape index: {}]   ;;  %s1140_s1 = inlined_call_operand.vmem [shape: f32[1,256], index: 1, kind: input, shape index: {}]   ;;  %s1141_s2 = inlined_call_operand.vmem [shape: f32[1,256], index: 2, kind: input, shape index: {}]   ;;  %s1142_s4 = inlined_call_operand.vmem [shape: f32[1,128], index: 4, kind: input, shape index: {}]   ;;  %s1143_s5 = inlined_call_operand.vmem [shape: f32[1,128], index: 5, kind: input, shape index: {}]   ;;  %s1144_s6 = inlined_call_operand.vmem [shape: bf16[128,128], index: 6, kind: output, shape index: {}]  }
   0x1   :  { %v843_v0 = vld [vmem:[%s1138_s3 + $0x40] sm:$0xff]   ;;  %v845_v2 = vld [vmem:[%s1138_s3 + $0x48] sm:$0xff]   ;;  %v847_v4 = vld [vmem:[%s1138_s3 + $0x50] sm:$0xff]  }
   0x2   :  { %v844_v1 = vld [vmem:[%s1138_s3] sm:$0xff]   ;;  %763 = vmatprep.subr.bf16.mxu0 %v843_v0  ;;  %827 = vmatprep.subr.bf16.mxu1 %v843_v0  ;;  %v846_v3 = vld [vmem:[%s1138_s3 + $0x8] sm:$0xff]   ;;  %v848_v6 = vld [vmem:[%s1138_s3 + $0x10] sm:$0xff]   ;;  %v95_v8 = vshrl.u32 %v94_v5, 7 }
   0x3   :  { %764 = vmatpush3.bf16.msra.mxu0 %v844_v1  ;;  %835 = vmatpush3.bf16.msra.mxu1 %v844_v1  ;;  %v849_v7 = vld [vmem:[%s1138_s3 + $0x58] sm:$0xff]   ;;  %v851_v10 = vld [vmem:[%s1138_s3 + $0x60] sm:$0xff]   ;;  %v853_v14 = vld [vmem:[%s1138_s3 + $0x68] sm:$0xff]  }
   0x4   :  { %765 = vmatprep.subr.bf16.mxu0 %v845_v2  ;;  %828 = vmatprep.subr.bf16.mxu1 %v845_v2  ;;  %v850_v9 = vld [vmem:[%s1138_s3 + $0x18] sm:$0xff]   ;;  %v96_v11 = vsub.s32 0, %v95_v8  ;;  %v852_v12 = vld [vmem:[%s1138_s3 + $0x20] sm:$0xff]   ;;  %v100_v13 = vsub.s32 1, %v95_v8  ;;  %v45_v16 = vld [vmem:[%s1139_s0 + $0x8] sm:$0xff] }
   0x5   :  { %v44_v15 = vld [vmem:[%s1139_s0] sm:$0xff]  ;;  %v62_v20 = vunpack.c.l.bf16 %v45_v16  ;;  %v63_v21 = vunpack.c.h.bf16 %v45_v16  ;;  %v53_v24 = vld [vmem:[%s1139_s0 + $0x48] sm:$0xff]  ;;  %v956_v29 = vld [vmem:[%s1139_s0 + $0x10] sm:$0xff] }
   0x6   :  { %v92_v17 = vld [vmem:[%s1140_s1] sm:$0x3]  ;;  %v60_v18 = vunpack.c.l.bf16 %v44_v15  ;;  %v61_v19 = vunpack.c.h.bf16 %v44_v15  ;;  %v854_v30 = vld [vmem:[%s1138_s3 + $0x28] sm:$0xff]   ;;  %v78_v33 = vunpack.c.l.bf16 %v53_v24  ;;  %v79_v34 = vunpack.c.h.bf16 %v53_v24  ;;  %v855_v35 = vld [vmem:[%s1138_s3 + $0x70] sm:$0xff]  }
   0x7   :  { %766 = vmatpush3.bf16.msra.mxu0 %v846_v3  ;;  %836 = vmatpush3.bf16.msra.mxu1 %v846_v3  ;;  %v136_v22 = vld [vmem:[%s1141_s2] sm:$0x3]  ;;  %v945_v25 = vrot.slane %v92_v17, %v96_v11  ;;  %v947_v26 = vrot.slane %v92_v17, %v100_v13  ;;  %v47_v39 = vld [vmem:[%s1139_s0 + $0x18] sm:$0xff]  ;;  %v65_v40 = vunpack.c.h.bf16 %v956_v29  ;;  %v856_v49 = vld [vmem:[%s1138_s3 + $0x30] sm:$0xff]  }
   0x8   :  { %767 = vmatprep.subr.bf16.mxu0 %v847_v4  ;;  %829 = vmatprep.subr.bf16.mxu1 %v847_v4  ;;  %v52_v23 = vld [vmem:[%s1139_s0 + $0x40] sm:$0xff]  ;;  %v949_v27 = vrot.slane %v136_v22, %v96_v11  ;;  %v951_v28 = vrot.slane %v136_v22, %v100_v13  ;;  %v67_v53 = vunpack.c.h.bf16 %v47_v39  ;;  %v857_v54 = vld [vmem:[%s1138_s3 + $0x78] sm:$0xff]   ;;  %v54_v59 = vld [vmem:[%s1139_s0 + $0x50] sm:$0xff]  ;;  %v64_v13 = vunpack.c.l.bf16 %v956_v29 }
   0x9   :  { %v76_v31 = vunpack.c.l.bf16 %v52_v23  ;;  %v77_v32 = vunpack.c.h.bf16 %v52_v23  ;;  %v105_v36 = vmul.f32 %v947_v26, %v61_v19  ;;  %v107_v37 = vmul.f32 %v947_v26, %v63_v21  ;;  %v55_v0 = vld [vmem:[%s1139_s0 + $0x58] sm:$0xff] }
   0xa   :  { %v104_v38 = vmul.f32 %v945_v25, %v60_v18  ;;  %v123_v42 = vmul.f32 %v947_v26, %v79_v34  ;;  %v106_v43 = vmul.f32 %v945_v25, %v62_v20  ;;  %v122_v48 = vmul.f32 %v945_v25, %v78_v33  ;;  %v858_v5 = vld [vmem:[%s1138_s3 + $0x38] sm:$0xff]   ;;  %v48_v18 = vld [vmem:[%s1139_s0 + $0x20] sm:$0xff] }
   0xb   :  { %768 = vmatpush3.bf16.msra.mxu0 %v848_v6  ;;  %837 = vmatpush3.bf16.msra.mxu1 %v848_v6  ;;  %v121_v41 = vmul.f32 %v947_v26, %v77_v32  ;;  %v120_v44 = vmul.f32 %v945_v25, %v76_v31  ;;  %v149_v45 = vadd.f32 %v951_v28, %v105_v36  ;;  %v66_v16 = vunpack.c.l.bf16 %v47_v39  ;;  %v49_v31 = vld [vmem:[%s1139_s0 + $0x28] sm:$0xff]  ;;  %v56_v36 = vld [vmem:[%s1139_s0 + $0x60] sm:$0xff] }
   0xc   :  { %769 = vmatprep.subr.bf16.mxu0 %v849_v7  ;;  %830 = vmatprep.subr.bf16.mxu1 %v849_v7  ;;  %v151_v46 = vadd.f32 %v951_v28, %v107_v37  ;;  %v148_v47 = vadd.f32 %v949_v27, %v104_v38  ;;  %v167_v51 = vadd.f32 %v951_v28, %v123_v42  ;;  %v80_v17 = vunpack.c.l.bf16 %v54_v59 }
   0xd   :  { %v165_v50 = vadd.f32 %v951_v28, %v121_v41  ;;  %v150_v52 = vadd.f32 %v949_v27, %v106_v43  ;;  %v181_v55 = vmax.f32 %v149_v45, 0.0  ;;  %v164_v58 = vadd.f32 %v949_v27, %v120_v44  ;;  %v57_v41 = vld [vmem:[%s1139_s0 + $0x68] sm:$0xff] }
   0xe   :  { %v183_v56 = vmax.f32 %v151_v46, 0.0  ;;  %v180_v57 = vmax.f32 %v148_v47, 0.0  ;;  %v199_v61 = vmax.f32 %v167_v51, 0.0  ;;  %v166_v63 = vadd.f32 %v949_v27, %v122_v48 }
   0xf   :  { %770 = vmatpush3.bf16.msra.mxu0 %v850_v9  ;;  %838 = vmatpush3.bf16.msra.mxu1 %v850_v9  ;;  %v197_v60 = vmax.f32 %v165_v50, 0.0  ;;  %v182_v62 = vmax.f32 %v150_v52, 0.0  ;;  %v196_v2 = vmax.f32 %v164_v58, 0.0  ;;  %v109_v3 = vmul.f32 %v947_v26, %v65_v40 }
  0x10   :  { %771 = vmatprep.subr.bf16.mxu0 %v851_v10  ;;  %831 = vmatprep.subr.bf16.mxu1 %v851_v10  ;;  %v213_v1 = vpack.c.bf16 %v183_v56, %v181_v55  ;;  %v111_v4 = vmul.f32 %v947_v26, %v67_v53  ;;  %v198_v8 = vmax.f32 %v166_v63, 0.0  ;;  %v81_v9 = vunpack.c.h.bf16 %v54_v59 }
  0x11   :  { %v221_v6 = vpack.c.bf16 %v199_v61, %v197_v60  ;;  %v212_v7 = vpack.c.bf16 %v182_v62, %v180_v57  ;;  %v153_v10 = vadd.f32 %v951_v28, %v109_v3  ;;  %v108_v22 = vmul.f32 %v945_v25, %v64_v13  ;;  %v50_v62 = vld [vmem:[%s1139_s0 + $0x30] sm:$0xff] }
  0x12   :  { %v155_v11 = vadd.f32 %v951_v28, %v111_v4  ;;  %404 = vmatprep.mubr.bf16.mxu0 %v213_v1  ;;  %v125_v15 = vmul.f32 %v947_v26, %v81_v9  ;;  %v110_v24 = vmul.f32 %v945_v25, %v66_v16  ;;  %v82_v29 = vunpack.c.l.bf16 %v55_v0 }
  0x13   :  { %772 = vmatpush3.bf16.msra.mxu0 %v852_v12  ;;  %839 = vmatpush3.bf16.msra.mxu1 %v852_v12  ;;  %v83_v12 = vunpack.c.h.bf16 %v55_v0  ;;  %v185_v19 = vmax.f32 %v153_v10, 0.0  ;;  %v152_v34 = vadd.f32 %v949_v27, %v108_v22  ;;  %v71_v44 = vunpack.c.h.bf16 %v49_v31 }
  0x14   :  { %773 = vmatprep.subr.bf16.mxu0 %v853_v14  ;;  %832 = vmatprep.subr.bf16.mxu1 %v853_v14  ;;  %v220_v14 = vpack.c.bf16 %v198_v8, %v196_v2  ;;  %v187_v20 = vmax.f32 %v155_v11, 0.0  ;;  %v169_v23 = vadd.f32 %v951_v28, %v125_v15  ;;  %v154_v38 = vadd.f32 %v949_v27, %v110_v24 }
  0x15   :  { %436 = vmatprep.mubr.bf16.mxu1 %v221_v6  ;;  %v127_v21 = vmul.f32 %v947_v26, %v83_v12  ;;  %v126_v39 = vmul.f32 %v945_v25, %v82_v29  ;;  %v184_v43 = vmax.f32 %v152_v34, 0.0  ;;  %v115_v51 = vmul.f32 %v947_v26, %v71_v44  ;;  %v58_v12 = vld [vmem:[%s1139_s0 + $0x70] sm:$0xff] }
  0x16   :  { %v215_v32 = vpack.c.bf16 %v187_v20, %v185_v19  ;;  %v201_v37 = vmax.f32 %v169_v23, 0.0  ;;  %v186_v46 = vmax.f32 %v154_v38, 0.0  ;;  %v87_v53 = vunpack.c.h.bf16 %v57_v41 }
  0x17   :  { %774 = vmatpush3.bf16.msra.mxu0 %v854_v30  ;;  %840 = vmatpush3.bf16.msra.mxu1 %v854_v30  ;;  %v124_v30 = vmul.f32 %v945_v25, %v80_v17  ;;  %v171_v33 = vadd.f32 %v951_v28, %v127_v21  ;;  %v170_v47 = vadd.f32 %v949_v27, %v126_v39  ;;  %v68_v57 = vunpack.c.l.bf16 %v48_v18  ;;  %v59_v17 = vld [vmem:[%s1139_s0 + $0x78] sm:$0xff] }
  0x18   :  { %775 = vmatprep.subr.bf16.mxu0 %v855_v35  ;;  %833 = vmatprep.subr.bf16.mxu1 %v855_v35  ;;  %v69_v35 = vunpack.c.h.bf16 %v48_v18  ;;  %v159_v58 = vadd.f32 %v951_v28, %v115_v51  ;;  %v131_v60 = vmul.f32 %v947_v26, %v87_v53  ;;  %v70_v61 = vunpack.c.l.bf16 %v49_v31 }
  0x19   :  { %v168_v40 = vadd.f32 %v949_v27, %v124_v30  ;;  %v203_v42 = vmax.f32 %v171_v33, 0.0  ;;  %v202_v55 = vmax.f32 %v170_v47, 0.0  ;;  %v112_v1 = vmul.f32 %v945_v25, %v68_v57 }
  0x1a   :  { %v113_v45 = vmul.f32 %v947_v26, %v69_v35  ;;  %v84_v2 = vunpack.c.l.bf16 %v56_v36  ;;  %v191_v3 = vmax.f32 %v159_v58, 0.0  ;;  %v175_v4 = vadd.f32 %v951_v28, %v131_v60 }
  0x1b   :  { %776 = vmatpush3.bf16.msra.mxu0 %v856_v49  ;;  %841 = vmatpush3.bf16.msra.mxu1 %v856_v49  ;;  %v200_v48 = vmax.f32 %v168_v40, 0.0  ;;  %v85_v49 = vunpack.c.h.bf16 %v56_v36  ;;  %v223_v50 = vpack.c.bf16 %v203_v42, %v201_v37  ;;  %v86_v6 = vunpack.c.l.bf16 %v57_v41 }
  0x1c   :  { %777 = vmatprep.subr.bf16.mxu0 %v857_v54  ;;  %834 = vmatprep.subr.bf16.mxu1 %v857_v54  ;;  %v157_v52 = vadd.f32 %v951_v28, %v113_v45  ;;  %v214_v54 = vpack.c.bf16 %v186_v46, %v184_v43  ;;  %v156_v9 = vadd.f32 %v949_v27, %v112_v1  ;;  %v73_v11 = vunpack.c.h.bf16 %v50_v62 }
  0x1d   :  { %v129_v56 = vmul.f32 %v947_v26, %v85_v49  ;;  %v222_v63 = vpack.c.bf16 %v202_v55, %v200_v48  ;;  %v128_v10 = vmul.f32 %v945_v25, %v84_v2  ;;  %v130_v16 = vmul.f32 %v945_v25, %v86_v6 }
  0x1e   :  { %v189_v59 = vmax.f32 %v157_v52, 0.0  ;;  %v188_v18 = vmax.f32 %v156_v9, 0.0  ;;  %v117_v21 = vmul.f32 %v947_v26, %v73_v11  ;;  %v89_v29 = vunpack.c.h.bf16 %v58_v12 }
  0x1f   :  { %778 = vmatpush3.bf16.msra.mxu0 %v858_v5  ;;  %842 = vmatpush3.bf16.msra.mxu1 %v858_v5  ;;  %v173_v0 = vadd.f32 %v951_v28, %v129_v56  ;;  %v114_v5 = vmul.f32 %v945_v25, %v70_v61  ;;  %v172_v19 = vadd.f32 %v949_v27, %v128_v10  ;;  %v91_v33 = vunpack.c.h.bf16 %v59_v17 }
  0x20   :  { %v217_v13 = vpack.c.bf16 %v191_v3, %v189_v59  ;;  %v174_v24 = vadd.f32 %v949_v27, %v130_v16  ;;  %v133_v36 = vmul.f32 %v947_v26, %v89_v29  ;;  %v72_v37 = vunpack.c.l.bf16 %v50_v62 }
  0x21   :  { %v205_v8 = vmax.f32 %v173_v0, 0.0  ;;  %v158_v15 = vadd.f32 %v949_v27, %v114_v5  ;;  %v204_v30 = vmax.f32 %v172_v19, 0.0  ;;  %v135_v40 = vmul.f32 %v947_v26, %v91_v33 }
  0x22   :  { %405 = vmatmul.mubr.bf16.vlgmr.msra.gmra.mrb[0].mxu0 %v212_v7  ;;  %437 = vmatmul.mubr.bf16.vlgmr.msra.gmra.mrb[0].mxu1 %v220_v14  ;;  %v51_v7 = vld [vmem:[%s1139_s0 + $0x38] sm:$0xff]  ;;  %v207_v14 = vmax.f32 %v175_v4, 0.0  ;;  %v206_v35 = vmax.f32 %v174_v24, 0.0  ;;  %v177_v43 = vadd.f32 %v951_v28, %v133_v36  ;;  %v116_v44 = vmul.f32 %v945_v25, %v72_v37 }
  0x23   :  { %412 = vmatprep.mubr.bf16.mxu0 %v215_v32  ;;  %444 = vmatprep.mubr.bf16.mxu1 %v223_v50  ;;  %v75_v20 = vunpack.c.h.bf16 %v51_v7  ;;  %v190_v23 = vmax.f32 %v158_v15, 0.0  ;;  %v161_v32 = vadd.f32 %v951_v28, %v117_v21  ;;  %v74_v41 = vunpack.c.l.bf16 %v51_v7  ;;  %v1080_v7 = vld [vmem:[%s1143_s5] ss:$0 sm:$0xff] }
  0x24   :  { %v225_v22 = vpack.c.bf16 %v207_v14, %v205_v8  ;;  %v224_v42 = vpack.c.bf16 %v206_v35, %v204_v30  ;;  %v88_v45 = vunpack.c.l.bf16 %v58_v12  ;;  %v179_v47 = vadd.f32 %v951_v28, %v135_v40 }
  0x25   :  { %v119_v31 = vmul.f32 %v947_v26, %v75_v20  ;;  %v216_v34 = vpack.c.bf16 %v190_v23, %v188_v18  ;;  %v193_v39 = vmax.f32 %v161_v32, 0.0  ;;  %v118_v48 = vmul.f32 %v945_v25, %v74_v41 }
  0x26   :  { %v90_v49 = vunpack.c.l.bf16 %v59_v17  ;;  %v209_v50 = vmax.f32 %v177_v43, 0.0  ;;  %v160_v51 = vadd.f32 %v949_v27, %v116_v44  ;;  %v132_v26 = vmul.f32 %v945_v25, %v88_v45 }
  0x27   :  { %v163_v38 = vadd.f32 %v951_v28, %v119_v31  ;;  %v211_v53 = vmax.f32 %v179_v47, 0.0 }
  0x28   :  { %v134_v55 = vmul.f32 %v945_v25, %v90_v49  ;;  %v192_v56 = vmax.f32 %v160_v51, 0.0  ;;  %v176_v57 = vadd.f32 %v949_v27, %v132_v26  ;;  %v1075_v25 = vld [vmem:[%s1142_s4] ss:$0 sm:$0xff] }
  0x29   :  { %v195_v46 = vmax.f32 %v163_v38, 0.0  ;;  %v227_v28 = vpack.c.bf16 %v211_v53, %v209_v50 }
  0x2a   :  { %413 = vmatmul.mubr.bf16.gmra.mrb[4].mxu0 %v214_v54  ;;  %445 = vmatmul.mubr.bf16.gmra.mrb[4].mxu1 %v222_v63  ;;  %v162_v54 = vadd.f32 %v949_v27, %v118_v48  ;;  %v178_v59 = vadd.f32 %v949_v27, %v134_v55  ;;  %v208_v60 = vmax.f32 %v176_v57, 0.0 }
  0x2b   :  { %420 = vmatprep.mubr.bf16.mxu0 %v217_v13  ;;  %452 = vmatprep.mubr.bf16.mxu1 %v225_v22  ;;  %v219_v52 = vpack.c.bf16 %v195_v46, %v193_v39 }
  0x2c   :  { %v194_v58 = vmax.f32 %v162_v54, 0.0  ;;  %v210_v62 = vmax.f32 %v178_v59, 0.0 }
  0x2e   :  { %v218_v61 = vpack.c.bf16 %v194_v58, %v192_v56  ;;  %v226_v63 = vpack.c.bf16 %v210_v62, %v208_v60 }
  0x32   :  { %421 = vmatmul.mubr.bf16.gmra.mrb[8].mxu0 %v216_v34  ;;  %453 = vmatmul.mubr.bf16.gmra.mrb[8].mxu1 %v224_v42 }
  0x33   :  { %428 = vmatprep.mubr.bf16.mxu0 %v219_v52  ;;  %460 = vmatprep.mubr.bf16.mxu1 %v227_v28 }
  0x3a   :  { %429 = vmatmul.mubr.bf16.gmra.mrb[12].mxu0 %v218_v61  ;;  %461 = vmatmul.mubr.bf16.gmra.mrb[12].mxu1 %v226_v63 }
  0xf5   :  { %v779_v0 = vpop.f32.mrb[0].mxu0  ;;  %v803_v1 = vpop.f32.mrb[0].mxu1 }
  0xf6   :  { %v780_v2 = vpop.f32.mrb[1].mxu0  ;;  %v804_v3 = vpop.f32.mrb[1].mxu1 }
  0xf7   :  { %v781_v4 = vadd.f32 %v780_v2, %v779_v0  ;;  %v805_v5 = vadd.f32 %v804_v3, %v803_v1  ;;  %v782_v6 = vpop.f32.mrb[2].mxu0  ;;  %v806_v27 = vpop.f32.mrb[2].mxu1 }
  0xf8   :  { %v783_v8 = vpop.f32.mrb[3].mxu0  ;;  %v807_v9 = vpop.f32.mrb[3].mxu1 }
  0xf9   :  { %v527_v10 = vmul.f32 %v781_v4, %v1075_v25  ;;  %v535_v11 = vmul.f32 %v805_v5, %v1075_v25  ;;  %v784_v12 = vadd.f32 %v783_v8, %v782_v6  ;;  %v808_v13 = vadd.f32 %v807_v9, %v806_v27 }
  0xfb   :  { %v550_v14 = vadd.f32 %v1080_v7, %v527_v10  ;;  %v558_v15 = vadd.f32 %v1080_v7, %v535_v11  ;;  %v528_v16 = vmul.f32 %v784_v12, %v1075_v25  ;;  %v536_v17 = vmul.f32 %v808_v13, %v1075_v25 }
  0xfd   :  { %v551_v18 = vadd.f32 %v1080_v7, %v528_v16  ;;  %v559_v19 = vadd.f32 %v1080_v7, %v536_v17  ;;  %v785_v20 = vpop.f32.mrb[4].mxu0  ;;  %v809_v21 = vpop.f32.mrb[4].mxu1  ;;  %v566_v22 = vmax.f32 %v550_v14, 0.0  ;;  %v574_v23 = vmax.f32 %v558_v15, 0.0 }
  0xfe   :  { %v786_v24 = vpop.f32.mrb[5].mxu0  ;;  %v810_v29 = vpop.f32.mrb[5].mxu1 }
  0xff   :  { %v567_v30 = vmax.f32 %v551_v18, 0.0  ;;  %v575_v31 = vmax.f32 %v559_v19, 0.0  ;;  %v787_v32 = vadd.f32 %v786_v24, %v785_v20  ;;  %v811_v33 = vadd.f32 %v810_v29, %v809_v21  ;;  %v788_v34 = vpop.f32.mrb[6].mxu0  ;;  %v812_v35 = vpop.f32.mrb[6].mxu1 }
 0x100   :  { %v789_v36 = vpop.f32.mrb[7].mxu0  ;;  %v813_v37 = vpop.f32.mrb[7].mxu1 }
 0x101   :  { %v719_v38 = vpack.c.bf16 %v567_v30, %v566_v22  ;;  %v739_v39 = vpack.c.bf16 %v575_v31, %v574_v23  ;;  %v529_v40 = vmul.f32 %v787_v32, %v1075_v25  ;;  %v537_v41 = vmul.f32 %v811_v33, %v1075_v25 }
 0x102   :  { %v790_v42 = vadd.f32 %v789_v36, %v788_v34  ;;  %v814_v43 = vadd.f32 %v813_v37, %v812_v35 }
 0x103   :  { %720 = vst [vmem:[%s1144_s6] sm:$0xff] %v719_v38   ;;  %759 = vst [vmem:[%s1144_s6 + $0x20] sm:$0xff] %v739_v39   ;;  %v552_v44 = vadd.f32 %v1080_v7, %v529_v40  ;;  %v560_v45 = vadd.f32 %v1080_v7, %v537_v41 }
 0x104   :  { %v530_v46 = vmul.f32 %v790_v42, %v1075_v25  ;;  %v538_v47 = vmul.f32 %v814_v43, %v1075_v25 }
 0x105   :  { %v791_v48 = vpop.f32.mrb[8].mxu0  ;;  %v815_v49 = vpop.f32.mrb[8].mxu1  ;;  %v568_v57 = vmax.f32 %v552_v44, 0.0  ;;  %v576_v28 = vmax.f32 %v560_v45, 0.0 }
 0x106   :  { %v553_v50 = vadd.f32 %v1080_v7, %v530_v46  ;;  %v561_v51 = vadd.f32 %v1080_v7, %v538_v47  ;;  %v792_v26 = vpop.f32.mrb[9].mxu0  ;;  %v816_v52 = vpop.f32.mrb[9].mxu1 }
 0x107   :  { %v793_v53 = vadd.f32 %v792_v26, %v791_v48  ;;  %v817_v54 = vadd.f32 %v816_v52, %v815_v49  ;;  %v794_v55 = vpop.f32.mrb[10].mxu0  ;;  %v818_v56 = vpop.f32.mrb[10].mxu1 }
 0x108   :  { %v569_v58 = vmax.f32 %v553_v50, 0.0  ;;  %v577_v59 = vmax.f32 %v561_v51, 0.0  ;;  %v795_v60 = vpop.f32.mrb[11].mxu0  ;;  %v819_v61 = vpop.f32.mrb[11].mxu1 }
 0x109   :  { %v531_v62 = vmul.f32 %v793_v53, %v1075_v25  ;;  %v539_v63 = vmul.f32 %v817_v54, %v1075_v25  ;;  %v796_v0 = vadd.f32 %v795_v60, %v794_v55  ;;  %v820_v1 = vadd.f32 %v819_v61, %v818_v56 }
 0x10a   :  { %v724_v2 = vpack.c.bf16 %v569_v58, %v568_v57  ;;  %v744_v3 = vpack.c.bf16 %v577_v59, %v576_v28 }
 0x10b   :  { %v554_v4 = vadd.f32 %v1080_v7, %v531_v62  ;;  %v562_v5 = vadd.f32 %v1080_v7, %v539_v63  ;;  %v532_v6 = vmul.f32 %v796_v0, %v1075_v25  ;;  %v540_v27 = vmul.f32 %v820_v1, %v1075_v25 }
 0x10c   :  { %756 = vst [vmem:[%s1144_s6 + $0x8] sm:$0xff] %v724_v2   ;;  %760 = vst [vmem:[%s1144_s6 + $0x28] sm:$0xff] %v744_v3  }
 0x10d   :  { %v555_v8 = vadd.f32 %v1080_v7, %v532_v6  ;;  %v563_v9 = vadd.f32 %v1080_v7, %v540_v27  ;;  %v797_v10 = vpop.f32.mrb[12].mxu0  ;;  %v570_v11 = vmax.f32 %v554_v4, 0.0  ;;  %v821_v12 = vpop.f32.mrb[12].mxu1  ;;  %v578_v14 = vmax.f32 %v562_v5, 0.0 }
 0x10e   :  { %v798_v13 = vpop.f32.mrb[13].mxu0  ;;  %v822_v18 = vpop.f32.mrb[13].mxu1 }
 0x10f   :  { %v571_v15 = vmax.f32 %v555_v8, 0.0  ;;  %v579_v16 = vmax.f32 %v563_v9, 0.0  ;;  %v799_v17 = vadd.f32 %v798_v13, %v797_v10  ;;  %v800_v19 = vpop.f32.mrb[14].mxu0  ;;  %v823_v20 = vadd.f32 %v822_v18, %v821_v12  ;;  %v824_v21 = vpop.f32.mrb[14].mxu1 }
 0x110   :  { %v801_v22 = vpop.f32.mrb[15].mxu0  ;;  %v825_v31 = vpop.f32.mrb[15].mxu1 }
 0x111   :  { %v729_v23 = vpack.c.bf16 %v571_v15, %v570_v11  ;;  %v749_v24 = vpack.c.bf16 %v579_v16, %v578_v14  ;;  %v533_v29 = vmul.f32 %v799_v17, %v1075_v25  ;;  %v802_v30 = vadd.f32 %v801_v22, %v800_v19 }
 0x112   :  { %v541_v32 = vmul.f32 %v823_v20, %v1075_v25  ;;  %v826_v33 = vadd.f32 %v825_v31, %v824_v21 }
 0x113   :  { %757 = vst [vmem:[%s1144_s6 + $0x10] sm:$0xff] %v729_v23   ;;  %761 = vst [vmem:[%s1144_s6 + $0x30] sm:$0xff] %v749_v24   ;;  %v556_v34 = vadd.f32 %v1080_v7, %v533_v29  ;;  %v534_v35 = vmul.f32 %v802_v30, %v1075_v25 }
 0x114   :  { %v564_v36 = vadd.f32 %v1080_v7, %v541_v32  ;;  %v542_v37 = vmul.f32 %v826_v33, %v1075_v25 }
 0x115   :  { %v557_v38 = vadd.f32 %v1080_v7, %v534_v35  ;;  %v572_v40 = vmax.f32 %v556_v34, 0.0 }
 0x116   :  { %v565_v39 = vadd.f32 %v1080_v7, %v542_v37  ;;  %v580_v42 = vmax.f32 %v564_v36, 0.0 }
 0x117   :  { %v573_v41 = vmax.f32 %v557_v38, 0.0 }
 0x118   :  { %v581_v43 = vmax.f32 %v565_v39, 0.0 }
 0x119   :  { %v734_v44 = vpack.c.bf16 %v573_v41, %v572_v40 }
 0x11a   :  { %v754_v45 = vpack.c.bf16 %v581_v43, %v580_v42 }
 0x11b   :  { %758 = vst [vmem:[%s1144_s6 + $0x18] sm:$0xff] %v734_v44  }
 0x11c   :  { %762 = vst [vmem:[%s1144_s6 + $0x38] sm:$0xff] %v754_v45  }

// kernel: _lambda_.28
= control target key start
LH: loop header
LB: loop body
LE: loop exit
PB: predicated region body
PF: predicated region fallthrough
CT: control target
= control target key end

     0   :  { %v46_v5 = vlaneseq  ;;  %s552_s3 = inlined_call_operand.vmem [shape: bf16[256,128], index: 3, kind: input, shape index: {}]   ;;  %s553_s0 = inlined_call_operand.vmem [shape: bf16[32,256], index: 0, kind: input, shape index: {}]   ;;  %s554_s1 = inlined_call_operand.vmem [shape: f32[1,256], index: 1, kind: input, shape index: {}]   ;;  %s555_s2 = inlined_call_operand.vmem [shape: f32[1,256], index: 2, kind: input, shape index: {}]   ;;  %s556_s4 = inlined_call_operand.vmem [shape: f32[1,128], index: 4, kind: input, shape index: {}]   ;;  %s557_s5 = inlined_call_operand.vmem [shape: f32[1,128], index: 5, kind: input, shape index: {}]   ;;  %s558_s6 = inlined_call_operand.vmem [shape: bf16[32,128], index: 6, kind: output, shape index: {}]  }
   0x1   :  { %v423_v0 = vld [vmem:[%s552_s3 + $0x40] sm:$0xff]   ;;  %v425_v2 = vld [vmem:[%s552_s3 + $0x48] sm:$0xff]   ;;  %v427_v4 = vld [vmem:[%s552_s3 + $0x50] sm:$0xff]  }
   0x2   :  { %v424_v1 = vld [vmem:[%s552_s3] sm:$0xff]   ;;  %379 = vmatprep.subr.bf16.mxu0 %v423_v0  ;;  %407 = vmatprep.subr.bf16.mxu1 %v423_v0  ;;  %v426_v3 = vld [vmem:[%s552_s3 + $0x8] sm:$0xff]   ;;  %v428_v6 = vld [vmem:[%s552_s3 + $0x10] sm:$0xff]   ;;  %v47_v8 = vshrl.u32 %v46_v5, 7 }
   0x3   :  { %380 = vmatpush3.bf16.msra.mxu0 %v424_v1  ;;  %415 = vmatpush3.bf16.msra.mxu1 %v424_v1  ;;  %v429_v7 = vld [vmem:[%s552_s3 + $0x58] sm:$0xff]   ;;  %v431_v10 = vld [vmem:[%s552_s3 + $0x60] sm:$0xff]   ;;  %v433_v14 = vld [vmem:[%s552_s3 + $0x68] sm:$0xff]  }
   0x4   :  { %381 = vmatprep.subr.bf16.mxu0 %v425_v2  ;;  %408 = vmatprep.subr.bf16.mxu1 %v425_v2  ;;  %v430_v9 = vld [vmem:[%s552_s3 + $0x18] sm:$0xff]   ;;  %v48_v11 = vsub.s32 0, %v47_v8  ;;  %v432_v12 = vld [vmem:[%s552_s3 + $0x20] sm:$0xff]   ;;  %v52_v13 = vsub.s32 1, %v47_v8  ;;  %v33_v16 = vld [vmem:[%s553_s0 + $0x8] sm:$0xff] }
   0x5   :  { %v32_v15 = vld [vmem:[%s553_s0] sm:$0xff]  ;;  %v38_v20 = vunpack.c.l.bf16 %v33_v16  ;;  %v39_v21 = vunpack.c.h.bf16 %v33_v16  ;;  %v34_v23 = vld [vmem:[%s553_s0 + $0x10] sm:$0xff]  ;;  %v35_v24 = vld [vmem:[%s553_s0 + $0x18] sm:$0xff] }
   0x6   :  { %v44_v17 = vld [vmem:[%s554_s1] sm:$0x3]  ;;  %v36_v18 = vunpack.c.l.bf16 %v32_v15  ;;  %v37_v19 = vunpack.c.h.bf16 %v32_v15  ;;  %v434_v29 = vld [vmem:[%s552_s3 + $0x28] sm:$0xff]   ;;  %v40_v30 = vunpack.c.l.bf16 %v34_v23  ;;  %v41_v31 = vunpack.c.h.bf16 %v34_v23  ;;  %v435_v34 = vld [vmem:[%s552_s3 + $0x70] sm:$0xff]  }
   0x7   :  { %382 = vmatpush3.bf16.msra.mxu0 %v426_v3  ;;  %416 = vmatpush3.bf16.msra.mxu1 %v426_v3  ;;  %v64_v22 = vld [vmem:[%s555_s2] sm:$0x3]  ;;  %v49_v25 = vrot.slane %v44_v17, %v48_v11  ;;  %v53_v26 = vrot.slane %v44_v17, %v52_v13  ;;  %v42_v32 = vunpack.c.l.bf16 %v35_v24  ;;  %v43_v33 = vunpack.c.h.bf16 %v35_v24  ;;  %v436_v46 = vld [vmem:[%s552_s3 + $0x30] sm:$0xff]   ;;  %v437_v50 = vld [vmem:[%s552_s3 + $0x78] sm:$0xff]  }
   0x8   :  { %383 = vmatprep.subr.bf16.mxu0 %v427_v4  ;;  %409 = vmatprep.subr.bf16.mxu1 %v427_v4  ;;  %v69_v27 = vrot.slane %v64_v22, %v48_v11  ;;  %v73_v28 = vrot.slane %v64_v22, %v52_v13  ;;  %v438_v61 = vld [vmem:[%s552_s3 + $0x38] sm:$0xff]   ;;  %v358_v5 = vld [vmem:[%s556_s4] ss:$0 sm:$0xff] }
   0x9   :  { %v57_v35 = vmul.f32 %v53_v26, %v37_v19  ;;  %v59_v36 = vmul.f32 %v53_v26, %v39_v21  ;;  %v56_v37 = vmul.f32 %v49_v25, %v36_v18  ;;  %v61_v38 = vmul.f32 %v53_v26, %v41_v31  ;;  %v359_v11 = vld [vmem:[%s557_s5] ss:$0 sm:$0xff] }
   0xa   :  { %v63_v39 = vmul.f32 %v53_v26, %v43_v33  ;;  %v58_v40 = vmul.f32 %v49_v25, %v38_v20  ;;  %v60_v41 = vmul.f32 %v49_v25, %v40_v30  ;;  %v62_v45 = vmul.f32 %v49_v25, %v42_v32 }
   0xb   :  { %384 = vmatpush3.bf16.msra.mxu0 %v428_v6  ;;  %417 = vmatpush3.bf16.msra.mxu1 %v428_v6  ;;  %v77_v42 = vadd.f32 %v73_v28, %v57_v35  ;;  %v79_v43 = vadd.f32 %v73_v28, %v59_v36  ;;  %v76_v44 = vadd.f32 %v69_v27, %v56_v37 }
   0xc   :  { %385 = vmatprep.subr.bf16.mxu0 %v429_v7  ;;  %410 = vmatprep.subr.bf16.mxu1 %v429_v7  ;;  %v81_v47 = vadd.f32 %v73_v28, %v61_v38  ;;  %v83_v48 = vadd.f32 %v73_v28, %v63_v39  ;;  %v78_v49 = vadd.f32 %v69_v27, %v58_v40 }
   0xd   :  { %v85_v51 = vmax.f32 %v77_v42, 0.0  ;;  %v87_v52 = vmax.f32 %v79_v43, 0.0  ;;  %v80_v53 = vadd.f32 %v69_v27, %v60_v41  ;;  %v82_v56 = vadd.f32 %v69_v27, %v62_v45 }
   0xe   :  { %v89_v54 = vmax.f32 %v81_v47, 0.0  ;;  %v91_v55 = vmax.f32 %v83_v48, 0.0  ;;  %v84_v58 = vmax.f32 %v76_v44, 0.0  ;;  %v86_v59 = vmax.f32 %v78_v49, 0.0 }
   0xf   :  { %386 = vmatpush3.bf16.msra.mxu0 %v430_v9  ;;  %418 = vmatpush3.bf16.msra.mxu1 %v430_v9  ;;  %v93_v57 = vpack.c.bf16 %v87_v52, %v85_v51  ;;  %v88_v60 = vmax.f32 %v80_v53, 0.0  ;;  %v90_v63 = vmax.f32 %v82_v56, 0.0 }
  0x10   :  { %387 = vmatprep.subr.bf16.mxu0 %v431_v10  ;;  %411 = vmatprep.subr.bf16.mxu1 %v431_v10  ;;  %v95_v62 = vpack.c.bf16 %v91_v55, %v89_v54  ;;  %v92_v0 = vpack.c.bf16 %v86_v59, %v84_v58 }
  0x11   :  { %260 = vmatprep.mubr.bf16.mxu0 %v93_v57  ;;  %v94_v1 = vpack.c.bf16 %v90_v63, %v88_v60 }
  0x12   :  { %268 = vmatprep.mubr.bf16.mxu1 %v95_v62 }
  0x13   :  { %388 = vmatpush3.bf16.msra.mxu0 %v432_v12  ;;  %419 = vmatpush3.bf16.msra.mxu1 %v432_v12 }
  0x14   :  { %389 = vmatprep.subr.bf16.mxu0 %v433_v14  ;;  %412 = vmatprep.subr.bf16.mxu1 %v433_v14 }
  0x17   :  { %390 = vmatpush3.bf16.msra.mxu0 %v434_v29  ;;  %420 = vmatpush3.bf16.msra.mxu1 %v434_v29 }
  0x18   :  { %391 = vmatprep.subr.bf16.mxu0 %v435_v34  ;;  %413 = vmatprep.subr.bf16.mxu1 %v435_v34 }
  0x1b   :  { %392 = vmatpush3.bf16.msra.mxu0 %v436_v46  ;;  %421 = vmatpush3.bf16.msra.mxu1 %v436_v46 }
  0x1c   :  { %393 = vmatprep.subr.bf16.mxu0 %v437_v50  ;;  %414 = vmatprep.subr.bf16.mxu1 %v437_v50 }
  0x1f   :  { %394 = vmatpush3.bf16.msra.mxu0 %v438_v61  ;;  %422 = vmatpush3.bf16.msra.mxu1 %v438_v61 }
  0x22   :  { %261 = vmatmul.mubr.bf16.vlgmr.msra.gmra.mrb[0].mxu0 %v92_v0  ;;  %269 = vmatmul.mubr.bf16.vlgmr.msra.gmra.mrb[0].mxu1 %v94_v1 }
  0xf5   :  { %v395_v2 = vpop.f32.mrb[0].mxu0  ;;  %v401_v3 = vpop.f32.mrb[0].mxu1 }
  0xf6   :  { %v396_v4 = vpop.f32.mrb[1].mxu0  ;;  %v402_v6 = vpop.f32.mrb[1].mxu1 }
  0xf7   :  { %v397_v7 = vadd.f32 %v396_v4, %v395_v2  ;;  %v403_v8 = vadd.f32 %v402_v6, %v401_v3  ;;  %v398_v9 = vpop.f32.mrb[2].mxu0  ;;  %v404_v10 = vpop.f32.mrb[2].mxu1 }
  0xf8   :  { %v399_v12 = vpop.f32.mrb[3].mxu0  ;;  %v405_v13 = vpop.f32.mrb[3].mxu1 }
  0xf9   :  { %v299_v14 = vmul.f32 %v397_v7, %v358_v5  ;;  %v301_v15 = vmul.f32 %v403_v8, %v358_v5  ;;  %v400_v16 = vadd.f32 %v399_v12, %v398_v9  ;;  %v406_v17 = vadd.f32 %v405_v13, %v404_v10 }
  0xfb   :  { %v310_v18 = vadd.f32 %v359_v11, %v299_v14  ;;  %v312_v19 = vadd.f32 %v359_v11, %v301_v15  ;;  %v300_v20 = vmul.f32 %v400_v16, %v358_v5  ;;  %v302_v21 = vmul.f32 %v406_v17, %v358_v5 }
  0xfd   :  { %v311_v22 = vadd.f32 %v359_v11, %v300_v20  ;;  %v313_v23 = vadd.f32 %v359_v11, %v302_v21  ;;  %v314_v24 = vmax.f32 %v310_v18, 0.0  ;;  %v316_v25 = vmax.f32 %v312_v19, 0.0 }
  0xff   :  { %v315_v26 = vmax.f32 %v311_v22, 0.0  ;;  %v317_v27 = vmax.f32 %v313_v23, 0.0 }
 0x101   :  { %v371_v28 = vpack.c.bf16 %v315_v26, %v314_v24  ;;  %v376_v29 = vpack.c.bf16 %v317_v27, %v316_v25 }
 0x103   :  { %372 = vst [vmem:[%s558_s6] sm:$0xff] %v371_v28   ;;  %378 = vst [vmem:[%s558_s6 + $0x8] sm:$0xff] %v376_v29  }

// kernel: _lambda_.27
= control target key start
LH: loop header
LB: loop body
LE: loop exit
PB: predicated region body
PF: predicated region fallthrough
CT: control target
= control target key end

     0   :  { %v30_v23 = vlaneseq  ;;  %s817_s3 = inlined_call_operand.vmem [shape: bf16[256,384], index: 3, kind: input, shape index: {}]   ;;  %s818_s0 = inlined_call_operand.vmem [shape: bf16[8,256], index: 0, kind: input, shape index: {}]   ;;  %s819_s1 = inlined_call_operand.vmem [shape: f32[1,256], index: 1, kind: input, shape index: {}]   ;;  %s820_s2 = inlined_call_operand.vmem [shape: f32[1,256], index: 2, kind: input, shape index: {}]   ;;  %s821_s4 = inlined_call_operand.vmem [shape: bf16[8,384], index: 4, kind: output, shape index: {}]  }
   0x1   :  { %v569_v0 = vld [vmem:[%s817_s3 + $0x4] ss:$12 sps:$4 sm:$0xff]   ;;  %v571_v1 = vld [vmem:[%s817_s3] ss:$12 sps:$4 sm:$0xff]   ;;  %v572_v2 = vld [vmem:[%s817_s3 + $0x1c] ss:$12 sps:$4 sm:$0xff]  }
   0x2   :  { %383 = vmatprep.subr.bf16.mxu0 %v569_v0  ;;  %v574_v3 = vld [vmem:[%s817_s3 + $0x18] ss:$12 sps:$4 sm:$0xff]   ;;  %v575_v4 = vld [vmem:[%s817_s3 + $0x34] ss:$12 sps:$4 sm:$0xff]   ;;  %v577_v5 = vld [vmem:[%s817_s3 + $0x30] ss:$12 sps:$4 sm:$0xff]  }
   0x3   :  { %384 = vmatpush1.bf16.msra.mxu0 %v571_v1  ;;  %v578_v6 = vld [vmem:[%s817_s3 + $0x4c] ss:$12 sps:$4 sm:$0xff]   ;;  %v590_v7 = vld [vmem:[%s817_s3 + $0xc8] ss:$12 sps:$4 sm:$0xff]   ;;  %v581_v9 = vld [vmem:[%s817_s3 + $0x64] ss:$12 sps:$4 sm:$0xff]  }
   0x4   :  { %385 = vmatprep.subr.bf16.mxu0 %v572_v2  ;;  %v580_v8 = vld [vmem:[%s817_s3 + $0x48] ss:$12 sps:$4 sm:$0xff]   ;;  %547 = vmatprep.subr.bf16.mxu1 %v590_v7  ;;  %v595_v11 = vld [vmem:[%s817_s3 + $0xe0] ss:$12 sps:$4 sm:$0xff]   ;;  %v600_v15 = vld [vmem:[%s817_s3 + $0xf8] ss:$12 sps:$4 sm:$0xff]  }
   0x5   :  { %v593_v10 = vld [vmem:[%s817_s3 + $0x8] ss:$12 sps:$4 sm:$0xff]   ;;  %v583_v12 = vld [vmem:[%s817_s3 + $0x60] ss:$12 sps:$4 sm:$0xff]   ;;  %v586_v16 = vld [vmem:[%s817_s3 + $0x78] ss:$12 sps:$4 sm:$0xff]  }
   0x6   :  { %548 = vmatpush3.bf16.msra.mxu1 %v593_v10  ;;  %v584_v13 = vld [vmem:[%s817_s3 + $0x7c] ss:$12 sps:$4 sm:$0xff]   ;;  %v598_v14 = vld [vmem:[%s817_s3 + $0x20] ss:$12 sps:$4 sm:$0xff]   ;;  %v603_v17 = vld [vmem:[%s817_s3 + $0x38] ss:$12 sps:$4 sm:$0xff]  }
   0x7   :  { %386 = vmatpush1.bf16.msra.mxu0 %v574_v3  ;;  %549 = vmatprep.subr.bf16.mxu1 %v595_v11  ;;  %v587_v18 = vld [vmem:[%s817_s3 + $0x94] ss:$12 sps:$4 sm:$0xff]   ;;  %v605_v19 = vld [vmem:[%s817_s3 + $0x110] ss:$12 sps:$4 sm:$0xff]   ;;  %v591_v24 = vld [vmem:[%s817_s3 + $0xac] ss:$12 sps:$4 sm:$0xff]  }
   0x8   :  { %387 = vmatprep.subr.bf16.mxu0 %v575_v4  ;;  %v589_v20 = vld [vmem:[%s817_s3 + $0x90] ss:$12 sps:$4 sm:$0xff]   ;;  %v610_v22 = vld [vmem:[%s817_s3 + $0x128] ss:$12 sps:$4 sm:$0xff]   ;;  %v615_v27 = vld [vmem:[%s817_s3 + $0x140] ss:$12 sps:$4 sm:$0xff]  }
   0x9   :  { %v608_v21 = vld [vmem:[%s817_s3 + $0x50] ss:$12 sps:$4 sm:$0xff]   ;;  %v594_v25 = vld [vmem:[%s817_s3 + $0xa8] ss:$12 sps:$4 sm:$0xff]   ;;  %v31_v28 = vshrl.u32 %v30_v23, 7  ;;  %v25_v40 = vld [vmem:[%s818_s0] sm:$0xff] }
   0xa   :  { %550 = vmatpush3.bf16.msra.mxu1 %v598_v14  ;;  %v613_v26 = vld [vmem:[%s817_s3 + $0x68] ss:$12 sps:$4 sm:$0xff]   ;;  %v596_v29 = vld [vmem:[%s817_s3 + $0xc4] ss:$12 sps:$4 sm:$0xff]   ;;  %v599_v30 = vld [vmem:[%s817_s3 + $0xc0] ss:$12 sps:$4 sm:$0xff]   ;;  %v26_v43 = vunpack.c.l.bf16 %v25_v40  ;;  %v27_v44 = vunpack.c.h.bf16 %v25_v40 }
   0xb   :  { %388 = vmatpush1.bf16.msra.mxu0 %v577_v5  ;;  %551 = vmatprep.subr.bf16.mxu1 %v600_v15  ;;  %v618_v31 = vld [vmem:[%s817_s3 + $0x80] ss:$12 sps:$4 sm:$0xff]   ;;  %v620_v32 = vld [vmem:[%s817_s3 + $0x158] ss:$12 sps:$4 sm:$0xff]   ;;  %v601_v33 = vld [vmem:[%s817_s3 + $0xdc] ss:$12 sps:$4 sm:$0xff]  }
   0xc   :  { %389 = vmatprep.subr.bf16.mxu0 %v578_v6  ;;  %v32_v34 = vsub.s32 0, %v31_v28  ;;  %v604_v35 = vld [vmem:[%s817_s3 + $0xd8] ss:$12 sps:$4 sm:$0xff]   ;;  %v36_v36 = vsub.s32 1, %v31_v28  ;;  %v606_v38 = vld [vmem:[%s817_s3 + $0xf4] ss:$12 sps:$4 sm:$0xff]  }
   0xd   :  { %v623_v37 = vld [vmem:[%s817_s3 + $0x98] ss:$12 sps:$4 sm:$0xff]   ;;  %v625_v39 = vld [vmem:[%s817_s3 + $0x170] ss:$12 sps:$4 sm:$0xff]   ;;  %v28_v41 = vld [vmem:[%s819_s1] sm:$0x3] }
   0xe   :  { %552 = vmatpush3.bf16.msra.mxu1 %v603_v17  ;;  %v42_v42 = vld [vmem:[%s820_s2] sm:$0x3]  ;;  %v33_v45 = vrot.slane %v28_v41, %v32_v34  ;;  %v37_v46 = vrot.slane %v28_v41, %v36_v36  ;;  %v628_v47 = vld [vmem:[%s817_s3 + $0xb0] ss:$12 sps:$4 sm:$0xff]   ;;  %v611_v53 = vld [vmem:[%s817_s3 + $0x10c] ss:$12 sps:$4 sm:$0xff]  }
   0xf   :  { %390 = vmatpush1.bf16.msra.mxu0 %v580_v8  ;;  %553 = vmatprep.subr.bf16.mxu1 %v605_v19  ;;  %v47_v48 = vrot.slane %v42_v42, %v32_v34  ;;  %v51_v49 = vrot.slane %v42_v42, %v36_v36  ;;  %v609_v50 = vld [vmem:[%s817_s3 + $0xf0] ss:$12 sps:$4 sm:$0xff]   ;;  %v614_v56 = vld [vmem:[%s817_s3 + $0x108] ss:$12 sps:$4 sm:$0xff]   ;;  %v619_v62 = vld [vmem:[%s817_s3 + $0x120] ss:$12 sps:$4 sm:$0xff]  }
  0x10   :  { %391 = vmatprep.subr.bf16.mxu0 %v581_v9  ;;  %v41_v51 = vmul.f32 %v37_v46, %v27_v44  ;;  %v40_v52 = vmul.f32 %v33_v45, %v26_v43  ;;  %v616_v59 = vld [vmem:[%s817_s3 + $0x124] ss:$12 sps:$4 sm:$0xff]   ;;  %v621_v63 = vld [vmem:[%s817_s3 + $0x13c] ss:$12 sps:$4 sm:$0xff]   ;;  %v626_v1 = vld [vmem:[%s817_s3 + $0x154] ss:$12 sps:$4 sm:$0xff]  }
  0x11   :  { %v624_v0 = vld [vmem:[%s817_s3 + $0x138] ss:$12 sps:$4 sm:$0xff]   ;;  %v629_v2 = vld [vmem:[%s817_s3 + $0x150] ss:$12 sps:$4 sm:$0xff]   ;;  %v632_v4 = vld [vmem:[%s817_s3 + $0x168] ss:$12 sps:$4 sm:$0xff]  }
  0x12   :  { %554 = vmatpush3.bf16.msra.mxu1 %v608_v21  ;;  %v55_v54 = vadd.f32 %v51_v49, %v41_v51  ;;  %v54_v55 = vadd.f32 %v47_v48, %v40_v52  ;;  %v630_v3 = vld [vmem:[%s817_s3 + $0x16c] ss:$12 sps:$4 sm:$0xff]  }
  0x13   :  { %392 = vmatpush1.bf16.msra.mxu0 %v583_v12  ;;  %555 = vmatprep.subr.bf16.mxu1 %v610_v22 }
  0x14   :  { %393 = vmatprep.subr.bf16.mxu0 %v584_v13  ;;  %v57_v57 = vmax.f32 %v55_v54, 0.0  ;;  %v56_v58 = vmax.f32 %v54_v55, 0.0 }
  0x16   :  { %556 = vmatpush3.bf16.msra.mxu1 %v613_v26  ;;  %v59_v60 = vpack.c.bf16 %v57_v57, %v57_v57  ;;  %v58_v61 = vpack.c.bf16 %v56_v58, %v56_v58 }
  0x17   :  { %394 = vmatpush1.bf16.msra.mxu0 %v586_v16  ;;  %557 = vmatprep.subr.bf16.mxu1 %v615_v27 }
  0x18   :  { %395 = vmatprep.subr.bf16.mxu0 %v587_v18  ;;  %456 = vmatprep.mubr.bf16.mxu1 %v59_v60 }
  0x19   :  { %415 = vmatprep.mubr.bf16.mxu0 %v59_v60 }
  0x1a   :  { %558 = vmatpush3.bf16.msra.mxu1 %v618_v31 }
  0x1b   :  { %396 = vmatpush1.bf16.msra.mxu0 %v589_v20  ;;  %559 = vmatprep.subr.bf16.mxu1 %v620_v32 }
  0x1c   :  { %397 = vmatprep.subr.bf16.mxu0 %v591_v24 }
  0x1e   :  { %560 = vmatpush3.bf16.msra.mxu1 %v623_v37 }
  0x1f   :  { %398 = vmatpush1.bf16.msra.mxu0 %v594_v25  ;;  %561 = vmatprep.subr.bf16.mxu1 %v625_v39 }
  0x20   :  { %399 = vmatprep.subr.bf16.mxu0 %v596_v29 }
  0x22   :  { %562 = vmatpush3.bf16.msra.mxu1 %v628_v47 }
  0x23   :  { %400 = vmatpush1.bf16.msra.mxu0 %v599_v30 }
  0x24   :  { %401 = vmatprep.subr.bf16.mxu0 %v601_v33 }
  0x25   :  { %457 = vmatmul.mubr.bf16.vlgmr.msra.gmra.mrb[0].mxu1 %v58_v61 }
  0x27   :  { %402 = vmatpush1.bf16.msra.mxu0 %v604_v35 }
  0x28   :  { %403 = vmatprep.subr.bf16.mxu0 %v606_v38 }
  0x2b   :  { %404 = vmatpush1.bf16.msra.mxu0 %v609_v50 }
  0x2c   :  { %405 = vmatprep.subr.bf16.mxu0 %v611_v53 }
  0x2f   :  { %406 = vmatpush1.bf16.msra.mxu0 %v614_v56 }
  0x30   :  { %407 = vmatprep.subr.bf16.mxu0 %v616_v59 }
  0x33   :  { %408 = vmatpush1.bf16.msra.mxu0 %v619_v62 }
  0x34   :  { %409 = vmatprep.subr.bf16.mxu0 %v621_v63 }
  0x37   :  { %410 = vmatpush1.bf16.msra.mxu0 %v624_v0 }
  0x38   :  { %411 = vmatprep.subr.bf16.mxu0 %v626_v1 }
  0x3b   :  { %412 = vmatpush1.bf16.msra.mxu0 %v629_v2 }
  0x3c   :  { %413 = vmatprep.subr.bf16.mxu0 %v630_v3 }
  0x3f   :  { %414 = vmatpush1.bf16.msra.mxu0 %v632_v4 }
  0x42   :  { %416 = vmatmul.mubr.bf16.vlgmr.msra.gmra.mrb[0].mxu0 %v58_v61 }
  0xf8   :  { %v563_v5 = vpop.f32.mrb[0].mxu1 }
  0xf9   :  { %v564_v6 = vpop.f32.mrb[1].mxu1 }
  0xfa   :  { %v565_v7 = vadd.f32 %v564_v6, %v563_v5  ;;  %v566_v8 = vpop.f32.mrb[2].mxu1 }
  0xfb   :  { %v567_v9 = vpop.f32.mrb[3].mxu1 }
  0xfc   :  { %v546_v10 = vpack.c.bf16 %v565_v7, %v565_v7 }
  0xfe   :  { %490 = vst [vmem:[%s821_s4 + $0x8] sm:$0xf] %v546_v10 }
 0x115   :  { %v417_v11 = vpop.f32.mrb[0].mxu0 }
 0x116   :  { %v419_v12 = vpop.f32.mrb[1].mxu0 }
 0x117   :  { %v545_v13 = vpack.c.bf16 %v419_v12, %v417_v11  ;;  %v421_v14 = vpop.f32.mrb[2].mxu0 }
 0x118   :  { %v422_v15 = vpop.f32.mrb[3].mxu0 }
 0x119   :  { %489 = vst [vmem:[%s821_s4] sm:$0xff] %v545_v13 }

// kernel: _lambda_.21
= control target key start
LH: loop header
LB: loop body
LE: loop exit
PB: predicated region body
PF: predicated region fallthrough
CT: control target
= control target key end

     0   :  { %v5079_v0 = vmov 0.0   ;;  %vm5080_vm0 = vmmov 0   ;;  %vm1509_vm1 = vsmask.f32 6400  ;;  %vm1915_vm2 = vcmask 1045504   ;;  %s6342_s1 = inlined_call_operand.vmem [shape: bf16[9,128,128], index: 1, kind: input, shape index: {}]   ;;  %s6343_s0 = inlined_call_operand.vmem [shape: bf16[224,128], index: 0, kind: input, shape index: {}]   ;;  %s6344_s2 = inlined_call_operand.vmem [shape: f32[1,128], index: 2, kind: input, shape index: {}]   ;;  %s6345_s3 = inlined_call_operand.vmem [shape: f32[1,128], index: 3, kind: input, shape index: {}]   ;;  %s6346_s4 = inlined_call_operand.vmem [shape: bf16[200,128], index: 4, kind: output, shape index: {}]  }
   0x1   :  { %3952 = vmatprep.subr.bf16.mxu1 %v5079_v0  ;;  %4224 = vmatprep.subr.bf16.mxu0 %v5079_v0  ;;  %v4971_v1 = vld [vmem:[%s6342_s1] sm:$0xff]   ;;  %v4973_v3 = vld [vmem:[%s6342_s1 + $0x8] sm:$0xff]   ;;  %v4975_v5 = vld [vmem:[%s6342_s1 + $0x10] sm:$0xff]   ;;  %vm472_vm3 = vsmask.f32 7424  ;;  %vm865_vm5 = vcmask 1046528  }
   0x2   :  { %v4972_v2 = vld [vmem:[%s6342_s1 + $0x100] sm:$0xff]   ;;  %3968 = vmatprep.mubr.msk.bf16.mxu1 %vm5080_vm0, %v5079_v0  ;;  %4240 = vmatprep.mubr.msk.bf16.mxu0 %vm5080_vm0, %v5079_v0  ;;  %v4974_v4 = vld [vmem:[%s6342_s1 + $0x108] sm:$0xff]   ;;  %v4976_v6 = vld [vmem:[%s6342_s1 + $0x110] sm:$0xff]   ;;  %vm2547_vm4 = vsmask.f32 5376  ;;  %vm2893_vm6 = vcmask 1044480  }
   0x3   :  { %3953 = vmatpush3.bf16.msra.mxu1 %v4971_v1  ;;  %4225 = vmatpush3.bf16.msra.mxu0 %v4972_v2  ;;  %v4977_v7 = vld [vmem:[%s6342_s1 + $0x18] sm:$0xff]   ;;  %v4979_v9 = vld [vmem:[%s6342_s1 + $0x20] sm:$0xff]   ;;  %v4981_v11 = vld [vmem:[%s6342_s1 + $0x28] sm:$0xff]  }
   0x4   :  { %3954 = vmatprep.subr.bf16.mxu1 %v5079_v0  ;;  %4226 = vmatprep.subr.bf16.mxu0 %v5079_v0  ;;  %v4978_v8 = vld [vmem:[%s6342_s1 + $0x118] sm:$0xff]   ;;  %v4980_v10 = vld [vmem:[%s6342_s1 + $0x120] sm:$0xff]   ;;  %v5159_v13 = vld [vmem:[%s6343_s0 + $0x8] sm:$0xf] }
   0x5   :  { %v24_v12 = vld [vmem:[%s6343_s0 + $0x4] sm:$0xf]  ;;  %v4982_v14 = vld [vmem:[%s6342_s1 + $0x128] sm:$0xff]   ;;  %v5172_v16 = vld [vmem:[%s6343_s0 + $0x10] sm:$0xf] }
   0x6   :  { %v5167_v15 = vld [vmem:[%s6343_s0 + $0xc] sm:$0xf]  ;;  %v5175_v17 = vcombine.low %v24_v12, %v5159_v13  ;;  %v5180_v18 = vld [vmem:[%s6343_s0 + $0x14] sm:$0xf]  ;;  %v5192_v22 = vld [vmem:[%s6343_s0 + $0x18] sm:$0xf] }
   0x7   :  { %3955 = vmatpush3.bf16.msra.mxu1 %v4973_v3  ;;  %4227 = vmatpush3.bf16.msra.mxu0 %v4974_v4  ;;  %v5184_v19 = vcombine.low %v5167_v15, %v5172_v16  ;;  %v4983_v25 = vld [vmem:[%s6342_s1 + $0x30] sm:$0xff]   ;;  %v5205_v27 = vcombine.low %v5180_v18, %v5192_v22  ;;  %v4985_v32 = vld [vmem:[%s6342_s1 + $0x38] sm:$0xff]   ;;  %v23_v33 = vld [vmem:[%s6343_s0] sm:$0xf]  ;;  %v5273_v55 = vcombine.low %v5159_v13, %v5167_v15 }
   0x8   :  { %3956 = vmatprep.subr.bf16.mxu1 %v5079_v0  ;;  %4228 = vmatprep.subr.bf16.mxu0 %v5079_v0  ;;  %v1511_v20 = vshrl.u32 %v5175_v17, 16  ;;  %v1514_v21 = vshll.u32 %v5175_v17, 16  ;;  %v4984_v26 = vld [vmem:[%s6342_s1 + $0x130] sm:$0xff]   ;;  %v4986_v34 = vld [vmem:[%s6342_s1 + $0x138] sm:$0xff]   ;;  %v5230_v40 = vld [vmem:[%s6343_s0 + $0x20] sm:$0xf]  ;;  %v5232_v41 = vcombine.low %v23_v33, %v24_v12 }
   0x9   :  { %v1519_v23 = vshrl.u32 %v5184_v19, 16  ;;  %v1522_v24 = vshll.u32 %v5184_v19, 16  ;;  %v1528_v37 = vshrl.u32 %v5205_v27, 16  ;;  %v1531_v38 = vshll.u32 %v5205_v27, 16  ;;  %v5225_v39 = vld [vmem:[%s6343_s0 + $0x1c] sm:$0xf] }
   0xa   :  { %v1513_v28 = vrot.slane %v1511_v20, 1  ;;  %v1516_v29 = vrot.slane %v1514_v21, 2  ;;  %v4992_v42 = vld [vmem:[%s6342_s1 + $0x140] sm:$0xff]   ;;  %v5241_v46 = vcombine.low %v5225_v39, %v5230_v40  ;;  %v5258_v49 = vld [vmem:[%s6343_s0 + $0x28] sm:$0xf]  ;;  %v4996_v58 = vld [vmem:[%s6342_s1 + $0x150] sm:$0xff]  }
   0xb   :  { %3957 = vmatpush3.bf16.msra.mxu1 %v4975_v5  ;;  %4229 = vmatpush3.bf16.msra.mxu0 %v4976_v6  ;;  %v1521_v30 = vrot.slane %v1519_v23, 1  ;;  %v1524_v31 = vrot.slane %v1522_v24, 2  ;;  %v1530_v44 = vrot.slane %v1528_v37, 1  ;;  %v1533_v45 = vrot.slane %v1531_v38, 2  ;;  %v4995_v47 = vld [vmem:[%s6342_s1 + $0x40] sm:$0xff]   ;;  %v4994_v51 = vld [vmem:[%s6342_s1 + $0x148] sm:$0xff]  }
   0xc   :  { %3958 = vmatprep.subr.bf16.mxu1 %v5079_v0  ;;  %4230 = vmatprep.subr.bf16.mxu0 %v5079_v0  ;;  %v1517_v35 = vor.u32 %v1516_v29, %v1513_v28  ;;  %v5251_v48 = vld [vmem:[%s6343_s0 + $0x24] sm:$0xf]  ;;  %v1537_v52 = vshrl.u32 %v5241_v46, 16  ;;  %v1540_v53 = vshll.u32 %v5241_v46, 16  ;;  %v4998_v54 = vld [vmem:[%s6342_s1 + $0x48] sm:$0xff]   ;;  %v5005_v61 = vld [vmem:[%s6342_s1 + $0x50] sm:$0xff]   ;;  %v5315_v6 = vcombine.low %v5172_v16, %v5180_v18 }
   0xd   :  { %v1525_v36 = vor.u32 %v1524_v31, %v1521_v30  ;;  %v1534_v50 = vor.u32 %v1533_v45, %v1530_v44  ;;  %v5278_v56 = vcombine.low %v5251_v48, %v5258_v49  ;;  %v4999_v1 = vld [vmem:[%s6342_s1 + $0x158] sm:$0xff]   ;;  %v5300_v2 = vld [vmem:[%s6343_s0 + $0x2c] sm:$0xf]  ;;  %v5307_v4 = vld [vmem:[%s6343_s0 + $0x30] sm:$0xf]  ;;  %v5382_v30 = vcombine.low %v5192_v22, %v5225_v39 }
   0xe   :  { %v1539_v59 = vrot.slane %v1537_v52, 1  ;;  %v1542_v60 = vrot.slane %v1540_v53, 2  ;;  %v5011_v5 = vld [vmem:[%s6342_s1 + $0x58] sm:$0xff]   ;;  %v5333_v12 = vld [vmem:[%s6343_s0 + $0x64] sm:$0xf]  ;;  %v5006_v21 = vld [vmem:[%s6342_s1 + $0x168] sm:$0xff]   ;;  %v5420_v45 = vcombine.low %v5230_v40, %v5251_v48 }
   0xf   :  { %3959 = vmatpush3.bf16.msra.mxu1 %v4977_v7  ;;  %4231 = vmatpush3.bf16.msra.mxu0 %v4978_v8  ;;  %v1526_v43 = vsel %vm1509_vm1, %v1517_v35, %v1525_v36  ;;  %v1535_v57 = vsel %vm1509_vm1, %v1525_v36, %v1534_v50  ;;  %v1546_v62 = vshrl.u32 %v5278_v56, 16  ;;  %v1549_v63 = vshll.u32 %v5278_v56, 16  ;;  %v5338_v13 = vld [vmem:[%s6343_s0 + $0x68] sm:$0xf]  ;;  %v50_v15 = vld [vmem:[%s6343_s0 + $0x6c] sm:$0xf] }
  0x10   :  { %3960 = vmatprep.subr.bf16.mxu1 %v5079_v0  ;;  %4232 = vmatprep.subr.bf16.mxu0 %v5079_v0  ;;  %v1543_v3 = vor.u32 %v1542_v60, %v1539_v59  ;;  %v5016_v18 = vld [vmem:[%s6342_s1 + $0x60] sm:$0xff]   ;;  %v5353_v20 = vcombine.low %v5338_v13, %v50_v15  ;;  %v5362_v23 = vld [vmem:[%s6343_s0 + $0x34] sm:$0xf]  ;;  %v5374_v28 = vld [vmem:[%s6343_s0 + $0x38] sm:$0xf] }
  0x11   :  { %v1548_v7 = vrot.slane %v1546_v62, 1  ;;  %v1551_v8 = vrot.slane %v1549_v63, 2  ;;  %v5020_v29 = vld [vmem:[%s6342_s1 + $0x68] sm:$0xff]   ;;  %v5387_v31 = vcombine.low %v5362_v23, %v5374_v28  ;;  %v5009_v35 = vld [vmem:[%s6342_s1 + $0x170] sm:$0xff]   ;;  %v38_v37 = vld [vmem:[%s6343_s0 + $0x3c] sm:$0xf] }
  0x12   :  { %v5023_v22 = vld [vmem:[%s6342_s1 + $0x70] sm:$0xff]   ;;  %v5031_v44 = vld [vmem:[%s6342_s1 + $0x78] sm:$0xff]   ;;  %v1916_v62 = vrot.slane %v5175_v17, 2  ;;  %v1917_v63 = vrot.slane %v5184_v19, 2  ;;  %v5496_v15 = vld [vmem:[%s6343_s0 + $0x48] sm:$0xf] }
  0x13   :  { %3961 = vmatpush3.bf16.msra.mxu1 %v4979_v9  ;;  %4233 = vmatpush3.bf16.msra.mxu0 %v4980_v10  ;;  %v5002_v9 = vld [vmem:[%s6342_s1 + $0x160] sm:$0xff]   ;;  %v5323_v10 = vcombine.low %v5300_v2, %v5307_v4  ;;  %v1564_v36 = vshrl.u32 %v5387_v31, 16  ;;  %v1567_v39 = vshll.u32 %v5387_v31, 16 }
  0x14   :  { %3962 = vmatprep.subr.bf16.mxu1 %v5079_v0  ;;  %4234 = vmatprep.subr.bf16.mxu0 %v5079_v0 }
  0x15   :  { %v1555_v24 = vshrl.u32 %v5323_v10, 16 }
  0x17   :  { %3963 = vmatpush3.bf16.msra.mxu1 %v4981_v11  ;;  %4235 = vmatpush3.bf16.msra.mxu0 %v4982_v14  ;;  %v5328_v11 = vld [vmem:[%s6343_s0 + $0x60] sm:$0xf]  ;;  %v1544_v14 = vsel %vm1509_vm1, %v1534_v50, %v1543_v3  ;;  %v1557_v33 = vrot.slane %v1555_v24, 1  ;;  %v1566_v50 = vrot.slane %v1564_v36, 1  ;;  %v5554_v36 = vld [vmem:[%s6343_s0 + $0x58] sm:$0xf] }
  0x18   :  { %3964 = vmatprep.subr.bf16.mxu1 %v5079_v0  ;;  %4236 = vmatprep.subr.bf16.mxu0 %v5079_v0  ;;  %v5346_v16 = vcombine.low %v5328_v11, %v5333_v12 }
  0x1b   :  { %3965 = vmatpush3.bf16.msra.mxu1 %v4983_v25  ;;  %4237 = vmatpush3.bf16.msra.mxu0 %v4984_v26  ;;  %v1558_v25 = vshll.u32 %v5323_v10, 16  ;;  %v1552_v26 = vor.u32 %v1551_v8, %v1548_v7  ;;  %v5018_v7 = vld [vmem:[%s6342_s1 + $0x188] sm:$0xff]  }
  0x1c   :  { %3966 = vmatprep.subr.bf16.mxu1 %v5079_v0  ;;  %4238 = vmatprep.subr.bf16.mxu0 %v5079_v0 }
  0x1f   :  { %3967 = vmatpush3.bf16.msra.mxu1 %v4985_v32  ;;  %4239 = vmatpush3.bf16.msra.mxu0 %v4986_v34  ;;  %v1553_v32 = vsel %vm1509_vm1, %v1543_v3, %v1552_v26  ;;  %v1560_v34 = vrot.slane %v1558_v25, 2  ;;  %v5015_v3 = vld [vmem:[%s6342_s1 + $0x180] sm:$0xff]  }
  0x20   :  { %4020 = vmatprep.subr.bf16.mxu1 %v5079_v0  ;;  %4292 = vmatprep.subr.bf16.mxu0 %v5079_v0 }
  0x21   :  { %v1561_v38 = vor.u32 %v1560_v34, %v1557_v33  ;;  %v5036_v33 = vld [vmem:[%s6342_s1 + $0x1a8] sm:$0xff]  }
  0x22   :  { %3969 = vmatmul.mubr.bf16.vlgmr.msra.gmra.mrb[0].mxu1 %v5232_v41  ;;  %4241 = vmatmul.mubr.bf16.vlgmr.msra.gmra.mrb[0].mxu0 %v1526_v43  ;;  %v39_v43 = vld [vmem:[%s6343_s0 + $0x40] sm:$0xf] }
  0x23   :  { %3972 = vmatprep.mubr.msk.bf16.mxu1 %vm5080_vm0, %v5079_v0  ;;  %4293 = vmatpush3.bf16.msra.mxu0 %v4992_v42  ;;  %v5013_v42 = vld [vmem:[%s6342_s1 + $0x178] sm:$0xff]   ;;  %v5424_v52 = vcombine.low %v38_v37, %v39_v43 }
  0x24   :  { %4244 = vmatprep.mubr.msk.bf16.mxu0 %vm5080_vm0, %v5079_v0  ;;  %4294 = vmatprep.subr.bf16.mxu0 %v5079_v0 }
  0x25   :  { %4021 = vmatpush3.bf16.msra.mxu1 %v4995_v47  ;;  %v1562_v47 = vsel %vm1509_vm1, %v1552_v26, %v1561_v38  ;;  %v1573_v48 = vshrl.u32 %v5424_v52, 16  ;;  %v1576_v53 = vshll.u32 %v5424_v52, 16  ;;  %v5032_v26 = vld [vmem:[%s6342_s1 + $0x1a0] sm:$0xff]  }
  0x26   :  { %4022 = vmatprep.subr.bf16.mxu1 %v5079_v0 }
  0x27   :  { %4295 = vmatpush3.bf16.msra.mxu0 %v4994_v51  ;;  %v1569_v51 = vrot.slane %v1567_v39, 2  ;;  %v1578_v59 = vrot.slane %v1576_v53, 2  ;;  %v5041_v39 = vld [vmem:[%s6342_s1 + $0x1b8] sm:$0xff]  }
  0x28   :  { %4296 = vmatprep.subr.bf16.mxu0 %v5079_v0 }
  0x29   :  { %4023 = vmatpush3.bf16.msra.mxu1 %v4998_v54  ;;  %v1570_v40 = vor.u32 %v1569_v51, %v1566_v50  ;;  %v5437_v54 = vcombine.low %v5258_v49, %v5300_v2  ;;  %v1918_v2 = vsel %vm1915_vm2, %v1916_v62, %v1917_v63  ;;  %v3424_v50 = vcombine.low %v5328_v11, %v5328_v11 }
  0x2a   :  { %3973 = vmatmul.mubr.bf16.gmra.mrb[4].mxu1 %v5273_v55  ;;  %4024 = vmatprep.subr.bf16.mxu1 %v5079_v0  ;;  %v474_v51 = vshrl.u32 %v5232_v41, 16  ;;  %v485_v62 = vshrl.u32 %v5273_v55, 16 }
  0x2b   :  { %4245 = vmatmul.mubr.bf16.gmra.mrb[4].mxu0 %v1535_v57  ;;  %3976 = vmatprep.mubr.msk.bf16.mxu1 %vm5080_vm0, %v5079_v0  ;;  %v1571_v57 = vsel %vm1509_vm1, %v1561_v38, %v1570_v40  ;;  %v1925_v38 = vrot.slane %v5323_v10, 2 }
  0x2c   :  { %4248 = vmatprep.mubr.msk.bf16.mxu0 %vm5080_vm0, %v5079_v0  ;;  %4297 = vmatpush3.bf16.msra.mxu0 %v4996_v58  ;;  %v1575_v58 = vrot.slane %v1573_v48, 1  ;;  %v481_v48 = vshll.u32 %v5273_v55, 16 }
  0x2d   :  { %4298 = vmatprep.subr.bf16.mxu0 %v5079_v0  ;;  %4025 = vmatpush3.bf16.msra.mxu1 %v5005_v61  ;;  %v5449_v61 = vcombine.low %v5307_v4, %v5362_v23  ;;  %v5473_v4 = vld [vmem:[%s6343_s0 + $0x44] sm:$0xf]  ;;  %v5030_v23 = vld [vmem:[%s6342_s1 + $0x198] sm:$0xff]  }
  0x2e   :  { %4026 = vmatprep.subr.bf16.mxu1 %v5079_v0  ;;  %v5445_v60 = vor.u32 %v1578_v59, %v1575_v58  ;;  %v5483_v8 = vcombine.low %v39_v43, %v5473_v4  ;;  %v483_v58 = vrot.slane %v481_v48, 1  ;;  %v1929_v59 = vrot.slane %v5424_v52, 2 }
  0x30   :  { %4299 = vmatpush3.bf16.msra.mxu0 %v4999_v1  ;;  %v1580_v49 = vsel %vm1509_vm1, %v1570_v40, %v5445_v60  ;;  %v5461_v1 = vcombine.low %v5374_v28, %v38_v37  ;;  %v5525_v28 = vld [vmem:[%s6343_s0 + $0x50] sm:$0xf]  ;;  %v5559_v37 = vld [vmem:[%s6343_s0 + $0x5c] sm:$0xf] }
  0x31   :  { %4300 = vmatprep.subr.bf16.mxu0 %v5079_v0  ;;  %4027 = vmatpush3.bf16.msra.mxu1 %v5011_v5  ;;  %v1919_v5 = vrot.slane %v5205_v27, 2 }
  0x32   :  { %3977 = vmatmul.mubr.bf16.gmra.mrb[8].mxu1 %v5315_v6  ;;  %4028 = vmatprep.subr.bf16.mxu1 %v5079_v0 }
  0x33   :  { %4249 = vmatmul.mubr.bf16.gmra.mrb[8].mxu0 %v1544_v14  ;;  %3980 = vmatprep.mubr.msk.bf16.mxu1 %vm5080_vm0, %v5079_v0  ;;  %v5022_v14 = vld [vmem:[%s6342_s1 + $0x190] sm:$0xff]  }
  0x34   :  { %4252 = vmatprep.mubr.msk.bf16.mxu0 %vm5080_vm0, %v5079_v0  ;;  %4301 = vmatpush3.bf16.msra.mxu0 %v5002_v9  ;;  %v1920_v9 = vsel %vm1915_vm2, %v1917_v63, %v1919_v5  ;;  %v489_v63 = vshll.u32 %v5315_v6, 16 }
  0x35   :  { %4302 = vmatprep.subr.bf16.mxu0 %v5079_v0  ;;  %4029 = vmatpush3.bf16.msra.mxu1 %v5016_v18  ;;  %v5501_v18 = vld [vmem:[%s6343_s0 + $0x4c] sm:$0xf] }
  0x36   :  { %4030 = vmatprep.subr.bf16.mxu1 %v5079_v0  ;;  %v5512_v24 = vcombine.low %v5496_v15, %v5501_v18 }
  0x38   :  { %4303 = vmatpush3.bf16.msra.mxu0 %v5006_v21  ;;  %v1921_v21 = vrot.slane %v5241_v46, 2 }
  0x39   :  { %4304 = vmatprep.subr.bf16.mxu0 %v5079_v0  ;;  %4031 = vmatpush3.bf16.msra.mxu1 %v5020_v29  ;;  %v5530_v29 = vld [vmem:[%s6343_s0 + $0x54] sm:$0xf] }
  0x3a   :  { %3981 = vmatmul.mubr.bf16.gmra.mrb[12].mxu1 %v5382_v30  ;;  %4032 = vmatprep.subr.bf16.mxu1 %v5079_v0  ;;  %v1922_v25 = vsel %vm1915_vm2, %v1919_v5, %v1921_v21  ;;  %v5541_v34 = vcombine.low %v5525_v28, %v5530_v29  ;;  %v5034_v5 = vld [vmem:[%s6342_s1 + $0x80] sm:$0xff]  }
  0x3b   :  { %4253 = vmatmul.mubr.bf16.gmra.mrb[12].mxu0 %v1553_v32  ;;  %3984 = vmatprep.mubr.msk.bf16.mxu1 %vm5080_vm0, %v5079_v0  ;;  %v1923_v32 = vrot.slane %v5278_v56, 2 }
  0x3c   :  { %4256 = vmatprep.mubr.msk.bf16.mxu0 %vm5080_vm0, %v5079_v0  ;;  %4305 = vmatpush3.bf16.msra.mxu0 %v5009_v35 }
  0x3d   :  { %4306 = vmatprep.subr.bf16.mxu0 %v5079_v0  ;;  %4033 = vmatpush3.bf16.msra.mxu1 %v5023_v22  ;;  %v1924_v35 = vsel %vm1915_vm2, %v1921_v21, %v1923_v32  ;;  %v5039_v22 = vld [vmem:[%s6342_s1 + $0x1b0] sm:$0xff]   ;;  %v1926_v43 = vsel %vm1915_vm2, %v1923_v32, %v1925_v38  ;;  %v493_v21 = vshrl.u32 %v5315_v6, 16 }
  0x3e   :  { %4034 = vmatprep.subr.bf16.mxu1 %v5079_v0  ;;  %v5040_v32 = vld [vmem:[%s6342_s1 + $0x90] sm:$0xff]  }
  0x40   :  { %4307 = vmatpush3.bf16.msra.mxu0 %v5013_v42  ;;  %v5570_v42 = vcombine.low %v5554_v36, %v5559_v37 }
  0x41   :  { %4360 = vmatprep.subr.bf16.mxu0 %v5079_v0  ;;  %4035 = vmatpush3.bf16.msra.mxu1 %v5031_v44  ;;  %v476_v44 = vshll.u32 %v5232_v41, 16 }
  0x42   :  { %3985 = vmatmul.mubr.bf16.gmra.mrb[16].mxu1 %v5420_v45  ;;  %4088 = vmatprep.subr.bf16.mxu1 %v5079_v0 }
  0x43   :  { %4257 = vmatmul.mubr.bf16.gmra.mrb[16].mxu0 %v1562_v47  ;;  %3988 = vmatprep.mubr.msk.bf16.mxu1 %vm5080_vm0, %v5079_v0  ;;  %v1927_v47 = vrot.slane %v5387_v31, 2  ;;  %v478_v40 = vrot.slane %v476_v44, 1  ;;  %v5646_v44 = vcombine.low %v5530_v29, %v5554_v36  ;;  %v5046_v36 = vld [vmem:[%s6342_s1 + $0xa8] sm:$0xff]  }
  0x44   :  { %4260 = vmatprep.mubr.msk.bf16.mxu0 %vm5080_vm0, %v5079_v0 }
  0x45   :  { %v1928_v53 = vsel %vm1915_vm2, %v1925_v38, %v1927_v47  ;;  %v501_v38 = vshrl.u32 %v5382_v30, 16  ;;  %v1935_v29 = vrot.slane %v5646_v44, 2 }
  0x4a   :  { %3989 = vmatmul.mubr.bf16.gmra.mrb[20].mxu1 %v5437_v54 }
  0x4b   :  { %4261 = vmatmul.mubr.bf16.gmra.mrb[20].mxu0 %v1571_v57  ;;  %3992 = vmatprep.mubr.msk.bf16.mxu1 %vm5080_vm0, %v5079_v0  ;;  %v479_v57 = vor.u32 %v478_v40, %v474_v51 }
  0x4c   :  { %4264 = vmatprep.mubr.msk.bf16.mxu0 %vm5080_vm0, %v5079_v0 }
  0x52   :  { %3993 = vmatmul.mubr.bf16.gmra.mrb[24].mxu1 %v5449_v61 }
  0x53   :  { %4265 = vmatmul.mubr.bf16.gmra.mrb[24].mxu0 %v1580_v49  ;;  %3996 = vmatprep.mubr.msk.bf16.mxu1 %vm5080_vm0, %v5079_v0  ;;  %v484_v49 = vsel %vm472_vm3, %v479_v57, %v483_v58  ;;  %v513_v57 = vshll.u32 %v5437_v54, 16 }
  0x54   :  { %4308 = vmatprep.mubr.msk.bf16.mxu0 %vm5080_vm0, %v5079_v0 }
  0x5a   :  { %3997 = vmatmul.mubr.bf16.gmra.mrb[28].mxu1 %v5461_v1 }
  0x5b   :  { %4309 = vmatmul.mubr.bf16.vlgmr.msra.gmra.mrb[0].mxu0 %v1918_v2  ;;  %4000 = vmatprep.mubr.msk.bf16.mxu1 %vm5080_vm0, %v5079_v0  ;;  %v1930_v2 = vsel %vm1915_vm2, %v1927_v47, %v1929_v59  ;;  %v5044_v47 = vld [vmem:[%s6342_s1 + $0xa0] sm:$0xff]  }
  0x5c   :  { %4361 = vmatpush3.bf16.msra.mxu0 %v5015_v3  ;;  %4312 = vmatprep.mubr.msk.bf16.mxu0 %vm5080_vm0, %v5079_v0  ;;  %v5599_v3 = vcombine.low %v5473_v4, %v5496_v15 }
  0x5d   :  { %4362 = vmatprep.subr.bf16.mxu0 %v5079_v0 }
  0x5e   :  { %v1931_v4 = vrot.slane %v5599_v3, 2 }
  0x60   :  { %4363 = vmatpush3.bf16.msra.mxu0 %v5018_v7  ;;  %v487_v7 = vor.u32 %v485_v62, %v483_v58  ;;  %v5670_v58 = vcombine.low %v5559_v37, %v5328_v11  ;;  %v515_v11 = vrot.slane %v513_v57, 1  ;;  %v2548_v37 = vrot.slane %v485_v62, 2 }
  0x61   :  { %4364 = vmatprep.subr.bf16.mxu0 %v5079_v0 }
  0x62   :  { %4001 = vmatmul.mubr.bf16.gmra.mrb[32].mxu1 %v5483_v8 }
  0x63   :  { %4313 = vmatmul.mubr.bf16.gmra.mrb[4].mxu0 %v1920_v9  ;;  %4004 = vmatprep.mubr.msk.bf16.mxu1 %vm5080_vm0, %v5079_v0  ;;  %v491_v9 = vrot.slane %v489_v63, 1 }
  0x64   :  { %4316 = vmatprep.mubr.msk.bf16.mxu0 %vm5080_vm0, %v5079_v0  ;;  %4365 = vmatpush3.bf16.msra.mxu0 %v5022_v14  ;;  %v5037_v14 = vld [vmem:[%s6342_s1 + $0x88] sm:$0xff]  }
  0x65   :  { %4366 = vmatprep.subr.bf16.mxu0 %v5079_v0  ;;  %v492_v15 = vsel %vm472_vm3, %v487_v7, %v491_v9  ;;  %v2551_v7 = vrot.slane %v493_v21, 2 }
  0x68   :  { %4367 = vmatpush3.bf16.msra.mxu0 %v5030_v23  ;;  %v497_v23 = vshll.u32 %v5382_v30, 16 }
  0x69   :  { %4368 = vmatprep.subr.bf16.mxu0 %v5079_v0 }
  0x6a   :  { %4005 = vmatmul.mubr.bf16.gmra.mrb[36].mxu1 %v5512_v24 }
  0x6b   :  { %4317 = vmatmul.mubr.bf16.gmra.mrb[8].mxu0 %v1922_v25  ;;  %4008 = vmatprep.mubr.msk.bf16.mxu1 %vm5080_vm0, %v5079_v0  ;;  %v1932_v25 = vsel %vm1915_vm2, %v1929_v59, %v1931_v4 }
  0x6c   :  { %4320 = vmatprep.mubr.msk.bf16.mxu0 %vm5080_vm0, %v5079_v0  ;;  %4369 = vmatpush3.bf16.msra.mxu0 %v5032_v26  ;;  %v5623_v26 = vcombine.low %v5501_v18, %v5525_v28  ;;  %v5042_v28 = vld [vmem:[%s6342_s1 + $0x98] sm:$0xff]  }
  0x6d   :  { %4370 = vmatprep.subr.bf16.mxu0 %v5079_v0 }
  0x6e   :  { %v1933_v18 = vrot.slane %v5623_v26, 2 }
  0x70   :  { %4371 = vmatpush3.bf16.msra.mxu0 %v5036_v33  ;;  %v495_v33 = vor.u32 %v493_v21, %v491_v9  ;;  %v1936_v59 = vsel %vm1915_vm2, %v1933_v18, %v1935_v29  ;;  %v1937_v9 = vrot.slane %v5670_v58, 2  ;;  %v5701_v21 = vcombine.low %v5333_v12, %v5338_v13 }
  0x71   :  { %4372 = vmatprep.subr.bf16.mxu0 %v5079_v0 }
  0x72   :  { %4009 = vmatmul.mubr.bf16.gmra.mrb[40].mxu1 %v5541_v34 }
  0x73   :  { %4321 = vmatmul.mubr.bf16.gmra.mrb[12].mxu0 %v1924_v35  ;;  %4012 = vmatprep.mubr.msk.bf16.mxu1 %vm5080_vm0, %v5079_v0  ;;  %v499_v35 = vrot.slane %v497_v23, 1 }
  0x74   :  { %4324 = vmatprep.mubr.msk.bf16.mxu0 %vm5080_vm0, %v5079_v0  ;;  %4373 = vmatpush3.bf16.msra.mxu0 %v5039_v22 }
  0x75   :  { %4374 = vmatprep.subr.bf16.mxu0 %v5079_v0  ;;  %v500_v22 = vsel %vm472_vm3, %v495_v33, %v499_v35 }
  0x78   :  { %4375 = vmatpush3.bf16.msra.mxu0 %v5041_v39  ;;  %v505_v39 = vshll.u32 %v5420_v45, 16 }
  0x79   :  { %4428 = vmatprep.subr.bf16.mxu0 %v5079_v0 }
  0x7a   :  { %4013 = vmatmul.mubr.bf16.gmra.mrb[44].mxu1 %v5570_v42  ;;  %v507_v51 = vrot.slane %v505_v39, 1 }
  0x7b   :  { %4325 = vmatmul.mubr.bf16.gmra.mrb[16].mxu0 %v1926_v43  ;;  %4016 = vmatprep.mubr.msk.bf16.mxu1 %vm5080_vm0, %v5079_v0  ;;  %v1934_v43 = vsel %vm1915_vm2, %v1931_v4, %v1933_v18  ;;  %v5050_v4 = vld [vmem:[%s6342_s1 + $0xb8] sm:$0xff]  }
  0x7c   :  { %4328 = vmatprep.mubr.msk.bf16.mxu0 %vm5080_vm0, %v5079_v0 }
  0x82   :  { %4017 = vmatmul.mubr.bf16.gmra.mrb[48].mxu1 %v3424_v50  ;;  %v503_v50 = vor.u32 %v501_v38, %v499_v35  ;;  %v1939_v35 = vrot.slane %v5701_v21, 2 }
  0x83   :  { %4329 = vmatmul.mubr.bf16.gmra.mrb[20].mxu0 %v1928_v53  ;;  %4036 = vmatprep.mubr.msk.bf16.mxu1 %vm5080_vm0, %v5079_v0  ;;  %v509_v53 = vshrl.u32 %v5420_v45, 16 }
  0x84   :  { %4332 = vmatprep.mubr.msk.bf16.mxu0 %vm5080_vm0, %v5079_v0  ;;  %v508_v40 = vsel %vm472_vm3, %v503_v50, %v507_v51 }
  0x8a   :  { %4037 = vmatmul.mubr.bf16.vlgmr.msra.gmra.mrb[0].mxu1 %v484_v49  ;;  %v5048_v49 = vld [vmem:[%s6342_s1 + $0xb0] sm:$0xff]  }
  0x8b   :  { %4333 = vmatmul.mubr.bf16.gmra.mrb[24].mxu0 %v1930_v2  ;;  %4040 = vmatprep.mubr.msk.bf16.mxu1 %vm5080_vm0, %v5079_v0  ;;  %v511_v2 = vor.u32 %v509_v53, %v507_v51 }
  0x8c   :  { %4336 = vmatprep.mubr.msk.bf16.mxu0 %vm5080_vm0, %v5079_v0  ;;  %4089 = vmatpush3.bf16.msra.mxu1 %v5034_v5  ;;  %v2552_v5 = vrot.slane %v489_v63, 3  ;;  %v517_v63 = vshrl.u32 %v5437_v54, 16 }
  0x8d   :  { %4090 = vmatprep.subr.bf16.mxu1 %v5079_v0  ;;  %v516_v62 = vsel %vm472_vm3, %v511_v2, %v515_v11  ;;  %v2234_v2 = vrot.slane %v5315_v6, 2 }
  0x8e   :  { %v5704_v33 = vor.u32 %v2552_v5, %v2551_v7  ;;  %v519_v12 = vor.u32 %v517_v63, %v515_v11  ;;  %v545_v5 = vshll.u32 %v5512_v24, 16 }
  0x90   :  { %4091 = vmatpush3.bf16.msra.mxu1 %v5037_v14  ;;  %v2549_v14 = vrot.slane %v481_v48, 3 }
  0x91   :  { %4092 = vmatprep.subr.bf16.mxu1 %v5079_v0 }
  0x92   :  { %4041 = vmatmul.mubr.bf16.gmra.mrb[4].mxu1 %v492_v15  ;;  %v521_v15 = vshll.u32 %v5449_v61, 16 }
  0x93   :  { %4337 = vmatmul.mubr.bf16.gmra.mrb[28].mxu0 %v1932_v25  ;;  %4044 = vmatprep.mubr.msk.bf16.mxu1 %vm5080_vm0, %v5079_v0  ;;  %v1938_v25 = vsel %vm1915_vm2, %v1935_v29, %v1937_v9  ;;  %v533_v29 = vshrl.u32 %v5461_v1, 16 }
  0x94   :  { %4340 = vmatprep.mubr.msk.bf16.mxu0 %vm5080_vm0, %v5079_v0  ;;  %4093 = vmatpush3.bf16.msra.mxu1 %v5040_v32  ;;  %v2550_v32 = vor.u32 %v2549_v14, %v2548_v37  ;;  %v523_v13 = vrot.slane %v521_v15, 1  ;;  %v541_v37 = vshrl.u32 %v5483_v8, 16  ;;  %v547_v14 = vrot.slane %v545_v5, 1 }
  0x95   :  { %4094 = vmatprep.subr.bf16.mxu1 %v5079_v0 }
  0x96   :  { %v5709_v48 = vsel %vm2547_vm4, %v2550_v32, %v5704_v33  ;;  %v524_v18 = vsel %vm472_vm3, %v519_v12, %v523_v13  ;;  %v549_v12 = vshrl.u32 %v5512_v24, 16 }
  0x98   :  { %4095 = vmatpush3.bf16.msra.mxu1 %v5042_v28  ;;  %v525_v28 = vshrl.u32 %v5449_v61, 16 }
  0x99   :  { %4096 = vmatprep.subr.bf16.mxu1 %v5079_v0 }
  0x9a   :  { %4045 = vmatmul.mubr.bf16.gmra.mrb[8].mxu1 %v500_v22  ;;  %v529_v22 = vshll.u32 %v5461_v1, 16 }
  0x9b   :  { %4341 = vmatmul.mubr.bf16.gmra.mrb[32].mxu0 %v1934_v43  ;;  %4048 = vmatprep.mubr.msk.bf16.mxu1 %vm5080_vm0, %v5079_v0  ;;  %v1940_v43 = vsel %vm1915_vm2, %v1937_v9, %v1939_v35  ;;  %v5043_v9 = vld [vmem:[%s6342_s1 + $0x1c0] sm:$0xff]  }
  0x9c   :  { %4344 = vmatprep.mubr.msk.bf16.mxu0 %vm5080_vm0, %v5079_v0  ;;  %4097 = vmatpush3.bf16.msra.mxu1 %v5044_v47  ;;  %v527_v47 = vor.u32 %v525_v28, %v523_v13  ;;  %v531_v50 = vrot.slane %v529_v22, 1  ;;  %v553_v13 = vshll.u32 %v5541_v34, 16 }
  0x9d   :  { %4098 = vmatprep.subr.bf16.mxu1 %v5079_v0 }
  0x9e   :  { %v532_v51 = vsel %vm472_vm3, %v527_v47, %v531_v50  ;;  %v555_v47 = vrot.slane %v553_v13, 1 }
  0xa0   :  { %4099 = vmatpush3.bf16.msra.mxu1 %v5046_v36  ;;  %v537_v36 = vshll.u32 %v5483_v8, 16 }
  0xa1   :  { %4100 = vmatprep.subr.bf16.mxu1 %v5079_v0 }
  0xa2   :  { %4049 = vmatmul.mubr.bf16.gmra.mrb[12].mxu1 %v508_v40  ;;  %v535_v40 = vor.u32 %v533_v29, %v531_v50  ;;  %v2238_v50 = vrot.slane %v5420_v45, 2 }
  0xa3   :  { %4345 = vmatmul.mubr.bf16.gmra.mrb[36].mxu0 %v1936_v59  ;;  %4052 = vmatprep.mubr.msk.bf16.mxu1 %vm5080_vm0, %v5079_v0  ;;  %v539_v59 = vrot.slane %v537_v36, 1 }
  0xa4   :  { %4348 = vmatprep.mubr.msk.bf16.mxu0 %vm5080_vm0, %v5079_v0  ;;  %4101 = vmatpush3.bf16.msra.mxu1 %v5048_v49  ;;  %v2233_v49 = vrot.slane %v5273_v55, 2 }
  0xa5   :  { %4102 = vmatprep.subr.bf16.mxu1 %v5079_v0  ;;  %v540_v11 = vsel %vm472_vm3, %v535_v40, %v539_v59 }
  0xa6   :  { %v2235_v7 = vsel %vm1915_vm2, %v2233_v49, %v2234_v2  ;;  %v561_v49 = vshll.u32 %v5570_v42, 16 }
  0xa8   :  { %4103 = vmatpush3.bf16.msra.mxu1 %v5050_v4  ;;  %v543_v4 = vor.u32 %v541_v37, %v539_v59  ;;  %v557_v59 = vshrl.u32 %v5541_v34, 16 }
  0xa9   :  { %4156 = vmatprep.subr.bf16.mxu1 %v5079_v0 }
  0xaa   :  { %4053 = vmatmul.mubr.bf16.gmra.mrb[16].mxu1 %v516_v62  ;;  %v2236_v62 = vrot.slane %v5382_v30, 2  ;;  %v548_v32 = vsel %vm472_vm3, %v543_v4, %v547_v14  ;;  %v2240_v4 = vrot.slane %v5437_v54, 2 }
  0xab   :  { %4349 = vmatmul.mubr.bf16.gmra.mrb[40].mxu0 %v1938_v25  ;;  %4056 = vmatprep.mubr.msk.bf16.mxu1 %vm5080_vm0, %v5079_v0  ;;  %v5045_v25 = vld [vmem:[%s6342_s1 + $0x1c8] sm:$0xff]  }
  0xac   :  { %4352 = vmatprep.mubr.msk.bf16.mxu0 %vm5080_vm0, %v5079_v0 }
  0xb2   :  { %4057 = vmatmul.mubr.bf16.gmra.mrb[20].mxu1 %v524_v18  ;;  %v5047_v18 = vld [vmem:[%s6342_s1 + $0x1d0] sm:$0xff]  }
  0xb3   :  { %4353 = vmatmul.mubr.bf16.gmra.mrb[44].mxu0 %v1940_v43  ;;  %4060 = vmatprep.mubr.msk.bf16.mxu1 %vm5080_vm0, %v5079_v0  ;;  %v551_v43 = vor.u32 %v549_v12, %v547_v14  ;;  %v5053_v14 = vld [vmem:[%s6342_s1 + $0x1e8] sm:$0xff]  }
  0xb4   :  { %4356 = vmatprep.mubr.msk.bf16.mxu0 %vm5080_vm0, %v5079_v0 }
  0xb5   :  { %v556_v40 = vsel %vm472_vm3, %v551_v43, %v555_v47 }
  0xba   :  { %4061 = vmatmul.mubr.bf16.gmra.mrb[24].mxu1 %v532_v51  ;;  %v5049_v51 = vld [vmem:[%s6342_s1 + $0x1d8] sm:$0xff]  }
  0xbb   :  { %4357 = vmatmul.mubr.bf16.gmra.mrb[48].mxu0 %v1939_v35  ;;  %4064 = vmatprep.mubr.msk.bf16.mxu1 %vm5080_vm0, %v5079_v0  ;;  %v2237_v35 = vsel %vm1915_vm2, %v2234_v2, %v2236_v62  ;;  %v2239_v2 = vsel %vm1915_vm2, %v2236_v62, %v2238_v50 }
  0xbc   :  { %4376 = vmatprep.mubr.msk.bf16.mxu0 %vm5080_vm0, %v5079_v0 }
  0xc2   :  { %4065 = vmatmul.mubr.bf16.gmra.mrb[28].mxu1 %v540_v11  ;;  %v5051_v11 = vld [vmem:[%s6342_s1 + $0x1e0] sm:$0xff]  }
  0xc3   :  { %4377 = vmatmul.mubr.bf16.vlgmr.msra.gmra.mrb[0].mxu0 %v2235_v7  ;;  %4068 = vmatprep.mubr.msk.bf16.mxu1 %vm5080_vm0, %v5079_v0  ;;  %v559_v7 = vor.u32 %v557_v59, %v555_v47 }
  0xc4   :  { %4429 = vmatpush3.bf16.msra.mxu0 %v5043_v9  ;;  %4380 = vmatprep.mubr.msk.bf16.mxu0 %vm5080_vm0, %v5079_v0  ;;  %v563_v9 = vrot.slane %v561_v49, 1 }
  0xc5   :  { %4430 = vmatprep.subr.bf16.mxu0 %v5079_v0 }
  0xc6   :  { %v564_v62 = vsel %vm472_vm3, %v559_v7, %v563_v9  ;;  %v2244_v7 = vrot.slane %v5461_v1, 2 }
  0xc8   :  { %4431 = vmatpush3.bf16.msra.mxu0 %v5045_v25  ;;  %v565_v25 = vshrl.u32 %v5570_v42, 16 }
  0xc9   :  { %4432 = vmatprep.subr.bf16.mxu0 %v5079_v0 }
  0xca   :  { %4069 = vmatmul.mubr.bf16.gmra.mrb[32].mxu1 %v548_v32  ;;  %v569_v32 = vshll.u32 %v5346_v16, 16  ;;  %v567_v43 = vor.u32 %v565_v25, %v563_v9 }
  0xcb   :  { %4381 = vmatmul.mubr.bf16.gmra.mrb[4].mxu0 %v2237_v35  ;;  %4072 = vmatprep.mubr.msk.bf16.mxu1 %vm5080_vm0, %v5079_v0  ;;  %v2241_v35 = vsel %vm1915_vm2, %v2238_v50, %v2240_v4  ;;  %v2242_v50 = vrot.slane %v5449_v61, 2 }
  0xcc   :  { %4384 = vmatprep.mubr.msk.bf16.mxu0 %vm5080_vm0, %v5079_v0  ;;  %4433 = vmatpush3.bf16.msra.mxu0 %v5047_v18  ;;  %v5055_v18 = vld [vmem:[%s6342_s1 + $0x1f0] sm:$0xff]   ;;  %v571_v47 = vrot.slane %v569_v32, 1 }
  0xcd   :  { %4434 = vmatprep.subr.bf16.mxu0 %v5079_v0 }
  0xd0   :  { %4435 = vmatpush3.bf16.msra.mxu0 %v5049_v51  ;;  %v5057_v51 = vld [vmem:[%s6342_s1 + $0x1f8] sm:$0xff]  }
  0xd1   :  { %4436 = vmatprep.subr.bf16.mxu0 %v5079_v0 }
  0xd2   :  { %4073 = vmatmul.mubr.bf16.gmra.mrb[36].mxu1 %v556_v40  ;;  %v572_v40 = vsel %vm472_vm3, %v567_v43, %v571_v47 }
  0xd3   :  { %4385 = vmatmul.mubr.bf16.gmra.mrb[8].mxu0 %v2239_v2  ;;  %4076 = vmatprep.mubr.msk.bf16.mxu1 %vm5080_vm0, %v5079_v0  ;;  %v2243_v2 = vsel %vm1915_vm2, %v2240_v4, %v2242_v50  ;;  %v2245_v4 = vsel %vm1915_vm2, %v2242_v50, %v2244_v7  ;;  %v2248_v50 = vrot.slane %v5512_v24, 2 }
  0xd4   :  { %4388 = vmatprep.mubr.msk.bf16.mxu0 %vm5080_vm0, %v5079_v0  ;;  %4437 = vmatpush3.bf16.msra.mxu0 %v5051_v11  ;;  %v573_v11 = vshrl.u32 %v5346_v16, 16 }
  0xd5   :  { %4438 = vmatprep.subr.bf16.mxu0 %v5079_v0 }
  0xd6   :  { %v575_v9 = vor.u32 %v573_v11, %v571_v47  ;;  %v5052_v47 = vld [vmem:[%s6342_s1 + $0xc0] sm:$0xff]  }
  0xd8   :  { %4439 = vmatpush3.bf16.msra.mxu0 %v5053_v14  ;;  %v866_v14 = vrot.slane %v5232_v41, 1  ;;  %v869_v41 = vrot.slane %v5315_v6, 1 }
  0xd9   :  { %4440 = vmatprep.subr.bf16.mxu0 %v5079_v0 }
  0xda   :  { %4077 = vmatmul.mubr.bf16.gmra.mrb[40].mxu1 %v564_v62  ;;  %v867_v62 = vrot.slane %v5273_v55, 1 }
  0xdb   :  { %4389 = vmatmul.mubr.bf16.gmra.mrb[12].mxu0 %v2241_v35  ;;  %4080 = vmatprep.mubr.msk.bf16.mxu1 %vm5080_vm0, %v5079_v0  ;;  %v2246_v35 = vrot.slane %v5483_v8, 2 }
  0xdc   :  { %4392 = vmatprep.mubr.msk.bf16.mxu0 %vm5080_vm0, %v5079_v0  ;;  %4441 = vmatpush3.bf16.msra.mxu0 %v5055_v18  ;;  %v868_v18 = vsel %vm865_vm5, %v866_v14, %v867_v62  ;;  %v5058_v14 = vld [vmem:[%s6342_s1 + $0xd8] sm:$0xff]  }
  0xdd   :  { %4442 = vmatprep.subr.bf16.mxu0 %v5079_v0  ;;  %v2247_v43 = vsel %vm1915_vm2, %v2244_v7, %v2246_v35  ;;  %v5056_v7 = vld [vmem:[%s6342_s1 + $0xd0] sm:$0xff]  }
  0xe0   :  { %4443 = vmatpush3.bf16.msra.mxu0 %v5057_v51  ;;  %v5054_v51 = vld [vmem:[%s6342_s1 + $0xc8] sm:$0xff]  }
  0xe1   :  { %4496 = vmatprep.subr.bf16.mxu0 %v5079_v0 }
  0xe2   :  { %4081 = vmatmul.mubr.bf16.gmra.mrb[44].mxu1 %v572_v40  ;;  %v870_v40 = vsel %vm865_vm5, %v867_v62, %v869_v41 }
  0xe3   :  { %4393 = vmatmul.mubr.bf16.gmra.mrb[16].mxu0 %v2243_v2  ;;  %4084 = vmatprep.mubr.msk.bf16.mxu1 %vm5080_vm0, %v5079_v0  ;;  %v2249_v2 = vsel %vm1915_vm2, %v2246_v35, %v2248_v50 }
  0xe4   :  { %4396 = vmatprep.mubr.msk.bf16.mxu0 %vm5080_vm0, %v5079_v0 }
  0xea   :  { %4085 = vmatmul.mubr.bf16.gmra.mrb[48].mxu1 %v575_v9  ;;  %v871_v9 = vrot.slane %v5382_v30, 1 }
  0xeb   :  { %4397 = vmatmul.mubr.bf16.gmra.mrb[20].mxu0 %v2245_v4  ;;  %4104 = vmatprep.mubr.msk.bf16.mxu1 %vm5080_vm0, %v5079_v0  ;;  %v2250_v4 = vrot.slane %v5541_v34, 2 }
  0xec   :  { %4400 = vmatprep.mubr.msk.bf16.mxu0 %vm5080_vm0, %v5079_v0  ;;  %v872_v62 = vsel %vm865_vm5, %v869_v41, %v871_v9  ;;  %v5062_v41 = vld [vmem:[%s6342_s1 + $0xe8] sm:$0xff]  }
  0xed   :  { %v2251_v35 = vsel %vm1915_vm2, %v2248_v50, %v2250_v4 }
  0xf2   :  { %4105 = vmatmul.mubr.bf16.vlgmr.msra.gmra.mrb[0].mxu1 %v868_v18  ;;  %v5060_v18 = vld [vmem:[%s6342_s1 + $0xe0] sm:$0xff]  }
  0xf3   :  { %4401 = vmatmul.mubr.bf16.gmra.mrb[24].mxu0 %v2247_v43  ;;  %4108 = vmatprep.mubr.msk.bf16.mxu1 %vm5080_vm0, %v5079_v0  ;;  %v873_v43 = vrot.slane %v5420_v45, 1 }
  0xf4   :  { %4404 = vmatprep.mubr.msk.bf16.mxu0 %vm5080_vm0, %v5079_v0  ;;  %4157 = vmatpush3.bf16.msra.mxu1 %v5052_v47  ;;  %v2252_v47 = vrot.slane %v5570_v42, 2 }
  0xf5   :  { %4158 = vmatprep.subr.bf16.mxu1 %v5079_v0  ;;  %v874_v50 = vsel %vm865_vm5, %v871_v9, %v873_v43  ;;  %v5066_v9 = vld [vmem:[%s6342_s1 + $0xf8] sm:$0xff]  }
  0xf8   :  { %4159 = vmatpush3.bf16.msra.mxu1 %v5054_v51  ;;  %v2253_v51 = vsel %vm1915_vm2, %v2250_v4, %v2252_v47 }
  0xf9   :  { %4160 = vmatprep.subr.bf16.mxu1 %v5079_v0 }
  0xfa   :  { %4109 = vmatmul.mubr.bf16.gmra.mrb[4].mxu1 %v870_v40  ;;  %v5064_v40 = vld [vmem:[%s6342_s1 + $0xf0] sm:$0xff]  }
  0xfb   :  { %4405 = vmatmul.mubr.bf16.gmra.mrb[28].mxu0 %v2249_v2  ;;  %4112 = vmatprep.mubr.msk.bf16.mxu1 %vm5080_vm0, %v5079_v0  ;;  %v875_v2 = vrot.slane %v5437_v54, 1 }
  0xfc   :  { %4408 = vmatprep.mubr.msk.bf16.mxu0 %vm5080_vm0, %v5079_v0  ;;  %4161 = vmatpush3.bf16.msra.mxu1 %v5056_v7  ;;  %v2254_v7 = vrot.slane %v5346_v16, 2 }
  0xfd   :  { %4162 = vmatprep.subr.bf16.mxu1 %v5079_v0  ;;  %v876_v4 = vsel %vm865_vm5, %v873_v43, %v875_v2 }
 0x100   :  { %4163 = vmatpush3.bf16.msra.mxu1 %v5058_v14  ;;  %v2255_v14 = vsel %vm1915_vm2, %v2252_v47, %v2254_v7  ;;  %v879_v47 = vrot.slane %v5461_v1, 1 }
 0x101   :  { %4164 = vmatprep.subr.bf16.mxu1 %v5079_v0 }
 0x102   :  { %4113 = vmatmul.mubr.bf16.gmra.mrb[8].mxu1 %v872_v62  ;;  %v877_v62 = vrot.slane %v5449_v61, 1 }
 0x103   :  { %4409 = vmatmul.mubr.bf16.gmra.mrb[32].mxu0 %v2251_v35  ;;  %4116 = vmatprep.mubr.msk.bf16.mxu1 %vm5080_vm0, %v5079_v0  ;;  %v2256_v35 = vrot.slane %v5353_v20, 2 }
 0x104   :  { %4412 = vmatprep.mubr.msk.bf16.mxu0 %vm5080_vm0, %v5079_v0  ;;  %4165 = vmatpush3.bf16.msra.mxu1 %v5060_v18  ;;  %v878_v18 = vsel %vm865_vm5, %v875_v2, %v877_v62  ;;  %v2555_v2 = vrot.slane %v501_v38, 2  ;;  %v5061_v38 = vld [vmem:[%s6342_s1 + $0x208] sm:$0xff]  }
 0x105   :  { %4166 = vmatprep.subr.bf16.mxu1 %v5079_v0  ;;  %v2257_v43 = vsel %vm1915_vm2, %v2254_v7, %v2256_v35  ;;  %v2556_v7 = vrot.slane %v497_v23, 3 }
 0x108   :  { %4167 = vmatpush3.bf16.msra.mxu1 %v5062_v41  ;;  %v880_v41 = vsel %vm865_vm5, %v877_v62, %v879_v47  ;;  %v2560_v62 = vrot.slane %v505_v39, 3  ;;  %v5065_v39 = vld [vmem:[%s6342_s1 + $0x218] sm:$0xff]  }
 0x109   :  { %4168 = vmatprep.subr.bf16.mxu1 %v5079_v0 }
 0x10a   :  { %4117 = vmatmul.mubr.bf16.gmra.mrb[12].mxu1 %v874_v50  ;;  %v881_v50 = vrot.slane %v5483_v8, 1 }
 0x10b   :  { %4413 = vmatmul.mubr.bf16.gmra.mrb[36].mxu0 %v2253_v51  ;;  %4120 = vmatprep.mubr.msk.bf16.mxu1 %vm5080_vm0, %v5079_v0 }
 0x10c   :  { %4416 = vmatprep.mubr.msk.bf16.mxu0 %vm5080_vm0, %v5079_v0  ;;  %4169 = vmatpush3.bf16.msra.mxu1 %v5064_v40  ;;  %v882_v51 = vsel %vm865_vm5, %v879_v47, %v881_v50  ;;  %v5059_v40 = vld [vmem:[%s6342_s1 + $0x200] sm:$0xff]   ;;  %v2563_v47 = vrot.slane %v517_v63, 2 }
 0x10d   :  { %4170 = vmatprep.subr.bf16.mxu1 %v5079_v0 }
 0x110   :  { %4171 = vmatpush3.bf16.msra.mxu1 %v5066_v9  ;;  %v883_v9 = vrot.slane %v5512_v24, 1 }
 0x111   :  { %4564 = vmatprep.subr.bf16.mxu1 %v5079_v0 }
 0x112   :  { %4121 = vmatmul.mubr.bf16.gmra.mrb[16].mxu1 %v876_v4  ;;  %v2557_v4 = vor.u32 %v2556_v7, %v2555_v2  ;;  %v884_v23 = vsel %vm865_vm5, %v881_v50, %v883_v9  ;;  %v5067_v50 = vld [vmem:[%s6342_s1 + $0x220] sm:$0xff]   ;;  %v2567_v7 = vrot.slane %v525_v28, 2 }
 0x113   :  { %4417 = vmatmul.mubr.bf16.gmra.mrb[40].mxu0 %v2255_v14  ;;  %4124 = vmatprep.mubr.msk.bf16.mxu1 %vm5080_vm0, %v5079_v0  ;;  %v2559_v14 = vrot.slane %v509_v53, 2 }
 0x114   :  { %4420 = vmatprep.mubr.msk.bf16.mxu0 %vm5080_vm0, %v5079_v0 }
 0x115   :  { %v2561_v53 = vor.u32 %v2560_v62, %v2559_v14  ;;  %v2571_v14 = vrot.slane %v533_v29, 2  ;;  %v2572_v62 = vrot.slane %v529_v22, 3  ;;  %v2576_v29 = vrot.slane %v537_v36, 3 }
 0x116   :  { %v1195_v22 = vrot.slane %v5175_v17, 1  ;;  %v2579_v36 = vrot.slane %v549_v12, 2  ;;  %v1198_v17 = vrot.slane %v5205_v27, 1  ;;  %v2584_v27 = vrot.slane %v553_v13, 3  ;;  %v5073_v13 = vld [vmem:[%s6342_s1 + $0x110] sm:$0xff]  }
 0x11a   :  { %4125 = vmatmul.mubr.bf16.gmra.mrb[20].mxu1 %v878_v18 }
 0x11b   :  { %4421 = vmatmul.mubr.bf16.gmra.mrb[44].mxu0 %v2257_v43  ;;  %4128 = vmatprep.mubr.msk.bf16.mxu1 %vm5080_vm0, %v5079_v0  ;;  %v2562_v43 = vsel %vm2547_vm4, %v2557_v4, %v2561_v53 }
 0x11c   :  { %4424 = vmatprep.mubr.msk.bf16.mxu0 %vm5080_vm0, %v5079_v0 }
 0x122   :  { %4129 = vmatmul.mubr.bf16.gmra.mrb[24].mxu1 %v880_v41  ;;  %v2564_v41 = vrot.slane %v513_v57, 3  ;;  %v5068_v57 = vld [vmem:[%s6342_s1 + $0x228] sm:$0xff]  }
 0x123   :  { %4425 = vmatmul.mubr.bf16.gmra.mrb[48].mxu0 %v2256_v35  ;;  %4132 = vmatprep.mubr.msk.bf16.mxu1 %vm5080_vm0, %v5079_v0  ;;  %v5063_v35 = vld [vmem:[%s6342_s1 + $0x210] sm:$0xff]  }
 0x124   :  { %4444 = vmatprep.mubr.msk.bf16.mxu0 %vm5080_vm0, %v5079_v0  ;;  %v2565_v63 = vor.u32 %v2564_v41, %v2563_v47  ;;  %v2580_v47 = vrot.slane %v545_v5, 3  ;;  %v5071_v41 = vld [vmem:[%s6342_s1 + $0x100] sm:$0xff]  }
 0x126   :  { %v2566_v2 = vsel %vm2547_vm4, %v2561_v53, %v2565_v63  ;;  %v2575_v53 = vrot.slane %v541_v37, 2 }
 0x12a   :  { %4133 = vmatmul.mubr.bf16.gmra.mrb[28].mxu1 %v882_v51  ;;  %v887_v51 = vrot.slane %v5570_v42, 1 }
 0x12b   :  { %4445 = vmatmul.mubr.bf16.vlgmr.msra.gmra.mrb[0].mxu0 %v5709_v48  ;;  %4136 = vmatprep.mubr.msk.bf16.mxu1 %vm5080_vm0, %v5079_v0  ;;  %v2558_v48 = vsel %vm2547_vm4, %v5704_v33, %v2557_v4  ;;  %v885_v33 = vrot.slane %v5541_v34, 1  ;;  %v5069_v4 = vld [vmem:[%s6342_s1 + $0x230] sm:$0xff]  }
 0x12c   :  { %4497 = vmatpush3.bf16.msra.mxu0 %v5059_v40  ;;  %4448 = vmatprep.mubr.msk.bf16.mxu0 %vm5080_vm0, %v5079_v0 }
 0x12d   :  { %4498 = vmatprep.subr.bf16.mxu0 %v5079_v0  ;;  %v886_v18 = vsel %vm865_vm5, %v883_v9, %v885_v33  ;;  %v888_v40 = vsel %vm865_vm5, %v885_v33, %v887_v51  ;;  %v2568_v9 = vrot.slane %v521_v15, 3  ;;  %v5070_v15 = vld [vmem:[%s6342_s1 + $0x238] sm:$0xff]  }
 0x12f   :  { %v2569_v28 = vor.u32 %v2568_v9, %v2567_v7  ;;  %v5074_v7 = vld [vmem:[%s6342_s1 + $0x118] sm:$0xff]   ;;  %v1202_v9 = vrot.slane %v5278_v56, 1  ;;  %v2592_v56 = vrot.slane %v569_v32, 3  ;;  %v2596_v32 = vshrl.u32 %v5353_v20, 16 }
 0x130   :  { %4499 = vmatpush3.bf16.msra.mxu0 %v5061_v38  ;;  %v889_v38 = vrot.slane %v5346_v16, 1 }
 0x131   :  { %4500 = vmatprep.subr.bf16.mxu0 %v5079_v0 }
 0x132   :  { %4137 = vmatmul.mubr.bf16.gmra.mrb[32].mxu1 %v884_v23  ;;  %v890_v23 = vsel %vm865_vm5, %v887_v51, %v889_v38  ;;  %v5072_v51 = vld [vmem:[%s6342_s1 + $0x108] sm:$0xff]  }
 0x133   :  { %4449 = vmatmul.mubr.bf16.gmra.mrb[4].mxu0 %v2558_v48  ;;  %4140 = vmatprep.mubr.msk.bf16.mxu1 %vm5080_vm0, %v5079_v0  ;;  %v2570_v48 = vsel %vm2547_vm4, %v2565_v63, %v2569_v28  ;;  %v1200_v63 = vrot.slane %v5241_v46, 1  ;;  %v2588_v46 = vrot.slane %v561_v49, 3  ;;  %v5075_v49 = vld [vmem:[%s6342_s1 + $0x120] sm:$0xff]  }
 0x134   :  { %4452 = vmatprep.mubr.msk.bf16.mxu0 %vm5080_vm0, %v5079_v0  ;;  %4501 = vmatpush3.bf16.msra.mxu0 %v5063_v35  ;;  %v2573_v35 = vor.u32 %v2572_v62, %v2571_v14  ;;  %v5077_v14 = vld [vmem:[%s6342_s1 + $0x130] sm:$0xff]  }
 0x135   :  { %4502 = vmatprep.subr.bf16.mxu0 %v5079_v0 }
 0x136   :  { %v2574_v33 = vsel %vm2547_vm4, %v2569_v28, %v2573_v35 }
 0x138   :  { %4503 = vmatpush3.bf16.msra.mxu0 %v5065_v39  ;;  %v1196_v39 = vrot.slane %v5184_v19, 1  ;;  %v2581_v19 = vor.u32 %v2580_v47, %v2579_v36  ;;  %v2894_v36 = vrot.slane %v5273_v55, 3  ;;  %v2895_v47 = vrot.slane %v5315_v6, 3 }
 0x139   :  { %4504 = vmatprep.subr.bf16.mxu0 %v5079_v0 }
 0x13a   :  { %4141 = vmatmul.mubr.bf16.gmra.mrb[36].mxu1 %v886_v18  ;;  %v2577_v18 = vor.u32 %v2576_v29, %v2575_v53  ;;  %v1199_v5 = vsel %vm865_vm5, %v1196_v39, %v1198_v17  ;;  %v5078_v53 = vld [vmem:[%s6342_s1 + $0x138] sm:$0xff]   ;;  %v1206_v29 = vrot.slane %v5387_v31, 1 }
 0x13b   :  { %4453 = vmatmul.mubr.bf16.gmra.mrb[8].mxu0 %v2562_v43  ;;  %4144 = vmatprep.mubr.msk.bf16.mxu1 %vm5080_vm0, %v5079_v0  ;;  %v1197_v43 = vsel %vm865_vm5, %v1195_v22, %v1196_v39 }
 0x13c   :  { %4456 = vmatprep.mubr.msk.bf16.mxu0 %vm5080_vm0, %v5079_v0  ;;  %4505 = vmatpush3.bf16.msra.mxu0 %v5067_v50  ;;  %v2578_v37 = vsel %vm2547_vm4, %v2573_v35, %v2577_v18  ;;  %v2582_v12 = vsel %vm2547_vm4, %v2577_v18, %v2581_v19  ;;  %v2583_v50 = vrot.slane %v557_v59, 2 }
 0x13d   :  { %4506 = vmatprep.subr.bf16.mxu0 %v5079_v0 }
 0x13e   :  { %v2585_v59 = vor.u32 %v2584_v27, %v2583_v50  ;;  %v1216_v27 = vrot.slane %v5670_v58, 1 }
 0x140   :  { %4507 = vmatpush3.bf16.msra.mxu0 %v5068_v57  ;;  %v1201_v57 = vsel %vm865_vm5, %v1198_v17, %v1200_v63  ;;  %v2896_v17 = vsel %vm2893_vm6, %v2894_v36, %v2895_v47 }
 0x141   :  { %4508 = vmatprep.subr.bf16.mxu0 %v5079_v0 }
 0x142   :  { %4145 = vmatmul.mubr.bf16.gmra.mrb[40].mxu1 %v888_v40  ;;  %v2586_v40 = vsel %vm2547_vm4, %v2581_v19, %v2585_v59  ;;  %v1212_v19 = vrot.slane %v5623_v26, 1 }
 0x143   :  { %4457 = vmatmul.mubr.bf16.gmra.mrb[12].mxu0 %v2566_v2  ;;  %4148 = vmatprep.mubr.msk.bf16.mxu1 %vm5080_vm0, %v5079_v0  ;;  %v2587_v2 = vrot.slane %v565_v25, 2 }
 0x144   :  { %4460 = vmatprep.mubr.msk.bf16.mxu0 %vm5080_vm0, %v5079_v0  ;;  %4509 = vmatpush3.bf16.msra.mxu0 %v5069_v4  ;;  %v1203_v4 = vsel %vm865_vm5, %v1200_v63, %v1202_v9 }
 0x145   :  { %4510 = vmatprep.subr.bf16.mxu0 %v5079_v0  ;;  %v2589_v25 = vor.u32 %v2588_v46, %v2587_v2  ;;  %v1585_v2 = vshll.u32 %v5599_v3, 16  ;;  %v2905_v46 = vrot.slane %v5461_v1, 3 }
 0x147   :  { %v2590_v28 = vsel %vm2547_vm4, %v2585_v59, %v2589_v25  ;;  %v1218_v59 = vrot.slane %v5701_v21, 1 }
 0x148   :  { %4511 = vmatpush3.bf16.msra.mxu0 %v5070_v15  ;;  %v5076_v15 = vld [vmem:[%s6342_s1 + $0x128] sm:$0xff]  }
 0x14a   :  { %4149 = vmatmul.mubr.bf16.gmra.mrb[44].mxu1 %v890_v23  ;;  %v1204_v23 = vrot.slane %v5323_v10, 1  ;;  %v2598_v10 = vrot.slane %v2596_v32, 2 }
 0x14b   :  { %4461 = vmatmul.mubr.bf16.gmra.mrb[16].mxu0 %v2570_v48  ;;  %4152 = vmatprep.mubr.msk.bf16.mxu1 %vm5080_vm0, %v5079_v0  ;;  %v2599_v48 = vshll.u32 %v5353_v20, 16 }
 0x14c   :  { %4464 = vmatprep.mubr.msk.bf16.mxu0 %vm5080_vm0, %v5079_v0  ;;  %v1205_v62 = vsel %vm865_vm5, %v1202_v9, %v1204_v23  ;;  %v1207_v39 = vsel %vm865_vm5, %v1204_v23, %v1206_v29  ;;  %v1603_v23 = vshll.u32 %v5646_v44, 16 }
 0x14e   :  { %v1605_v32 = vrot.slane %v1603_v23, 2 }
 0x152   :  { %4153 = vmatmul.mubr.bf16.gmra.mrb[48].mxu1 %v889_v38  ;;  %v2591_v38 = vrot.slane %v573_v11, 2 }
 0x153   :  { %4465 = vmatmul.mubr.bf16.gmra.mrb[20].mxu0 %v2574_v33  ;;  %4172 = vmatprep.mubr.msk.bf16.mxu1 %vm5080_vm0, %v5079_v0  ;;  %v2601_v33 = vrot.slane %v2599_v48, 3 }
 0x154   :  { %4468 = vmatprep.mubr.msk.bf16.mxu0 %vm5080_vm0, %v5079_v0  ;;  %v2593_v11 = vor.u32 %v2592_v56, %v2591_v38 }
 0x155   :  { %v2602_v22 = vor.u32 %v2601_v33, %v2598_v10 }
 0x156   :  { %v2594_v35 = vsel %vm2547_vm4, %v2589_v25, %v2593_v11 }
 0x157   :  { %v2603_v18 = vsel %vm2547_vm4, %v2593_v11, %v2602_v22 }
 0x15a   :  { %4173 = vmatmul.mubr.bf16.vlgmr.msra.gmra.mrb[0].mxu1 %v1197_v43  ;;  %v1208_v43 = vrot.slane %v5424_v52, 1 }
 0x15b   :  { %4469 = vmatmul.mubr.bf16.gmra.mrb[24].mxu0 %v2578_v37  ;;  %4176 = vmatprep.mubr.msk.bf16.mxu1 %vm5080_vm0, %v5079_v0  ;;  %v1210_v37 = vrot.slane %v5599_v3, 1 }
 0x15c   :  { %4472 = vmatprep.mubr.msk.bf16.mxu0 %vm5080_vm0, %v5079_v0  ;;  %4572 = vmatpush3.bf16.msra.mxu1 %v5071_v41  ;;  %v1209_v31 = vsel %vm865_vm5, %v1206_v29, %v1208_v43  ;;  %v2897_v41 = vrot.slane %v5382_v30, 3 }
 0x15d   :  { %4565 = vmatprep.subr.bf16.mxu1 %v5079_v0  ;;  %v1211_v52 = vsel %vm865_vm5, %v1208_v43, %v1210_v37  ;;  %v1213_v55 = vsel %vm865_vm5, %v1210_v37, %v1212_v19 }
 0x15e   :  { %v2898_v6 = vsel %vm2893_vm6, %v2895_v47, %v2897_v41  ;;  %v2917_v47 = vrot.slane %v5353_v20, 3 }
 0x160   :  { %4573 = vmatpush3.bf16.msra.mxu1 %v5072_v51  ;;  %v2901_v51 = vrot.slane %v5437_v54, 3 }
 0x161   :  { %4566 = vmatprep.subr.bf16.mxu1 %v5079_v0 }
 0x162   :  { %4177 = vmatmul.mubr.bf16.gmra.mrb[4].mxu1 %v1199_v5  ;;  %v1214_v5 = vrot.slane %v5646_v44, 1 }
 0x163   :  { %4473 = vmatmul.mubr.bf16.gmra.mrb[28].mxu0 %v2582_v12  ;;  %4180 = vmatprep.mubr.msk.bf16.mxu1 %vm5080_vm0, %v5079_v0  ;;  %v2899_v12 = vrot.slane %v5420_v45, 3 }
 0x164   :  { %4476 = vmatprep.mubr.msk.bf16.mxu0 %vm5080_vm0, %v5079_v0  ;;  %4574 = vmatpush3.bf16.msra.mxu1 %v5073_v13  ;;  %v1215_v50 = vsel %vm865_vm5, %v1212_v19, %v1214_v5  ;;  %v1217_v63 = vsel %vm865_vm5, %v1214_v5, %v1216_v27  ;;  %v2903_v13 = vrot.slane %v5449_v61, 3  ;;  %v1587_v61 = vrot.slane %v1585_v2, 2 }
 0x165   :  { %4567 = vmatprep.subr.bf16.mxu1 %v5079_v0  ;;  %v2900_v30 = vsel %vm2893_vm6, %v2897_v41, %v2899_v12  ;;  %v2902_v45 = vsel %vm2893_vm6, %v2899_v12, %v2901_v51 }
 0x166   :  { %v2904_v54 = vsel %vm2893_vm6, %v2901_v51, %v2903_v13  ;;  %v2906_v9 = vsel %vm2893_vm6, %v2903_v13, %v2905_v46 }
 0x168   :  { %4575 = vmatpush3.bf16.msra.mxu1 %v5074_v7 }
 0x169   :  { %4568 = vmatprep.subr.bf16.mxu1 %v5079_v0 }
 0x16a   :  { %4181 = vmatmul.mubr.bf16.gmra.mrb[8].mxu1 %v1201_v57  ;;  %v1219_v57 = vsel %vm865_vm5, %v1216_v27, %v1218_v59 }
 0x16b   :  { %4477 = vmatmul.mubr.bf16.gmra.mrb[32].mxu0 %v2586_v40  ;;  %4184 = vmatprep.mubr.msk.bf16.mxu1 %vm5080_vm0, %v5079_v0  ;;  %v1582_v40 = vshrl.u32 %v5599_v3, 16  ;;  %v2907_v3 = vrot.slane %v5483_v8, 3  ;;  %v2909_v8 = vrot.slane %v5512_v24, 3  ;;  %v2911_v24 = vrot.slane %v5541_v34, 3 }
 0x16c   :  { %4480 = vmatprep.mubr.msk.bf16.mxu0 %vm5080_vm0, %v5079_v0  ;;  %4576 = vmatpush3.bf16.msra.mxu1 %v5075_v49  ;;  %v1591_v49 = vshrl.u32 %v5623_v26, 16  ;;  %v2913_v34 = vrot.slane %v5570_v42, 3 }
 0x16d   :  { %4569 = vmatprep.subr.bf16.mxu1 %v5079_v0  ;;  %v1584_v7 = vrot.slane %v1582_v40, 1  ;;  %v2908_v56 = vsel %vm2893_vm6, %v2905_v46, %v2907_v3  ;;  %v2910_v48 = vsel %vm2893_vm6, %v2907_v3, %v2909_v8  ;;  %v6239_v3 = vld [vmem:[%s6344_s2] ss:$0 sm:$0xff] }
 0x16e   :  { %v1593_v38 = vrot.slane %v1591_v49, 1 }
 0x16f   :  { %v1588_v25 = vor.u32 %v1587_v61, %v1584_v7 }
 0x170   :  { %4577 = vmatpush3.bf16.msra.mxu1 %v5076_v15 }
 0x171   :  { %4570 = vmatprep.subr.bf16.mxu1 %v5079_v0  ;;  %v1589_v1 = vsel %vm1509_vm1, %v5445_v60, %v1588_v25 }
 0x172   :  { %4185 = vmatmul.mubr.bf16.gmra.mrb[12].mxu1 %v1203_v4  ;;  %v1594_v4 = vshll.u32 %v5623_v26, 16  ;;  %v1600_v26 = vshrl.u32 %v5646_v44, 16  ;;  %v1612_v44 = vshll.u32 %v5670_v58, 16 }
 0x173   :  { %4481 = vmatmul.mubr.bf16.gmra.mrb[36].mxu0 %v2590_v28  ;;  %4188 = vmatprep.mubr.msk.bf16.mxu1 %vm5080_vm0, %v5079_v0 }
 0x174   :  { %4484 = vmatprep.mubr.msk.bf16.mxu0 %vm5080_vm0, %v5079_v0  ;;  %4578 = vmatpush3.bf16.msra.mxu1 %v5077_v14  ;;  %v1596_v28 = vrot.slane %v1594_v4, 2  ;;  %v1602_v11 = vrot.slane %v1600_v26, 1  ;;  %v1614_v33 = vrot.slane %v1612_v44, 2 }
 0x175   :  { %4571 = vmatprep.subr.bf16.mxu1 %v5079_v0 }
 0x176   :  { %v1597_v15 = vor.u32 %v1596_v28, %v1593_v38  ;;  %v1606_v14 = vor.u32 %v1605_v32, %v1602_v11  ;;  %v6244_v28 = vld [vmem:[%s6345_s3] ss:$0 sm:$0xff] }
 0x178   :  { %4579 = vmatpush3.bf16.msra.mxu1 %v5078_v53  ;;  %v1598_v60 = vsel %vm1509_vm1, %v1588_v25, %v1597_v15  ;;  %v2912_v53 = vsel %vm2893_vm6, %v2909_v8, %v2911_v24 }
 0x17a   :  { %4189 = vmatmul.mubr.bf16.gmra.mrb[16].mxu1 %v1205_v62  ;;  %v1609_v62 = vshrl.u32 %v5670_v58, 16  ;;  %v1621_v58 = vshll.u32 %v5701_v21, 16 }
 0x17b   :  { %4485 = vmatmul.mubr.bf16.gmra.mrb[40].mxu0 %v2594_v35  ;;  %4192 = vmatprep.mubr.msk.bf16.mxu1 %vm5080_vm0, %v5079_v0  ;;  %v1607_v35 = vsel %vm1509_vm1, %v1597_v15, %v1606_v14 }
 0x17c   :  { %4488 = vmatprep.mubr.msk.bf16.mxu0 %vm5080_vm0, %v5079_v0  ;;  %v1611_v10 = vrot.slane %v1609_v62, 1  ;;  %v1623_v43 = vrot.slane %v1621_v58, 2 }
 0x17e   :  { %v1615_v29 = vor.u32 %v1614_v33, %v1611_v10 }
 0x182   :  { %4193 = vmatmul.mubr.bf16.gmra.mrb[20].mxu1 %v1207_v39  ;;  %v1616_v39 = vsel %vm1509_vm1, %v1606_v14, %v1615_v29 }
 0x183   :  { %4489 = vmatmul.mubr.bf16.gmra.mrb[44].mxu0 %v2603_v18  ;;  %4196 = vmatprep.mubr.msk.bf16.mxu1 %vm5080_vm0, %v5079_v0 }
 0x184   :  { %4492 = vmatprep.mubr.msk.bf16.mxu0 %vm5080_vm0, %v5079_v0 }
 0x18a   :  { %4197 = vmatmul.mubr.bf16.gmra.mrb[24].mxu1 %v1209_v31  ;;  %v2914_v31 = vsel %vm2893_vm6, %v2911_v24, %v2913_v34 }
 0x18b   :  { %4493 = vmatmul.mubr.bf16.gmra.mrb[48].mxu0 %v2602_v22  ;;  %4200 = vmatprep.mubr.msk.bf16.mxu1 %vm5080_vm0, %v5079_v0  ;;  %v1618_v22 = vshrl.u32 %v5701_v21, 16  ;;  %v2915_v21 = vrot.slane %v5346_v16, 3 }
 0x18c   :  { %4512 = vmatprep.mubr.msk.bf16.mxu0 %vm5080_vm0, %v5079_v0 }
 0x18d   :  { %v1620_v18 = vrot.slane %v1618_v22, 1  ;;  %v2916_v42 = vsel %vm2893_vm6, %v2913_v34, %v2915_v21 }
 0x18f   :  { %v1624_v37 = vor.u32 %v1623_v43, %v1620_v18 }
 0x191   :  { %v1625_v36 = vsel %vm1509_vm1, %v1615_v29, %v1624_v37 }
 0x192   :  { %4201 = vmatmul.mubr.bf16.gmra.mrb[28].mxu1 %v1211_v52  ;;  %v2918_v52 = vsel %vm2893_vm6, %v2915_v21, %v2917_v47 }
 0x193   :  { %4513 = vmatmul.mubr.bf16.vlgmr.msra.gmra.mrb[0].mxu0 %v2896_v17  ;;  %4204 = vmatprep.mubr.msk.bf16.mxu1 %vm5080_vm0, %v5079_v0 }
 0x194   :  { %4516 = vmatprep.mubr.msk.bf16.mxu0 %vm5080_vm0, %v5079_v0 }
 0x19a   :  { %4205 = vmatmul.mubr.bf16.gmra.mrb[32].mxu1 %v1213_v55 }
 0x19b   :  { %4517 = vmatmul.mubr.bf16.gmra.mrb[4].mxu0 %v2898_v6  ;;  %4208 = vmatprep.mubr.msk.bf16.mxu1 %vm5080_vm0, %v5079_v0 }
 0x19c   :  { %4520 = vmatprep.mubr.msk.bf16.mxu0 %vm5080_vm0, %v5079_v0 }
 0x1a2   :  { %4209 = vmatmul.mubr.bf16.gmra.mrb[36].mxu1 %v1215_v50 }
 0x1a3   :  { %4521 = vmatmul.mubr.bf16.gmra.mrb[8].mxu0 %v2900_v30  ;;  %4212 = vmatprep.mubr.msk.bf16.mxu1 %vm5080_vm0, %v5079_v0 }
 0x1a4   :  { %4524 = vmatprep.mubr.msk.bf16.mxu0 %vm5080_vm0, %v5079_v0 }
 0x1aa   :  { %4213 = vmatmul.mubr.bf16.gmra.mrb[40].mxu1 %v1217_v63 }
 0x1ab   :  { %4525 = vmatmul.mubr.bf16.gmra.mrb[12].mxu0 %v2902_v45  ;;  %4216 = vmatprep.mubr.msk.bf16.mxu1 %vm5080_vm0, %v5079_v0 }
 0x1ac   :  { %4528 = vmatprep.mubr.msk.bf16.mxu0 %vm5080_vm0, %v5079_v0 }
 0x1b2   :  { %4217 = vmatmul.mubr.bf16.gmra.mrb[44].mxu1 %v1219_v57 }
 0x1b3   :  { %4529 = vmatmul.mubr.bf16.gmra.mrb[16].mxu0 %v2904_v54  ;;  %4220 = vmatprep.mubr.msk.bf16.mxu1 %vm5080_vm0, %v5079_v0 }
 0x1b4   :  { %4532 = vmatprep.mubr.msk.bf16.mxu0 %vm5080_vm0, %v5079_v0 }
 0x1ba   :  { %4221 = vmatmul.mubr.bf16.gmra.mrb[48].mxu1 %v1218_v59 }
 0x1bb   :  { %4533 = vmatmul.mubr.bf16.gmra.mrb[20].mxu0 %v2906_v9  ;;  %4268 = vmatprep.mubr.msk.bf16.mxu1 %vm5080_vm0, %v5079_v0 }
 0x1bc   :  { %4536 = vmatprep.mubr.msk.bf16.mxu0 %vm5080_vm0, %v5079_v0 }
 0x1c2   :  { %4269 = vmatmul.mubr.bf16.vlgmr.msra.gmra.mrb[28].mxu1 %v1589_v1 }
 0x1c3   :  { %4537 = vmatmul.mubr.bf16.gmra.mrb[24].mxu0 %v2908_v56  ;;  %4272 = vmatprep.mubr.msk.bf16.mxu1 %vm5080_vm0, %v5079_v0 }
 0x1c4   :  { %4540 = vmatprep.mubr.msk.bf16.mxu0 %vm5080_vm0, %v5079_v0 }
 0x1ca   :  { %4273 = vmatmul.mubr.bf16.gmra.mrb[32].mxu1 %v1598_v60 }
 0x1cb   :  { %4541 = vmatmul.mubr.bf16.gmra.mrb[28].mxu0 %v2910_v48  ;;  %4276 = vmatprep.mubr.msk.bf16.mxu1 %vm5080_vm0, %v5079_v0 }
 0x1cc   :  { %4544 = vmatprep.mubr.msk.bf16.mxu0 %vm5080_vm0, %v5079_v0 }
 0x1d2   :  { %4277 = vmatmul.mubr.bf16.gmra.mrb[36].mxu1 %v1607_v35 }
 0x1d3   :  { %4545 = vmatmul.mubr.bf16.gmra.mrb[32].mxu0 %v2912_v53  ;;  %4280 = vmatprep.mubr.msk.bf16.mxu1 %vm5080_vm0, %v5079_v0 }
 0x1d4   :  { %4548 = vmatprep.mubr.msk.bf16.mxu0 %vm5080_vm0, %v5079_v0 }
 0x1da   :  { %4281 = vmatmul.mubr.bf16.gmra.mrb[40].mxu1 %v1616_v39 }
 0x1db   :  { %4549 = vmatmul.mubr.bf16.gmra.mrb[36].mxu0 %v2914_v31  ;;  %4284 = vmatprep.mubr.msk.bf16.mxu1 %vm5080_vm0, %v5079_v0 }
 0x1dc   :  { %4552 = vmatprep.mubr.msk.bf16.mxu0 %vm5080_vm0, %v5079_v0 }
 0x1e2   :  { %4285 = vmatmul.mubr.bf16.gmra.mrb[44].mxu1 %v1625_v36 }
 0x1e3   :  { %4553 = vmatmul.mubr.bf16.gmra.mrb[40].mxu0 %v2916_v42  ;;  %4288 = vmatprep.mubr.msk.bf16.mxu1 %vm5080_vm0, %v5079_v0 }
 0x1e4   :  { %4556 = vmatprep.mubr.msk.bf16.mxu0 %vm5080_vm0, %v5079_v0 }
 0x1ea   :  { %4289 = vmatmul.mubr.bf16.gmra.mrb[48].mxu1 %v1624_v37 }
 0x1eb   :  { %4557 = vmatmul.mubr.bf16.gmra.mrb[44].mxu0 %v2918_v52 }
 0x1ec   :  { %4560 = vmatprep.mubr.msk.bf16.mxu0 %vm5080_vm0, %v5079_v0 }
 0x1f3   :  { %4561 = vmatmul.mubr.bf16.gmra.mrb[48].mxu0 %v2917_v47 }
 0x22d   :  { %v1315_v16 = vpop.f32.mrb[0].mxu1 }
 0x22e   :  { %v4174_v17 = vpop.f32.mrb[1].mxu1 }
 0x22f   :  { %v1318_v19 = vpop.f32.mrb[2].mxu1 }
 0x230   :  { %v4175_v41 = vpop.f32.mrb[3].mxu1 }
 0x235   :  { %v1323_v55 = vpop.f32.mrb[4].mxu1 }
 0x236   :  { %v4178_v6 = vpop.f32.mrb[5].mxu1 }
 0x237   :  { %v1326_v5 = vpop.f32.mrb[6].mxu1 }
 0x238   :  { %v4179_v12 = vpop.f32.mrb[7].mxu1 }
 0x23d   :  { %v1331_v50 = vpop.f32.mrb[8].mxu1 }
 0x23e   :  { %v4182_v30 = vpop.f32.mrb[9].mxu1 }
 0x23f   :  { %v1334_v27 = vpop.f32.mrb[10].mxu1 }
 0x240   :  { %v4183_v20 = vpop.f32.mrb[11].mxu1 }
 0x245   :  { %v1339_v51 = vpop.f32.mrb[12].mxu1 }
 0x246   :  { %v4186_v63 = vpop.f32.mrb[13].mxu1 }
 0x247   :  { %v6222_v45 = vpop.f32.mrb[14].mxu1 }
 0x248   :  { %v4187_v59 = vpop.f32.mrb[15].mxu1 }
 0x24d   :  { %v6224_v13 = vpop.f32.mrb[16].mxu1 }
 0x24e   :  { %v4190_v0 = vpop.f32.mrb[17].mxu1 }
 0x24f   :  { %v6226_v57 = vpop.f32.mrb[18].mxu1 }
 0x250   :  { %v4191_v54 = vpop.f32.mrb[19].mxu1 }
 0x255   :  { %v6228_v40 = vpop.f32.mrb[20].mxu1 }
 0x256   :  { %v4194_v2 = vpop.f32.mrb[21].mxu1 }
 0x257   :  { %v6230_v46 = vpop.f32.mrb[22].mxu1 }
 0x258   :  { %v4195_v7 = vpop.f32.mrb[23].mxu1 }
 0x25d   :  { %v6232_v61 = vpop.f32.mrb[24].mxu1 }
 0x25e   :  { %v4198_v9 = vpop.f32.mrb[25].mxu1 }
 0x25f   :  { %v6234_v25 = vpop.f32.mrb[26].mxu1 }
 0x260   :  { %v4199_v49 = vpop.f32.mrb[27].mxu1 }
 0x266   :  { %v3014_v4 = vpop.f32.mrb[0].mxu0 }
 0x267   :  { %v4580_v1 = vadd.f32 %v3014_v4, %v1315_v16  ;;  %v4514_v38 = vpop.f32.mrb[1].mxu0 }
 0x268   :  { %v3017_v56 = vpop.f32.mrb[2].mxu0 }
 0x269   :  { %v3198_v15 = vmul.f32 %v4580_v1, %v6239_v3  ;;  %v4581_v26 = vadd.f32 %v3017_v56, %v1318_v19  ;;  %v4515_v23 = vpop.f32.mrb[3].mxu0 }
 0x26b   :  { %v3230_v8 = vadd.f32 %v6244_v28, %v3198_v15  ;;  %v3199_v60 = vmul.f32 %v4581_v26, %v6239_v3 }
 0x26d   :  { %v3231_v11 = vadd.f32 %v6244_v28, %v3199_v60  ;;  %v3255_v48 = vmax.f32 %v3230_v8, 0.0 }
 0x26e   :  { %v3022_v32 = vpop.f32.mrb[4].mxu0 }
 0x26f   :  { %v3256_v14 = vmax.f32 %v3231_v11, 0.0  ;;  %v4582_v62 = vadd.f32 %v3022_v32, %v1323_v55  ;;  %v4518_v44 = vpop.f32.mrb[5].mxu0 }
 0x270   :  { %v3025_v24 = vpop.f32.mrb[6].mxu0 }
 0x271   :  { %v3695_v35 = vpack.c.bf16 %v3256_v14, %v3255_v48  ;;  %v3200_v10 = vmul.f32 %v4582_v62, %v6239_v3  ;;  %v4583_v33 = vadd.f32 %v3025_v24, %v1326_v5  ;;  %v4519_v53 = vpop.f32.mrb[7].mxu0 }
 0x273   :  { %3696 = vst [vmem:[%s6346_s4] sm:$0xff] %v3695_v35   ;;  %v3232_v29 = vadd.f32 %v6244_v28, %v3200_v10  ;;  %v3201_v22 = vmul.f32 %v4583_v33, %v6239_v3 }
 0x275   :  { %v3233_v58 = vadd.f32 %v6244_v28, %v3201_v22  ;;  %v3257_v39 = vmax.f32 %v3232_v29, 0.0 }
 0x276   :  { %v3030_v34 = vpop.f32.mrb[8].mxu0 }
 0x277   :  { %v3258_v18 = vmax.f32 %v3233_v58, 0.0  ;;  %v4584_v43 = vadd.f32 %v3030_v34, %v1331_v50  ;;  %v4522_v31 = vpop.f32.mrb[9].mxu0 }
 0x278   :  { %v3033_v37 = vpop.f32.mrb[10].mxu0 }
 0x279   :  { %v3700_v21 = vpack.c.bf16 %v3258_v18, %v3257_v39  ;;  %v3202_v36 = vmul.f32 %v4584_v43, %v6239_v3  ;;  %v4585_v42 = vadd.f32 %v3033_v37, %v1334_v27  ;;  %v4523_v47 = vpop.f32.mrb[11].mxu0 }
 0x27b   :  { %3752 = vst [vmem:[%s6346_s4 + $0x8] sm:$0xff] %v3700_v21   ;;  %v3234_v52 = vadd.f32 %v6244_v28, %v3202_v36  ;;  %v3203_v16 = vmul.f32 %v4585_v42, %v6239_v3 }
 0x27d   :  { %v3235_v17 = vadd.f32 %v6244_v28, %v3203_v16  ;;  %v3259_v41 = vmax.f32 %v3234_v52, 0.0 }
 0x27e   :  { %v3038_v19 = vpop.f32.mrb[12].mxu0 }
 0x27f   :  { %v3260_v55 = vmax.f32 %v3235_v17, 0.0  ;;  %v4586_v6 = vadd.f32 %v3038_v19, %v1339_v51  ;;  %v4526_v5 = vpop.f32.mrb[13].mxu0 }
 0x280   :  { %v3041_v12 = vpop.f32.mrb[14].mxu0 }
 0x281   :  { %v3705_v50 = vpack.c.bf16 %v3260_v55, %v3259_v41  ;;  %v3204_v30 = vmul.f32 %v4586_v6, %v6239_v3  ;;  %v4587_v27 = vadd.f32 %v3041_v12, %v6222_v45  ;;  %v4527_v20 = vpop.f32.mrb[15].mxu0 }
 0x283   :  { %3753 = vst [vmem:[%s6346_s4 + $0x10] sm:$0xff] %v3705_v50   ;;  %v3236_v63 = vadd.f32 %v6244_v28, %v3204_v30  ;;  %v3205_v59 = vmul.f32 %v4587_v27, %v6239_v3 }
 0x285   :  { %v3237_v0 = vadd.f32 %v6244_v28, %v3205_v59  ;;  %v3261_v51 = vmax.f32 %v3236_v63, 0.0 }
 0x286   :  { %v3046_v54 = vpop.f32.mrb[16].mxu0 }
 0x287   :  { %v3262_v2 = vmax.f32 %v3237_v0, 0.0  ;;  %v4588_v7 = vadd.f32 %v3046_v54, %v6224_v13  ;;  %v4530_v9 = vpop.f32.mrb[17].mxu0 }
 0x288   :  { %v3049_v49 = vpop.f32.mrb[18].mxu0 }
 0x289   :  { %v3710_v4 = vpack.c.bf16 %v3262_v2, %v3261_v51  ;;  %v3206_v45 = vmul.f32 %v4588_v7, %v6239_v3  ;;  %v4589_v1 = vadd.f32 %v3049_v49, %v6226_v57  ;;  %v4531_v38 = vpop.f32.mrb[19].mxu0 }
 0x28b   :  { %3754 = vst [vmem:[%s6346_s4 + $0x18] sm:$0xff] %v3710_v4   ;;  %v3238_v56 = vadd.f32 %v6244_v28, %v3206_v45  ;;  %v3207_v15 = vmul.f32 %v4589_v1, %v6239_v3 }
 0x28d   :  { %v3239_v26 = vadd.f32 %v6244_v28, %v3207_v15  ;;  %v3263_v13 = vmax.f32 %v3238_v56, 0.0 }
 0x28e   :  { %v3054_v23 = vpop.f32.mrb[20].mxu0 }
 0x28f   :  { %v3264_v8 = vmax.f32 %v3239_v26, 0.0  ;;  %v4590_v60 = vadd.f32 %v3054_v23, %v6228_v40  ;;  %v4534_v11 = vpop.f32.mrb[21].mxu0 }
 0x290   :  { %v3057_v32 = vpop.f32.mrb[22].mxu0 }
 0x291   :  { %v3715_v48 = vpack.c.bf16 %v3264_v8, %v3263_v13  ;;  %v3208_v57 = vmul.f32 %v4590_v60, %v6239_v3  ;;  %v4591_v14 = vadd.f32 %v3057_v32, %v6230_v46  ;;  %v4535_v62 = vpop.f32.mrb[23].mxu0 }
 0x293   :  { %3755 = vst [vmem:[%s6346_s4 + $0x20] sm:$0xff] %v3715_v48   ;;  %v3240_v44 = vadd.f32 %v6244_v28, %v3208_v57  ;;  %v3209_v24 = vmul.f32 %v4591_v14, %v6239_v3 }
 0x295   :  { %v3241_v35 = vadd.f32 %v6244_v28, %v3209_v24  ;;  %v1777_v10 = vpop.f32.mrb[28].mxu1  ;;  %v3265_v53 = vmax.f32 %v3240_v44, 0.0 }
 0x296   :  { %v3062_v40 = vpop.f32.mrb[24].mxu0  ;;  %v4270_v33 = vpop.f32.mrb[29].mxu1 }
 0x297   :  { %v3266_v29 = vmax.f32 %v3241_v35, 0.0  ;;  %v4592_v22 = vadd.f32 %v3062_v40, %v6232_v61  ;;  %v4538_v58 = vpop.f32.mrb[25].mxu0  ;;  %v1780_v46 = vpop.f32.mrb[30].mxu1 }
 0x298   :  { %v3065_v34 = vpop.f32.mrb[26].mxu0  ;;  %v4271_v39 = vpop.f32.mrb[31].mxu1 }
 0x299   :  { %v3720_v18 = vpack.c.bf16 %v3266_v29, %v3265_v53  ;;  %v3210_v43 = vmul.f32 %v4592_v22, %v6239_v3  ;;  %v4593_v31 = vadd.f32 %v3065_v34, %v6234_v25  ;;  %v4539_v37 = vpop.f32.mrb[27].mxu0 }
 0x29b   :  { %3756 = vst [vmem:[%s6346_s4 + $0x28] sm:$0xff] %v3720_v18   ;;  %v3242_v21 = vadd.f32 %v6244_v28, %v3210_v43  ;;  %v3211_v36 = vmul.f32 %v4593_v31, %v6239_v3 }
 0x29d   :  { %v3243_v61 = vadd.f32 %v6244_v28, %v3211_v36  ;;  %v1785_v42 = vpop.f32.mrb[32].mxu1  ;;  %v3267_v16 = vmax.f32 %v3242_v21, 0.0 }
 0x29e   :  { %v3070_v47 = vpop.f32.mrb[28].mxu0  ;;  %v4274_v52 = vpop.f32.mrb[33].mxu1 }
 0x29f   :  { %v3268_v17 = vmax.f32 %v3243_v61, 0.0  ;;  %v4594_v19 = vadd.f32 %v3070_v47, %v1777_v10  ;;  %v4542_v41 = vpop.f32.mrb[29].mxu0  ;;  %v1788_v55 = vpop.f32.mrb[34].mxu1 }
 0x2a0   :  { %v3073_v25 = vpop.f32.mrb[30].mxu0  ;;  %v4275_v6 = vpop.f32.mrb[35].mxu1 }
 0x2a1   :  { %v3725_v5 = vpack.c.bf16 %v3268_v17, %v3267_v16  ;;  %v3212_v12 = vmul.f32 %v4594_v19, %v6239_v3  ;;  %v4595_v50 = vadd.f32 %v3073_v25, %v1780_v46  ;;  %v4543_v30 = vpop.f32.mrb[31].mxu0 }
 0x2a3   :  { %3757 = vst [vmem:[%s6346_s4 + $0x30] sm:$0xff] %v3725_v5   ;;  %v3244_v27 = vadd.f32 %v6244_v28, %v3212_v12  ;;  %v3213_v20 = vmul.f32 %v4595_v50, %v6239_v3 }
 0x2a5   :  { %v3245_v63 = vadd.f32 %v6244_v28, %v3213_v20  ;;  %v1793_v59 = vpop.f32.mrb[36].mxu1  ;;  %v3269_v51 = vmax.f32 %v3244_v27, 0.0 }
 0x2a6   :  { %v3078_v0 = vpop.f32.mrb[32].mxu0  ;;  %v4278_v54 = vpop.f32.mrb[37].mxu1 }
 0x2a7   :  { %v3270_v2 = vmax.f32 %v3245_v63, 0.0  ;;  %v4596_v7 = vadd.f32 %v3078_v0, %v1785_v42  ;;  %v4546_v9 = vpop.f32.mrb[33].mxu0  ;;  %v1796_v49 = vpop.f32.mrb[38].mxu1 }
 0x2a8   :  { %v3081_v4 = vpop.f32.mrb[34].mxu0  ;;  %v4279_v45 = vpop.f32.mrb[39].mxu1 }
 0x2a9   :  { %v3730_v1 = vpack.c.bf16 %v3270_v2, %v3269_v51  ;;  %v3214_v38 = vmul.f32 %v4596_v7, %v6239_v3  ;;  %v4597_v56 = vadd.f32 %v3081_v4, %v1788_v55  ;;  %v4547_v15 = vpop.f32.mrb[35].mxu0 }
 0x2ab   :  { %3758 = vst [vmem:[%s6346_s4 + $0x38] sm:$0xff] %v3730_v1   ;;  %v3246_v26 = vadd.f32 %v6244_v28, %v3214_v38  ;;  %v3215_v23 = vmul.f32 %v4597_v56, %v6239_v3 }
 0x2ad   :  { %v3247_v13 = vadd.f32 %v6244_v28, %v3215_v23  ;;  %v1801_v8 = vpop.f32.mrb[40].mxu1  ;;  %v3271_v32 = vmax.f32 %v3246_v26, 0.0 }
 0x2ae   :  { %v3086_v60 = vpop.f32.mrb[36].mxu0  ;;  %v4282_v11 = vpop.f32.mrb[41].mxu1 }
 0x2af   :  { %v3272_v48 = vmax.f32 %v3247_v13, 0.0  ;;  %v4598_v57 = vadd.f32 %v3086_v60, %v1793_v59  ;;  %v4550_v14 = vpop.f32.mrb[37].mxu0  ;;  %v1804_v62 = vpop.f32.mrb[42].mxu1 }
 0x2b0   :  { %v3089_v44 = vpop.f32.mrb[38].mxu0  ;;  %v4283_v24 = vpop.f32.mrb[43].mxu1 }
 0x2b1   :  { %v3735_v35 = vpack.c.bf16 %v3272_v48, %v3271_v32  ;;  %v3216_v10 = vmul.f32 %v4598_v57, %v6239_v3  ;;  %v4599_v40 = vadd.f32 %v3089_v44, %v1796_v49  ;;  %v4551_v33 = vpop.f32.mrb[39].mxu0 }
 0x2b3   :  { %3759 = vst [vmem:[%s6346_s4 + $0x40] sm:$0xff] %v3735_v35   ;;  %v3248_v53 = vadd.f32 %v6244_v28, %v3216_v10  ;;  %v3217_v29 = vmul.f32 %v4599_v40, %v6239_v3 }
 0x2b5   :  { %v3249_v22 = vadd.f32 %v6244_v28, %v3217_v29  ;;  %v1809_v58 = vpop.f32.mrb[44].mxu1  ;;  %v3273_v39 = vmax.f32 %v3248_v53, 0.0 }
 0x2b6   :  { %v3094_v46 = vpop.f32.mrb[40].mxu0  ;;  %v4286_v34 = vpop.f32.mrb[45].mxu1 }
 0x2b7   :  { %v3274_v18 = vmax.f32 %v3249_v22, 0.0  ;;  %v4600_v43 = vadd.f32 %v3094_v46, %v1801_v8  ;;  %v4554_v31 = vpop.f32.mrb[41].mxu0  ;;  %v1812_v37 = vpop.f32.mrb[46].mxu1 }
 0x2b8   :  { %v3097_v21 = vpop.f32.mrb[42].mxu0  ;;  %v4287_v36 = vpop.f32.mrb[47].mxu1 }
 0x2b9   :  { %v3740_v61 = vpack.c.bf16 %v3274_v18, %v3273_v39  ;;  %v3218_v42 = vmul.f32 %v4600_v43, %v6239_v3  ;;  %v4601_v47 = vadd.f32 %v3097_v21, %v1804_v62  ;;  %v4555_v52 = vpop.f32.mrb[43].mxu0 }
 0x2bb   :  { %3760 = vst [vmem:[%s6346_s4 + $0x48] sm:$0xff] %v3740_v61   ;;  %v3250_v16 = vadd.f32 %v6244_v28, %v3218_v42  ;;  %v3219_v17 = vmul.f32 %v4601_v47, %v6239_v3 }
 0x2bd   :  { %v3251_v19 = vadd.f32 %v6244_v28, %v3219_v17  ;;  %v1817_v41 = vpop.f32.mrb[48].mxu1  ;;  %v3275_v6 = vmax.f32 %v3250_v16, 0.0 }
 0x2be   :  { %v3102_v55 = vpop.f32.mrb[44].mxu0  ;;  %v4290_v25 = vpop.f32.mrb[49].mxu1 }
 0x2bf   :  { %v3276_v5 = vmax.f32 %v3251_v19, 0.0  ;;  %v4602_v12 = vadd.f32 %v3102_v55, %v1809_v58  ;;  %v4558_v50 = vpop.f32.mrb[45].mxu0  ;;  %v1820_v30 = vpop.f32.mrb[50].mxu1 }
 0x2c0   :  { %v3105_v27 = vpop.f32.mrb[46].mxu0  ;;  %v4291_v20 = vpop.f32.mrb[51].mxu1 }
 0x2c1   :  { %v3745_v63 = vpack.c.bf16 %v3276_v5, %v3275_v6  ;;  %v3220_v59 = vmul.f32 %v4602_v12, %v6239_v3  ;;  %v4603_v0 = vadd.f32 %v3105_v27, %v1812_v37  ;;  %v4559_v54 = vpop.f32.mrb[47].mxu0 }
 0x2c3   :  { %3761 = vst [vmem:[%s6346_s4 + $0x50] sm:$0xff] %v3745_v63   ;;  %v3252_v51 = vadd.f32 %v6244_v28, %v3220_v59  ;;  %v3221_v2 = vmul.f32 %v4603_v0, %v6239_v3 }
 0x2c5   :  { %v3253_v7 = vadd.f32 %v6244_v28, %v3221_v2  ;;  %v3277_v49 = vmax.f32 %v3252_v51, 0.0 }
 0x2c6   :  { %v3110_v9 = vpop.f32.mrb[48].mxu0 }
 0x2c7   :  { %v3278_v4 = vmax.f32 %v3253_v7, 0.0  ;;  %v4604_v45 = vadd.f32 %v3110_v9, %v1817_v41  ;;  %v4562_v1 = vpop.f32.mrb[49].mxu0 }
 0x2c8   :  { %v3113_v38 = vpop.f32.mrb[50].mxu0 }
 0x2c9   :  { %v3750_v56 = vpack.c.bf16 %v3278_v4, %v3277_v49  ;;  %v3222_v15 = vmul.f32 %v4604_v45, %v6239_v3  ;;  %v4563_v26 = vpop.f32.mrb[51].mxu0 }
 0x2cb   :  { %3762 = vst [vmem:[%s6346_s4 + $0x58] sm:$0xff] %v3750_v56   ;;  %v3254_v23 = vadd.f32 %v6244_v28, %v3222_v15 }
 0x2cd   :  { %v3279_v13 = vmax.f32 %v3254_v23, 0.0 }
 0x2cf   :  { %v3691_v8 = vpack.c.bf16 %v3279_v13, %v3279_v13 }
 0x2d1   :  { %3405 = vst [vmem:[%s6346_s4 + $0x60] sm:$0xf] %v3691_v8 }

// kernel: _lambda_.30
= control target key start
LH: loop header
LB: loop body
LE: loop exit
PB: predicated region body
PF: predicated region fallthrough
CT: control target
= control target key end

     0   :  { %v395_v1 = vmov 0.0   ;;  %v396_v2 = vmov 0   ;;  %vm397_vm0 = vmmov 0   ;;  %s502_s1 = inlined_call_operand.vmem [shape: bf16[128,384], index: 1, kind: input, shape index: {}]   ;;  %s503_s0 = inlined_call_operand.vmem [shape: bf16[8,128], index: 0, kind: input, shape index: {}]   ;;  %s504_s2 = inlined_call_operand.vmem [shape: bf16[8,256], index: 2, kind: input, shape index: {}]   ;;  %s505_s3 = inlined_call_operand.vmem [shape: bf16[8,384], index: 3, kind: output, shape index: {}]  }
   0x1   :  { %v363_v0 = vld [vmem:[%s502_s1 + $0x4] ss:$12 sps:$4 sm:$0xff]   ;;  %340 = vmatprep.subr.bf16.mxu1 %v395_v1  ;;  %218 = vmatprep.mubr.bf16.mxu0 %v396_v2  ;;  %v365_v3 = vld [vmem:[%s502_s1] ss:$12 sps:$4 sm:$0xff]   ;;  %v366_v4 = vld [vmem:[%s502_s1 + $0x8] ss:$12 sps:$4 sm:$0xff]  }
   0x2   :  { %356 = vmatprep.mubr.msk.bf16.mxu1 %vm397_vm0, %v395_v1  ;;  %186 = vmatprep.subr.bf16.mxu0 %v363_v0  ;;  %v367_v5 = vld [vmem:[%s502_s1 + $0x1c] ss:$12 sps:$4 sm:$0xff]   ;;  %v369_v6 = vld [vmem:[%s502_s1 + $0x18] ss:$12 sps:$4 sm:$0xff]   ;;  %v370_v7 = vld [vmem:[%s502_s1 + $0x20] ss:$12 sps:$4 sm:$0xff]  }
   0x3   :  { %187 = vmatpush1.bf16.msra.mxu0 %v365_v3  ;;  %341 = vmatpush3.bf16.msra.mxu1 %v366_v4  ;;  %v371_v8 = vld [vmem:[%s502_s1 + $0x34] ss:$12 sps:$4 sm:$0xff]   ;;  %v373_v9 = vld [vmem:[%s502_s1 + $0x30] ss:$12 sps:$4 sm:$0xff]   ;;  %v374_v10 = vld [vmem:[%s502_s1 + $0x38] ss:$12 sps:$4 sm:$0xff]  }
   0x4   :  { %188 = vmatprep.subr.bf16.mxu0 %v367_v5  ;;  %342 = vmatprep.subr.bf16.mxu1 %v395_v1  ;;  %v375_v11 = vld [vmem:[%s502_s1 + $0x4c] ss:$12 sps:$4 sm:$0xff]   ;;  %v377_v12 = vld [vmem:[%s502_s1 + $0x48] ss:$12 sps:$4 sm:$0xff]   ;;  %v378_v13 = vld [vmem:[%s502_s1 + $0x50] ss:$12 sps:$4 sm:$0xff]  }
   0x5   :  { %v379_v14 = vld [vmem:[%s502_s1 + $0x64] ss:$12 sps:$4 sm:$0xff]   ;;  %v381_v15 = vld [vmem:[%s502_s1 + $0x60] ss:$12 sps:$4 sm:$0xff]   ;;  %v382_v16 = vld [vmem:[%s502_s1 + $0x68] ss:$12 sps:$4 sm:$0xff]  }
   0x6   :  { %v383_v17 = vld [vmem:[%s502_s1 + $0x7c] ss:$12 sps:$4 sm:$0xff]   ;;  %v385_v18 = vld [vmem:[%s502_s1 + $0x78] ss:$12 sps:$4 sm:$0xff]   ;;  %v386_v19 = vld [vmem:[%s502_s1 + $0x80] ss:$12 sps:$4 sm:$0xff]  }
   0x7   :  { %189 = vmatpush1.bf16.msra.mxu0 %v369_v6  ;;  %343 = vmatpush3.bf16.msra.mxu1 %v370_v7  ;;  %v387_v20 = vld [vmem:[%s502_s1 + $0x94] ss:$12 sps:$4 sm:$0xff]   ;;  %v389_v21 = vld [vmem:[%s502_s1 + $0x90] ss:$12 sps:$4 sm:$0xff]   ;;  %v390_v22 = vld [vmem:[%s502_s1 + $0x98] ss:$12 sps:$4 sm:$0xff]  }
   0x8   :  { %190 = vmatprep.subr.bf16.mxu0 %v371_v8  ;;  %344 = vmatprep.subr.bf16.mxu1 %v395_v1  ;;  %v391_v23 = vld [vmem:[%s502_s1 + $0xac] ss:$12 sps:$4 sm:$0xff]   ;;  %v393_v24 = vld [vmem:[%s502_s1 + $0xa8] ss:$12 sps:$4 sm:$0xff]   ;;  %v394_v25 = vld [vmem:[%s502_s1 + $0xb0] ss:$12 sps:$4 sm:$0xff]  }
   0x9   :  { %v22_v26 = vld [vmem:[%s503_s0] sm:$0xf] }
   0xa   :  { %v279_v27 = vld [vmem:[%s504_s2] sm:$0xff] }
   0xb   :  { %191 = vmatpush1.bf16.msra.mxu0 %v373_v9  ;;  %345 = vmatpush3.bf16.msra.mxu1 %v374_v10  ;;  %v280_v28 = vunpack.c.l.bf16 %v279_v27  ;;  %v281_v29 = vunpack.c.h.bf16 %v279_v27 }
   0xc   :  { %192 = vmatprep.subr.bf16.mxu0 %v375_v11  ;;  %346 = vmatprep.subr.bf16.mxu1 %v395_v1 }
   0xf   :  { %193 = vmatpush1.bf16.msra.mxu0 %v377_v12  ;;  %347 = vmatpush3.bf16.msra.mxu1 %v378_v13 }
  0x10   :  { %194 = vmatprep.subr.bf16.mxu0 %v379_v14  ;;  %348 = vmatprep.subr.bf16.mxu1 %v395_v1 }
  0x13   :  { %195 = vmatpush1.bf16.msra.mxu0 %v381_v15  ;;  %349 = vmatpush3.bf16.msra.mxu1 %v382_v16 }
  0x14   :  { %196 = vmatprep.subr.bf16.mxu0 %v383_v17  ;;  %350 = vmatprep.subr.bf16.mxu1 %v395_v1 }
  0x17   :  { %197 = vmatpush1.bf16.msra.mxu0 %v385_v18  ;;  %351 = vmatpush3.bf16.msra.mxu1 %v386_v19 }
  0x18   :  { %198 = vmatprep.subr.bf16.mxu0 %v387_v20  ;;  %352 = vmatprep.subr.bf16.mxu1 %v395_v1 }
  0x1b   :  { %199 = vmatpush1.bf16.msra.mxu0 %v389_v21  ;;  %353 = vmatpush3.bf16.msra.mxu1 %v390_v22 }
  0x1c   :  { %200 = vmatprep.subr.bf16.mxu0 %v391_v23  ;;  %354 = vmatprep.subr.bf16.mxu1 %v395_v1 }
  0x1f   :  { %201 = vmatpush1.bf16.msra.mxu0 %v393_v24  ;;  %355 = vmatpush3.bf16.msra.mxu1 %v394_v25 }
  0x22   :  { %219 = vmatmul.mubr.bf16.vlgmr.msra.gmra.mrb[0].mxu0 %v22_v26  ;;  %357 = vmatmul.mubr.bf16.vlgmr.msra.gmra.mrb[0].mxu1 %v22_v26 }
  0xf5   :  { %v220_v30 = vpop.f32.mrb[0].mxu0  ;;  %v261_v32 = vpop.f32.mrb[0].mxu1 }
  0xf6   :  { %v282_v31 = vadd.f32 %v280_v28, %v220_v30  ;;  %v222_v33 = vpop.f32.mrb[1].mxu0  ;;  %v330_v34 = vpack.c.bf16 %v261_v32, %v261_v32  ;;  %v358_v36 = vpop.f32.mrb[1].mxu1 }
  0xf7   :  { %v283_v35 = vadd.f32 %v281_v29, %v222_v33  ;;  %v224_v37 = vpop.f32.mrb[2].mxu0  ;;  %v264_v38 = vpop.f32.mrb[2].mxu1 }
  0xf8   :  { %v225_v39 = vpop.f32.mrb[3].mxu0  ;;  %298 = vst [vmem:[%s505_s3 + $0x8] sm:$0xf] %v330_v34  ;;  %v359_v41 = vpop.f32.mrb[3].mxu1 }
  0xf9   :  { %v329_v40 = vpack.c.bf16 %v283_v35, %v282_v31 }
  0xfb   :  { %297 = vst [vmem:[%s505_s3] sm:$0xff] %v329_v40 }

// kernel: _lambda_.29
= control target key start
LH: loop header
LB: loop body
LE: loop exit
PB: predicated region body
PF: predicated region fallthrough
CT: control target
= control target key end

     0   :  { %v2785_v0 = vmov 0.0   ;;  %vm2786_vm0 = vmmov 0   ;;  %vm830_vm1 = vsmask.f32 4352  ;;  %vm472_vm2 = vcmask 1046528   ;;  %s3512_s1 = inlined_call_operand.vmem [shape: bf16[9,128,128], index: 1, kind: input, shape index: {}]   ;;  %s3513_s0 = inlined_call_operand.vmem [shape: bf16[88,128], index: 0, kind: input, shape index: {}]   ;;  %s3514_s2 = inlined_call_operand.vmem [shape: f32[1,128], index: 2, kind: input, shape index: {}]   ;;  %s3515_s3 = inlined_call_operand.vmem [shape: f32[1,128], index: 3, kind: input, shape index: {}]   ;;  %s3516_s4 = inlined_call_operand.vmem [shape: bf16[72,128], index: 4, kind: output, shape index: {}]  }
   0x1   :  { %2215 = vmatprep.subr.bf16.mxu1 %v2785_v0  ;;  %2359 = vmatprep.subr.bf16.mxu0 %v2785_v0  ;;  %v2701_v1 = vld [vmem:[%s3512_s1] sm:$0xff]   ;;  %v2703_v3 = vld [vmem:[%s3512_s1 + $0x8] sm:$0xff]   ;;  %v2705_v5 = vld [vmem:[%s3512_s1 + $0x10] sm:$0xff]   ;;  %vm651_vm3 = vcmask 1044480   ;;  %vm263_vm4 = vsmask.f32 7424 }
   0x2   :  { %v2702_v2 = vld [vmem:[%s3512_s1 + $0x100] sm:$0xff]   ;;  %2231 = vmatprep.mubr.msk.bf16.mxu1 %vm2786_vm0, %v2785_v0  ;;  %2375 = vmatprep.mubr.msk.bf16.mxu0 %vm2786_vm0, %v2785_v0  ;;  %v2704_v4 = vld [vmem:[%s3512_s1 + $0x108] sm:$0xff]   ;;  %v2706_v6 = vld [vmem:[%s3512_s1 + $0x110] sm:$0xff]   ;;  %vm1375_vm5 = vsmask.f32 5376  ;;  %vm1196_vm6 = vcmask 1045504  }
   0x3   :  { %2216 = vmatpush3.bf16.msra.mxu1 %v2701_v1  ;;  %2360 = vmatpush3.bf16.msra.mxu0 %v2702_v2  ;;  %v2707_v7 = vld [vmem:[%s3512_s1 + $0x18] sm:$0xff]   ;;  %v2709_v9 = vld [vmem:[%s3512_s1 + $0x20] sm:$0xff]   ;;  %v2867_v13 = vld [vmem:[%s3513_s0 + $0x8] sm:$0xf] }
   0x4   :  { %2217 = vmatprep.subr.bf16.mxu1 %v2785_v0  ;;  %2361 = vmatprep.subr.bf16.mxu0 %v2785_v0  ;;  %v2708_v8 = vld [vmem:[%s3512_s1 + $0x118] sm:$0xff]   ;;  %v2710_v10 = vld [vmem:[%s3512_s1 + $0x120] sm:$0xff]   ;;  %v2875_v15 = vld [vmem:[%s3513_s0 + $0xc] sm:$0xf] }
   0x5   :  { %v23_v11 = vld [vmem:[%s3513_s0] sm:$0xf]  ;;  %v2862_v12 = vld [vmem:[%s3513_s0 + $0x4] sm:$0xf]  ;;  %v2711_v16 = vld [vmem:[%s3512_s1 + $0x28] sm:$0xff]   ;;  %v2882_v17 = vcombine.low %v2867_v13, %v2875_v15 }
   0x6   :  { %v2870_v14 = vcombine.low %v23_v11, %v2862_v12  ;;  %v2712_v18 = vld [vmem:[%s3512_s1 + $0x128] sm:$0xff]   ;;  %v2893_v21 = vld [vmem:[%s3513_s0 + $0x10] sm:$0xf]  ;;  %v2901_v24 = vld [vmem:[%s3513_s0 + $0x14] sm:$0xf] }
   0x7   :  { %2218 = vmatpush3.bf16.msra.mxu1 %v2703_v3  ;;  %2362 = vmatpush3.bf16.msra.mxu0 %v2704_v4  ;;  %v272_v22 = vshll.u32 %v2882_v17, 16  ;;  %v276_v23 = vshrl.u32 %v2882_v17, 16  ;;  %v2713_v25 = vld [vmem:[%s3512_s1 + $0x30] sm:$0xff]   ;;  %v2920_v31 = vcombine.low %v2893_v21, %v2901_v24  ;;  %v2715_v32 = vld [vmem:[%s3512_s1 + $0x38] sm:$0xff]   ;;  %v2719_v41 = vld [vmem:[%s3512_s1 + $0x140] sm:$0xff]   ;;  %v474_v60 = vrot.slane %v2882_v17, 1 }
   0x8   :  { %2219 = vmatprep.subr.bf16.mxu1 %v2785_v0  ;;  %2363 = vmatprep.subr.bf16.mxu0 %v2785_v0  ;;  %v265_v19 = vshrl.u32 %v2870_v14, 16  ;;  %v267_v20 = vshll.u32 %v2870_v14, 16  ;;  %v2714_v26 = vld [vmem:[%s3512_s1 + $0x130] sm:$0xff]   ;;  %v2929_v33 = vld [vmem:[%s3513_s0 + $0x18] sm:$0xf]  ;;  %v2722_v45 = vld [vmem:[%s3512_s1 + $0x40] sm:$0xff]  }
   0x9   :  { %v834_v29 = vrot.slane %v276_v23, 3  ;;  %v835_v30 = vrot.slane %v272_v22, 4  ;;  %v2934_v34 = vld [vmem:[%s3513_s0 + $0x1c] sm:$0xf]  ;;  %v280_v38 = vshll.u32 %v2920_v31, 16  ;;  %v284_v39 = vshrl.u32 %v2920_v31, 16 }
   0xa   :  { %v831_v27 = vrot.slane %v265_v19, 3  ;;  %v832_v28 = vrot.slane %v267_v20, 4  ;;  %v2716_v35 = vld [vmem:[%s3512_s1 + $0x138] sm:$0xff]   ;;  %v2945_v40 = vcombine.low %v2929_v33, %v2934_v34  ;;  %v2720_v48 = vld [vmem:[%s3512_s1 + $0x148] sm:$0xff]   ;;  %v2971_v49 = vld [vmem:[%s3513_s0 + $0x20] sm:$0xf] }
   0xb   :  { %2220 = vmatpush3.bf16.msra.mxu1 %v2705_v5  ;;  %2364 = vmatpush3.bf16.msra.mxu0 %v2706_v6  ;;  %v836_v37 = vor.u32 %v835_v30, %v834_v29  ;;  %v838_v43 = vrot.slane %v284_v39, 3  ;;  %v839_v44 = vrot.slane %v280_v38, 4  ;;  %v2976_v50 = vld [vmem:[%s3513_s0 + $0x24] sm:$0xf]  ;;  %v2724_v52 = vld [vmem:[%s3512_s1 + $0x48] sm:$0xff]   ;;  %v2723_v53 = vld [vmem:[%s3512_s1 + $0x150] sm:$0xff]  }
   0xc   :  { %2221 = vmatprep.subr.bf16.mxu1 %v2785_v0  ;;  %2365 = vmatprep.subr.bf16.mxu0 %v2785_v0  ;;  %v833_v36 = vor.u32 %v832_v28, %v831_v27  ;;  %v288_v46 = vshll.u32 %v2945_v40, 16  ;;  %v292_v47 = vshrl.u32 %v2945_v40, 16  ;;  %v2992_v55 = vcombine.low %v2971_v49, %v2976_v50  ;;  %v2727_v59 = vld [vmem:[%s3512_s1 + $0x50] sm:$0xff]   ;;  %v2726_v61 = vld [vmem:[%s3512_s1 + $0x158] sm:$0xff]   ;;  %v2732_v29 = vld [vmem:[%s3512_s1 + $0x168] sm:$0xff]  }
   0xd   :  { %v840_v51 = vor.u32 %v839_v44, %v838_v43  ;;  %v473_v58 = vrot.slane %v2870_v14, 1  ;;  %v476_v3 = vrot.slane %v2920_v31, 1  ;;  %v2728_v4 = vld [vmem:[%s3512_s1 + $0x58] sm:$0xff]   ;;  %v478_v6 = vrot.slane %v2945_v40, 1  ;;  %v2733_v30 = vld [vmem:[%s3512_s1 + $0x68] sm:$0xff]  }
   0xe   :  { %v837_v42 = vsel %vm830_vm1, %v833_v36, %v836_v37  ;;  %v842_v54 = vrot.slane %v292_v47, 3  ;;  %v843_v57 = vrot.slane %v288_v46, 4  ;;  %v300_v62 = vshrl.u32 %v2992_v55, 16 }
   0xf   :  { %2222 = vmatpush3.bf16.msra.mxu1 %v2707_v7  ;;  %2366 = vmatpush3.bf16.msra.mxu0 %v2708_v8  ;;  %v841_v56 = vsel %vm830_vm1, %v836_v37, %v840_v51  ;;  %v3012_v63 = vsel %vm472_vm2, %v473_v58, %v474_v60  ;;  %v296_v2 = vshll.u32 %v2992_v55, 16  ;;  %v3024_v5 = vsel %vm472_vm2, %v474_v60, %v476_v3  ;;  %v2729_v7 = vld [vmem:[%s3512_s1 + $0x160] sm:$0xff]  }
  0x10   :  { %2223 = vmatprep.subr.bf16.mxu1 %v2785_v0  ;;  %2367 = vmatprep.subr.bf16.mxu0 %v2785_v0  ;;  %v844_v1 = vor.u32 %v843_v57, %v842_v54  ;;  %v846_v8 = vrot.slane %v300_v62, 3  ;;  %v3036_v11 = vsel %vm472_vm2, %v476_v3, %v478_v6  ;;  %v653_v27 = vrot.slane %v2882_v17, 3 }
  0x11   :  { %v269_v36 = vrot.slane %v267_v20, 1  ;;  %v3100_v44 = vcombine.low %v2901_v24, %v2929_v33  ;;  %v1847_v54 = vcombine.low %v2971_v49, %v2971_v49  ;;  %v33_v24 = vld [vmem:[%s3513_s0 + $0x28] sm:$0xf] }
  0x12   :  { %v3119_v58 = vcombine.low %v2976_v50, %v33_v24 }
  0x13   :  { %2224 = vmatpush3.bf16.msra.mxu1 %v2709_v9  ;;  %2368 = vmatpush3.bf16.msra.mxu0 %v2710_v10  ;;  %v845_v9 = vsel %vm830_vm1, %v840_v51, %v844_v1  ;;  %v847_v10 = vrot.slane %v296_v2, 4  ;;  %v655_v51 = vrot.slane %v2920_v31, 3  ;;  %v1397_v57 = vshll.u32 %v3100_v44, 16 }
  0x14   :  { %2225 = vmatprep.subr.bf16.mxu1 %v2785_v0  ;;  %2369 = vmatprep.subr.bf16.mxu0 %v2785_v0  ;;  %v270_v3 = vor.u32 %v269_v36, %v265_v19  ;;  %v1412_v36 = vshrl.u32 %v3119_v58, 16 }
  0x15   :  { %v848_v28 = vor.u32 %v847_v10, %v846_v8 }
  0x17   :  { %2226 = vmatpush3.bf16.msra.mxu1 %v2711_v16  ;;  %2370 = vmatpush3.bf16.msra.mxu0 %v2712_v18  ;;  %v480_v16 = vrot.slane %v2992_v55, 1  ;;  %v2731_v18 = vld [vmem:[%s3512_s1 + $0x60] sm:$0xff]   ;;  %v849_v37 = vsel %vm830_vm1, %v844_v1, %v848_v28  ;;  %v3124_v1 = vcombine.low %v2934_v34, %v2971_v49 }
  0x18   :  { %2227 = vmatprep.subr.bf16.mxu1 %v2785_v0  ;;  %2371 = vmatprep.subr.bf16.mxu0 %v2785_v0 }
  0x19   :  { %v1403_v34 = vshrl.u32 %v3124_v1, 16  ;;  %v1406_v19 = vshll.u32 %v3124_v1, 16 }
  0x1b   :  { %2228 = vmatpush3.bf16.msra.mxu1 %v2713_v25  ;;  %2372 = vmatpush3.bf16.msra.mxu0 %v2714_v26  ;;  %v3048_v25 = vsel %vm472_vm2, %v478_v6, %v480_v16  ;;  %v652_v26 = vrot.slane %v2870_v14, 3  ;;  %v657_v6 = vrot.slane %v2945_v40, 3 }
  0x1c   :  { %2229 = vmatprep.subr.bf16.mxu1 %v2785_v0  ;;  %2373 = vmatprep.subr.bf16.mxu0 %v2785_v0 }
  0x1f   :  { %2230 = vmatpush3.bf16.msra.mxu1 %v2715_v32  ;;  %2374 = vmatpush3.bf16.msra.mxu0 %v2716_v35  ;;  %v3064_v32 = vsel %vm651_vm3, %v652_v26, %v653_v27  ;;  %v3069_v35 = vcombine.low %v2862_v12, %v2867_v13  ;;  %v2736_v12 = vld [vmem:[%s3512_s1 + $0x70] sm:$0xff]   ;;  %v1408_v26 = vrot.slane %v1406_v19, 3  ;;  %v2754_v19 = vld [vmem:[%s3512_s1 + $0xa8] sm:$0xff]  }
  0x20   :  { %2251 = vmatprep.subr.bf16.mxu1 %v2785_v0  ;;  %2395 = vmatprep.subr.bf16.mxu0 %v2785_v0 }
  0x21   :  { %v1377_v43 = vshrl.u32 %v3069_v35, 16  ;;  %v1380_v13 = vshll.u32 %v3069_v35, 16 }
  0x22   :  { %2232 = vmatmul.mubr.bf16.vlgmr.msra.gmra.mrb[0].mxu1 %v2870_v14  ;;  %2376 = vmatmul.mubr.bf16.vlgmr.msra.gmra.mrb[0].mxu0 %v837_v42  ;;  %v3079_v42 = vcombine.low %v2875_v15, %v2893_v21  ;;  %v2737_v15 = vld [vmem:[%s3512_s1 + $0x178] sm:$0xff]   ;;  %v3138_v14 = vsel %vm651_vm3, %v655_v51, %v657_v6 }
  0x23   :  { %2235 = vmatprep.mubr.msk.bf16.mxu1 %vm2786_vm0, %v2785_v0  ;;  %2396 = vmatpush3.bf16.msra.mxu0 %v2719_v41  ;;  %v2734_v41 = vld [vmem:[%s3512_s1 + $0x170] sm:$0xff]   ;;  %v2738_v21 = vld [vmem:[%s3512_s1 + $0x78] sm:$0xff]  }
  0x24   :  { %2379 = vmatprep.mubr.msk.bf16.mxu0 %vm2786_vm0, %v2785_v0  ;;  %2397 = vmatprep.subr.bf16.mxu0 %v2785_v0  ;;  %v1385_v20 = vshrl.u32 %v3079_v42, 16 }
  0x25   :  { %2252 = vmatpush3.bf16.msra.mxu1 %v2722_v45  ;;  %v1388_v45 = vshll.u32 %v3079_v42, 16 }
  0x26   :  { %2253 = vmatprep.subr.bf16.mxu1 %v2785_v0  ;;  %v1387_v33 = vrot.slane %v1385_v20, 2  ;;  %v2741_v20 = vld [vmem:[%s3512_s1 + $0x188] sm:$0xff]  }
  0x27   :  { %2398 = vmatpush3.bf16.msra.mxu0 %v2720_v48  ;;  %v1379_v48 = vrot.slane %v1377_v43, 2 }
  0x28   :  { %2399 = vmatprep.subr.bf16.mxu0 %v2785_v0 }
  0x29   :  { %2254 = vmatpush3.bf16.msra.mxu1 %v2724_v52  ;;  %v1382_v52 = vrot.slane %v1380_v13, 3 }
  0x2a   :  { %2236 = vmatmul.mubr.bf16.gmra.mrb[4].mxu1 %v2882_v17  ;;  %2255 = vmatprep.subr.bf16.mxu1 %v2785_v0  ;;  %v2745_v17 = vld [vmem:[%s3512_s1 + $0x88] sm:$0xff]  }
  0x2b   :  { %2380 = vmatmul.mubr.bf16.gmra.mrb[4].mxu0 %v841_v56  ;;  %2239 = vmatprep.mubr.msk.bf16.mxu1 %vm2786_vm0, %v2785_v0  ;;  %v3115_v56 = vsel %vm651_vm3, %v653_v27, %v655_v51  ;;  %v2740_v27 = vld [vmem:[%s3512_s1 + $0x180] sm:$0xff]   ;;  %v1596_v51 = vrot.slane %v3119_v58, 3 }
  0x2c   :  { %2400 = vmatpush3.bf16.msra.mxu0 %v2723_v53  ;;  %2383 = vmatprep.mubr.msk.bf16.mxu0 %vm2786_vm0, %v2785_v0  ;;  %v1394_v53 = vshrl.u32 %v3100_v44, 16 }
  0x2d   :  { %2401 = vmatprep.subr.bf16.mxu0 %v2785_v0  ;;  %2256 = vmatpush3.bf16.msra.mxu1 %v2727_v59  ;;  %v1390_v59 = vrot.slane %v1388_v45, 3  ;;  %v1590_v45 = vrot.slane %v3079_v42, 3 }
  0x2e   :  { %2257 = vmatprep.subr.bf16.mxu1 %v2785_v0  ;;  %v1396_v60 = vrot.slane %v1394_v53, 2  ;;  %v1592_v53 = vrot.slane %v3100_v44, 3 }
  0x2f   :  { %v1391_v8 = vor.u32 %v1390_v59, %v1387_v33  ;;  %v2748_v59 = vld [vmem:[%s3512_s1 + $0x90] sm:$0xff]  }
  0x30   :  { %2402 = vmatpush3.bf16.msra.mxu0 %v2726_v61  ;;  %v1399_v61 = vrot.slane %v1397_v57, 3 }
  0x31   :  { %2403 = vmatprep.subr.bf16.mxu0 %v2785_v0  ;;  %2258 = vmatpush3.bf16.msra.mxu1 %v2728_v4  ;;  %v274_v4 = vrot.slane %v272_v22, 1  ;;  %v1405_v22 = vrot.slane %v1403_v34, 2  ;;  %v2753_v34 = vld [vmem:[%s3512_s1 + $0x1a8] sm:$0xff]  }
  0x32   :  { %2240 = vmatmul.mubr.bf16.gmra.mrb[8].mxu1 %v2920_v31  ;;  %2259 = vmatprep.subr.bf16.mxu1 %v2785_v0 }
  0x33   :  { %2384 = vmatmul.mubr.bf16.gmra.mrb[8].mxu0 %v845_v9  ;;  %2243 = vmatprep.mubr.msk.bf16.mxu1 %vm2786_vm0, %v2785_v0  ;;  %v1400_v9 = vor.u32 %v1399_v61, %v1396_v60  ;;  %v275_v49 = vsel %vm263_vm4, %v270_v3, %v274_v4  ;;  %v278_v43 = vor.u32 %v276_v23, %v274_v4  ;;  %v1589_v23 = vrot.slane %v3069_v35, 3 }
  0x34   :  { %2404 = vmatpush3.bf16.msra.mxu0 %v2729_v7  ;;  %2387 = vmatprep.mubr.msk.bf16.mxu0 %vm2786_vm0, %v2785_v0  ;;  %v1383_v7 = vor.u32 %v1382_v52, %v1379_v48  ;;  %v1594_v48 = vrot.slane %v3124_v1, 3  ;;  %v3210_v60 = vsel %vm651_vm3, %v1590_v45, %v1592_v53  ;;  %v290_v4 = vrot.slane %v288_v46, 1  ;;  %v2752_v46 = vld [vmem:[%s3512_s1 + $0xa0] sm:$0xff]  }
  0x35   :  { %2260 = vmatpush3.bf16.msra.mxu1 %v2731_v18  ;;  %2405 = vmatprep.subr.bf16.mxu0 %v2785_v0  ;;  %v3146_v18 = vsel %vm1375_vm5, %v1391_v8, %v1400_v9  ;;  %v3198_v33 = vsel %vm651_vm3, %v1589_v23, %v1590_v45  ;;  %v2771_v23 = vld [vmem:[%s3512_s1 + $0x1e8] sm:$0xff]  }
  0x36   :  { %2261 = vmatprep.subr.bf16.mxu1 %v2785_v0  ;;  %v3143_v10 = vsel %vm1375_vm5, %v1383_v7, %v1391_v8  ;;  %v3203_v57 = vsel %vm651_vm3, %v1594_v48, %v1596_v51  ;;  %v3213_v61 = vsel %vm651_vm3, %v1592_v53, %v1594_v48  ;;  %v2749_v7 = vld [vmem:[%s3512_s1 + $0x98] sm:$0xff]   ;;  %v294_v8 = vor.u32 %v292_v47, %v290_v4  ;;  %v2755_v47 = vld [vmem:[%s3512_s1 + $0x1b0] sm:$0xff]  }
  0x37   :  { %v2773_v48 = vld [vmem:[%s3512_s1 + $0x1f0] sm:$0xff]   ;;  %v2775_v53 = vld [vmem:[%s3512_s1 + $0x1f8] sm:$0xff]  }
  0x38   :  { %2406 = vmatpush3.bf16.msra.mxu0 %v2732_v29  ;;  %v2743_v29 = vld [vmem:[%s3512_s1 + $0x80] sm:$0xff]  }
  0x39   :  { %2262 = vmatpush3.bf16.msra.mxu1 %v2733_v30  ;;  %2407 = vmatprep.subr.bf16.mxu0 %v2785_v0  ;;  %v1409_v30 = vor.u32 %v1408_v26, %v1405_v22  ;;  %v2758_v22 = vld [vmem:[%s3512_s1 + $0x1b8] sm:$0xff]  }
  0x3a   :  { %2244 = vmatmul.mubr.bf16.gmra.mrb[12].mxu1 %v2945_v40  ;;  %2263 = vmatprep.subr.bf16.mxu1 %v2785_v0 }
  0x3b   :  { %2388 = vmatmul.mubr.bf16.gmra.mrb[12].mxu0 %v849_v37  ;;  %2247 = vmatprep.mubr.msk.bf16.mxu1 %vm2786_vm0, %v2785_v0  ;;  %v3170_v13 = vsel %vm1375_vm5, %v1400_v9, %v1409_v30  ;;  %v298_v9 = vrot.slane %v296_v2, 1  ;;  %v2757_v2 = vld [vmem:[%s3512_s1 + $0xb0] sm:$0xff]  }
  0x3c   :  { %2391 = vmatprep.mubr.msk.bf16.mxu0 %vm2786_vm0, %v2785_v0  ;;  %2408 = vmatpush3.bf16.msra.mxu0 %v2734_v41  ;;  %v1415_v41 = vshll.u32 %v3119_v58, 16 }
  0x3d   :  { %2264 = vmatpush3.bf16.msra.mxu1 %v2736_v12  ;;  %2409 = vmatprep.subr.bf16.mxu0 %v2785_v0  ;;  %v282_v12 = vrot.slane %v280_v38, 1  ;;  %v299_v40 = vsel %vm263_vm4, %v294_v8, %v298_v9  ;;  %v302_v26 = vor.u32 %v300_v62, %v298_v9  ;;  %v1197_v62 = vrot.slane %v3069_v35, 2 }
  0x3e   :  { %2265 = vmatprep.subr.bf16.mxu1 %v2785_v0 }
  0x3f   :  { %v283_v52 = vsel %vm263_vm4, %v278_v43, %v282_v12  ;;  %v286_v3 = vor.u32 %v284_v39, %v282_v12  ;;  %v2750_v39 = vld [vmem:[%s3512_s1 + $0x1a0] sm:$0xff]   ;;  %v2763_v43 = vld [vmem:[%s3512_s1 + $0x1d0] sm:$0xff]   ;;  %v1202_v12 = vrot.slane %v3124_v1, 2 }
  0x40   :  { %2410 = vmatpush3.bf16.msra.mxu0 %v2737_v15  ;;  %v1414_v15 = vrot.slane %v1412_v36, 2  ;;  %v2762_v36 = vld [vmem:[%s3512_s1 + $0xc0] sm:$0xff]  }
  0x41   :  { %2266 = vmatpush3.bf16.msra.mxu1 %v2738_v21  ;;  %2431 = vmatprep.subr.bf16.mxu0 %v2785_v0  ;;  %v1417_v21 = vrot.slane %v1415_v41, 3  ;;  %v291_v31 = vsel %vm263_vm4, %v286_v3, %v290_v4 }
  0x42   :  { %2248 = vmatmul.mubr.bf16.gmra.mrb[16].mxu1 %v1847_v54  ;;  %2287 = vmatprep.subr.bf16.mxu1 %v2785_v0  ;;  %v2744_v54 = vld [vmem:[%s3512_s1 + $0x190] sm:$0xff]  }
  0x43   :  { %2392 = vmatmul.mubr.bf16.gmra.mrb[16].mxu0 %v848_v28  ;;  %2267 = vmatprep.mubr.msk.bf16.mxu1 %vm2786_vm0, %v2785_v0  ;;  %v659_v28 = vrot.slane %v2992_v55, 3  ;;  %v3183_v38 = vor.u32 %v1417_v21, %v1414_v15  ;;  %v2765_v15 = vld [vmem:[%s3512_s1 + $0x1d8] sm:$0xff]   ;;  %v2770_v21 = vld [vmem:[%s3512_s1 + $0xe0] sm:$0xff]  }
  0x44   :  { %2411 = vmatprep.mubr.msk.bf16.mxu0 %vm2786_vm0, %v2785_v0 }
  0x45   :  { %v3159_v37 = vsel %vm651_vm3, %v657_v6, %v659_v28  ;;  %v3195_v24 = vsel %vm1375_vm5, %v1409_v30, %v3183_v38  ;;  %v2747_v6 = vld [vmem:[%s3512_s1 + $0x198] sm:$0xff]   ;;  %v2760_v30 = vld [vmem:[%s3512_s1 + $0x1c0] sm:$0xff]  }
  0x4a   :  { %2268 = vmatmul.mubr.bf16.vlgmr.msra.gmra.mrb[0].mxu1 %v275_v49  ;;  %v2759_v49 = vld [vmem:[%s3512_s1 + $0xb8] sm:$0xff]  }
  0x4b   :  { %2412 = vmatmul.mubr.bf16.vlgmr.msra.gmra.mrb[0].mxu0 %v3069_v35  ;;  %2271 = vmatprep.mubr.msk.bf16.mxu1 %vm2786_vm0, %v2785_v0  ;;  %v2761_v35 = vld [vmem:[%s3512_s1 + $0x1c8] sm:$0xff]  }
  0x4c   :  { %2432 = vmatpush3.bf16.msra.mxu0 %v2740_v27  ;;  %2415 = vmatprep.mubr.msk.bf16.mxu0 %vm2786_vm0, %v2785_v0  ;;  %v1973_v27 = vcombine.low %v2976_v50, %v2976_v50 }
  0x4d   :  { %2433 = vmatprep.subr.bf16.mxu0 %v2785_v0  ;;  %2288 = vmatpush3.bf16.msra.mxu1 %v2743_v29  ;;  %v1198_v29 = vrot.slane %v3079_v42, 2 }
  0x4e   :  { %2289 = vmatprep.subr.bf16.mxu1 %v2785_v0 }
  0x4f   :  { %v1199_v50 = vsel %vm1196_vm6, %v1197_v62, %v1198_v29  ;;  %v3480_v62 = vld [vmem:[%s3514_s2] ss:$0 sm:$0xff] }
  0x50   :  { %2434 = vmatpush3.bf16.msra.mxu0 %v2741_v20 }
  0x51   :  { %2435 = vmatprep.subr.bf16.mxu0 %v2785_v0  ;;  %2290 = vmatpush3.bf16.msra.mxu1 %v2745_v17  ;;  %v1204_v17 = vrot.slane %v3119_v58, 2 }
  0x52   :  { %2272 = vmatmul.mubr.bf16.gmra.mrb[4].mxu1 %v283_v52  ;;  %2291 = vmatprep.subr.bf16.mxu1 %v2785_v0  ;;  %v2774_v52 = vld [vmem:[%s3512_s1 + $0xf0] sm:$0xff]  }
  0x53   :  { %2416 = vmatmul.mubr.bf16.gmra.mrb[4].mxu0 %v3079_v42  ;;  %2275 = vmatprep.mubr.msk.bf16.mxu1 %vm2786_vm0, %v2785_v0  ;;  %v1200_v42 = vrot.slane %v3100_v44, 2  ;;  %v1205_v45 = vsel %vm1196_vm6, %v1202_v12, %v1204_v17 }
  0x54   :  { %2436 = vmatpush3.bf16.msra.mxu0 %v2744_v54  ;;  %2419 = vmatprep.mubr.msk.bf16.mxu0 %vm2786_vm0, %v2785_v0  ;;  %v2777_v54 = vld [vmem:[%s3512_s1 + $0x200] sm:$0xff]  }
  0x55   :  { %2437 = vmatprep.subr.bf16.mxu0 %v2785_v0  ;;  %2292 = vmatpush3.bf16.msra.mxu1 %v2748_v59  ;;  %v1201_v41 = vsel %vm1196_vm6, %v1198_v29, %v1200_v42  ;;  %v1203_v20 = vsel %vm1196_vm6, %v1200_v42, %v1202_v12  ;;  %v2056_v42 = vld [vmem:[%s3515_s3] ss:$0 sm:$0xff] }
  0x56   :  { %2293 = vmatprep.subr.bf16.mxu1 %v2785_v0 }
  0x58   :  { %2438 = vmatpush3.bf16.msra.mxu0 %v2747_v6 }
  0x59   :  { %2439 = vmatprep.subr.bf16.mxu0 %v2785_v0  ;;  %2294 = vmatpush3.bf16.msra.mxu1 %v2749_v7 }
  0x5a   :  { %2276 = vmatmul.mubr.bf16.gmra.mrb[8].mxu1 %v291_v31  ;;  %2295 = vmatprep.subr.bf16.mxu1 %v2785_v0 }
  0x5b   :  { %2420 = vmatmul.mubr.bf16.gmra.mrb[8].mxu0 %v3100_v44  ;;  %2279 = vmatprep.mubr.msk.bf16.mxu1 %vm2786_vm0, %v2785_v0  ;;  %v2766_v44 = vld [vmem:[%s3512_s1 + $0xd0] sm:$0xff]  }
  0x5c   :  { %2440 = vmatpush3.bf16.msra.mxu0 %v2750_v39  ;;  %2423 = vmatprep.mubr.msk.bf16.mxu0 %vm2786_vm0, %v2785_v0 }
  0x5d   :  { %2296 = vmatpush3.bf16.msra.mxu1 %v2752_v46  ;;  %2441 = vmatprep.subr.bf16.mxu0 %v2785_v0 }
  0x5e   :  { %2297 = vmatprep.subr.bf16.mxu1 %v2785_v0 }
  0x60   :  { %2442 = vmatpush3.bf16.msra.mxu0 %v2753_v34 }
  0x61   :  { %2298 = vmatpush3.bf16.msra.mxu1 %v2754_v19  ;;  %2443 = vmatprep.subr.bf16.mxu0 %v2785_v0 }
  0x62   :  { %2280 = vmatmul.mubr.bf16.gmra.mrb[12].mxu1 %v299_v40  ;;  %2299 = vmatprep.subr.bf16.mxu1 %v2785_v0 }
  0x63   :  { %2424 = vmatmul.mubr.bf16.gmra.mrb[12].mxu0 %v3124_v1  ;;  %2283 = vmatprep.mubr.msk.bf16.mxu1 %vm2786_vm0, %v2785_v0  ;;  %v2768_v1 = vld [vmem:[%s3512_s1 + $0x1e0] sm:$0xff]  }
  0x64   :  { %2427 = vmatprep.mubr.msk.bf16.mxu0 %vm2786_vm0, %v2785_v0  ;;  %2444 = vmatpush3.bf16.msra.mxu0 %v2755_v47 }
  0x65   :  { %2300 = vmatpush3.bf16.msra.mxu1 %v2757_v2  ;;  %2445 = vmatprep.subr.bf16.mxu0 %v2785_v0 }
  0x66   :  { %2301 = vmatprep.subr.bf16.mxu1 %v2785_v0 }
  0x68   :  { %2446 = vmatpush3.bf16.msra.mxu0 %v2758_v22 }
  0x69   :  { %2302 = vmatpush3.bf16.msra.mxu1 %v2759_v49  ;;  %2467 = vmatprep.subr.bf16.mxu0 %v2785_v0 }
  0x6a   :  { %2284 = vmatmul.mubr.bf16.gmra.mrb[16].mxu1 %v302_v26  ;;  %2323 = vmatprep.subr.bf16.mxu1 %v2785_v0 }
  0x6b   :  { %2428 = vmatmul.mubr.bf16.gmra.mrb[16].mxu0 %v1973_v27  ;;  %2303 = vmatprep.mubr.msk.bf16.mxu1 %vm2786_vm0, %v2785_v0 }
  0x6c   :  { %2447 = vmatprep.mubr.msk.bf16.mxu0 %vm2786_vm0, %v2785_v0 }
  0x72   :  { %2304 = vmatmul.mubr.bf16.vlgmr.msra.gmra.mrb[0].mxu1 %v3012_v63  ;;  %v2764_v63 = vld [vmem:[%s3512_s1 + $0xc8] sm:$0xff]  }
  0x73   :  { %2448 = vmatmul.mubr.bf16.vlgmr.msra.gmra.mrb[0].mxu0 %v1199_v50  ;;  %2307 = vmatprep.mubr.msk.bf16.mxu1 %vm2786_vm0, %v2785_v0 }
  0x74   :  { %2468 = vmatpush3.bf16.msra.mxu0 %v2760_v30  ;;  %2451 = vmatprep.mubr.msk.bf16.mxu0 %vm2786_vm0, %v2785_v0 }
  0x75   :  { %2469 = vmatprep.subr.bf16.mxu0 %v2785_v0  ;;  %2324 = vmatpush3.bf16.msra.mxu1 %v2762_v36 }
  0x76   :  { %2325 = vmatprep.subr.bf16.mxu1 %v2785_v0 }
  0x78   :  { %2470 = vmatpush3.bf16.msra.mxu0 %v2761_v35 }
  0x79   :  { %2471 = vmatprep.subr.bf16.mxu0 %v2785_v0  ;;  %2326 = vmatpush3.bf16.msra.mxu1 %v2764_v63 }
  0x7a   :  { %2308 = vmatmul.mubr.bf16.gmra.mrb[4].mxu1 %v3024_v5  ;;  %2327 = vmatprep.subr.bf16.mxu1 %v2785_v0  ;;  %v2767_v5 = vld [vmem:[%s3512_s1 + $0xd8] sm:$0xff]  }
  0x7b   :  { %2452 = vmatmul.mubr.bf16.gmra.mrb[4].mxu0 %v1201_v41  ;;  %2311 = vmatprep.mubr.msk.bf16.mxu1 %vm2786_vm0, %v2785_v0 }
  0x7c   :  { %2472 = vmatpush3.bf16.msra.mxu0 %v2763_v43  ;;  %2455 = vmatprep.mubr.msk.bf16.mxu0 %vm2786_vm0, %v2785_v0 }
  0x7d   :  { %2473 = vmatprep.subr.bf16.mxu0 %v2785_v0  ;;  %2328 = vmatpush3.bf16.msra.mxu1 %v2766_v44 }
  0x7e   :  { %2329 = vmatprep.subr.bf16.mxu1 %v2785_v0 }
  0x80   :  { %2474 = vmatpush3.bf16.msra.mxu0 %v2765_v15 }
  0x81   :  { %2475 = vmatprep.subr.bf16.mxu0 %v2785_v0  ;;  %2330 = vmatpush3.bf16.msra.mxu1 %v2767_v5 }
  0x82   :  { %2312 = vmatmul.mubr.bf16.gmra.mrb[8].mxu1 %v3036_v11  ;;  %2331 = vmatprep.subr.bf16.mxu1 %v2785_v0  ;;  %v2772_v11 = vld [vmem:[%s3512_s1 + $0xe8] sm:$0xff]  }
  0x83   :  { %2456 = vmatmul.mubr.bf16.gmra.mrb[8].mxu0 %v1203_v20  ;;  %2315 = vmatprep.mubr.msk.bf16.mxu1 %vm2786_vm0, %v2785_v0 }
  0x84   :  { %2476 = vmatpush3.bf16.msra.mxu0 %v2768_v1  ;;  %2459 = vmatprep.mubr.msk.bf16.mxu0 %vm2786_vm0, %v2785_v0 }
  0x85   :  { %2332 = vmatpush3.bf16.msra.mxu1 %v2770_v21  ;;  %2477 = vmatprep.subr.bf16.mxu0 %v2785_v0 }
  0x86   :  { %2333 = vmatprep.subr.bf16.mxu1 %v2785_v0 }
  0x88   :  { %2478 = vmatpush3.bf16.msra.mxu0 %v2771_v23 }
  0x89   :  { %2334 = vmatpush3.bf16.msra.mxu1 %v2772_v11  ;;  %2479 = vmatprep.subr.bf16.mxu0 %v2785_v0 }
  0x8a   :  { %2316 = vmatmul.mubr.bf16.gmra.mrb[12].mxu1 %v3048_v25  ;;  %2335 = vmatprep.subr.bf16.mxu1 %v2785_v0  ;;  %v2776_v25 = vld [vmem:[%s3512_s1 + $0xf8] sm:$0xff]  }
  0x8b   :  { %2460 = vmatmul.mubr.bf16.gmra.mrb[12].mxu0 %v1205_v45  ;;  %2319 = vmatprep.mubr.msk.bf16.mxu1 %vm2786_vm0, %v2785_v0 }
  0x8c   :  { %2463 = vmatprep.mubr.msk.bf16.mxu0 %vm2786_vm0, %v2785_v0  ;;  %2480 = vmatpush3.bf16.msra.mxu0 %v2773_v48 }
  0x8d   :  { %2336 = vmatpush3.bf16.msra.mxu1 %v2774_v52  ;;  %2481 = vmatprep.subr.bf16.mxu0 %v2785_v0 }
  0x8e   :  { %2337 = vmatprep.subr.bf16.mxu1 %v2785_v0 }
  0x90   :  { %2482 = vmatpush3.bf16.msra.mxu0 %v2775_v53 }
  0x91   :  { %2338 = vmatpush3.bf16.msra.mxu1 %v2776_v25  ;;  %2503 = vmatprep.subr.bf16.mxu0 %v2785_v0 }
  0x92   :  { %2320 = vmatmul.mubr.bf16.gmra.mrb[16].mxu1 %v480_v16  ;;  %2539 = vmatprep.subr.bf16.mxu1 %v2785_v0  ;;  %v2778_v16 = vld [vmem:[%s3512_s1 + $0x208] sm:$0xff]  }
  0x93   :  { %2464 = vmatmul.mubr.bf16.gmra.mrb[16].mxu0 %v1204_v17  ;;  %2339 = vmatprep.mubr.msk.bf16.mxu1 %vm2786_vm0, %v2785_v0 }
  0x94   :  { %2483 = vmatprep.mubr.msk.bf16.mxu0 %vm2786_vm0, %v2785_v0 }
  0x9a   :  { %2340 = vmatmul.mubr.bf16.vlgmr.msra.gmra.mrb[0].mxu1 %v3064_v32  ;;  %v2779_v32 = vld [vmem:[%s3512_s1 + $0x210] sm:$0xff]  }
  0x9b   :  { %2484 = vmatmul.mubr.bf16.vlgmr.msra.gmra.mrb[0].mxu0 %v3143_v10  ;;  %2343 = vmatprep.mubr.msk.bf16.mxu1 %vm2786_vm0, %v2785_v0  ;;  %v2780_v10 = vld [vmem:[%s3512_s1 + $0x218] sm:$0xff]  }
  0x9c   :  { %2504 = vmatpush3.bf16.msra.mxu0 %v2777_v54  ;;  %2487 = vmatprep.mubr.msk.bf16.mxu0 %vm2786_vm0, %v2785_v0 }
  0x9d   :  { %2505 = vmatprep.subr.bf16.mxu0 %v2785_v0  ;;  %2547 = vmatpush3.bf16.msra.mxu1 %v2777_v54 }
  0x9e   :  { %2540 = vmatprep.subr.bf16.mxu1 %v2785_v0 }
  0xa0   :  { %2506 = vmatpush3.bf16.msra.mxu0 %v2778_v16 }
  0xa1   :  { %2507 = vmatprep.subr.bf16.mxu0 %v2785_v0  ;;  %2548 = vmatpush3.bf16.msra.mxu1 %v2778_v16 }
  0xa2   :  { %2344 = vmatmul.mubr.bf16.gmra.mrb[4].mxu1 %v3115_v56  ;;  %2541 = vmatprep.subr.bf16.mxu1 %v2785_v0  ;;  %v2781_v56 = vld [vmem:[%s3512_s1 + $0x220] sm:$0xff]  }
  0xa3   :  { %2488 = vmatmul.mubr.bf16.gmra.mrb[4].mxu0 %v3146_v18  ;;  %2347 = vmatprep.mubr.msk.bf16.mxu1 %vm2786_vm0, %v2785_v0  ;;  %v2782_v18 = vld [vmem:[%s3512_s1 + $0x228] sm:$0xff]  }
  0xa4   :  { %2508 = vmatpush3.bf16.msra.mxu0 %v2779_v32  ;;  %2491 = vmatprep.mubr.msk.bf16.mxu0 %vm2786_vm0, %v2785_v0 }
  0xa5   :  { %2509 = vmatprep.subr.bf16.mxu0 %v2785_v0  ;;  %2549 = vmatpush3.bf16.msra.mxu1 %v2779_v32 }
  0xa6   :  { %2542 = vmatprep.subr.bf16.mxu1 %v2785_v0 }
  0xa8   :  { %2510 = vmatpush3.bf16.msra.mxu0 %v2780_v10 }
  0xa9   :  { %2511 = vmatprep.subr.bf16.mxu0 %v2785_v0  ;;  %2550 = vmatpush3.bf16.msra.mxu1 %v2780_v10 }
  0xaa   :  { %2348 = vmatmul.mubr.bf16.gmra.mrb[8].mxu1 %v3138_v14  ;;  %2543 = vmatprep.subr.bf16.mxu1 %v2785_v0  ;;  %v2783_v14 = vld [vmem:[%s3512_s1 + $0x230] sm:$0xff]  }
  0xab   :  { %2492 = vmatmul.mubr.bf16.gmra.mrb[8].mxu0 %v3170_v13  ;;  %2351 = vmatprep.mubr.msk.bf16.mxu1 %vm2786_vm0, %v2785_v0  ;;  %v2784_v13 = vld [vmem:[%s3512_s1 + $0x238] sm:$0xff]  }
  0xac   :  { %2512 = vmatpush3.bf16.msra.mxu0 %v2781_v56  ;;  %2495 = vmatprep.mubr.msk.bf16.mxu0 %vm2786_vm0, %v2785_v0 }
  0xad   :  { %2551 = vmatpush3.bf16.msra.mxu1 %v2781_v56  ;;  %2513 = vmatprep.subr.bf16.mxu0 %v2785_v0 }
  0xae   :  { %2544 = vmatprep.subr.bf16.mxu1 %v2785_v0 }
  0xb0   :  { %2514 = vmatpush3.bf16.msra.mxu0 %v2782_v18 }
  0xb1   :  { %2552 = vmatpush3.bf16.msra.mxu1 %v2782_v18  ;;  %2515 = vmatprep.subr.bf16.mxu0 %v2785_v0 }
  0xb2   :  { %2352 = vmatmul.mubr.bf16.gmra.mrb[12].mxu1 %v3159_v37  ;;  %2545 = vmatprep.subr.bf16.mxu1 %v2785_v0 }
  0xb3   :  { %2496 = vmatmul.mubr.bf16.gmra.mrb[12].mxu0 %v3195_v24  ;;  %2355 = vmatprep.mubr.msk.bf16.mxu1 %vm2786_vm0, %v2785_v0 }
  0xb4   :  { %2499 = vmatprep.mubr.msk.bf16.mxu0 %vm2786_vm0, %v2785_v0  ;;  %2516 = vmatpush3.bf16.msra.mxu0 %v2783_v14 }
  0xb5   :  { %2553 = vmatpush3.bf16.msra.mxu1 %v2783_v14  ;;  %2517 = vmatprep.subr.bf16.mxu0 %v2785_v0 }
  0xb6   :  { %2546 = vmatprep.subr.bf16.mxu1 %v2785_v0 }
  0xb8   :  { %2518 = vmatpush3.bf16.msra.mxu0 %v2784_v13 }
  0xb9   :  { %2554 = vmatpush3.bf16.msra.mxu1 %v2784_v13 }
  0xba   :  { %2356 = vmatmul.mubr.bf16.gmra.mrb[16].mxu1 %v659_v28 }
  0xbb   :  { %2500 = vmatmul.mubr.bf16.gmra.mrb[16].mxu0 %v3183_v38  ;;  %2531 = vmatprep.mubr.msk.bf16.mxu1 %vm2786_vm0, %v2785_v0 }
  0xbc   :  { %2519 = vmatprep.mubr.msk.bf16.mxu0 %vm2786_vm0, %v2785_v0 }
  0xc2   :  { %2532 = vmatmul.mubr.bf16.vlgmr.msra.gmra.mrb[20].mxu1 %v3203_v57 }
  0xc3   :  { %2520 = vmatmul.mubr.bf16.vlgmr.msra.gmra.mrb[0].mxu0 %v3198_v33  ;;  %2535 = vmatprep.mubr.msk.bf16.mxu1 %vm2786_vm0, %v2785_v0 }
  0xc4   :  { %2523 = vmatprep.mubr.msk.bf16.mxu0 %vm2786_vm0, %v2785_v0 }
  0xca   :  { %2536 = vmatmul.mubr.bf16.gmra.mrb[24].mxu1 %v1596_v51 }
  0xcb   :  { %2524 = vmatmul.mubr.bf16.gmra.mrb[4].mxu0 %v3210_v60 }
  0xcc   :  { %2527 = vmatprep.mubr.msk.bf16.mxu0 %vm2786_vm0, %v2785_v0 }
  0xd3   :  { %2528 = vmatmul.mubr.bf16.gmra.mrb[8].mxu0 %v3213_v61 }
 0x16d   :  { %v748_v55 = vpop.f32.mrb[0].mxu1 }
 0x16e   :  { %v2341_v28 = vpop.f32.mrb[1].mxu1 }
 0x16f   :  { %v751_v37 = vpop.f32.mrb[2].mxu1 }
 0x170   :  { %v2342_v38 = vpop.f32.mrb[3].mxu1 }
 0x175   :  { %v756_v24 = vpop.f32.mrb[4].mxu1 }
 0x176   :  { %v2345_v33 = vpop.f32.mrb[5].mxu1 }
 0x177   :  { %v3471_v57 = vpop.f32.mrb[6].mxu1 }
 0x178   :  { %v2346_v59 = vpop.f32.mrb[7].mxu1 }
 0x17d   :  { %v3473_v3 = vpop.f32.mrb[8].mxu1 }
 0x17e   :  { %v2349_v58 = vpop.f32.mrb[9].mxu1 }
 0x17f   :  { %v3475_v51 = vpop.f32.mrb[10].mxu1 }
 0x180   :  { %v2350_v60 = vpop.f32.mrb[11].mxu1 }
 0x185   :  { %v772_v4 = vpop.f32.mrb[12].mxu1 }
 0x186   :  { %v1531_v6 = vpop.f32.mrb[12].mxu0  ;;  %v2353_v0 = vpop.f32.mrb[13].mxu1 }
 0x187   :  { %v2561_v7 = vadd.f32 %v1531_v6, %v772_v4  ;;  %v2497_v61 = vpop.f32.mrb[13].mxu0  ;;  %v775_v31 = vpop.f32.mrb[14].mxu1 }
 0x188   :  { %v1534_v39 = vpop.f32.mrb[14].mxu0  ;;  %v2354_v46 = vpop.f32.mrb[15].mxu1 }
 0x189   :  { %v2563_v8 = vadd.f32 %v1534_v39, %v775_v31  ;;  %v2498_v9 = vpop.f32.mrb[15].mxu0 }
 0x18d   :  { %v780_v34 = vpop.f32.mrb[16].mxu1 }
 0x18e   :  { %v1539_v19 = vpop.f32.mrb[16].mxu0  ;;  %v2357_v40 = vpop.f32.mrb[17].mxu1 }
 0x18f   :  { %v2565_v47 = vadd.f32 %v1539_v19, %v780_v34  ;;  %v2501_v2 = vpop.f32.mrb[17].mxu0  ;;  %v783_v22 = vpop.f32.mrb[18].mxu1 }
 0x190   :  { %v1542_v49 = vpop.f32.mrb[18].mxu0  ;;  %v2358_v26 = vpop.f32.mrb[19].mxu1 }
 0x191   :  { %v2502_v27 = vpop.f32.mrb[19].mxu0 }
 0x195   :  { %v1709_v29 = vpop.f32.mrb[20].mxu1 }
 0x196   :  { %v1685_v50 = vpop.f32.mrb[0].mxu0  ;;  %v2562_v30 = vadd.f32 %v2561_v7, %v1709_v29  ;;  %v2533_v36 = vpop.f32.mrb[21].mxu1 }
 0x197   :  { %v2555_v35 = vadd.f32 %v1685_v50, %v748_v55  ;;  %v2521_v63 = vpop.f32.mrb[1].mxu0  ;;  %v1712_v41 = vpop.f32.mrb[22].mxu1 }
 0x198   :  { %v1763_v43 = vmul.f32 %v2562_v30, %v3480_v62  ;;  %v1688_v44 = vpop.f32.mrb[2].mxu0  ;;  %v2564_v12 = vadd.f32 %v2563_v8, %v1712_v41  ;;  %v2534_v15 = vpop.f32.mrb[23].mxu1 }
 0x199   :  { %v1757_v5 = vmul.f32 %v2555_v35, %v3480_v62  ;;  %v2556_v20 = vadd.f32 %v1688_v44, %v751_v37  ;;  %v2522_v1 = vpop.f32.mrb[3].mxu0 }
 0x19a   :  { %v1779_v21 = vadd.f32 %v2056_v42, %v1763_v43  ;;  %v1764_v17 = vmul.f32 %v2564_v12, %v3480_v62 }
 0x19b   :  { %v1773_v23 = vadd.f32 %v2056_v42, %v1757_v5  ;;  %v1758_v11 = vmul.f32 %v2556_v20, %v3480_v62 }
 0x19c   :  { %v1780_v45 = vadd.f32 %v2056_v42, %v1764_v17  ;;  %v1788_v53 = vmax.f32 %v1779_v21, 0.0 }
 0x19d   :  { %v1774_v48 = vadd.f32 %v2056_v42, %v1758_v11  ;;  %v1717_v52 = vpop.f32.mrb[24].mxu1  ;;  %v1782_v10 = vmax.f32 %v1773_v23, 0.0 }
 0x19e   :  { %v1789_v25 = vmax.f32 %v1780_v45, 0.0  ;;  %v1693_v54 = vpop.f32.mrb[4].mxu0  ;;  %v2566_v16 = vadd.f32 %v2565_v47, %v1717_v52  ;;  %v2537_v32 = vpop.f32.mrb[25].mxu1 }
 0x19f   :  { %v1783_v56 = vmax.f32 %v1774_v48, 0.0  ;;  %v2557_v18 = vadd.f32 %v1693_v54, %v756_v24  ;;  %v2525_v14 = vpop.f32.mrb[5].mxu0  ;;  %v1720_v13 = vpop.f32.mrb[26].mxu1 }
 0x1a0   :  { %v2093_v55 = vpack.c.bf16 %v1789_v25, %v1788_v53  ;;  %v1765_v28 = vmul.f32 %v2566_v16, %v3480_v62  ;;  %v1696_v37 = vpop.f32.mrb[6].mxu0  ;;  %v2538_v38 = vpop.f32.mrb[27].mxu1 }
 0x1a1   :  { %v2078_v33 = vpack.c.bf16 %v1783_v56, %v1782_v10  ;;  %v1759_v59 = vmul.f32 %v2557_v18, %v3480_v62  ;;  %v2558_v58 = vadd.f32 %v1696_v37, %v3471_v57  ;;  %v2526_v60 = vpop.f32.mrb[7].mxu0 }
 0x1a2   :  { %2097 = vst [vmem:[%s3516_s4 + $0x18] sm:$0xff] %v2093_v55   ;;  %v1781_v4 = vadd.f32 %v2056_v42, %v1765_v28 }
 0x1a3   :  { %2079 = vst [vmem:[%s3516_s4] sm:$0xff] %v2078_v33   ;;  %v1775_v24 = vadd.f32 %v2056_v42, %v1759_v59  ;;  %v1760_v6 = vmul.f32 %v2558_v58, %v3480_v62 }
 0x1a4   :  { %v1790_v0 = vmax.f32 %v1781_v4, 0.0 }
 0x1a5   :  { %v1776_v7 = vadd.f32 %v2056_v42, %v1760_v6  ;;  %v1784_v39 = vmax.f32 %v1775_v24, 0.0 }
 0x1a6   :  { %v2074_v61 = vpack.c.bf16 %v1790_v0, %v1790_v0  ;;  %v1701_v31 = vpop.f32.mrb[8].mxu0 }
 0x1a7   :  { %v1785_v46 = vmax.f32 %v1776_v7, 0.0  ;;  %v2559_v57 = vadd.f32 %v1701_v31, %v3473_v3  ;;  %v2529_v8 = vpop.f32.mrb[9].mxu0 }
 0x1a8   :  { %1836 = vst [vmem:[%s3516_s4 + $0x20] sm:$0xf] %v2074_v61  ;;  %v1704_v9 = vpop.f32.mrb[10].mxu0 }
 0x1a9   :  { %v2083_v34 = vpack.c.bf16 %v1785_v46, %v1784_v39  ;;  %v1761_v19 = vmul.f32 %v2559_v57, %v3480_v62  ;;  %v2560_v40 = vadd.f32 %v1704_v9, %v3475_v51  ;;  %v2530_v47 = vpop.f32.mrb[11].mxu0 }
 0x1ab   :  { %2095 = vst [vmem:[%s3516_s4 + $0x8] sm:$0xff] %v2083_v34   ;;  %v1777_v2 = vadd.f32 %v2056_v42, %v1761_v19  ;;  %v1762_v22 = vmul.f32 %v2560_v40, %v3480_v62 }
 0x1ad   :  { %v1778_v3 = vadd.f32 %v2056_v42, %v1762_v22  ;;  %v1786_v49 = vmax.f32 %v1777_v2, 0.0 }
 0x1af   :  { %v1787_v26 = vmax.f32 %v1778_v3, 0.0 }
 0x1b1   :  { %v2088_v27 = vpack.c.bf16 %v1787_v26, %v1786_v49 }
 0x1b3   :  { %2096 = vst [vmem:[%s3516_s4 + $0x10] sm:$0xff] %v2088_v27  }

// kernel: _lambda_.31
= control target key start
LH: loop header
LB: loop body
LE: loop exit
PB: predicated region body
PF: predicated region fallthrough
CT: control target
= control target key end

     0   :  { %s1054_s15 = smov 0   ;;  %s1056_s16 = smov 0   ;;  %s1169_s0 = inlined_call_operand.vmem [shape: bf16[8,384], index: 0, kind: input, shape index: {}]   ;;  %s1170_s1 = inlined_call_operand.vmem [shape: f32[1,384], index: 1, kind: input, shape index: {}]   ;;  %s1171_s2 = inlined_call_operand.vmem [shape: f32[1,384], index: 2, kind: input, shape index: {}]   ;;  %s1172_s3 = inlined_call_operand.vmem [shape: bf16[384,640], index: 3, kind: input, shape index: {}]   ;;  %s1173_s4 = inlined_call_operand.vmem [shape: bf16[8,640], index: 4, kind: output, shape index: {}]  }
   0x1   :  { %s1058_s17 = smov 0  }
   0x2 LB: > { %s23_s18 = sadd.s32 1, %s1019_s16  ;;  %p830_p0 = scmp.ge.s32.totalorder %s1023_s17, 1  ;;  %s1023_s17 = sphi %s1058_s17, %s14_s17   ;;  %s1019_s16 = sphi %s1056_s16, %s1175_s16   ;;  %s1015_s15 = sphi %s1054_s15, %s1174_s15  }
   0x3   : > { %p24_p1 = scmp.ge.s32.totalorder %s23_s18, 3  ;;  %p207_p2 = scmp.lt.s32.totalorder %s1023_s17, 4 }
   0x5   : > { %s1177_s18 = smov (%p24_p1, %s23_s18), 0  ;;  %p208_p3 = pnand %p830_p0, %p207_p2 }
   0x6   : > { %p250_p4 = scmp.lt.s32.totalorder (!%p208_p3), %s1015_s15, 2  ;;  %s832_s19 = sshll.u32 (!%p208_p3), %s1015_s15, 4 }
   0x7   : > { %211 = sbr.rel (%p208_p3) target bundleno = 313 (0x139), region = 36  ;;  %p263_p5 = scmp.lt.s32.totalorder (!%p208_p3), %s832_s19, 47 }
   0x8   : > { %p834_p6 = scmp.ne.s32.totalorder (!%p208_p3), %s1015_s15, 0 }
   0xe   : > { %s1077_s20 = scalar_select %p250_p4, %s1015_s15, 2 }
   0xf   : > { %s1179_s19 = smov (!%p263_p5, %s832_s19), 47  ;;  %278 = sbr.rel (%p834_p6) target bundleno = 22 (0x16), region = 40 }
  0x10   : > { %s831_s21 = sshll.u32 %s1077_s20, 2  ;;  %s258_s24 = scalar_lea.vmem %s1170_s1, %s1077_s20  ;;  %v1025_v0 = vmov (!%p834_p6), 0.0  }
  0x11   : > { %s1087_s27 = scalar_lea.vmem %s1169_s0, %s831_s21  ;;  %s261_s30 = scalar_lea.vmem %s1171_s2, %s1077_s20  ;;  %279 = vst [vmem:[#allocation2] sm:$0xff] (!%p834_p6), %v1025_v0  ;;  %280 = vst [vmem:[#allocation2 + $0x8] sm:$0xff] (!%p834_p6), %v1025_v0 }
  0x12   : > { %s916_s5 = smul.u32 20, %s1179_s19  ;;  %281 = vst [vmem:[#allocation2 + $0x10] sm:$0xff] (!%p834_p6), %v1025_v0  ;;  %282 = vst [vmem:[#allocation2 + $0x18] sm:$0xff] (!%p834_p6), %v1025_v0 }
  0x13   : > { %283 = vst [vmem:[#allocation2 + $0x20] sm:$0xff] (!%p834_p6), %v1025_v0 }
  0x14   : > { %s1096_s8 = scalar_lea.vmem %s1172_s3, %s916_s5 }
  0x16 PF: > { %v945_v1 = vld [vmem:[%s1096_s8 + $0x4] ss:$20 sps:$4 sm:$0xff]   ;;  %v947_v2 = vld [vmem:[%s1096_s8] ss:$20 sps:$4 sm:$0xff]   ;;  %v1026_v3 = vmov 0   ;;  %v1027_v40 = vmov 0.0  }
  0x17   : > { %597 = vmatprep.mubr.bf16.mxu0 %v1026_v3  ;;  %638 = vmatprep.mubr.bf16.mxu1 %v1026_v3  ;;  %v948_v4 = vld [vmem:[%s1096_s8 + $0x2c] ss:$20 sps:$4 sm:$0xff]   ;;  %v950_v5 = vld [vmem:[%s1096_s8 + $0x28] ss:$20 sps:$4 sm:$0xff]   ;;  %v953_v7 = vld [vmem:[%s1096_s8 + $0x50] ss:$20 sps:$4 sm:$0xff]  }
  0x18   : > { %565 = vmatprep.subr.bf16.mxu0 %v945_v1  ;;  %v951_v6 = vld [vmem:[%s1096_s8 + $0x54] ss:$20 sps:$4 sm:$0xff]   ;;  %v954_v8 = vld [vmem:[%s1096_s8 + $0x7c] ss:$20 sps:$4 sm:$0xff]   ;;  %v956_v9 = vld [vmem:[%s1096_s8 + $0x78] ss:$20 sps:$4 sm:$0xff]  }
  0x19   : > { %566 = vmatpush1.bf16.msra.mxu0 %v947_v2  ;;  %v968_v10 = vld [vmem:[%s1096_s8 + $0xc] ss:$20 sps:$4 sm:$0xff]   ;;  %v971_v11 = vld [vmem:[%s1096_s8 + $0x8] ss:$20 sps:$4 sm:$0xff]   ;;  %v957_v12 = vld [vmem:[%s1096_s8 + $0xa4] ss:$20 sps:$4 sm:$0xff]  }
  0x1a   : > { %567 = vmatprep.subr.bf16.mxu0 %v948_v4  ;;  %v284_v13 = vld [vmem:[%s1087_s27] sm:$0xf]  ;;  %606 = vmatprep.subr.bf16.mxu1 %v968_v10  ;;  %v972_v16 = vld [vmem:[%s1096_s8 + $0x34] ss:$20 sps:$4 sm:$0xff]   ;;  %v974_v17 = vld [vmem:[%s1096_s8 + $0x30] ss:$20 sps:$4 sm:$0xff]  }
  0x1b   : > { %v835_v14 = vld [vmem:[%s258_s24] ss:$0 sm:$0xff]  ;;  %v285_v15 = vunpack.c.l.bf16 %v284_v13  ;;  %607 = vmatpush1.bf16.msra.mxu1 %v971_v11  ;;  %v976_v20 = vld [vmem:[%s1096_s8 + $0x5c] ss:$20 sps:$4 sm:$0xff]   ;;  %v978_v24 = vld [vmem:[%s1096_s8 + $0x58] ss:$20 sps:$4 sm:$0xff]  }
  0x1c   : > { %v959_v18 = vld [vmem:[%s1096_s8 + $0xa0] ss:$20 sps:$4 sm:$0xff]   ;;  %608 = vmatprep.subr.bf16.mxu1 %v972_v16  ;;  %v962_v21 = vld [vmem:[%s1096_s8 + $0xc8] ss:$20 sps:$4 sm:$0xff]   ;;  %v980_v25 = vld [vmem:[%s1096_s8 + $0x84] ss:$20 sps:$4 sm:$0xff]  }
  0x1d   : > { %568 = vmatpush1.bf16.msra.mxu0 %v950_v5  ;;  %v960_v19 = vld [vmem:[%s1096_s8 + $0xcc] ss:$20 sps:$4 sm:$0xff]   ;;  %v293_v22 = vmul.f32 %v835_v14, %v285_v15  ;;  %v963_v26 = vld [vmem:[%s1096_s8 + $0xf4] ss:$20 sps:$4 sm:$0xff]   ;;  %v965_v29 = vld [vmem:[%s1096_s8 + $0xf0] ss:$20 sps:$4 sm:$0xff]  }
  0x1e   : > { %569 = vmatprep.subr.bf16.mxu0 %v951_v6  ;;  %v836_v23 = vld [vmem:[%s261_s30] ss:$0 sm:$0xff]  ;;  %v966_v31 = vld [vmem:[%s1096_s8 + $0x11c] ss:$20 sps:$4 sm:$0xff]   ;;  %v970_v32 = vld [vmem:[%s1096_s8 + $0x118] ss:$20 sps:$4 sm:$0xff]  }
  0x1f   : > { %609 = vmatpush1.bf16.msra.mxu1 %v974_v17  ;;  %v301_v27 = vadd.f32 %v836_v23, %v293_v22  ;;  %v982_v28 = vld [vmem:[%s1096_s8 + $0x80] ss:$20 sps:$4 sm:$0xff]   ;;  %v986_v34 = vld [vmem:[%s1096_s8 + $0xa8] ss:$20 sps:$4 sm:$0xff]   ;;  %v990_v37 = vld [vmem:[%s1096_s8 + $0xd0] ss:$20 sps:$4 sm:$0xff]  }
  0x20   : > { %610 = vmatprep.subr.bf16.mxu1 %v976_v20  ;;  %v984_v30 = vld [vmem:[%s1096_s8 + $0xac] ss:$20 sps:$4 sm:$0xff]   ;;  %v988_v35 = vld [vmem:[%s1096_s8 + $0xd4] ss:$20 sps:$4 sm:$0xff]   ;;  %v975_v38 = vld [vmem:[%s1096_s8 + $0x10] ss:$20 sps:$4 sm:$0xff]  }
  0x21   : > { %570 = vmatpush1.bf16.msra.mxu0 %v953_v7  ;;  %v302_v33 = vmax.f32 %v301_v27, 0.0  ;;  %v992_v39 = vld [vmem:[%s1096_s8 + $0xfc] ss:$20 sps:$4 sm:$0xff]   ;;  %v994_v41 = vld [vmem:[%s1096_s8 + $0xf8] ss:$20 sps:$4 sm:$0xff]   ;;  %vm1028_vm0 = vmmov 0  }
  0x22   : > { %571 = vmatprep.subr.bf16.mxu0 %v954_v8  ;;  %v979_v42 = vld [vmem:[%s1096_s8 + $0x38] ss:$20 sps:$4 sm:$0xff]   ;;  %v998_v44 = vld [vmem:[%s1096_s8 + $0x120] ss:$20 sps:$4 sm:$0xff]   ;;  %v987_v46 = vld [vmem:[%s1096_s8 + $0x88] ss:$20 sps:$4 sm:$0xff]  }
  0x23   : > { %611 = vmatpush1.bf16.msra.mxu1 %v978_v24  ;;  %v303_v36 = vpack.c.bf16 %v302_v33, %v302_v33  ;;  %v996_v43 = vld [vmem:[%s1096_s8 + $0x124] ss:$20 sps:$4 sm:$0xff]   ;;  %v983_v45 = vld [vmem:[%s1096_s8 + $0x60] ss:$20 sps:$4 sm:$0xff]   ;;  %v1000_v50 = vld [vmem:[%s1096_s8 + $0x128] ss:$20 sps:$4 sm:$0xff]  }
  0x24   : > { %612 = vmatprep.subr.bf16.mxu1 %v980_v25  ;;  %v991_v47 = vld [vmem:[%s1096_s8 + $0xb0] ss:$20 sps:$4 sm:$0xff]   ;;  %v995_v48 = vld [vmem:[%s1096_s8 + $0xd8] ss:$20 sps:$4 sm:$0xff]   ;;  %v999_v49 = vld [vmem:[%s1096_s8 + $0x100] ss:$20 sps:$4 sm:$0xff]  }
  0x25   : > { %572 = vmatpush1.bf16.msra.mxu0 %v956_v9  ;;  %v304_v51 = vld [vmem:[#allocation2] sm:$0xff]  ;;  %v305_v52 = vld [vmem:[#allocation2 + $0x8] sm:$0xff]  ;;  %v306_v59 = vld [vmem:[#allocation2 + $0x10] sm:$0xff]  ;;  %p877_p7 = scmp.ne.s32.totalorder %s1015_s15, 2 }
  0x26   : > { %573 = vmatprep.subr.bf16.mxu0 %v957_v12  ;;  %v307_v60 = vld [vmem:[#allocation2 + $0x18] sm:$0xff]  ;;  %v308_v3 = vld [vmem:[#allocation2 + $0x20] sm:$0xff] }
  0x27   : > { %613 = vmatpush1.bf16.msra.mxu1 %v982_v28 }
  0x28   : > { %614 = vmatprep.subr.bf16.mxu1 %v984_v30 }
  0x29   : > { %574 = vmatpush1.bf16.msra.mxu0 %v959_v18 }
  0x2a   : > { %575 = vmatprep.subr.bf16.mxu0 %v960_v19 }
  0x2b   : > { %615 = vmatpush1.bf16.msra.mxu1 %v986_v34 }
  0x2c   : > { %616 = vmatprep.subr.bf16.mxu1 %v988_v35 }
  0x2d   : > { %576 = vmatpush1.bf16.msra.mxu0 %v962_v21 }
  0x2e   : > { %577 = vmatprep.subr.bf16.mxu0 %v963_v26 }
  0x2f   : > { %617 = vmatpush1.bf16.msra.mxu1 %v990_v37 }
  0x30   : > { %618 = vmatprep.subr.bf16.mxu1 %v992_v39 }
  0x31   : > { %578 = vmatpush1.bf16.msra.mxu0 %v965_v29 }
  0x32   : > { %579 = vmatprep.subr.bf16.mxu0 %v966_v31 }
  0x33   : > { %619 = vmatpush1.bf16.msra.mxu1 %v994_v41 }
  0x34   : > { %620 = vmatprep.subr.bf16.mxu1 %v996_v43 }
  0x35   : > { %580 = vmatpush1.bf16.msra.mxu0 %v970_v32 }
  0x36   : > { %896 = vmatprep.subr.bf16.mxu0 %v1027_v40 }
  0x37   : > { %621 = vmatpush1.bf16.msra.mxu1 %v998_v44 }
  0x38   : > { %598 = vmatmul.mubr.bf16.vlgmr.msra.gmra.mrb[0].mxu0 %v303_v36 }
  0x39   : > { %897 = vmatpush3.bf16.msra.mxu0 %v975_v38  ;;  %912 = vmatprep.mubr.msk.bf16.mxu0 %vm1028_vm0, %v1027_v40 }
  0x3a   : > { %898 = vmatprep.subr.bf16.mxu0 %v1027_v40  ;;  %639 = vmatmul.mubr.bf16.vlgmr.msra.gmra.mrb[0].mxu1 %v303_v36 }
  0x3d   : > { %899 = vmatpush3.bf16.msra.mxu0 %v979_v42 }
  0x3e   : > { %900 = vmatprep.subr.bf16.mxu0 %v1027_v40 }
  0x41   : > { %901 = vmatpush3.bf16.msra.mxu0 %v983_v45 }
  0x42   : > { %902 = vmatprep.subr.bf16.mxu0 %v1027_v40 }
  0x45   : > { %903 = vmatpush3.bf16.msra.mxu0 %v987_v46 }
  0x46   : > { %904 = vmatprep.subr.bf16.mxu0 %v1027_v40 }
  0x49   : > { %905 = vmatpush3.bf16.msra.mxu0 %v991_v47 }
  0x4a   : > { %906 = vmatprep.subr.bf16.mxu0 %v1027_v40 }
  0x4d   : > { %907 = vmatpush3.bf16.msra.mxu0 %v995_v48 }
  0x4e   : > { %908 = vmatprep.subr.bf16.mxu0 %v1027_v40 }
  0x51   : > { %909 = vmatpush3.bf16.msra.mxu0 %v999_v49 }
  0x52   : > { %910 = vmatprep.subr.bf16.mxu0 %v1027_v40 }
  0x55   : > { %911 = vmatpush3.bf16.msra.mxu0 %v1000_v50 }
  0x58   : > { %913 = vmatmul.mubr.bf16.vlgmr.msra.gmra.mrb[4].mxu0 %v303_v36 }
 0x10b   : > { %v599_v53 = vpop.f32.mrb[0].mxu0 }
 0x10c   : > { %v687_v54 = vadd.f32 %v599_v53, %v304_v51  ;;  %v601_v55 = vpop.f32.mrb[1].mxu0 }
 0x10d   : > { %v688_v56 = vadd.f32 %v601_v55, %v305_v52  ;;  %v603_v57 = vpop.f32.mrb[2].mxu0  ;;  %v640_v61 = vpop.f32.mrb[0].mxu1 }
 0x10e   : > { %692 = vst [vmem:[#allocation2] sm:$0xff] %v687_v54  ;;  %v604_v58 = vpop.f32.mrb[3].mxu0  ;;  %v689_v62 = vadd.f32 %v640_v61, %v306_v59  ;;  %v642_v63 = vpop.f32.mrb[1].mxu1 }
 0x10f   : > { %693 = vst [vmem:[#allocation2 + $0x8] sm:$0xff] %v688_v56  ;;  %v690_v0 = vadd.f32 %v642_v63, %v307_v60  ;;  %v644_v1 = vpop.f32.mrb[2].mxu1 }
 0x110   : > { %694 = vst [vmem:[#allocation2 + $0x10] sm:$0xff] %v689_v62  ;;  %v645_v2 = vpop.f32.mrb[3].mxu1 }
 0x111   : > { %695 = vst [vmem:[#allocation2 + $0x18] sm:$0xff] %v690_v0 }
 0x115   : > { %v701_v9 = vld [vmem:[#allocation2] sm:$0xff] (!%p877_p7) }
 0x116   : > { %v702_v10 = vld [vmem:[#allocation2 + $0x8] sm:$0xff] (!%p877_p7) }
 0x117   : > { %v703_v11 = vld [vmem:[#allocation2 + $0x10] sm:$0xff] (!%p877_p7)  ;;  %v884_v12 = vpack.c.bf16 (!%p877_p7), %v702_v10, %v701_v9 }
 0x118   : > { %v704_v13 = vld [vmem:[#allocation2 + $0x18] sm:$0xff] (!%p877_p7) }
 0x119   : > { %v885_v15 = vpack.c.bf16 (!%p877_p7), %v704_v13, %v703_v11  ;;  %727 = vst [vmem:[%s1173_s4] sm:$0xff] (!%p877_p7), %v884_v12 }
 0x11b   : > { %728 = vst [vmem:[%s1173_s4 + $0x8] sm:$0xff] (!%p877_p7), %v885_v15 }
 0x128   : > { %700 = sbr.rel (%p877_p7) target bundleno = 313 (0x139), region = 44 }
 0x12b   : > { %v681_v4 = vpop.f32.mrb[4].mxu0 }
 0x12c   : > { %v691_v5 = vadd.f32 %v681_v4, %v308_v3  ;;  %v914_v6 = vpop.f32.mrb[5].mxu0 }
 0x12d   : > { %v684_v7 = vpop.f32.mrb[6].mxu0 }
 0x12e   : > { %696 = vst [vmem:[#allocation2 + $0x20] sm:$0xff] %v691_v5  ;;  %v915_v8 = vpop.f32.mrb[7].mxu0 }
 0x135   : > { %v705_v14 = vld [vmem:[#allocation2 + $0x20] sm:$0xff] }
 0x136   : > { %v886_v16 = vpack.c.bf16 %v705_v14, %v705_v14 }
 0x138   : > { %729 = vst [vmem:[%s1173_s4 + $0x10] sm:$0xf] %v886_v16 }
 0x139 PF: > { %s14_s17 = sadd.s32 1, %s1023_s17   ;;  %s1174_s15 = smov %s1019_s16 }
 0x13a   : > { %p11_p8 = scmp.ge.s32.totalorder %s14_s17, 5   ;;  %s1175_s16 = smov %s1177_s18 }
 0x13c   :  { %13 = sbr.rel (!%p11_p8) target bundleno = 2 (0x2), region = 83 }

// kernel: _lambda_.32
= control target key start
LH: loop header
LB: loop body
LE: loop exit
PB: predicated region body
PF: predicated region fallthrough
CT: control target
= control target key end

     0   :  { %s725_s21 = smov 0   ;;  %s727_s22 = smov 0   ;;  %s800_s0 = inlined_call_operand.vmem [shape: bf16[8,384], index: 0, kind: input, shape index: {}]   ;;  %s801_s1 = inlined_call_operand.vmem [shape: f32[1,384], index: 1, kind: input, shape index: {}]   ;;  %s802_s2 = inlined_call_operand.vmem [shape: f32[1,384], index: 2, kind: input, shape index: {}]   ;;  %s803_s3 = inlined_call_operand.vmem [shape: bf16[384,128], index: 3, kind: input, shape index: {}]   ;;  %s804_s4 = inlined_call_operand.vmem [shape: f32[1,128], index: 4, kind: input, shape index: {}]   ;;  %s805_s5 = inlined_call_operand.vmem [shape: f32[1,128], index: 5, kind: input, shape index: {}]   ;;  %s806_s6 = inlined_call_operand.vmem [shape: bf16[8,128], index: 6, kind: output, shape index: {}]  }
   0x1   :  { %s729_s23 = smov 0  }
   0x2 LB: > { %s25_s24 = sadd.s32 1, %s681_s22  ;;  %p578_p0 = scmp.ge.s32.totalorder %s685_s23, 1  ;;  %s685_s23 = sphi %s729_s23, %s16_s23   ;;  %s681_s22 = sphi %s727_s22, %s808_s22   ;;  %s677_s21 = sphi %s725_s21, %s807_s21  }
   0x3   : > { %p26_p1 = scmp.ge.s32.totalorder %s25_s24, 3  ;;  %p256_p2 = scmp.lt.s32.totalorder %s685_s23, 4 }
   0x5   : > { %s810_s24 = smov (%p26_p1, %s25_s24), 0  ;;  %p257_p3 = pnand %p578_p0, %p256_p2 }
   0x6   : > { %p301_p4 = scmp.lt.s32.totalorder (!%p257_p3), %s677_s21, 2  ;;  %s580_s25 = sshll.u32 (!%p257_p3), %s677_s21, 4 }
   0x7   : > { %260 = sbr.rel (%p257_p3) target bundleno = 286 (0x11e), region = 44  ;;  %p314_p5 = scmp.lt.s32.totalorder (!%p257_p3), %s580_s25, 47 }
   0x8   : > { %p582_p6 = scmp.ne.s32.totalorder (!%p257_p3), %s677_s21, 0 }
   0xe   : > { %s748_s26 = scalar_select %p301_p4, %s677_s21, 2 }
   0xf   : > { %s812_s25 = smov (!%p314_p5, %s580_s25), 47  ;;  %327 = sbr.rel (%p582_p6) target bundleno = 22 (0x16), region = 48 }
  0x10   : > { %s579_s27 = sshll.u32 %s748_s26, 2  ;;  %s309_s30 = scalar_lea.vmem %s801_s1, %s748_s26  ;;  %v687_v0 = vmov (!%p582_p6), 0.0  }
  0x11   : > { %s306_s9 = scalar_lea.vmem %s800_s0, %s579_s27  ;;  %s312_s12 = scalar_lea.vmem %s802_s2, %s748_s26  ;;  %328 = vst [vmem:[#allocation2] sm:$0xff] (!%p582_p6), %v687_v0 }
  0x12   : > { %s581_s13 = sshll.u32 %s812_s25, 2 }
  0x13   : > { %s765_s16 = scalar_lea.vmem %s803_s3, %s581_s13 }
  0x16 PF: > { %v655_v1 = vld [vmem:[%s765_s16] sm:$0xff]   ;;  %v688_v2 = vmov 0.0   ;;  %v656_v3 = vld [vmem:[%s765_s16 + $0x8] sm:$0xff]   ;;  %vm689_vm0 = vmmov 0   ;;  %v657_v4 = vld [vmem:[%s765_s16 + $0x10] sm:$0xff]   ;;  %p593_p7 = scmp.ne.s32.totalorder %s677_s21, 2 }
  0x17   : > { %608 = vmatprep.subr.bf16.mxu0 %v688_v2  ;;  %624 = vmatprep.mubr.msk.bf16.mxu0 %vm689_vm0, %v688_v2  ;;  %v658_v5 = vld [vmem:[%s765_s16 + $0x18] sm:$0xff]   ;;  %v329_v6 = vld [vmem:[%s306_s9] sm:$0xf]  ;;  %v660_v11 = vld [vmem:[%s765_s16 + $0x28] sm:$0xff]  }
  0x18   : > { %609 = vmatpush3.bf16.msra.mxu0 %v655_v1  ;;  %v330_v7 = vunpack.c.l.bf16 %v329_v6  ;;  %v659_v8 = vld [vmem:[%s765_s16 + $0x20] sm:$0xff]   ;;  %v661_v14 = vld [vmem:[%s765_s16 + $0x30] sm:$0xff]   ;;  %v662_v16 = vld [vmem:[%s765_s16 + $0x38] sm:$0xff]  }
  0x19   : > { %610 = vmatprep.subr.bf16.mxu0 %v688_v2  ;;  %v583_v9 = vld [vmem:[%s309_s30] ss:$0 sm:$0xff] }
  0x1a   : > { %v338_v10 = vmul.f32 %v583_v9, %v330_v7  ;;  %v584_v12 = vld [vmem:[%s312_s12] ss:$0 sm:$0xff] }
  0x1b   : > { %v349_v18 = vld [vmem:[#allocation2] sm:$0xff] }
  0x1c   : > { %611 = vmatpush3.bf16.msra.mxu0 %v656_v3  ;;  %v346_v13 = vadd.f32 %v584_v12, %v338_v10  ;;  %v594_v25 = vld [vmem:[%s804_s4] ss:$0 sm:$0xff] (!%p593_p7) }
  0x1d   : > { %612 = vmatprep.subr.bf16.mxu0 %v688_v2  ;;  %v595_v26 = vld [vmem:[%s805_s5] ss:$0 sm:$0xff] (!%p593_p7) }
  0x1e   : > { %v347_v15 = vmax.f32 %v346_v13, 0.0 }
  0x20   : > { %613 = vmatpush3.bf16.msra.mxu0 %v657_v4  ;;  %v348_v17 = vpack.c.bf16 %v347_v15, %v347_v15 }
  0x21   : > { %614 = vmatprep.subr.bf16.mxu0 %v688_v2 }
  0x24   : > { %615 = vmatpush3.bf16.msra.mxu0 %v658_v5 }
  0x25   : > { %616 = vmatprep.subr.bf16.mxu0 %v688_v2 }
  0x28   : > { %617 = vmatpush3.bf16.msra.mxu0 %v659_v8 }
  0x29   : > { %618 = vmatprep.subr.bf16.mxu0 %v688_v2 }
  0x2c   : > { %619 = vmatpush3.bf16.msra.mxu0 %v660_v11 }
  0x2d   : > { %620 = vmatprep.subr.bf16.mxu0 %v688_v2 }
  0x30   : > { %621 = vmatpush3.bf16.msra.mxu0 %v661_v14 }
  0x31   : > { %622 = vmatprep.subr.bf16.mxu0 %v688_v2 }
  0x34   : > { %623 = vmatpush3.bf16.msra.mxu0 %v662_v16 }
  0x37   : > { %625 = vmatmul.mubr.bf16.vlgmr.msra.gmra.mrb[0].mxu0 %v348_v17 }
 0x107   : > { %459 = sbr.rel (%p593_p7) target bundleno = 286 (0x11e), region = 52 }
 0x10a   : > { %v448_v19 = vpop.f32.mrb[0].mxu0 }
 0x10b   : > { %v454_v20 = vadd.f32 %v448_v19, %v349_v18  ;;  %v626_v21 = vpop.f32.mrb[1].mxu0 }
 0x10c   : > { %v451_v22 = vpop.f32.mrb[2].mxu0 }
 0x10d   : > { %455 = vst [vmem:[#allocation2] sm:$0xff] %v454_v20  ;;  %v627_v23 = vpop.f32.mrb[3].mxu0 }
 0x114   : > { %v460_v24 = vld [vmem:[#allocation2] sm:$0xff] }
 0x115   : > { %v468_v27 = vmul.f32 %v594_v25, %v460_v24 }
 0x117   : > { %v476_v28 = vadd.f32 %v595_v26, %v468_v27 }
 0x119   : > { %v477_v29 = vmax.f32 %v476_v28, 0.0 }
 0x11b   : > { %v478_v30 = vpack.c.bf16 %v477_v29, %v477_v29 }
 0x11d   : > { %479 = vst [vmem:[%s806_s6] sm:$0xf] %v478_v30 }
 0x11e PF: > { %s16_s23 = sadd.s32 1, %s685_s23   ;;  %s807_s21 = smov %s681_s22 }
 0x11f   : > { %p13_p8 = scmp.ge.s32.totalorder %s16_s23, 5   ;;  %s808_s22 = smov %s810_s24 }
 0x121   :  { %15 = sbr.rel (!%p13_p8) target bundleno = 2 (0x2), region = 91 }

// kernel: _lambda_.34
= control target key start
LH: loop header
LB: loop body
LE: loop exit
PB: predicated region body
PF: predicated region fallthrough
CT: control target
= control target key end

     0   :  { %v598_v1 = vmov 0   ;;  %v599_v32 = vmov 0.0   ;;  %vm600_vm0 = vmmov 0   ;;  %s759_s1 = inlined_call_operand.vmem [shape: bf16[128,640], index: 1, kind: input, shape index: {}]   ;;  %s760_s0 = inlined_call_operand.vmem [shape: bf16[8,128], index: 0, kind: input, shape index: {}]   ;;  %s761_s2 = inlined_call_operand.vmem [shape: bf16[8,512], index: 2, kind: input, shape index: {}]   ;;  %s762_s3 = inlined_call_operand.vmem [shape: bf16[8,640], index: 3, kind: output, shape index: {}]  }
   0x1   :  { %v542_v0 = vld [vmem:[%s759_s1 + $0x4] ss:$20 sps:$4 sm:$0xff]   ;;  %318 = vmatprep.mubr.bf16.mxu0 %v598_v1  ;;  %359 = vmatprep.mubr.bf16.mxu1 %v598_v1  ;;  %v544_v2 = vld [vmem:[%s759_s1] ss:$20 sps:$4 sm:$0xff]   ;;  %v547_v4 = vld [vmem:[%s759_s1 + $0x28] ss:$20 sps:$4 sm:$0xff]  }
   0x2   :  { %286 = vmatprep.subr.bf16.mxu0 %v542_v0  ;;  %v545_v3 = vld [vmem:[%s759_s1 + $0x2c] ss:$20 sps:$4 sm:$0xff]   ;;  %v548_v5 = vld [vmem:[%s759_s1 + $0x54] ss:$20 sps:$4 sm:$0xff]   ;;  %v550_v6 = vld [vmem:[%s759_s1 + $0x50] ss:$20 sps:$4 sm:$0xff]  }
   0x3   :  { %287 = vmatpush1.bf16.msra.mxu0 %v544_v2  ;;  %v551_v7 = vld [vmem:[%s759_s1 + $0x7c] ss:$20 sps:$4 sm:$0xff]   ;;  %v563_v8 = vld [vmem:[%s759_s1 + $0xc] ss:$20 sps:$4 sm:$0xff]   ;;  %v554_v11 = vld [vmem:[%s759_s1 + $0xa4] ss:$20 sps:$4 sm:$0xff]  }
   0x4   :  { %288 = vmatprep.subr.bf16.mxu0 %v545_v3  ;;  %v565_v9 = vld [vmem:[%s759_s1 + $0x8] ss:$20 sps:$4 sm:$0xff]   ;;  %v553_v10 = vld [vmem:[%s759_s1 + $0x78] ss:$20 sps:$4 sm:$0xff]   ;;  %327 = vmatprep.subr.bf16.mxu1 %v563_v8  ;;  %v571_v13 = vld [vmem:[%s759_s1 + $0x30] ss:$20 sps:$4 sm:$0xff]  }
   0x5   :  { %v569_v12 = vld [vmem:[%s759_s1 + $0x34] ss:$20 sps:$4 sm:$0xff]   ;;  %328 = vmatpush1.bf16.msra.mxu1 %v565_v9  ;;  %v573_v15 = vld [vmem:[%s759_s1 + $0x5c] ss:$20 sps:$4 sm:$0xff]   ;;  %v557_v16 = vld [vmem:[%s759_s1 + $0xcc] ss:$20 sps:$4 sm:$0xff]  }
   0x6   :  { %329 = vmatprep.subr.bf16.mxu1 %v569_v12  ;;  %v556_v14 = vld [vmem:[%s759_s1 + $0xa0] ss:$20 sps:$4 sm:$0xff]   ;;  %v575_v17 = vld [vmem:[%s759_s1 + $0x58] ss:$20 sps:$4 sm:$0xff]   ;;  %v559_v19 = vld [vmem:[%s759_s1 + $0xc8] ss:$20 sps:$4 sm:$0xff]  }
   0x7   :  { %289 = vmatpush1.bf16.msra.mxu0 %v547_v4  ;;  %v577_v18 = vld [vmem:[%s759_s1 + $0x84] ss:$20 sps:$4 sm:$0xff]   ;;  %v560_v20 = vld [vmem:[%s759_s1 + $0xf4] ss:$20 sps:$4 sm:$0xff]   ;;  %v581_v22 = vld [vmem:[%s759_s1 + $0xac] ss:$20 sps:$4 sm:$0xff]  }
   0x8   :  { %290 = vmatprep.subr.bf16.mxu0 %v548_v5  ;;  %v579_v21 = vld [vmem:[%s759_s1 + $0x80] ss:$20 sps:$4 sm:$0xff]   ;;  %v562_v23 = vld [vmem:[%s759_s1 + $0xf0] ss:$20 sps:$4 sm:$0xff]   ;;  %v583_v25 = vld [vmem:[%s759_s1 + $0xa8] ss:$20 sps:$4 sm:$0xff]  }
   0x9   :  { %330 = vmatpush1.bf16.msra.mxu1 %v571_v13  ;;  %v566_v24 = vld [vmem:[%s759_s1 + $0x11c] ss:$20 sps:$4 sm:$0xff]   ;;  %v585_v26 = vld [vmem:[%s759_s1 + $0xd4] ss:$20 sps:$4 sm:$0xff]   ;;  %v568_v27 = vld [vmem:[%s759_s1 + $0x118] ss:$20 sps:$4 sm:$0xff]  }
   0xa   :  { %331 = vmatprep.subr.bf16.mxu1 %v573_v15  ;;  %v587_v28 = vld [vmem:[%s759_s1 + $0xd0] ss:$20 sps:$4 sm:$0xff]   ;;  %v24_v30 = vld [vmem:[%s760_s0] sm:$0xf]  ;;  %v591_v33 = vld [vmem:[%s759_s1 + $0xf8] ss:$20 sps:$4 sm:$0xff]  }
   0xb   :  { %291 = vmatpush1.bf16.msra.mxu0 %v550_v6  ;;  %v589_v29 = vld [vmem:[%s759_s1 + $0xfc] ss:$20 sps:$4 sm:$0xff]   ;;  %v593_v34 = vld [vmem:[%s759_s1 + $0x124] ss:$20 sps:$4 sm:$0xff]   ;;  %v595_v36 = vld [vmem:[%s759_s1 + $0x120] ss:$20 sps:$4 sm:$0xff]  }
   0xc   :  { %292 = vmatprep.subr.bf16.mxu0 %v551_v7  ;;  %v572_v31 = vld [vmem:[%s759_s1 + $0x10] ss:$20 sps:$4 sm:$0xff]   ;;  %v576_v35 = vld [vmem:[%s759_s1 + $0x38] ss:$20 sps:$4 sm:$0xff]   ;;  %v580_v37 = vld [vmem:[%s759_s1 + $0x60] ss:$20 sps:$4 sm:$0xff]  }
   0xd   :  { %332 = vmatpush1.bf16.msra.mxu1 %v575_v17  ;;  %v584_v38 = vld [vmem:[%s759_s1 + $0x88] ss:$20 sps:$4 sm:$0xff]   ;;  %v588_v39 = vld [vmem:[%s759_s1 + $0xb0] ss:$20 sps:$4 sm:$0xff]   ;;  %v592_v40 = vld [vmem:[%s759_s1 + $0xd8] ss:$20 sps:$4 sm:$0xff]  }
   0xe   :  { %333 = vmatprep.subr.bf16.mxu1 %v577_v18  ;;  %v596_v41 = vld [vmem:[%s759_s1 + $0x100] ss:$20 sps:$4 sm:$0xff]   ;;  %v597_v42 = vld [vmem:[%s759_s1 + $0x128] ss:$20 sps:$4 sm:$0xff]  }
   0xf   :  { %293 = vmatpush1.bf16.msra.mxu0 %v553_v10  ;;  %v426_v43 = vld [vmem:[%s761_s2] sm:$0xff]  ;;  %v427_v53 = vld [vmem:[%s761_s2 + $0x8] sm:$0xff] }
  0x10   :  { %294 = vmatprep.subr.bf16.mxu0 %v554_v11  ;;  %v428_v44 = vunpack.c.l.bf16 %v426_v43  ;;  %v429_v45 = vunpack.c.h.bf16 %v426_v43  ;;  %v430_v54 = vunpack.c.l.bf16 %v427_v53  ;;  %v431_v55 = vunpack.c.h.bf16 %v427_v53 }
  0x11   :  { %334 = vmatpush1.bf16.msra.mxu1 %v579_v21 }
  0x12   :  { %335 = vmatprep.subr.bf16.mxu1 %v581_v22 }
  0x13   :  { %295 = vmatpush1.bf16.msra.mxu0 %v556_v14 }
  0x14   :  { %296 = vmatprep.subr.bf16.mxu0 %v557_v16 }
  0x15   :  { %336 = vmatpush1.bf16.msra.mxu1 %v583_v25 }
  0x16   :  { %337 = vmatprep.subr.bf16.mxu1 %v585_v26 }
  0x17   :  { %297 = vmatpush1.bf16.msra.mxu0 %v559_v19 }
  0x18   :  { %298 = vmatprep.subr.bf16.mxu0 %v560_v20 }
  0x19   :  { %338 = vmatpush1.bf16.msra.mxu1 %v587_v28 }
  0x1a   :  { %339 = vmatprep.subr.bf16.mxu1 %v589_v29 }
  0x1b   :  { %299 = vmatpush1.bf16.msra.mxu0 %v562_v23 }
  0x1c   :  { %300 = vmatprep.subr.bf16.mxu0 %v566_v24 }
  0x1d   :  { %340 = vmatpush1.bf16.msra.mxu1 %v591_v33 }
  0x1e   :  { %341 = vmatprep.subr.bf16.mxu1 %v593_v34 }
  0x1f   :  { %301 = vmatpush1.bf16.msra.mxu0 %v568_v27 }
  0x20   :  { %519 = vmatprep.subr.bf16.mxu0 %v599_v32 }
  0x21   :  { %342 = vmatpush1.bf16.msra.mxu1 %v595_v36 }
  0x22   :  { %319 = vmatmul.mubr.bf16.vlgmr.msra.gmra.mrb[0].mxu0 %v24_v30 }
  0x23   :  { %520 = vmatpush3.bf16.msra.mxu0 %v572_v31  ;;  %535 = vmatprep.mubr.msk.bf16.mxu0 %vm600_vm0, %v599_v32 }
  0x24   :  { %521 = vmatprep.subr.bf16.mxu0 %v599_v32  ;;  %360 = vmatmul.mubr.bf16.vlgmr.msra.gmra.mrb[0].mxu1 %v24_v30 }
  0x27   :  { %522 = vmatpush3.bf16.msra.mxu0 %v576_v35 }
  0x28   :  { %523 = vmatprep.subr.bf16.mxu0 %v599_v32 }
  0x2b   :  { %524 = vmatpush3.bf16.msra.mxu0 %v580_v37 }
  0x2c   :  { %525 = vmatprep.subr.bf16.mxu0 %v599_v32 }
  0x2f   :  { %526 = vmatpush3.bf16.msra.mxu0 %v584_v38 }
  0x30   :  { %527 = vmatprep.subr.bf16.mxu0 %v599_v32 }
  0x33   :  { %528 = vmatpush3.bf16.msra.mxu0 %v588_v39 }
  0x34   :  { %529 = vmatprep.subr.bf16.mxu0 %v599_v32 }
  0x37   :  { %530 = vmatpush3.bf16.msra.mxu0 %v592_v40 }
  0x38   :  { %531 = vmatprep.subr.bf16.mxu0 %v599_v32 }
  0x3b   :  { %532 = vmatpush3.bf16.msra.mxu0 %v596_v41 }
  0x3c   :  { %533 = vmatprep.subr.bf16.mxu0 %v599_v32 }
  0x3f   :  { %534 = vmatpush3.bf16.msra.mxu0 %v597_v42 }
  0x42   :  { %536 = vmatmul.mubr.bf16.vlgmr.msra.gmra.mrb[4].mxu0 %v24_v30 }
  0xf5   :  { %v320_v46 = vpop.f32.mrb[0].mxu0 }
  0xf6   :  { %v432_v47 = vadd.f32 %v428_v44, %v320_v46  ;;  %v322_v48 = vpop.f32.mrb[1].mxu0 }
  0xf7   :  { %v433_v49 = vadd.f32 %v429_v45, %v322_v48  ;;  %v324_v50 = vpop.f32.mrb[2].mxu0  ;;  %v361_v56 = vpop.f32.mrb[0].mxu1 }
  0xf8   :  { %v325_v51 = vpop.f32.mrb[3].mxu0  ;;  %v434_v57 = vadd.f32 %v430_v54, %v361_v56  ;;  %v363_v58 = vpop.f32.mrb[1].mxu1 }
  0xf9   :  { %v507_v52 = vpack.c.bf16 %v433_v49, %v432_v47  ;;  %v435_v59 = vadd.f32 %v431_v55, %v363_v58  ;;  %v365_v60 = vpop.f32.mrb[2].mxu1 }
  0xfa   :  { %v366_v61 = vpop.f32.mrb[3].mxu1 }
  0xfb   :  { %457 = vst [vmem:[%s762_s3] sm:$0xff] %v507_v52  ;;  %v508_v62 = vpack.c.bf16 %v435_v59, %v434_v57 }
  0xfd   :  { %458 = vst [vmem:[%s762_s3 + $0x8] sm:$0xff] %v508_v62 }
 0x115   :  { %v402_v63 = vpop.f32.mrb[4].mxu0 }
 0x116   :  { %v509_v0 = vpack.c.bf16 %v402_v63, %v402_v63  ;;  %v537_v1 = vpop.f32.mrb[5].mxu0 }
 0x117   :  { %v405_v2 = vpop.f32.mrb[6].mxu0 }
 0x118   :  { %459 = vst [vmem:[%s762_s3 + $0x10] sm:$0xf] %v509_v0  ;;  %v538_v3 = vpop.f32.mrb[7].mxu0 }

// kernel: _lambda_.35
= control target key start
LH: loop header
LB: loop body
LE: loop exit
PB: predicated region body
PF: predicated region fallthrough
CT: control target
= control target key end

     0   :  { %s682_s18 = smov 0   ;;  %s684_s19 = smov 0   ;;  %s754_s0 = inlined_call_operand.vmem [shape: bf16[8,640], index: 0, kind: input, shape index: {}]   ;;  %s755_s1 = inlined_call_operand.vmem [shape: f32[1,640], index: 1, kind: input, shape index: {}]   ;;  %s756_s2 = inlined_call_operand.vmem [shape: f32[1,640], index: 2, kind: input, shape index: {}]   ;;  %s757_s3 = inlined_call_operand.vmem [shape: bf16[640,128], index: 3, kind: input, shape index: {}]   ;;  %s758_s4 = inlined_call_operand.vmem [shape: f32[1,128], index: 4, kind: input, shape index: {}]   ;;  %s759_s5 = inlined_call_operand.vmem [shape: f32[8,128], index: 5, kind: output, shape index: {}]  }
   0x1   :  { %s686_s20 = smov 0  }
   0x2 LB: > { %s24_s21 = sadd.s32 1, %s643_s19  ;;  %p541_p0 = scmp.ge.s32.totalorder %s647_s20, 1  ;;  %s647_s20 = sphi %s686_s20, %s15_s20   ;;  %s643_s19 = sphi %s684_s19, %s761_s19   ;;  %s639_s18 = sphi %s682_s18, %s760_s18  }
   0x3   : > { %p25_p1 = scmp.ge.s32.totalorder %s24_s21, 5  ;;  %p231_p2 = scmp.lt.s32.totalorder %s647_s20, 6 }
   0x5   : > { %s763_s21 = smov (%p25_p1, %s24_s21), 0  ;;  %p232_p3 = pnand %p541_p0, %p231_p2 }
   0x6   : > { %p274_p4 = scmp.lt.s32.totalorder (!%p232_p3), %s639_s18, 4  ;;  %s543_s22 = sshll.u32 (!%p232_p3), %s639_s18, 4 }
   0x7   : > { %235 = sbr.rel (%p232_p3) target bundleno = 280 (0x118), region = 40  ;;  %p287_p5 = scmp.lt.s32.totalorder (!%p232_p3), %s543_s22, 79 }
   0x8   : > { %p545_p6 = scmp.ne.s32.totalorder (!%p232_p3), %s639_s18, 0 }
   0xe   : > { %s705_s23 = scalar_select %p274_p4, %s639_s18, 4 }
   0xf   : > { %s765_s22 = smov (!%p287_p5, %s543_s22), 79  ;;  %300 = sbr.rel (%p545_p6) target bundleno = 22 (0x16), region = 44 }
  0x10   : > { %s542_s24 = sshll.u32 %s705_s23, 2  ;;  %s282_s27 = scalar_lea.vmem %s755_s1, %s705_s23  ;;  %v649_v0 = vmov (!%p545_p6), 0.0  }
  0x11   : > { %s279_s30 = scalar_lea.vmem %s754_s0, %s542_s24  ;;  %s285_s8 = scalar_lea.vmem %s756_s2, %s705_s23  ;;  %301 = vst [vmem:[#allocation2] sm:$0xff] (!%p545_p6), %v649_v0 }
  0x12   : > { %s544_s9 = sshll.u32 %s765_s22, 2 }
  0x13   : > { %s722_s12 = scalar_lea.vmem %s757_s3, %s544_s9 }
  0x16 PF: > { %v617_v1 = vld [vmem:[%s722_s12] sm:$0xff]   ;;  %v650_v2 = vmov 0.0   ;;  %v618_v3 = vld [vmem:[%s722_s12 + $0x8] sm:$0xff]   ;;  %vm651_vm0 = vmmov 0   ;;  %v619_v4 = vld [vmem:[%s722_s12 + $0x10] sm:$0xff]   ;;  %p556_p7 = scmp.ne.s32.totalorder %s639_s18, 4 }
  0x17   : > { %570 = vmatprep.subr.bf16.mxu0 %v650_v2  ;;  %586 = vmatprep.mubr.msk.bf16.mxu0 %vm651_vm0, %v650_v2  ;;  %v620_v5 = vld [vmem:[%s722_s12 + $0x18] sm:$0xff]   ;;  %v302_v6 = vld [vmem:[%s279_s30] sm:$0xf]  ;;  %v622_v11 = vld [vmem:[%s722_s12 + $0x28] sm:$0xff]  }
  0x18   : > { %571 = vmatpush3.bf16.msra.mxu0 %v617_v1  ;;  %v303_v7 = vunpack.c.l.bf16 %v302_v6  ;;  %v621_v8 = vld [vmem:[%s722_s12 + $0x20] sm:$0xff]   ;;  %v623_v14 = vld [vmem:[%s722_s12 + $0x30] sm:$0xff]   ;;  %v624_v16 = vld [vmem:[%s722_s12 + $0x38] sm:$0xff]  }
  0x19   : > { %572 = vmatprep.subr.bf16.mxu0 %v650_v2  ;;  %v546_v9 = vld [vmem:[%s282_s27] ss:$0 sm:$0xff] }
  0x1a   : > { %v311_v10 = vmul.f32 %v546_v9, %v303_v7  ;;  %v547_v12 = vld [vmem:[%s285_s8] ss:$0 sm:$0xff] }
  0x1b   : > { %v322_v18 = vld [vmem:[#allocation2] sm:$0xff] }
  0x1c   : > { %573 = vmatpush3.bf16.msra.mxu0 %v618_v3  ;;  %v319_v13 = vadd.f32 %v547_v12, %v311_v10  ;;  %v557_v25 = vld [vmem:[%s758_s4] ss:$0 sm:$0xff] (!%p556_p7) }
  0x1d   : > { %574 = vmatprep.subr.bf16.mxu0 %v650_v2 }
  0x1e   : > { %v320_v15 = vmax.f32 %v319_v13, 0.0 }
  0x20   : > { %575 = vmatpush3.bf16.msra.mxu0 %v619_v4  ;;  %v321_v17 = vpack.c.bf16 %v320_v15, %v320_v15 }
  0x21   : > { %576 = vmatprep.subr.bf16.mxu0 %v650_v2 }
  0x24   : > { %577 = vmatpush3.bf16.msra.mxu0 %v620_v5 }
  0x25   : > { %578 = vmatprep.subr.bf16.mxu0 %v650_v2 }
  0x28   : > { %579 = vmatpush3.bf16.msra.mxu0 %v621_v8 }
  0x29   : > { %580 = vmatprep.subr.bf16.mxu0 %v650_v2 }
  0x2c   : > { %581 = vmatpush3.bf16.msra.mxu0 %v622_v11 }
  0x2d   : > { %582 = vmatprep.subr.bf16.mxu0 %v650_v2 }
  0x30   : > { %583 = vmatpush3.bf16.msra.mxu0 %v623_v14 }
  0x31   : > { %584 = vmatprep.subr.bf16.mxu0 %v650_v2 }
  0x34   : > { %585 = vmatpush3.bf16.msra.mxu0 %v624_v16 }
  0x37   : > { %587 = vmatmul.mubr.bf16.vlgmr.msra.gmra.mrb[0].mxu0 %v321_v17 }
 0x107   : > { %432 = sbr.rel (%p556_p7) target bundleno = 280 (0x118), region = 48 }
 0x10a   : > { %v421_v19 = vpop.f32.mrb[0].mxu0 }
 0x10b   : > { %v427_v20 = vadd.f32 %v421_v19, %v322_v18  ;;  %v588_v21 = vpop.f32.mrb[1].mxu0 }
 0x10c   : > { %v424_v22 = vpop.f32.mrb[2].mxu0 }
 0x10d   : > { %428 = vst [vmem:[#allocation2] sm:$0xff] %v427_v20  ;;  %v589_v23 = vpop.f32.mrb[3].mxu0 }
 0x114   : > { %v433_v24 = vld [vmem:[#allocation2] sm:$0xff] }
 0x115   : > { %v441_v26 = vadd.f32 %v557_v25, %v433_v24 }
 0x117   : > { %442 = vst [vmem:[%s759_s5] sm:$0xff] %v441_v26 }
 0x118 PF: > { %s15_s20 = sadd.s32 1, %s647_s20   ;;  %s760_s18 = smov %s643_s19 }
 0x119   : > { %p12_p8 = scmp.ge.s32.totalorder %s15_s20, 7   ;;  %s761_s19 = smov %s763_s21 }
 0x11b   :  { %14 = sbr.rel (!%p12_p8) target bundleno = 2 (0x2), region = 87 }

// kernel: _lambda_.33
= control target key start
LH: loop header
LB: loop body
LE: loop exit
PB: predicated region body
PF: predicated region fallthrough
CT: control target
= control target key end

     0   :  { %vm611_vm0 = vsmask.f32 5376  ;;  %vm194_vm1 = vsmask.f32 7424  ;;  %vm753_vm2 = vcmask 1044480   ;;  %vm477_vm3 = vcmask 1045504   ;;  %s2308_s1 = inlined_call_operand.vmem [shape: bf16[9,128,128], index: 1, kind: input, shape index: {}]   ;;  %s2309_s0 = inlined_call_operand.vmem [shape: bf16[48,128], index: 0, kind: input, shape index: {}]   ;;  %s2310_s2 = inlined_call_operand.vmem [shape: f32[1,128], index: 2, kind: input, shape index: {}]   ;;  %s2311_s3 = inlined_call_operand.vmem [shape: f32[1,128], index: 3, kind: input, shape index: {}]   ;;  %s2312_s4 = inlined_call_operand.vmem [shape: bf16[32,128], index: 4, kind: output, shape index: {}]  }
   0x1   :  { %v1865_v0 = vld [vmem:[%s2308_s1] sm:$0xff]   ;;  %v1867_v2 = vld [vmem:[%s2308_s1 + $0x8] sm:$0xff]   ;;  %v1869_v4 = vld [vmem:[%s2308_s1 + $0x10] sm:$0xff]   ;;  %vm343_vm4 = vcmask 1046528  }
   0x2   :  { %v1866_v1 = vld [vmem:[%s2308_s1 + $0x100] sm:$0xff]   ;;  %1653 = vmatprep.subr.bf16.mxu1 %v1865_v0  ;;  %v1868_v3 = vld [vmem:[%s2308_s1 + $0x108] sm:$0xff]   ;;  %v1870_v5 = vld [vmem:[%s2308_s1 + $0x110] sm:$0xff]  }
   0x3   :  { %1733 = vmatprep.subr.bf16.mxu0 %v1866_v1  ;;  %1654 = vmatpush3.bf16.msra.mxu1 %v1865_v0  ;;  %v1871_v6 = vld [vmem:[%s2308_s1 + $0x18] sm:$0xff]   ;;  %v1873_v8 = vld [vmem:[%s2308_s1 + $0x20] sm:$0xff]   ;;  %v1875_v10 = vld [vmem:[%s2308_s1 + $0x28] sm:$0xff]  }
   0x4   :  { %1734 = vmatpush3.bf16.msra.mxu0 %v1866_v1  ;;  %1655 = vmatprep.subr.bf16.mxu1 %v1867_v2  ;;  %v1872_v7 = vld [vmem:[%s2308_s1 + $0x118] sm:$0xff]   ;;  %v1874_v9 = vld [vmem:[%s2308_s1 + $0x120] sm:$0xff]   ;;  %v1876_v13 = vld [vmem:[%s2308_s1 + $0x128] sm:$0xff]  }
   0x5   :  { %1735 = vmatprep.subr.bf16.mxu0 %v1868_v3  ;;  %v23_v11 = vld [vmem:[%s2309_s0] sm:$0xf]  ;;  %v2007_v12 = vld [vmem:[%s2309_s0 + $0x4] sm:$0xf]  ;;  %v2018_v15 = vld [vmem:[%s2309_s0 + $0x8] sm:$0xf] }
   0x6   :  { %v2013_v14 = vcombine.low %v23_v11, %v2007_v12  ;;  %v26_v16 = vld [vmem:[%s2309_s0 + $0xc] sm:$0xf]  ;;  %v1877_v17 = vld [vmem:[%s2308_s1 + $0x30] sm:$0xff]   ;;  %v1879_v34 = vld [vmem:[%s2308_s1 + $0x38] sm:$0xff]   ;;  %v2090_v57 = vcombine.low %v2007_v12, %v2018_v15 }
   0x7   :  { %1656 = vmatpush3.bf16.msra.mxu1 %v1867_v2  ;;  %v1878_v18 = vld [vmem:[%s2308_s1 + $0x130] sm:$0xff]   ;;  %v2031_v19 = vcombine.low %v2018_v15, %v26_v16  ;;  %v1880_v35 = vld [vmem:[%s2308_s1 + $0x138] sm:$0xff]   ;;  %v1882_v41 = vld [vmem:[%s2308_s1 + $0x40] sm:$0xff]  }
   0x8   :  { %1736 = vmatpush3.bf16.msra.mxu0 %v1868_v3  ;;  %1657 = vmatprep.subr.bf16.mxu1 %v1869_v4  ;;  %v196_v20 = vshrl.u32 %v2013_v14, 16  ;;  %v198_v21 = vshll.u32 %v2013_v14, 16  ;;  %v27_v22 = vld [vmem:[%s2309_s0 + $0x10] sm:$0xf]  ;;  %v1884_v43 = vld [vmem:[%s2308_s1 + $0x140] sm:$0xff]   ;;  %v754_v46 = vrot.slane %v2013_v14, 3 }
   0x9   :  { %1737 = vmatprep.subr.bf16.mxu0 %v1870_v5  ;;  %1669 = vmatprep.mubr.bf16.mxu1 %v2013_v14  ;;  %v2038_v23 = vcombine.low %v27_v22, %v27_v22  ;;  %v2040_v24 = vcombine.low %v26_v16, %v27_v22  ;;  %v203_v25 = vshll.u32 %v2031_v19, 16  ;;  %v207_v26 = vshrl.u32 %v2031_v19, 16  ;;  %v1886_v49 = vld [vmem:[%s2308_s1 + $0x48] sm:$0xff]   ;;  %v1888_v54 = vld [vmem:[%s2308_s1 + $0x50] sm:$0xff]   ;;  %v1890_v63 = vld [vmem:[%s2308_s1 + $0x58] sm:$0xff]  }
   0xa   :  { %v612_v27 = vrot.slane %v196_v20, 2  ;;  %v613_v28 = vrot.slane %v198_v21, 3  ;;  %v200_v39 = vrot.slane %v198_v21, 1  ;;  %v755_v47 = vrot.slane %v2031_v19, 3  ;;  %v1887_v50 = vld [vmem:[%s2308_s1 + $0x148] sm:$0xff]   ;;  %v1889_v56 = vld [vmem:[%s2308_s1 + $0x150] sm:$0xff]  }
   0xb   :  { %1658 = vmatpush3.bf16.msra.mxu1 %v1869_v4  ;;  %v211_v29 = vshll.u32 %v2038_v23, 16  ;;  %v619_v30 = vshrl.u32 %v2038_v23, 16  ;;  %v615_v32 = vrot.slane %v207_v26, 2  ;;  %v616_v33 = vrot.slane %v203_v25, 3  ;;  %v1891_v1 = vld [vmem:[%s2308_s1 + $0x158] sm:$0xff]   ;;  %v1897_v11 = vld [vmem:[%s2308_s1 + $0x170] sm:$0xff]  }
   0xc   :  { %1738 = vmatpush3.bf16.msra.mxu0 %v1870_v5  ;;  %1659 = vmatprep.subr.bf16.mxu1 %v1871_v6  ;;  %v614_v31 = vor.u32 %v613_v28, %v612_v27  ;;  %v201_v44 = vor.u32 %v200_v39, %v196_v20  ;;  %v2063_v45 = vrot.slane %v203_v25, 1  ;;  %v756_v52 = vsel %vm753_vm2, %v754_v46, %v755_v47  ;;  %v1892_v5 = vld [vmem:[%s2308_s1 + $0x60] sm:$0xff]   ;;  %v1898_v12 = vld [vmem:[%s2308_s1 + $0x78] sm:$0xff]   ;;  %v1902_v27 = vld [vmem:[%s2308_s1 + $0x88] sm:$0xff]  }
   0xd   :  { %1739 = vmatprep.subr.bf16.mxu0 %v1872_v7  ;;  %v621_v36 = vrot.slane %v619_v30, 2  ;;  %v622_v37 = vrot.slane %v211_v29, 3  ;;  %v617_v38 = vor.u32 %v616_v33, %v615_v32  ;;  %v478_v53 = vrot.slane %v2013_v14, 2  ;;  %v1901_v20 = vld [vmem:[%s2308_s1 + $0x180] sm:$0xff]   ;;  %v1904_v30 = vld [vmem:[%s2308_s1 + $0x90] sm:$0xff]   ;;  %v1907_v39 = vld [vmem:[%s2308_s1 + $0x198] sm:$0xff]  }
   0xe   :  { %v206_v51 = vsel %vm194_vm1, %v201_v44, %v2063_v45  ;;  %v479_v55 = vrot.slane %v2031_v19, 2  ;;  %v481_v58 = vrot.slane %v2038_v23, 2  ;;  %v1021_v61 = vshrl.u32 %v2090_v57, 16  ;;  %v1905_v32 = vld [vmem:[%s2308_s1 + $0x190] sm:$0xff]   ;;  %v1910_v44 = vld [vmem:[%s2308_s1 + $0xa8] sm:$0xff]  }
   0xf   :  { %1660 = vmatpush3.bf16.msra.mxu1 %v1871_v6  ;;  %v618_v40 = vsel %vm611_vm0, %v614_v31, %v617_v38  ;;  %v623_v42 = vor.u32 %v622_v37, %v621_v36  ;;  %v1023_v62 = vshll.u32 %v2090_v57, 16  ;;  %v1028_v0 = vshll.u32 %v2040_v24, 16  ;;  %v1893_v6 = vld [vmem:[%s2308_s1 + $0x160] sm:$0xff]   ;;  %v1935_v31 = vld [vmem:[%s2309_s0 + $0x14] ss:$0 sps:$4 sm:$0xff]   ;;  %v1906_v37 = vld [vmem:[%s2308_s1 + $0x98] sm:$0xff]  }
  0x10   :  { %1740 = vmatpush3.bf16.msra.mxu0 %v1872_v7  ;;  %1661 = vmatprep.subr.bf16.mxu1 %v1873_v8  ;;  %v2093_v59 = vsel %vm477_vm3, %v478_v53, %v479_v55  ;;  %v2095_v60 = vsel %vm477_vm3, %v479_v55, %v481_v58  ;;  %v209_v15 = vor.u32 %v207_v26, %v2063_v45  ;;  %v213_v16 = vrot.slane %v211_v29, 1  ;;  %v1911_v45 = vld [vmem:[%s2308_s1 + $0x1a8] sm:$0xff]   ;;  %v1912_v46 = vld [vmem:[%s2308_s1 + $0xb0] sm:$0xff]   ;;  %v1925_v58 = vld [vmem:[%s2308_s1 + $0x1d8] sm:$0xff]  }
  0x11   :  { %1741 = vmatprep.subr.bf16.mxu0 %v1874_v9  ;;  %1749 = vmatprep.mubr.bf16.mxu0 %v618_v40  ;;  %v624_v48 = vsel %vm611_vm0, %v617_v38, %v623_v42  ;;  %v1025_v2 = vrot.slane %v1023_v62, 1  ;;  %v1030_v3 = vrot.slane %v1028_v0, 1  ;;  %v344_v21 = vrot.slane %v2013_v14, 1  ;;  %v1903_v14 = vld [vmem:[%s2308_s1 + $0x188] sm:$0xff]   ;;  %v1908_v42 = vld [vmem:[%s2308_s1 + $0xa0] sm:$0xff]   ;;  %v1923_v55 = vld [vmem:[%s2308_s1 + $0x1d0] sm:$0xff]  }
  0x12   :  { %v345_v22 = vrot.slane %v2031_v19, 1  ;;  %v214_v25 = vsel %vm194_vm1, %v209_v15, %v213_v16  ;;  %v1032_v29 = vshrl.u32 %v2040_v24, 16  ;;  %v1169_v33 = vrot.slane %v2040_v24, 1  ;;  %v1928_v62 = vld [vmem:[%s2308_s1 + $0xe8] sm:$0xff]   ;;  %v1930_v0 = vld [vmem:[%s2308_s1 + $0xf0] sm:$0xff]  }
  0x13   :  { %1662 = vmatpush3.bf16.msra.mxu1 %v1873_v8  ;;  %v1026_v4 = vor.u32 %v1025_v2, %v1021_v61  ;;  %v1894_v8 = vld [vmem:[%s2308_s1 + $0x68] sm:$0xff]   ;;  %v1171_v36 = vrot.slane %v1935_v31, 1  ;;  %v1927_v61 = vld [vmem:[%s2308_s1 + $0x1e0] sm:$0xff]   ;;  %v1932_v2 = vld [vmem:[%s2308_s1 + $0xf8] sm:$0xff]  }
  0x14   :  { %1742 = vmatpush3.bf16.msra.mxu0 %v1874_v9  ;;  %1663 = vmatprep.subr.bf16.mxu1 %v1875_v10  ;;  %v1895_v9 = vld [vmem:[%s2308_s1 + $0x168] sm:$0xff]   ;;  %v346_v28 = vsel %vm343_vm4, %v344_v21, %v345_v22  ;;  %v1543_v21 = vld [vmem:[%s2311_s3] ss:$0 sm:$0xff] }
  0x15   :  { %1743 = vmatprep.subr.bf16.mxu0 %v1876_v13  ;;  %v2113_v7 = vsel %vm194_vm1, %v1026_v4, %v1030_v3  ;;  %v2181_v40 = vsel %vm343_vm4, %v1169_v33, %v1171_v36  ;;  %v1934_v4 = vld [vmem:[%s2308_s1 + $0x200] sm:$0xff]  }
  0x17   :  { %1664 = vmatpush3.bf16.msra.mxu1 %v1875_v10  ;;  %v1896_v10 = vld [vmem:[%s2308_s1 + $0x70] sm:$0xff]  }
  0x18   :  { %1744 = vmatpush3.bf16.msra.mxu0 %v1876_v13  ;;  %1665 = vmatprep.subr.bf16.mxu1 %v1877_v17  ;;  %v1899_v13 = vld [vmem:[%s2308_s1 + $0x178] sm:$0xff]  }
  0x19   :  { %1745 = vmatprep.subr.bf16.mxu0 %v1878_v18 }
  0x1b   :  { %1666 = vmatpush3.bf16.msra.mxu1 %v1877_v17  ;;  %v1900_v17 = vld [vmem:[%s2308_s1 + $0x80] sm:$0xff]  }
  0x1c   :  { %1746 = vmatpush3.bf16.msra.mxu0 %v1878_v18  ;;  %1667 = vmatprep.subr.bf16.mxu1 %v1879_v34  ;;  %v757_v18 = vrot.slane %v2038_v23, 3 }
  0x1d   :  { %1747 = vmatprep.subr.bf16.mxu0 %v1880_v35 }
  0x1e   :  { %v758_v26 = vsel %vm753_vm2, %v755_v47, %v757_v18  ;;  %v1913_v47 = vld [vmem:[%s2308_s1 + $0x1b0] sm:$0xff]  }
  0x1f   :  { %1668 = vmatpush3.bf16.msra.mxu1 %v1879_v34  ;;  %v1034_v34 = vor.u32 %v1032_v29, %v1030_v3  ;;  %v1933_v3 = vld [vmem:[%s2308_s1 + $0x1f8] sm:$0xff]  }
  0x20   :  { %1748 = vmatpush3.bf16.msra.mxu0 %v1880_v35  ;;  %1673 = vmatprep.subr.bf16.mxu1 %v1882_v41  ;;  %v1036_v35 = vshll.u32 %v1935_v31, 16 }
  0x21   :  { %1753 = vmatprep.subr.bf16.mxu0 %v1884_v43 }
  0x22   :  { %1670 = vmatmul.mubr.bf16.vlgmr.msra.gmra.mrb[0].mxu1 %v2031_v19  ;;  %v1038_v38 = vrot.slane %v1036_v35, 1  ;;  %v1922_v19 = vld [vmem:[%s2308_s1 + $0xd0] sm:$0xff]  }
  0x23   :  { %1674 = vmatpush3.bf16.msra.mxu1 %v1882_v41  ;;  %1750 = vmatmul.mubr.bf16.vlgmr.msra.gmra.mrb[0].mxu0 %v624_v48  ;;  %v1914_v48 = vld [vmem:[%s2308_s1 + $0xb8] sm:$0xff]  }
  0x24   :  { %1754 = vmatpush3.bf16.msra.mxu0 %v1884_v43  ;;  %1675 = vmatprep.subr.bf16.mxu1 %v1886_v49  ;;  %v2184_v41 = vsel %vm194_vm1, %v1034_v34, %v1038_v38  ;;  %v1909_v43 = vld [vmem:[%s2308_s1 + $0x1a0] sm:$0xff]  }
  0x25   :  { %1755 = vmatprep.subr.bf16.mxu0 %v1887_v50  ;;  %1689 = vmatprep.mubr.bf16.mxu1 %v206_v51  ;;  %v1916_v51 = vld [vmem:[%s2308_s1 + $0xc0] sm:$0xff]  }
  0x26   :  { %1769 = vmatprep.mubr.bf16.mxu0 %v756_v52  ;;  %v1918_v52 = vld [vmem:[%s2308_s1 + $0x1c0] sm:$0xff]  }
  0x27   :  { %1676 = vmatpush3.bf16.msra.mxu1 %v1886_v49  ;;  %v1915_v49 = vld [vmem:[%s2308_s1 + $0x1b8] sm:$0xff]  }
  0x28   :  { %1756 = vmatpush3.bf16.msra.mxu0 %v1887_v50  ;;  %1677 = vmatprep.subr.bf16.mxu1 %v1888_v54  ;;  %v347_v50 = vrot.slane %v2038_v23, 1  ;;  %v1920_v23 = vld [vmem:[%s2308_s1 + $0xc8] sm:$0xff]  }
  0x29   :  { %1757 = vmatprep.subr.bf16.mxu0 %v1889_v56 }
  0x2a   :  { %v348_v53 = vsel %vm343_vm4, %v345_v22, %v347_v50 }
  0x2b   :  { %1678 = vmatpush3.bf16.msra.mxu1 %v1888_v54  ;;  %v1921_v54 = vld [vmem:[%s2308_s1 + $0x1c8] sm:$0xff]  }
  0x2c   :  { %1758 = vmatpush3.bf16.msra.mxu0 %v1889_v56  ;;  %1679 = vmatprep.subr.bf16.mxu1 %v1890_v63  ;;  %v1924_v56 = vld [vmem:[%s2308_s1 + $0xd8] sm:$0xff]  }
  0x2d   :  { %1759 = vmatprep.subr.bf16.mxu0 %v1891_v1 }
  0x2f   :  { %1680 = vmatpush3.bf16.msra.mxu1 %v1890_v63  ;;  %v1929_v63 = vld [vmem:[%s2308_s1 + $0x1e8] sm:$0xff]  }
  0x30   :  { %1760 = vmatpush3.bf16.msra.mxu0 %v1891_v1  ;;  %1681 = vmatprep.subr.bf16.mxu1 %v1892_v5  ;;  %v1931_v1 = vld [vmem:[%s2308_s1 + $0x1f0] sm:$0xff]  }
  0x31   :  { %1761 = vmatprep.subr.bf16.mxu0 %v1893_v6 }
  0x33   :  { %1682 = vmatpush3.bf16.msra.mxu1 %v1892_v5  ;;  %v1168_v5 = vrot.slane %v2090_v57, 1 }
  0x34   :  { %1762 = vmatpush3.bf16.msra.mxu0 %v1893_v6  ;;  %1683 = vmatprep.subr.bf16.mxu1 %v1894_v8  ;;  %v1936_v6 = vld [vmem:[%s2308_s1 + $0x208] sm:$0xff]  }
  0x35   :  { %1763 = vmatprep.subr.bf16.mxu0 %v1895_v9 }
  0x37   :  { %1684 = vmatpush3.bf16.msra.mxu1 %v1894_v8  ;;  %v1938_v8 = vld [vmem:[%s2308_s1 + $0x218] sm:$0xff]  }
  0x38   :  { %1764 = vmatpush3.bf16.msra.mxu0 %v1895_v9  ;;  %1685 = vmatprep.subr.bf16.mxu1 %v1896_v10  ;;  %v1941_v9 = vld [vmem:[%s2308_s1 + $0x230] sm:$0xff]  }
  0x39   :  { %1765 = vmatprep.subr.bf16.mxu0 %v1897_v11 }
  0x3b   :  { %1686 = vmatpush3.bf16.msra.mxu1 %v1896_v10  ;;  %v1942_v10 = vld [vmem:[%s2308_s1 + $0x238] sm:$0xff]  }
  0x3c   :  { %1766 = vmatpush3.bf16.msra.mxu0 %v1897_v11  ;;  %1687 = vmatprep.subr.bf16.mxu1 %v1898_v12 }
  0x3d   :  { %1767 = vmatprep.subr.bf16.mxu0 %v1899_v13 }
  0x3f   :  { %1688 = vmatpush3.bf16.msra.mxu1 %v1898_v12 }
  0x40   :  { %1768 = vmatpush3.bf16.msra.mxu0 %v1899_v13  ;;  %1693 = vmatprep.subr.bf16.mxu1 %v1900_v17 }
  0x41   :  { %1773 = vmatprep.subr.bf16.mxu0 %v1901_v20 }
  0x42   :  { %1690 = vmatmul.mubr.bf16.vlgmr.msra.gmra.mrb[0].mxu1 %v214_v25 }
  0x43   :  { %1694 = vmatpush3.bf16.msra.mxu1 %v1900_v17  ;;  %1770 = vmatmul.mubr.bf16.vlgmr.msra.gmra.mrb[0].mxu0 %v758_v26  ;;  %v1542_v17 = vld [vmem:[%s2310_s2] ss:$0 sm:$0xff] }
  0x44   :  { %1774 = vmatpush3.bf16.msra.mxu0 %v1901_v20  ;;  %1695 = vmatprep.subr.bf16.mxu1 %v1902_v27 }
  0x45   :  { %1775 = vmatprep.subr.bf16.mxu0 %v1903_v14  ;;  %1709 = vmatprep.mubr.bf16.mxu1 %v346_v28 }
  0x46   :  { %1789 = vmatprep.mubr.bf16.mxu0 %v2090_v57  ;;  %v1937_v57 = vld [vmem:[%s2308_s1 + $0x210] sm:$0xff]  }
  0x47   :  { %1696 = vmatpush3.bf16.msra.mxu1 %v1902_v27 }
  0x48   :  { %1776 = vmatpush3.bf16.msra.mxu0 %v1903_v14  ;;  %1697 = vmatprep.subr.bf16.mxu1 %v1904_v30 }
  0x49   :  { %1777 = vmatprep.subr.bf16.mxu0 %v1905_v32 }
  0x4b   :  { %1698 = vmatpush3.bf16.msra.mxu1 %v1904_v30 }
  0x4c   :  { %1778 = vmatpush3.bf16.msra.mxu0 %v1905_v32  ;;  %1699 = vmatprep.subr.bf16.mxu1 %v1906_v37 }
  0x4d   :  { %1779 = vmatprep.subr.bf16.mxu0 %v1907_v39 }
  0x4f   :  { %1700 = vmatpush3.bf16.msra.mxu1 %v1906_v37 }
  0x50   :  { %1780 = vmatpush3.bf16.msra.mxu0 %v1907_v39  ;;  %1701 = vmatprep.subr.bf16.mxu1 %v1908_v42 }
  0x51   :  { %1781 = vmatprep.subr.bf16.mxu0 %v1909_v43 }
  0x53   :  { %1702 = vmatpush3.bf16.msra.mxu1 %v1908_v42 }
  0x54   :  { %1782 = vmatpush3.bf16.msra.mxu0 %v1909_v43  ;;  %1703 = vmatprep.subr.bf16.mxu1 %v1910_v44 }
  0x55   :  { %1783 = vmatprep.subr.bf16.mxu0 %v1911_v45 }
  0x57   :  { %1704 = vmatpush3.bf16.msra.mxu1 %v1910_v44 }
  0x58   :  { %1784 = vmatpush3.bf16.msra.mxu0 %v1911_v45  ;;  %1705 = vmatprep.subr.bf16.mxu1 %v1912_v46 }
  0x59   :  { %1785 = vmatprep.subr.bf16.mxu0 %v1913_v47 }
  0x5b   :  { %1706 = vmatpush3.bf16.msra.mxu1 %v1912_v46 }
  0x5c   :  { %1786 = vmatpush3.bf16.msra.mxu0 %v1913_v47  ;;  %1707 = vmatprep.subr.bf16.mxu1 %v1914_v48 }
  0x5d   :  { %1787 = vmatprep.subr.bf16.mxu0 %v1915_v49 }
  0x5f   :  { %1708 = vmatpush3.bf16.msra.mxu1 %v1914_v48 }
  0x60   :  { %1788 = vmatpush3.bf16.msra.mxu0 %v1915_v49  ;;  %1713 = vmatprep.subr.bf16.mxu1 %v1916_v51 }
  0x61   :  { %1793 = vmatprep.subr.bf16.mxu0 %v1918_v52 }
  0x62   :  { %1710 = vmatmul.mubr.bf16.vlgmr.msra.gmra.mrb[0].mxu1 %v348_v53 }
  0x63   :  { %1714 = vmatpush3.bf16.msra.mxu1 %v1916_v51  ;;  %1790 = vmatmul.mubr.bf16.vlgmr.msra.gmra.mrb[0].mxu0 %v2040_v24  ;;  %v1939_v24 = vld [vmem:[%s2308_s1 + $0x220] sm:$0xff]  }
  0x64   :  { %1794 = vmatpush3.bf16.msra.mxu0 %v1918_v52  ;;  %1715 = vmatprep.subr.bf16.mxu1 %v1920_v23 }
  0x65   :  { %1795 = vmatprep.subr.bf16.mxu0 %v1921_v54  ;;  %1729 = vmatprep.mubr.bf16.mxu1 %v2093_v59  ;;  %v1926_v59 = vld [vmem:[%s2308_s1 + $0xe0] sm:$0xff]  }
  0x66   :  { %1809 = vmatprep.mubr.bf16.mxu0 %v2113_v7  ;;  %v1170_v7 = vsel %vm343_vm4, %v1168_v5, %v1169_v33 }
  0x67   :  { %1716 = vmatpush3.bf16.msra.mxu1 %v1920_v23 }
  0x68   :  { %1796 = vmatpush3.bf16.msra.mxu0 %v1921_v54  ;;  %1717 = vmatprep.subr.bf16.mxu1 %v1922_v19 }
  0x69   :  { %1797 = vmatprep.subr.bf16.mxu0 %v1923_v55 }
  0x6b   :  { %1718 = vmatpush3.bf16.msra.mxu1 %v1922_v19 }
  0x6c   :  { %1798 = vmatpush3.bf16.msra.mxu0 %v1923_v55  ;;  %1719 = vmatprep.subr.bf16.mxu1 %v1924_v56 }
  0x6d   :  { %1799 = vmatprep.subr.bf16.mxu0 %v1925_v58 }
  0x6f   :  { %1720 = vmatpush3.bf16.msra.mxu1 %v1924_v56 }
  0x70   :  { %1800 = vmatpush3.bf16.msra.mxu0 %v1925_v58  ;;  %1721 = vmatprep.subr.bf16.mxu1 %v1926_v59 }
  0x71   :  { %1801 = vmatprep.subr.bf16.mxu0 %v1927_v61 }
  0x73   :  { %1722 = vmatpush3.bf16.msra.mxu1 %v1926_v59 }
  0x74   :  { %1802 = vmatpush3.bf16.msra.mxu0 %v1927_v61  ;;  %1723 = vmatprep.subr.bf16.mxu1 %v1928_v62 }
  0x75   :  { %1803 = vmatprep.subr.bf16.mxu0 %v1929_v63 }
  0x77   :  { %1724 = vmatpush3.bf16.msra.mxu1 %v1928_v62 }
  0x78   :  { %1804 = vmatpush3.bf16.msra.mxu0 %v1929_v63  ;;  %1725 = vmatprep.subr.bf16.mxu1 %v1930_v0 }
  0x79   :  { %1805 = vmatprep.subr.bf16.mxu0 %v1931_v1 }
  0x7b   :  { %1726 = vmatpush3.bf16.msra.mxu1 %v1930_v0 }
  0x7c   :  { %1806 = vmatpush3.bf16.msra.mxu0 %v1931_v1  ;;  %1727 = vmatprep.subr.bf16.mxu1 %v1932_v2 }
  0x7d   :  { %1807 = vmatprep.subr.bf16.mxu0 %v1933_v3 }
  0x7f   :  { %1728 = vmatpush3.bf16.msra.mxu1 %v1932_v2 }
  0x80   :  { %1808 = vmatpush3.bf16.msra.mxu0 %v1933_v3 }
  0x81   :  { %1813 = vmatprep.subr.bf16.mxu0 %v1934_v4 }
  0x82   :  { %1730 = vmatmul.mubr.bf16.vlgmr.msra.gmra.mrb[0].mxu1 %v2095_v60  ;;  %v1940_v60 = vld [vmem:[%s2308_s1 + $0x228] sm:$0xff]  }
  0x83   :  { %1810 = vmatmul.mubr.bf16.vlgmr.msra.gmra.mrb[0].mxu0 %v2184_v41 }
  0x84   :  { %1814 = vmatpush3.bf16.msra.mxu0 %v1934_v4  ;;  %1829 = vmatprep.mubr.bf16.mxu0 %v1170_v7 }
  0x85   :  { %1815 = vmatprep.subr.bf16.mxu0 %v1936_v6 }
  0x88   :  { %1816 = vmatpush3.bf16.msra.mxu0 %v1936_v6 }
  0x89   :  { %1817 = vmatprep.subr.bf16.mxu0 %v1937_v57 }
  0x8c   :  { %1818 = vmatpush3.bf16.msra.mxu0 %v1937_v57 }
  0x8d   :  { %1819 = vmatprep.subr.bf16.mxu0 %v1938_v8 }
  0x90   :  { %1820 = vmatpush3.bf16.msra.mxu0 %v1938_v8 }
  0x91   :  { %1821 = vmatprep.subr.bf16.mxu0 %v1939_v24 }
  0x94   :  { %1822 = vmatpush3.bf16.msra.mxu0 %v1939_v24 }
  0x95   :  { %1823 = vmatprep.subr.bf16.mxu0 %v1940_v60 }
  0x98   :  { %1824 = vmatpush3.bf16.msra.mxu0 %v1940_v60 }
  0x99   :  { %1825 = vmatprep.subr.bf16.mxu0 %v1941_v9 }
  0x9c   :  { %1826 = vmatpush3.bf16.msra.mxu0 %v1941_v9 }
  0x9d   :  { %1827 = vmatprep.subr.bf16.mxu0 %v1942_v10 }
  0xa0   :  { %1828 = vmatpush3.bf16.msra.mxu0 %v1942_v10 }
  0xa3   :  { %1830 = vmatmul.mubr.bf16.vlgmr.msra.gmra.mrb[0].mxu0 %v2181_v40 }
 0x155   :  { %v1731_v11 = vpop.f32.mrb[0].mxu1 }
 0x156   :  { %v567_v12 = vpop.f32.mrb[1].mxu1 }
 0x157   :  { %v1732_v13 = vpop.f32.mrb[2].mxu1 }
 0x158   :  { %v570_v15 = vpop.f32.mrb[3].mxu1 }
 0x176   :  { %v1831_v16 = vpop.f32.mrb[0].mxu0 }
 0x177   :  { %v1833_v18 = vadd.f32 %v1831_v16, %v1731_v11  ;;  %v1257_v20 = vpop.f32.mrb[1].mxu0 }
 0x178   :  { %v1834_v22 = vadd.f32 %v1257_v20, %v567_v12  ;;  %v1832_v25 = vpop.f32.mrb[2].mxu0 }
 0x179   :  { %v1293_v26 = vmul.f32 %v1833_v18, %v1542_v17  ;;  %v1835_v27 = vadd.f32 %v1832_v25, %v1732_v13  ;;  %v1260_v14 = vpop.f32.mrb[3].mxu0 }
 0x17a   :  { %v1291_v28 = vmul.f32 %v1834_v22, %v1542_v17  ;;  %v1836_v29 = vadd.f32 %v1260_v14, %v570_v15 }
 0x17b   :  { %v1304_v30 = vadd.f32 %v1543_v21, %v1293_v26  ;;  %v1294_v31 = vmul.f32 %v1835_v27, %v1542_v17 }
 0x17c   :  { %v1302_v32 = vadd.f32 %v1543_v21, %v1291_v28  ;;  %v1292_v33 = vmul.f32 %v1836_v29, %v1542_v17 }
 0x17d   :  { %v1305_v34 = vadd.f32 %v1543_v21, %v1294_v31  ;;  %v1308_v36 = vmax.f32 %v1304_v30, 0.0 }
 0x17e   :  { %v1303_v35 = vadd.f32 %v1543_v21, %v1292_v33  ;;  %v1306_v38 = vmax.f32 %v1302_v32, 0.0 }
 0x17f   :  { %v1309_v37 = vmax.f32 %v1305_v34, 0.0 }
 0x180   :  { %v1307_v39 = vmax.f32 %v1303_v35, 0.0 }
 0x181   :  { %v1560_v40 = vpack.c.bf16 %v1309_v37, %v1308_v36 }
 0x182   :  { %v1555_v41 = vpack.c.bf16 %v1307_v39, %v1306_v38 }
 0x183   :  { %1562 = vst [vmem:[%s2312_s4 + $0x8] sm:$0xff] %v1560_v40  }
 0x184   :  { %1556 = vst [vmem:[%s2312_s4] sm:$0xff] %v1555_v41  }

</bundles_post_ra>
